<compile_context>
chip_gen: v7x
topology: tpu7x:2x2x1
jax: 0.10.0
libtpu: 0.0.40
codegen_flags: <defaults>
</compile_context>

<pallas_src>
import jax
import jax.numpy as jnp
from jax.experimental import pallas as pl
from jax.experimental.pallas import tpu as pltpu


# ---------------------------------------------------------------------------
# Model hyper-parameters (NeRFModule(D, W, in_x, in_d), skips=[4])
# ---------------------------------------------------------------------------
D = 8          # hidden layers in the "x" trunk
W = 32         # channels per layer
IN_X = 16      # positional-encoded xyz channels
IN_D = 8       # positional-encoded direction channels
SKIPS = (4,)   # concat input_x after layer i in SKIPS
C_IN = IN_X + IN_D          # 24

NL = 11        # packed layers (skip & linear_d merged, feature+density fused)
MAX_C = 48     # every packed weight is (48, 48); activations are 48-row slabs
DENSITY_ROW = 35   # density row inside the fused head: local row 3 of slice [32:40]

# real (out, in) dims of each packed matmul -- for the FLOP estimate only
REAL_DIMS = (
    (W, IN_X),                              # 0  linear_x[0]
    (W, W), (W, W), (W, W), (W, W),         # 1..4
    (W, IN_X + W),                          # 5  skip layer (single merged dot)
    (W, W), (W, W),                         # 6,7
    (W + 1, W),                             # 8  fused [feature ; density]
    (W // 2, W + IN_D),                     # 9  linear_d (single merged dot)
    (3, W // 2),                            # 10 linear_color
)


# ---------------------------------------------------------------------------
# Parameter construction (deterministic, synthetic; torch Linear convention,
# stored as (in_features, out_features) so y = x @ W + b)
# ---------------------------------------------------------------------------
def make_params(key):
    params = []

    def linear(key, fan_in, fan_out):
        kw, kb = jax.random.split(key)
        scale = 1.0 / jnp.sqrt(jnp.float32(fan_in))
        w = jax.random.uniform(kw, (fan_in, fan_out), jnp.float32, -scale, scale)
        b = jax.random.uniform(kb, (1, fan_out), jnp.float32, -scale, scale)
        return w, b

    keys = jax.random.split(key, D + 4)

    for j in range(D):
        if j == 0:
            fan_in = IN_X
        elif (j - 1) in SKIPS:
            fan_in = IN_X + W
        else:
            fan_in = W
        w, b = linear(keys[j], fan_in, W)
        params += [w, b]

    w, b = linear(keys[D + 0], W, 1)              # linear_density
    params += [w, b]
    w, b = linear(keys[D + 1], W, W)              # linear_feat
    params += [w, b]
    w, b = linear(keys[D + 2], W + IN_D, W // 2)  # linear_d ([feature | dir])
    params += [w, b]
    w, b = linear(keys[D + 3], W // 2, 3)         # linear_color
    params += [w, b]
    return params


def pack_params(params):
    """Pack params into (NL,48,48) bf16 weights (stored (out,in)) + (NL,48,1) f32
    biases.  Skip layer and linear_d are kept as single matrices (no split); the
    feature and density heads are fused, with density at output row DENSITY_ROW."""
    ws = params[0::2]
    bs = [b[0] for b in params[1::2]]

    def slot(wt, bias):
        w = jnp.zeros((MAX_C, MAX_C), jnp.float32)
        w = w.at[: wt.shape[0], : wt.shape[1]].set(wt)
        b = jnp.zeros((MAX_C,), jnp.float32)
        b = b.at[: bias.shape[0]].set(bias)
        return w, b

    entries = []
    for j in range(5):                                   # trunk 0..4
        entries.append(slot(ws[j].T, bs[j]))
    # 5: skip layer -- input is [input_x(0..15) ; h(16..47)], ws[5].T is (32,48)
    entries.append(slot(ws[5].T, bs[5]))
    entries.append(slot(ws[6].T, bs[6]))                 # trunk 6
    entries.append(slot(ws[7].T, bs[7]))                 # trunk 7
    # 8: fused linear_feat (rows 0..31) + linear_density (row DENSITY_ROW)
    w8 = jnp.zeros((MAX_C, MAX_C), jnp.float32)
    w8 = w8.at[:W, :W].set(ws[9].T)                      # feature
    w8 = w8.at[DENSITY_ROW, :W].set(ws[8].T[0])          # density
    b8 = jnp.zeros((MAX_C,), jnp.float32)
    b8 = b8.at[:W].set(bs[9])
    b8 = b8.at[DENSITY_ROW].set(bs[8][0])
    entries.append((w8, b8))
    # 9: linear_d -- input is [feature(0..31) ; input_d(32..39) ; 0(40..47)]
    entries.append(slot(ws[10].T, bs[10]))
    # 10: color
    entries.append(slot(ws[11].T, bs[11]))

    assert len(entries) == NL
    w_all = jnp.stack([w for w, _ in entries]).astype(jnp.bfloat16)   # (NL,48,48)
    b_all = jnp.stack([b for _, b in entries])[:, :, None]            # (NL,48,1) f32
    return w_all, b_all


# ---------------------------------------------------------------------------
# Pallas kernel: full NeRF MLP for one (C_IN, tile_n) block, transposed layout,
# processed as tile_n // chunk lane-dense chunks.
#   x_ref : (C_IN, tile_n)   f32   channels on sublanes, points on lanes
#   w_ref : (NL, 48, 48)     bf16  zero-padded weights, (out, in) per layer
#   b_ref : (NL, 48, 1)      f32   zero-padded biases
#   o_ref : (8, tile_n)      f32   rows = [r, g, b, density, 0, 0, 0, 0]
# ---------------------------------------------------------------------------
def _make_kernel(tile_n: int, chunk: int):
    assert tile_n % chunk == 0 and chunk % 128 == 0
    nchunk = tile_n // chunk

    def kernel(x_ref, w_ref, b_ref, o_ref):
        # hoisted zero pad (f32 so the input concat boundary is 8-row aligned)
        zpad = jnp.zeros((MAX_C - C_IN, chunk), jnp.float32)

        def dense(l, act_bf16):
            # full padded operands: no weight/bias slicing anywhere
            acc = jnp.dot(w_ref[l], act_bf16, preferred_element_type=jnp.float32)
            return acc + b_ref[l]                       # (48, chunk) f32

        for c in range(nchunk):
            sl = pl.ds(c * chunk, chunk)
            # 48-row input slab: rows 0..15 = input_x, 16..23 = input_d, rest 0
            x48 = jnp.concatenate([x_ref[:, sl], zpad], axis=0).astype(jnp.bfloat16)

            # trunk (ReLU in f32, activations carried in bf16)
            h = jnp.maximum(dense(0, x48), 0.0).astype(jnp.bfloat16)
            for l in range(1, 5):
                h = jnp.maximum(dense(l, h), 0.0).astype(jnp.bfloat16)
            # skip layer: ONE dot on the sublane-concat [input_x ; h]
            sk_in = jnp.concatenate([x48[:IN_X, :], h[:W, :]], axis=0)
            h = jnp.maximum(dense(5, sk_in), 0.0).astype(jnp.bfloat16)
            for l in (6, 7):
                h = jnp.maximum(dense(l, h), 0.0).astype(jnp.bfloat16)

            # fused feature(rows 0..31) + density(row DENSITY_ROW) head, no activation
            df = dense(8, h)                            # (48, chunk) f32
            # linear_d: ONE dot on the sublane-concat [feature ; input_d ; 0]
            ld_in = jnp.concatenate(
                [df[:W, :].astype(jnp.bfloat16), x48[IN_X:IN_X + 16, :]], axis=0)
            hd = jnp.maximum(dense(9, ld_in), 0.0).astype(jnp.bfloat16)

            res = dense(10, hd)                         # rows 0..2 = rgb, 3..47 = 0
            # df[32:40] = [0,0,0,density,0,0,0,0]  (density packed at row 35)
            o_ref[:, sl] = res[:8, :] + df[32:40, :]    # unmasked 8-row store

    return kernel


# ---------------------------------------------------------------------------
# Wrapper: (N, 24) f32 -> (N, 4) f32 = [r, g, b, density]
# ---------------------------------------------------------------------------
def nerf_forward(x, w_all, b_all, *, tile_n=2048, chunk=512):
    n, c = x.shape
    assert c == C_IN
    assert tile_n % chunk == 0 and chunk % 128 == 0

    grid_n = pl.cdiv(n, tile_n)          # keep grid_n >= 2 on v7x for both TCs
    n_pad = grid_n * tile_n

    xt = x.T                             # (C_IN, n): lane-dense tiles
    if n_pad != n:
        xt = jnp.pad(xt, ((0, 0), (0, n_pad - n)))   # zero tail, sliced off below

    flops = 2 * n_pad * sum(o * i for o, i in REAL_DIMS)
    bytes_accessed = int(n_pad * (C_IN + 8) * 4 + w_all.size * 2 + b_all.size * 4)

    out_t = pl.pallas_call(
        _make_kernel(tile_n, chunk),
        out_shape=jax.ShapeDtypeStruct((8, n_pad), jnp.float32),
        grid_spec=pltpu.PrefetchScalarGridSpec(
            num_scalar_prefetch=0,
            grid=(grid_n,),
            in_specs=[
                pl.BlockSpec((C_IN, tile_n), lambda i: (0, i)),
                pl.BlockSpec(w_all.shape, lambda i: (0, 0, 0)),   # resident weights
                pl.BlockSpec(b_all.shape, lambda i: (0, 0, 0)),   # resident biases
            ],
            out_specs=pl.BlockSpec((8, tile_n), lambda i: (0, i)),
        ),
        compiler_params=pltpu.CompilerParams(
            dimension_semantics=("parallel",)),
        cost_estimate=pl.CostEstimate(
            flops=int(flops), transcendentals=0, bytes_accessed=bytes_accessed),
    )(xt, w_all, b_all)

    # x.T / .T below are wrapper-side XLA passes; channels-major callers can skip them.
    return out_t[:4, :n].T               # (N, 4)


# ---------------------------------------------------------------------------
# Pure-JAX f32 reference (mirrors the torch forward exactly)
# ---------------------------------------------------------------------------
def nerf_reference(x, params):
    input_x, input_d = x[:, :IN_X], x[:, IN_X:]
    out = input_x
    idx = 0
    for i in range(D):
        w, b = params[idx], params[idx + 1]; idx += 2
        out = jax.nn.relu(out @ w + b)
        if i in SKIPS:
            out = jnp.concatenate([input_x, out], axis=-1)
    w, b = params[idx], params[idx + 1]; idx += 2
    density = out @ w + b
    w, b = params[idx], params[idx + 1]; idx += 2
    feature = out @ w + b
    w, b = params[idx], params[idx + 1]; idx += 2
    h = jax.nn.relu(jnp.concatenate([feature, input_d], axis=-1) @ w + b)
    w, b = params[idx], params[idx + 1]; idx += 2
    color = h @ w + b
    return jnp.concatenate([color, density], axis=-1)


if __name__ == "__main__":
    key = jax.random.PRNGKey(0)
    k_param, k_x = jax.random.split(key)

    params = make_params(k_param)
    w_all, b_all = pack_params(params)

    # N not a multiple of tile_n: exercises cdiv + tail padding; grid_n = 2 (even).
    N = 3000
    x = jax.random.normal(k_x, (N, C_IN), jnp.float32)

    out = jax.block_until_ready(nerf_forward(x, w_all, b_all, tile_n=2048, chunk=512))

    ref = nerf_reference(x, params)
    assert out.shape == (N, 4)
    max_err = jnp.max(jnp.abs(out - ref))
    # bf16 matmul operands (f32 accumulation) -> relaxed tolerance vs f32 reference.
    assert jnp.allclose(out, ref, atol=3e-2, rtol=3e-2), \
        f"mismatch vs reference (max abs err {max_err})"

    print("KERNEL_OK")
</pallas_src>

<mosaic_0001>
module attributes {stable_mosaic.version = 11 : i64} {
  func.func @kernel(%arg0: i32, %arg1: memref<24x2048xf32, #tpu.memory_space<vmem>>, %arg2: memref<11x48x48xbf16, #tpu.memory_space<vmem>>, %arg3: memref<11x48x1xf32, #tpu.memory_space<vmem>>, %arg4: memref<8x2048xf32, #tpu.memory_space<vmem>>) attributes {dimension_semantics = [#tpu.dimension_semantics<parallel>], iteration_bounds = array<i64: 2>, scalar_prefetch = 0 : i64, scratch_operands = 0 : i64, tpu.core_type = #tpu.core_type<tc>, window_params = [{transform_indices = @transform_0, window_bounds = array<i64: 24, 2048>}, {pipeline_mode = #tpu.pipeline_mode<synchronous>, transform_indices = @transform_1, window_bounds = array<i64: 11, 48, 48>}, {pipeline_mode = #tpu.pipeline_mode<synchronous>, transform_indices = @transform_2, window_bounds = array<i64: 11, 48, 1>}, {transform_indices = @transform_3, window_bounds = array<i64: 8, 2048>}]} {
    %cst = arith.constant 0.000000e+00 : f32
    %0 = vector.broadcast %cst : f32 to vector<24x512xf32>
    %c0 = arith.constant 0 : index
    %c0_0 = arith.constant 0 : index
    %1 = vector.load %arg1[%c0, %c0_0] : memref<24x2048xf32, #tpu.memory_space<vmem>>, vector<24x512xf32>
    %2 = tpu.concatenate %1, %0 in 0 : vector<24x512xf32>, vector<24x512xf32> -> vector<48x512xf32>
    %3 = arith.truncf %2 : vector<48x512xf32> to vector<48x512xbf16>
    %c0_1 = arith.constant 0 : index
    %c0_2 = arith.constant 0 : index
    %c0_3 = arith.constant 0 : index
    %4 = vector.load %arg2[%c0_1, %c0_2, %c0_3] : memref<11x48x48xbf16, #tpu.memory_space<vmem>>, vector<1x48x48xbf16>
    %5 = vector.shape_cast %4 : vector<1x48x48xbf16> to vector<48x48xbf16>
    %cst_4 = arith.constant dense<0.000000e+00> : vector<48x512xf32>
    %6 = tpu.matmul %5, %3, %cst_4 {dimension_numbers = #tpu.dot_dimension_numbers<[1], [0], [0], [1], [0, 0, 1, 1], [], []>} : vector<48x48xbf16>, vector<48x512xbf16>, vector<48x512xf32> -> vector<48x512xf32>
    %c0_5 = arith.constant 0 : index
    %c0_6 = arith.constant 0 : index
    %c0_7 = arith.constant 0 : index
    %7 = vector.load %arg3[%c0_5, %c0_6, %c0_7] : memref<11x48x1xf32, #tpu.memory_space<vmem>>, vector<1x48x1xf32>
    %8 = vector.shape_cast %7 : vector<1x48x1xf32> to vector<48x1xf32>
    %9 = vector.broadcast %8 : vector<48x1xf32> to vector<48x512xf32>
    %10 = arith.addf %6, %9 : vector<48x512xf32>
    %cst_8 = arith.constant 0.000000e+00 : f32
    %11 = vector.broadcast %cst_8 : f32 to vector<48x512xf32>
    %12 = arith.maximumf %10, %11 : vector<48x512xf32>
    %13 = arith.truncf %12 : vector<48x512xf32> to vector<48x512xbf16>
    %c1 = arith.constant 1 : index
    %c0_9 = arith.constant 0 : index
    %c0_10 = arith.constant 0 : index
    %14 = vector.load %arg2[%c1, %c0_9, %c0_10] : memref<11x48x48xbf16, #tpu.memory_space<vmem>>, vector<1x48x48xbf16>
    %15 = vector.shape_cast %14 : vector<1x48x48xbf16> to vector<48x48xbf16>
    %cst_11 = arith.constant dense<0.000000e+00> : vector<48x512xf32>
    %16 = tpu.matmul %15, %13, %cst_11 {dimension_numbers = #tpu.dot_dimension_numbers<[1], [0], [0], [1], [0, 0, 1, 1], [], []>} : vector<48x48xbf16>, vector<48x512xbf16>, vector<48x512xf32> -> vector<48x512xf32>
    %c1_12 = arith.constant 1 : index
    %c0_13 = arith.constant 0 : index
    %c0_14 = arith.constant 0 : index
    %17 = vector.load %arg3[%c1_12, %c0_13, %c0_14] : memref<11x48x1xf32, #tpu.memory_space<vmem>>, vector<1x48x1xf32>
    %18 = vector.shape_cast %17 : vector<1x48x1xf32> to vector<48x1xf32>
    %19 = vector.broadcast %18 : vector<48x1xf32> to vector<48x512xf32>
    %20 = arith.addf %16, %19 : vector<48x512xf32>
    %cst_15 = arith.constant 0.000000e+00 : f32
    %21 = vector.broadcast %cst_15 : f32 to vector<48x512xf32>
    %22 = arith.maximumf %20, %21 : vector<48x512xf32>
    %23 = arith.truncf %22 : vector<48x512xf32> to vector<48x512xbf16>
    %c2 = arith.constant 2 : index
    %c0_16 = arith.constant 0 : index
    %c0_17 = arith.constant 0 : index
    %24 = vector.load %arg2[%c2, %c0_16, %c0_17] : memref<11x48x48xbf16, #tpu.memory_space<vmem>>, vector<1x48x48xbf16>
    %25 = vector.shape_cast %24 : vector<1x48x48xbf16> to vector<48x48xbf16>
    %cst_18 = arith.constant dense<0.000000e+00> : vector<48x512xf32>
    %26 = tpu.matmul %25, %23, %cst_18 {dimension_numbers = #tpu.dot_dimension_numbers<[1], [0], [0], [1], [0, 0, 1, 1], [], []>} : vector<48x48xbf16>, vector<48x512xbf16>, vector<48x512xf32> -> vector<48x512xf32>
    %c2_19 = arith.constant 2 : index
    %c0_20 = arith.constant 0 : index
    %c0_21 = arith.constant 0 : index
    %27 = vector.load %arg3[%c2_19, %c0_20, %c0_21] : memref<11x48x1xf32, #tpu.memory_space<vmem>>, vector<1x48x1xf32>
    %28 = vector.shape_cast %27 : vector<1x48x1xf32> to vector<48x1xf32>
    %29 = vector.broadcast %28 : vector<48x1xf32> to vector<48x512xf32>
    %30 = arith.addf %26, %29 : vector<48x512xf32>
    %cst_22 = arith.constant 0.000000e+00 : f32
    %31 = vector.broadcast %cst_22 : f32 to vector<48x512xf32>
    %32 = arith.maximumf %30, %31 : vector<48x512xf32>
    %33 = arith.truncf %32 : vector<48x512xf32> to vector<48x512xbf16>
    %c3 = arith.constant 3 : index
    %c0_23 = arith.constant 0 : index
    %c0_24 = arith.constant 0 : index
    %34 = vector.load %arg2[%c3, %c0_23, %c0_24] : memref<11x48x48xbf16, #tpu.memory_space<vmem>>, vector<1x48x48xbf16>
    %35 = vector.shape_cast %34 : vector<1x48x48xbf16> to vector<48x48xbf16>
    %cst_25 = arith.constant dense<0.000000e+00> : vector<48x512xf32>
    %36 = tpu.matmul %35, %33, %cst_25 {dimension_numbers = #tpu.dot_dimension_numbers<[1], [0], [0], [1], [0, 0, 1, 1], [], []>} : vector<48x48xbf16>, vector<48x512xbf16>, vector<48x512xf32> -> vector<48x512xf32>
    %c3_26 = arith.constant 3 : index
    %c0_27 = arith.constant 0 : index
    %c0_28 = arith.constant 0 : index
    %37 = vector.load %arg3[%c3_26, %c0_27, %c0_28] : memref<11x48x1xf32, #tpu.memory_space<vmem>>, vector<1x48x1xf32>
    %38 = vector.shape_cast %37 : vector<1x48x1xf32> to vector<48x1xf32>
    %39 = vector.broadcast %38 : vector<48x1xf32> to vector<48x512xf32>
    %40 = arith.addf %36, %39 : vector<48x512xf32>
    %cst_29 = arith.constant 0.000000e+00 : f32
    %41 = vector.broadcast %cst_29 : f32 to vector<48x512xf32>
    %42 = arith.maximumf %40, %41 : vector<48x512xf32>
    %43 = arith.truncf %42 : vector<48x512xf32> to vector<48x512xbf16>
    %c4 = arith.constant 4 : index
    %c0_30 = arith.constant 0 : index
    %c0_31 = arith.constant 0 : index
    %44 = vector.load %arg2[%c4, %c0_30, %c0_31] : memref<11x48x48xbf16, #tpu.memory_space<vmem>>, vector<1x48x48xbf16>
    %45 = vector.shape_cast %44 : vector<1x48x48xbf16> to vector<48x48xbf16>
    %cst_32 = arith.constant dense<0.000000e+00> : vector<48x512xf32>
    %46 = tpu.matmul %45, %43, %cst_32 {dimension_numbers = #tpu.dot_dimension_numbers<[1], [0], [0], [1], [0, 0, 1, 1], [], []>} : vector<48x48xbf16>, vector<48x512xbf16>, vector<48x512xf32> -> vector<48x512xf32>
    %c4_33 = arith.constant 4 : index
    %c0_34 = arith.constant 0 : index
    %c0_35 = arith.constant 0 : index
    %47 = vector.load %arg3[%c4_33, %c0_34, %c0_35] : memref<11x48x1xf32, #tpu.memory_space<vmem>>, vector<1x48x1xf32>
    %48 = vector.shape_cast %47 : vector<1x48x1xf32> to vector<48x1xf32>
    %49 = vector.broadcast %48 : vector<48x1xf32> to vector<48x512xf32>
    %50 = arith.addf %46, %49 : vector<48x512xf32>
    %cst_36 = arith.constant 0.000000e+00 : f32
    %51 = vector.broadcast %cst_36 : f32 to vector<48x512xf32>
    %52 = arith.maximumf %50, %51 : vector<48x512xf32>
    %53 = arith.truncf %52 : vector<48x512xf32> to vector<48x512xbf16>
    %54 = vector.extract_strided_slice %3 {offsets = [0, 0], sizes = [16, 512], strides = [1, 1]} : vector<48x512xbf16> to vector<16x512xbf16>
    %55 = vector.extract_strided_slice %53 {offsets = [0, 0], sizes = [32, 512], strides = [1, 1]} : vector<48x512xbf16> to vector<32x512xbf16>
    %56 = tpu.concatenate %54, %55 in 0 : vector<16x512xbf16>, vector<32x512xbf16> -> vector<48x512xbf16>
    %c5 = arith.constant 5 : index
    %c0_37 = arith.constant 0 : index
    %c0_38 = arith.constant 0 : index
    %57 = vector.load %arg2[%c5, %c0_37, %c0_38] : memref<11x48x48xbf16, #tpu.memory_space<vmem>>, vector<1x48x48xbf16>
    %58 = vector.shape_cast %57 : vector<1x48x48xbf16> to vector<48x48xbf16>
    %cst_39 = arith.constant dense<0.000000e+00> : vector<48x512xf32>
    %59 = tpu.matmul %58, %56, %cst_39 {dimension_numbers = #tpu.dot_dimension_numbers<[1], [0], [0], [1], [0, 0, 1, 1], [], []>} : vector<48x48xbf16>, vector<48x512xbf16>, vector<48x512xf32> -> vector<48x512xf32>
    %c5_40 = arith.constant 5 : index
    %c0_41 = arith.constant 0 : index
    %c0_42 = arith.constant 0 : index
    %60 = vector.load %arg3[%c5_40, %c0_41, %c0_42] : memref<11x48x1xf32, #tpu.memory_space<vmem>>, vector<1x48x1xf32>
    %61 = vector.shape_cast %60 : vector<1x48x1xf32> to vector<48x1xf32>
    %62 = vector.broadcast %61 : vector<48x1xf32> to vector<48x512xf32>
    %63 = arith.addf %59, %62 : vector<48x512xf32>
    %cst_43 = arith.constant 0.000000e+00 : f32
    %64 = vector.broadcast %cst_43 : f32 to vector<48x512xf32>
    %65 = arith.maximumf %63, %64 : vector<48x512xf32>
    %66 = arith.truncf %65 : vector<48x512xf32> to vector<48x512xbf16>
    %c6 = arith.constant 6 : index
    %c0_44 = arith.constant 0 : index
    %c0_45 = arith.constant 0 : index
    %67 = vector.load %arg2[%c6, %c0_44, %c0_45] : memref<11x48x48xbf16, #tpu.memory_space<vmem>>, vector<1x48x48xbf16>
    %68 = vector.shape_cast %67 : vector<1x48x48xbf16> to vector<48x48xbf16>
    %cst_46 = arith.constant dense<0.000000e+00> : vector<48x512xf32>
    %69 = tpu.matmul %68, %66, %cst_46 {dimension_numbers = #tpu.dot_dimension_numbers<[1], [0], [0], [1], [0, 0, 1, 1], [], []>} : vector<48x48xbf16>, vector<48x512xbf16>, vector<48x512xf32> -> vector<48x512xf32>
    %c6_47 = arith.constant 6 : index
    %c0_48 = arith.constant 0 : index
    %c0_49 = arith.constant 0 : index
    %70 = vector.load %arg3[%c6_47, %c0_48, %c0_49] : memref<11x48x1xf32, #tpu.memory_space<vmem>>, vector<1x48x1xf32>
    %71 = vector.shape_cast %70 : vector<1x48x1xf32> to vector<48x1xf32>
    %72 = vector.broadcast %71 : vector<48x1xf32> to vector<48x512xf32>
    %73 = arith.addf %69, %72 : vector<48x512xf32>
    %cst_50 = arith.constant 0.000000e+00 : f32
    %74 = vector.broadcast %cst_50 : f32 to vector<48x512xf32>
    %75 = arith.maximumf %73, %74 : vector<48x512xf32>
    %76 = arith.truncf %75 : vector<48x512xf32> to vector<48x512xbf16>
    %c7 = arith.constant 7 : index
    %c0_51 = arith.constant 0 : index
    %c0_52 = arith.constant 0 : index
    %77 = vector.load %arg2[%c7, %c0_51, %c0_52] : memref<11x48x48xbf16, #tpu.memory_space<vmem>>, vector<1x48x48xbf16>
    %78 = vector.shape_cast %77 : vector<1x48x48xbf16> to vector<48x48xbf16>
    %cst_53 = arith.constant dense<0.000000e+00> : vector<48x512xf32>
    %79 = tpu.matmul %78, %76, %cst_53 {dimension_numbers = #tpu.dot_dimension_numbers<[1], [0], [0], [1], [0, 0, 1, 1], [], []>} : vector<48x48xbf16>, vector<48x512xbf16>, vector<48x512xf32> -> vector<48x512xf32>
    %c7_54 = arith.constant 7 : index
    %c0_55 = arith.constant 0 : index
    %c0_56 = arith.constant 0 : index
    %80 = vector.load %arg3[%c7_54, %c0_55, %c0_56] : memref<11x48x1xf32, #tpu.memory_space<vmem>>, vector<1x48x1xf32>
    %81 = vector.shape_cast %80 : vector<1x48x1xf32> to vector<48x1xf32>
    %82 = vector.broadcast %81 : vector<48x1xf32> to vector<48x512xf32>
    %83 = arith.addf %79, %82 : vector<48x512xf32>
    %cst_57 = arith.constant 0.000000e+00 : f32
    %84 = vector.broadcast %cst_57 : f32 to vector<48x512xf32>
    %85 = arith.maximumf %83, %84 : vector<48x512xf32>
    %86 = arith.truncf %85 : vector<48x512xf32> to vector<48x512xbf16>
    %c8 = arith.constant 8 : index
    %c0_58 = arith.constant 0 : index
    %c0_59 = arith.constant 0 : index
    %87 = vector.load %arg2[%c8, %c0_58, %c0_59] : memref<11x48x48xbf16, #tpu.memory_space<vmem>>, vector<1x48x48xbf16>
    %88 = vector.shape_cast %87 : vector<1x48x48xbf16> to vector<48x48xbf16>
    %cst_60 = arith.constant dense<0.000000e+00> : vector<48x512xf32>
    %89 = tpu.matmul %88, %86, %cst_60 {dimension_numbers = #tpu.dot_dimension_numbers<[1], [0], [0], [1], [0, 0, 1, 1], [], []>} : vector<48x48xbf16>, vector<48x512xbf16>, vector<48x512xf32> -> vector<48x512xf32>
    %c8_61 = arith.constant 8 : index
    %c0_62 = arith.constant 0 : index
    %c0_63 = arith.constant 0 : index
    %90 = vector.load %arg3[%c8_61, %c0_62, %c0_63] : memref<11x48x1xf32, #tpu.memory_space<vmem>>, vector<1x48x1xf32>
    %91 = vector.shape_cast %90 : vector<1x48x1xf32> to vector<48x1xf32>
    %92 = vector.broadcast %91 : vector<48x1xf32> to vector<48x512xf32>
    %93 = arith.addf %89, %92 : vector<48x512xf32>
    %94 = vector.extract_strided_slice %93 {offsets = [0, 0], sizes = [32, 512], strides = [1, 1]} : vector<48x512xf32> to vector<32x512xf32>
    %95 = arith.truncf %94 : vector<32x512xf32> to vector<32x512xbf16>
    %96 = vector.extract_strided_slice %3 {offsets = [16, 0], sizes = [16, 512], strides = [1, 1]} : vector<48x512xbf16> to vector<16x512xbf16>
    %97 = tpu.concatenate %95, %96 in 0 : vector<32x512xbf16>, vector<16x512xbf16> -> vector<48x512xbf16>
    %c9 = arith.constant 9 : index
    %c0_64 = arith.constant 0 : index
    %c0_65 = arith.constant 0 : index
    %98 = vector.load %arg2[%c9, %c0_64, %c0_65] : memref<11x48x48xbf16, #tpu.memory_space<vmem>>, vector<1x48x48xbf16>
    %99 = vector.shape_cast %98 : vector<1x48x48xbf16> to vector<48x48xbf16>
    %cst_66 = arith.constant dense<0.000000e+00> : vector<48x512xf32>
    %100 = tpu.matmul %99, %97, %cst_66 {dimension_numbers = #tpu.dot_dimension_numbers<[1], [0], [0], [1], [0, 0, 1, 1], [], []>} : vector<48x48xbf16>, vector<48x512xbf16>, vector<48x512xf32> -> vector<48x512xf32>
    %c9_67 = arith.constant 9 : index
    %c0_68 = arith.constant 0 : index
    %c0_69 = arith.constant 0 : index
    %101 = vector.load %arg3[%c9_67, %c0_68, %c0_69] : memref<11x48x1xf32, #tpu.memory_space<vmem>>, vector<1x48x1xf32>
    %102 = vector.shape_cast %101 : vector<1x48x1xf32> to vector<48x1xf32>
    %103 = vector.broadcast %102 : vector<48x1xf32> to vector<48x512xf32>
    %104 = arith.addf %100, %103 : vector<48x512xf32>
    %cst_70 = arith.constant 0.000000e+00 : f32
    %105 = vector.broadcast %cst_70 : f32 to vector<48x512xf32>
    %106 = arith.maximumf %104, %105 : vector<48x512xf32>
    %107 = arith.truncf %106 : vector<48x512xf32> to vector<48x512xbf16>
    %c10 = arith.constant 10 : index
    %c0_71 = arith.constant 0 : index
    %c0_72 = arith.constant 0 : index
    %108 = vector.load %arg2[%c10, %c0_71, %c0_72] : memref<11x48x48xbf16, #tpu.memory_space<vmem>>, vector<1x48x48xbf16>
    %109 = vector.shape_cast %108 : vector<1x48x48xbf16> to vector<48x48xbf16>
    %cst_73 = arith.constant dense<0.000000e+00> : vector<48x512xf32>
    %110 = tpu.matmul %109, %107, %cst_73 {dimension_numbers = #tpu.dot_dimension_numbers<[1], [0], [0], [1], [0, 0, 1, 1], [], []>} : vector<48x48xbf16>, vector<48x512xbf16>, vector<48x512xf32> -> vector<48x512xf32>
    %c10_74 = arith.constant 10 : index
    %c0_75 = arith.constant 0 : index
    %c0_76 = arith.constant 0 : index
    %111 = vector.load %arg3[%c10_74, %c0_75, %c0_76] : memref<11x48x1xf32, #tpu.memory_space<vmem>>, vector<1x48x1xf32>
    %112 = vector.shape_cast %111 : vector<1x48x1xf32> to vector<48x1xf32>
    %113 = vector.broadcast %112 : vector<48x1xf32> to vector<48x512xf32>
    %114 = arith.addf %110, %113 : vector<48x512xf32>
    %115 = vector.extract_strided_slice %114 {offsets = [0, 0], sizes = [8, 512], strides = [1, 1]} : vector<48x512xf32> to vector<8x512xf32>
    %116 = vector.extract_strided_slice %93 {offsets = [32, 0], sizes = [8, 512], strides = [1, 1]} : vector<48x512xf32> to vector<8x512xf32>
    %117 = arith.addf %115, %116 : vector<8x512xf32>
    %c0_77 = arith.constant 0 : index
    %c0_78 = arith.constant 0 : index
    %118 = vector.load %arg4[%c0_77, %c0_78] : memref<8x2048xf32, #tpu.memory_space<vmem>>, vector<8x512xf32>
    tpu.vector_store %arg4[%c0_77, %c0_78], %117 {strides = array<i32>} : memref<8x2048xf32, #tpu.memory_space<vmem>>, vector<8x512xf32>,
    %c0_79 = arith.constant 0 : index
    %c512 = arith.constant 512 : index
    %119 = vector.load %arg1[%c0_79, %c512] : memref<24x2048xf32, #tpu.memory_space<vmem>>, vector<24x512xf32>
    %120 = tpu.concatenate %119, %0 in 0 : vector<24x512xf32>, vector<24x512xf32> -> vector<48x512xf32>
    %121 = arith.truncf %120 : vector<48x512xf32> to vector<48x512xbf16>
    %c0_80 = arith.constant 0 : index
    %c0_81 = arith.constant 0 : index
    %c0_82 = arith.constant 0 : index
    %122 = vector.load %arg2[%c0_80, %c0_81, %c0_82] : memref<11x48x48xbf16, #tpu.memory_space<vmem>>, vector<1x48x48xbf16>
    %123 = vector.shape_cast %122 : vector<1x48x48xbf16> to vector<48x48xbf16>
    %cst_83 = arith.constant dense<0.000000e+00> : vector<48x512xf32>
    %124 = tpu.matmul %123, %121, %cst_83 {dimension_numbers = #tpu.dot_dimension_numbers<[1], [0], [0], [1], [0, 0, 1, 1], [], []>} : vector<48x48xbf16>, vector<48x512xbf16>, vector<48x512xf32> -> vector<48x512xf32>
    %c0_84 = arith.constant 0 : index
    %c0_85 = arith.constant 0 : index
    %c0_86 = arith.constant 0 : index
    %125 = vector.load %arg3[%c0_84, %c0_85, %c0_86] : memref<11x48x1xf32, #tpu.memory_space<vmem>>, vector<1x48x1xf32>
    %126 = vector.shape_cast %125 : vector<1x48x1xf32> to vector<48x1xf32>
    %127 = vector.broadcast %126 : vector<48x1xf32> to vector<48x512xf32>
    %128 = arith.addf %124, %127 : vector<48x512xf32>
    %cst_87 = arith.constant 0.000000e+00 : f32
    %129 = vector.broadcast %cst_87 : f32 to vector<48x512xf32>
    %130 = arith.maximumf %128, %129 : vector<48x512xf32>
    %131 = arith.truncf %130 : vector<48x512xf32> to vector<48x512xbf16>
    %c1_88 = arith.constant 1 : index
    %c0_89 = arith.constant 0 : index
    %c0_90 = arith.constant 0 : index
    %132 = vector.load %arg2[%c1_88, %c0_89, %c0_90] : memref<11x48x48xbf16, #tpu.memory_space<vmem>>, vector<1x48x48xbf16>
    %133 = vector.shape_cast %132 : vector<1x48x48xbf16> to vector<48x48xbf16>
    %cst_91 = arith.constant dense<0.000000e+00> : vector<48x512xf32>
    %134 = tpu.matmul %133, %131, %cst_91 {dimension_numbers = #tpu.dot_dimension_numbers<[1], [0], [0], [1], [0, 0, 1, 1], [], []>} : vector<48x48xbf16>, vector<48x512xbf16>, vector<48x512xf32> -> vector<48x512xf32>
    %c1_92 = arith.constant 1 : index
    %c0_93 = arith.constant 0 : index
    %c0_94 = arith.constant 0 : index
    %135 = vector.load %arg3[%c1_92, %c0_93, %c0_94] : memref<11x48x1xf32, #tpu.memory_space<vmem>>, vector<1x48x1xf32>
    %136 = vector.shape_cast %135 : vector<1x48x1xf32> to vector<48x1xf32>
    %137 = vector.broadcast %136 : vector<48x1xf32> to vector<48x512xf32>
    %138 = arith.addf %134, %137 : vector<48x512xf32>
    %cst_95 = arith.constant 0.000000e+00 : f32
    %139 = vector.broadcast %cst_95 : f32 to vector<48x512xf32>
    %140 = arith.maximumf %138, %139 : vector<48x512xf32>
    %141 = arith.truncf %140 : vector<48x512xf32> to vector<48x512xbf16>
    %c2_96 = arith.constant 2 : index
    %c0_97 = arith.constant 0 : index
    %c0_98 = arith.constant 0 : index
    %142 = vector.load %arg2[%c2_96, %c0_97, %c0_98] : memref<11x48x48xbf16, #tpu.memory_space<vmem>>, vector<1x48x48xbf16>
    %143 = vector.shape_cast %142 : vector<1x48x48xbf16> to vector<48x48xbf16>
    %cst_99 = arith.constant dense<0.000000e+00> : vector<48x512xf32>
    %144 = tpu.matmul %143, %141, %cst_99 {dimension_numbers = #tpu.dot_dimension_numbers<[1], [0], [0], [1], [0, 0, 1, 1], [], []>} : vector<48x48xbf16>, vector<48x512xbf16>, vector<48x512xf32> -> vector<48x512xf32>
    %c2_100 = arith.constant 2 : index
    %c0_101 = arith.constant 0 : index
    %c0_102 = arith.constant 0 : index
    %145 = vector.load %arg3[%c2_100, %c0_101, %c0_102] : memref<11x48x1xf32, #tpu.memory_space<vmem>>, vector<1x48x1xf32>
    %146 = vector.shape_cast %145 : vector<1x48x1xf32> to vector<48x1xf32>
    %147 = vector.broadcast %146 : vector<48x1xf32> to vector<48x512xf32>
    %148 = arith.addf %144, %147 : vector<48x512xf32>
    %cst_103 = arith.constant 0.000000e+00 : f32
    %149 = vector.broadcast %cst_103 : f32 to vector<48x512xf32>
    %150 = arith.maximumf %148, %149 : vector<48x512xf32>
    %151 = arith.truncf %150 : vector<48x512xf32> to vector<48x512xbf16>
    %c3_104 = arith.constant 3 : index
    %c0_105 = arith.constant 0 : index
    %c0_106 = arith.constant 0 : index
    %152 = vector.load %arg2[%c3_104, %c0_105, %c0_106] : memref<11x48x48xbf16, #tpu.memory_space<vmem>>, vector<1x48x48xbf16>
    %153 = vector.shape_cast %152 : vector<1x48x48xbf16> to vector<48x48xbf16>
    %cst_107 = arith.constant dense<0.000000e+00> : vector<48x512xf32>
    %154 = tpu.matmul %153, %151, %cst_107 {dimension_numbers = #tpu.dot_dimension_numbers<[1], [0], [0], [1], [0, 0, 1, 1], [], []>} : vector<48x48xbf16>, vector<48x512xbf16>, vector<48x512xf32> -> vector<48x512xf32>
    %c3_108 = arith.constant 3 : index
    %c0_109 = arith.constant 0 : index
    %c0_110 = arith.constant 0 : index
    %155 = vector.load %arg3[%c3_108, %c0_109, %c0_110] : memref<11x48x1xf32, #tpu.memory_space<vmem>>, vector<1x48x1xf32>
    %156 = vector.shape_cast %155 : vector<1x48x1xf32> to vector<48x1xf32>
    %157 = vector.broadcast %156 : vector<48x1xf32> to vector<48x512xf32>
    %158 = arith.addf %154, %157 : vector<48x512xf32>
    %cst_111 = arith.constant 0.000000e+00 : f32
    %159 = vector.broadcast %cst_111 : f32 to vector<48x512xf32>
    %160 = arith.maximumf %158, %159 : vector<48x512xf32>
    %161 = arith.truncf %160 : vector<48x512xf32> to vector<48x512xbf16>
    %c4_112 = arith.constant 4 : index
    %c0_113 = arith.constant 0 : index
    %c0_114 = arith.constant 0 : index
    %162 = vector.load %arg2[%c4_112, %c0_113, %c0_114] : memref<11x48x48xbf16, #tpu.memory_space<vmem>>, vector<1x48x48xbf16>
    %163 = vector.shape_cast %162 : vector<1x48x48xbf16> to vector<48x48xbf16>
    %cst_115 = arith.constant dense<0.000000e+00> : vector<48x512xf32>
    %164 = tpu.matmul %163, %161, %cst_115 {dimension_numbers = #tpu.dot_dimension_numbers<[1], [0], [0], [1], [0, 0, 1, 1], [], []>} : vector<48x48xbf16>, vector<48x512xbf16>, vector<48x512xf32> -> vector<48x512xf32>
    %c4_116 = arith.constant 4 : index
    %c0_117 = arith.constant 0 : index
    %c0_118 = arith.constant 0 : index
    %165 = vector.load %arg3[%c4_116, %c0_117, %c0_118] : memref<11x48x1xf32, #tpu.memory_space<vmem>>, vector<1x48x1xf32>
    %166 = vector.shape_cast %165 : vector<1x48x1xf32> to vector<48x1xf32>
    %167 = vector.broadcast %166 : vector<48x1xf32> to vector<48x512xf32>
    %168 = arith.addf %164, %167 : vector<48x512xf32>
    %cst_119 = arith.constant 0.000000e+00 : f32
    %169 = vector.broadcast %cst_119 : f32 to vector<48x512xf32>
    %170 = arith.maximumf %168, %169 : vector<48x512xf32>
    %171 = arith.truncf %170 : vector<48x512xf32> to vector<48x512xbf16>
    %172 = vector.extract_strided_slice %121 {offsets = [0, 0], sizes = [16, 512], strides = [1, 1]} : vector<48x512xbf16> to vector<16x512xbf16>
    %173 = vector.extract_strided_slice %171 {offsets = [0, 0], sizes = [32, 512], strides = [1, 1]} : vector<48x512xbf16> to vector<32x512xbf16>
    %174 = tpu.concatenate %172, %173 in 0 : vector<16x512xbf16>, vector<32x512xbf16> -> vector<48x512xbf16>
    %c5_120 = arith.constant 5 : index
    %c0_121 = arith.constant 0 : index
    %c0_122 = arith.constant 0 : index
    %175 = vector.load %arg2[%c5_120, %c0_121, %c0_122] : memref<11x48x48xbf16, #tpu.memory_space<vmem>>, vector<1x48x48xbf16>
    %176 = vector.shape_cast %175 : vector<1x48x48xbf16> to vector<48x48xbf16>
    %cst_123 = arith.constant dense<0.000000e+00> : vector<48x512xf32>
    %177 = tpu.matmul %176, %174, %cst_123 {dimension_numbers = #tpu.dot_dimension_numbers<[1], [0], [0], [1], [0, 0, 1, 1], [], []>} : vector<48x48xbf16>, vector<48x512xbf16>, vector<48x512xf32> -> vector<48x512xf32>
    %c5_124 = arith.constant 5 : index
    %c0_125 = arith.constant 0 : index
    %c0_126 = arith.constant 0 : index
    %178 = vector.load %arg3[%c5_124, %c0_125, %c0_126] : memref<11x48x1xf32, #tpu.memory_space<vmem>>, vector<1x48x1xf32>
    %179 = vector.shape_cast %178 : vector<1x48x1xf32> to vector<48x1xf32>
    %180 = vector.broadcast %179 : vector<48x1xf32> to vector<48x512xf32>
    %181 = arith.addf %177, %180 : vector<48x512xf32>
    %cst_127 = arith.constant 0.000000e+00 : f32
    %182 = vector.broadcast %cst_127 : f32 to vector<48x512xf32>
    %183 = arith.maximumf %181, %182 : vector<48x512xf32>
    %184 = arith.truncf %183 : vector<48x512xf32> to vector<48x512xbf16>
    %c6_128 = arith.constant 6 : index
    %c0_129 = arith.constant 0 : index
    %c0_130 = arith.constant 0 : index
    %185 = vector.load %arg2[%c6_128, %c0_129, %c0_130] : memref<11x48x48xbf16, #tpu.memory_space<vmem>>, vector<1x48x48xbf16>
    %186 = vector.shape_cast %185 : vector<1x48x48xbf16> to vector<48x48xbf16>
    %cst_131 = arith.constant dense<0.000000e+00> : vector<48x512xf32>
    %187 = tpu.matmul %186, %184, %cst_131 {dimension_numbers = #tpu.dot_dimension_numbers<[1], [0], [0], [1], [0, 0, 1, 1], [], []>} : vector<48x48xbf16>, vector<48x512xbf16>, vector<48x512xf32> -> vector<48x512xf32>
    %c6_132 = arith.constant 6 : index
    %c0_133 = arith.constant 0 : index
    %c0_134 = arith.constant 0 : index
    %188 = vector.load %arg3[%c6_132, %c0_133, %c0_134] : memref<11x48x1xf32, #tpu.memory_space<vmem>>, vector<1x48x1xf32>
    %189 = vector.shape_cast %188 : vector<1x48x1xf32> to vector<48x1xf32>
    %190 = vector.broadcast %189 : vector<48x1xf32> to vector<48x512xf32>
    %191 = arith.addf %187, %190 : vector<48x512xf32>
    %cst_135 = arith.constant 0.000000e+00 : f32
    %192 = vector.broadcast %cst_135 : f32 to vector<48x512xf32>
    %193 = arith.maximumf %191, %192 : vector<48x512xf32>
    %194 = arith.truncf %193 : vector<48x512xf32> to vector<48x512xbf16>
    %c7_136 = arith.constant 7 : index
    %c0_137 = arith.constant 0 : index
    %c0_138 = arith.constant 0 : index
    %195 = vector.load %arg2[%c7_136, %c0_137, %c0_138] : memref<11x48x48xbf16, #tpu.memory_space<vmem>>, vector<1x48x48xbf16>
    %196 = vector.shape_cast %195 : vector<1x48x48xbf16> to vector<48x48xbf16>
    %cst_139 = arith.constant dense<0.000000e+00> : vector<48x512xf32>
    %197 = tpu.matmul %196, %194, %cst_139 {dimension_numbers = #tpu.dot_dimension_numbers<[1], [0], [0], [1], [0, 0, 1, 1], [], []>} : vector<48x48xbf16>, vector<48x512xbf16>, vector<48x512xf32> -> vector<48x512xf32>
    %c7_140 = arith.constant 7 : index
    %c0_141 = arith.constant 0 : index
    %c0_142 = arith.constant 0 : index
    %198 = vector.load %arg3[%c7_140, %c0_141, %c0_142] : memref<11x48x1xf32, #tpu.memory_space<vmem>>, vector<1x48x1xf32>
    %199 = vector.shape_cast %198 : vector<1x48x1xf32> to vector<48x1xf32>
    %200 = vector.broadcast %199 : vector<48x1xf32> to vector<48x512xf32>
    %201 = arith.addf %197, %200 : vector<48x512xf32>
    %cst_143 = arith.constant 0.000000e+00 : f32
    %202 = vector.broadcast %cst_143 : f32 to vector<48x512xf32>
    %203 = arith.maximumf %201, %202 : vector<48x512xf32>
    %204 = arith.truncf %203 : vector<48x512xf32> to vector<48x512xbf16>
    %c8_144 = arith.constant 8 : index
    %c0_145 = arith.constant 0 : index
    %c0_146 = arith.constant 0 : index
    %205 = vector.load %arg2[%c8_144, %c0_145, %c0_146] : memref<11x48x48xbf16, #tpu.memory_space<vmem>>, vector<1x48x48xbf16>
    %206 = vector.shape_cast %205 : vector<1x48x48xbf16> to vector<48x48xbf16>
    %cst_147 = arith.constant dense<0.000000e+00> : vector<48x512xf32>
    %207 = tpu.matmul %206, %204, %cst_147 {dimension_numbers = #tpu.dot_dimension_numbers<[1], [0], [0], [1], [0, 0, 1, 1], [], []>} : vector<48x48xbf16>, vector<48x512xbf16>, vector<48x512xf32> -> vector<48x512xf32>
    %c8_148 = arith.constant 8 : index
    %c0_149 = arith.constant 0 : index
    %c0_150 = arith.constant 0 : index
    %208 = vector.load %arg3[%c8_148, %c0_149, %c0_150] : memref<11x48x1xf32, #tpu.memory_space<vmem>>, vector<1x48x1xf32>
    %209 = vector.shape_cast %208 : vector<1x48x1xf32> to vector<48x1xf32>
    %210 = vector.broadcast %209 : vector<48x1xf32> to vector<48x512xf32>
    %211 = arith.addf %207, %210 : vector<48x512xf32>
    %212 = vector.extract_strided_slice %211 {offsets = [0, 0], sizes = [32, 512], strides = [1, 1]} : vector<48x512xf32> to vector<32x512xf32>
    %213 = arith.truncf %212 : vector<32x512xf32> to vector<32x512xbf16>
    %214 = vector.extract_strided_slice %121 {offsets = [16, 0], sizes = [16, 512], strides = [1, 1]} : vector<48x512xbf16> to vector<16x512xbf16>
    %215 = tpu.concatenate %213, %214 in 0 : vector<32x512xbf16>, vector<16x512xbf16> -> vector<48x512xbf16>
    %c9_151 = arith.constant 9 : index
    %c0_152 = arith.constant 0 : index
    %c0_153 = arith.constant 0 : index
    %216 = vector.load %arg2[%c9_151, %c0_152, %c0_153] : memref<11x48x48xbf16, #tpu.memory_space<vmem>>, vector<1x48x48xbf16>
    %217 = vector.shape_cast %216 : vector<1x48x48xbf16> to vector<48x48xbf16>
    %cst_154 = arith.constant dense<0.000000e+00> : vector<48x512xf32>
    %218 = tpu.matmul %217, %215, %cst_154 {dimension_numbers = #tpu.dot_dimension_numbers<[1], [0], [0], [1], [0, 0, 1, 1], [], []>} : vector<48x48xbf16>, vector<48x512xbf16>, vector<48x512xf32> -> vector<48x512xf32>
    %c9_155 = arith.constant 9 : index
    %c0_156 = arith.constant 0 : index
    %c0_157 = arith.constant 0 : index
    %219 = vector.load %arg3[%c9_155, %c0_156, %c0_157] : memref<11x48x1xf32, #tpu.memory_space<vmem>>, vector<1x48x1xf32>
    %220 = vector.shape_cast %219 : vector<1x48x1xf32> to vector<48x1xf32>
    %221 = vector.broadcast %220 : vector<48x1xf32> to vector<48x512xf32>
    %222 = arith.addf %218, %221 : vector<48x512xf32>
    %cst_158 = arith.constant 0.000000e+00 : f32
    %223 = vector.broadcast %cst_158 : f32 to vector<48x512xf32>
    %224 = arith.maximumf %222, %223 : vector<48x512xf32>
    %225 = arith.truncf %224 : vector<48x512xf32> to vector<48x512xbf16>
    %c10_159 = arith.constant 10 : index
    %c0_160 = arith.constant 0 : index
    %c0_161 = arith.constant 0 : index
    %226 = vector.load %arg2[%c10_159, %c0_160, %c0_161] : memref<11x48x48xbf16, #tpu.memory_space<vmem>>, vector<1x48x48xbf16>
    %227 = vector.shape_cast %226 : vector<1x48x48xbf16> to vector<48x48xbf16>
    %cst_162 = arith.constant dense<0.000000e+00> : vector<48x512xf32>
    %228 = tpu.matmul %227, %225, %cst_162 {dimension_numbers = #tpu.dot_dimension_numbers<[1], [0], [0], [1], [0, 0, 1, 1], [], []>} : vector<48x48xbf16>, vector<48x512xbf16>, vector<48x512xf32> -> vector<48x512xf32>
    %c10_163 = arith.constant 10 : index
    %c0_164 = arith.constant 0 : index
    %c0_165 = arith.constant 0 : index
    %229 = vector.load %arg3[%c10_163, %c0_164, %c0_165] : memref<11x48x1xf32, #tpu.memory_space<vmem>>, vector<1x48x1xf32>
    %230 = vector.shape_cast %229 : vector<1x48x1xf32> to vector<48x1xf32>
    %231 = vector.broadcast %230 : vector<48x1xf32> to vector<48x512xf32>
    %232 = arith.addf %228, %231 : vector<48x512xf32>
    %233 = vector.extract_strided_slice %232 {offsets = [0, 0], sizes = [8, 512], strides = [1, 1]} : vector<48x512xf32> to vector<8x512xf32>
    %234 = vector.extract_strided_slice %211 {offsets = [32, 0], sizes = [8, 512], strides = [1, 1]} : vector<48x512xf32> to vector<8x512xf32>
    %235 = arith.addf %233, %234 : vector<8x512xf32>
    %c0_166 = arith.constant 0 : index
    %c512_167 = arith.constant 512 : index
    %236 = vector.load %arg4[%c0_166, %c512_167] : memref<8x2048xf32, #tpu.memory_space<vmem>>, vector<8x512xf32>
    tpu.vector_store %arg4[%c0_166, %c512_167], %235 {strides = array<i32>} : memref<8x2048xf32, #tpu.memory_space<vmem>>, vector<8x512xf32>,
    %c0_168 = arith.constant 0 : index
    %c1024 = arith.constant 1024 : index
    %237 = vector.load %arg1[%c0_168, %c1024] : memref<24x2048xf32, #tpu.memory_space<vmem>>, vector<24x512xf32>
    %238 = tpu.concatenate %237, %0 in 0 : vector<24x512xf32>, vector<24x512xf32> -> vector<48x512xf32>
    %239 = arith.truncf %238 : vector<48x512xf32> to vector<48x512xbf16>
    %c0_169 = arith.constant 0 : index
    %c0_170 = arith.constant 0 : index
    %c0_171 = arith.constant 0 : index
    %240 = vector.load %arg2[%c0_169, %c0_170, %c0_171] : memref<11x48x48xbf16, #tpu.memory_space<vmem>>, vector<1x48x48xbf16>
    %241 = vector.shape_cast %240 : vector<1x48x48xbf16> to vector<48x48xbf16>
    %cst_172 = arith.constant dense<0.000000e+00> : vector<48x512xf32>
    %242 = tpu.matmul %241, %239, %cst_172 {dimension_numbers = #tpu.dot_dimension_numbers<[1], [0], [0], [1], [0, 0, 1, 1], [], []>} : vector<48x48xbf16>, vector<48x512xbf16>, vector<48x512xf32> -> vector<48x512xf32>
    %c0_173 = arith.constant 0 : index
    %c0_174 = arith.constant 0 : index
    %c0_175 = arith.constant 0 : index
    %243 = vector.load %arg3[%c0_173, %c0_174, %c0_175] : memref<11x48x1xf32, #tpu.memory_space<vmem>>, vector<1x48x1xf32>
    %244 = vector.shape_cast %243 : vector<1x48x1xf32> to vector<48x1xf32>
    %245 = vector.broadcast %244 : vector<48x1xf32> to vector<48x512xf32>
    %246 = arith.addf %242, %245 : vector<48x512xf32>
    %cst_176 = arith.constant 0.000000e+00 : f32
    %247 = vector.broadcast %cst_176 : f32 to vector<48x512xf32>
    %248 = arith.maximumf %246, %247 : vector<48x512xf32>
    %249 = arith.truncf %248 : vector<48x512xf32> to vector<48x512xbf16>
    %c1_177 = arith.constant 1 : index
    %c0_178 = arith.constant 0 : index
    %c0_179 = arith.constant 0 : index
    %250 = vector.load %arg2[%c1_177, %c0_178, %c0_179] : memref<11x48x48xbf16, #tpu.memory_space<vmem>>, vector<1x48x48xbf16>
    %251 = vector.shape_cast %250 : vector<1x48x48xbf16> to vector<48x48xbf16>
    %cst_180 = arith.constant dense<0.000000e+00> : vector<48x512xf32>
    %252 = tpu.matmul %251, %249, %cst_180 {dimension_numbers = #tpu.dot_dimension_numbers<[1], [0], [0], [1], [0, 0, 1, 1], [], []>} : vector<48x48xbf16>, vector<48x512xbf16>, vector<48x512xf32> -> vector<48x512xf32>
    %c1_181 = arith.constant 1 : index
    %c0_182 = arith.constant 0 : index
    %c0_183 = arith.constant 0 : index
    %253 = vector.load %arg3[%c1_181, %c0_182, %c0_183] : memref<11x48x1xf32, #tpu.memory_space<vmem>>, vector<1x48x1xf32>
    %254 = vector.shape_cast %253 : vector<1x48x1xf32> to vector<48x1xf32>
    %255 = vector.broadcast %254 : vector<48x1xf32> to vector<48x512xf32>
    %256 = arith.addf %252, %255 : vector<48x512xf32>
    %cst_184 = arith.constant 0.000000e+00 : f32
    %257 = vector.broadcast %cst_184 : f32 to vector<48x512xf32>
    %258 = arith.maximumf %256, %257 : vector<48x512xf32>
    %259 = arith.truncf %258 : vector<48x512xf32> to vector<48x512xbf16>
    %c2_185 = arith.constant 2 : index
    %c0_186 = arith.constant 0 : index
    %c0_187 = arith.constant 0 : index
    %260 = vector.load %arg2[%c2_185, %c0_186, %c0_187] : memref<11x48x48xbf16, #tpu.memory_space<vmem>>, vector<1x48x48xbf16>
    %261 = vector.shape_cast %260 : vector<1x48x48xbf16> to vector<48x48xbf16>
    %cst_188 = arith.constant dense<0.000000e+00> : vector<48x512xf32>
    %262 = tpu.matmul %261, %259, %cst_188 {dimension_numbers = #tpu.dot_dimension_numbers<[1], [0], [0], [1], [0, 0, 1, 1], [], []>} : vector<48x48xbf16>, vector<48x512xbf16>, vector<48x512xf32> -> vector<48x512xf32>
    %c2_189 = arith.constant 2 : index
    %c0_190 = arith.constant 0 : index
    %c0_191 = arith.constant 0 : index
    %263 = vector.load %arg3[%c2_189, %c0_190, %c0_191] : memref<11x48x1xf32, #tpu.memory_space<vmem>>, vector<1x48x1xf32>
    %264 = vector.shape_cast %263 : vector<1x48x1xf32> to vector<48x1xf32>
    %265 = vector.broadcast %264 : vector<48x1xf32> to vector<48x512xf32>
    %266 = arith.addf %262, %265 : vector<48x512xf32>
    %cst_192 = arith.constant 0.000000e+00 : f32
    %267 = vector.broadcast %cst_192 : f32 to vector<48x512xf32>
    %268 = arith.maximumf %266, %267 : vector<48x512xf32>
    %269 = arith.truncf %268 : vector<48x512xf32> to vector<48x512xbf16>
    %c3_193 = arith.constant 3 : index
    %c0_194 = arith.constant 0 : index
    %c0_195 = arith.constant 0 : index
    %270 = vector.load %arg2[%c3_193, %c0_194, %c0_195] : memref<11x48x48xbf16, #tpu.memory_space<vmem>>, vector<1x48x48xbf16>
    %271 = vector.shape_cast %270 : vector<1x48x48xbf16> to vector<48x48xbf16>
    %cst_196 = arith.constant dense<0.000000e+00> : vector<48x512xf32>
    %272 = tpu.matmul %271, %269, %cst_196 {dimension_numbers = #tpu.dot_dimension_numbers<[1], [0], [0], [1], [0, 0, 1, 1], [], []>} : vector<48x48xbf16>, vector<48x512xbf16>, vector<48x512xf32> -> vector<48x512xf32>
    %c3_197 = arith.constant 3 : index
    %c0_198 = arith.constant 0 : index
    %c0_199 = arith.constant 0 : index
    %273 = vector.load %arg3[%c3_197, %c0_198, %c0_199] : memref<11x48x1xf32, #tpu.memory_space<vmem>>, vector<1x48x1xf32>
    %274 = vector.shape_cast %273 : vector<1x48x1xf32> to vector<48x1xf32>
    %275 = vector.broadcast %274 : vector<48x1xf32> to vector<48x512xf32>
    %276 = arith.addf %272, %275 : vector<48x512xf32>
    %cst_200 = arith.constant 0.000000e+00 : f32
    %277 = vector.broadcast %cst_200 : f32 to vector<48x512xf32>
    %278 = arith.maximumf %276, %277 : vector<48x512xf32>
    %279 = arith.truncf %278 : vector<48x512xf32> to vector<48x512xbf16>
    %c4_201 = arith.constant 4 : index
    %c0_202 = arith.constant 0 : index
    %c0_203 = arith.constant 0 : index
    %280 = vector.load %arg2[%c4_201, %c0_202, %c0_203] : memref<11x48x48xbf16, #tpu.memory_space<vmem>>, vector<1x48x48xbf16>
    %281 = vector.shape_cast %280 : vector<1x48x48xbf16> to vector<48x48xbf16>
    %cst_204 = arith.constant dense<0.000000e+00> : vector<48x512xf32>
    %282 = tpu.matmul %281, %279, %cst_204 {dimension_numbers = #tpu.dot_dimension_numbers<[1], [0], [0], [1], [0, 0, 1, 1], [], []>} : vector<48x48xbf16>, vector<48x512xbf16>, vector<48x512xf32> -> vector<48x512xf32>
    %c4_205 = arith.constant 4 : index
    %c0_206 = arith.constant 0 : index
    %c0_207 = arith.constant 0 : index
    %283 = vector.load %arg3[%c4_205, %c0_206, %c0_207] : memref<11x48x1xf32, #tpu.memory_space<vmem>>, vector<1x48x1xf32>
    %284 = vector.shape_cast %283 : vector<1x48x1xf32> to vector<48x1xf32>
    %285 = vector.broadcast %284 : vector<48x1xf32> to vector<48x512xf32>
    %286 = arith.addf %282, %285 : vector<48x512xf32>
    %cst_208 = arith.constant 0.000000e+00 : f32
    %287 = vector.broadcast %cst_208 : f32 to vector<48x512xf32>
    %288 = arith.maximumf %286, %287 : vector<48x512xf32>
    %289 = arith.truncf %288 : vector<48x512xf32> to vector<48x512xbf16>
    %290 = vector.extract_strided_slice %239 {offsets = [0, 0], sizes = [16, 512], strides = [1, 1]} : vector<48x512xbf16> to vector<16x512xbf16>
    %291 = vector.extract_strided_slice %289 {offsets = [0, 0], sizes = [32, 512], strides = [1, 1]} : vector<48x512xbf16> to vector<32x512xbf16>
    %292 = tpu.concatenate %290, %291 in 0 : vector<16x512xbf16>, vector<32x512xbf16> -> vector<48x512xbf16>
    %c5_209 = arith.constant 5 : index
    %c0_210 = arith.constant 0 : index
    %c0_211 = arith.constant 0 : index
    %293 = vector.load %arg2[%c5_209, %c0_210, %c0_211] : memref<11x48x48xbf16, #tpu.memory_space<vmem>>, vector<1x48x48xbf16>
    %294 = vector.shape_cast %293 : vector<1x48x48xbf16> to vector<48x48xbf16>
    %cst_212 = arith.constant dense<0.000000e+00> : vector<48x512xf32>
    %295 = tpu.matmul %294, %292, %cst_212 {dimension_numbers = #tpu.dot_dimension_numbers<[1], [0], [0], [1], [0, 0, 1, 1], [], []>} : vector<48x48xbf16>, vector<48x512xbf16>, vector<48x512xf32> -> vector<48x512xf32>
    %c5_213 = arith.constant 5 : index
    %c0_214 = arith.constant 0 : index
    %c0_215 = arith.constant 0 : index
    %296 = vector.load %arg3[%c5_213, %c0_214, %c0_215] : memref<11x48x1xf32, #tpu.memory_space<vmem>>, vector<1x48x1xf32>
    %297 = vector.shape_cast %296 : vector<1x48x1xf32> to vector<48x1xf32>
    %298 = vector.broadcast %297 : vector<48x1xf32> to vector<48x512xf32>
    %299 = arith.addf %295, %298 : vector<48x512xf32>
    %cst_216 = arith.constant 0.000000e+00 : f32
    %300 = vector.broadcast %cst_216 : f32 to vector<48x512xf32>
    %301 = arith.maximumf %299, %300 : vector<48x512xf32>
    %302 = arith.truncf %301 : vector<48x512xf32> to vector<48x512xbf16>
    %c6_217 = arith.constant 6 : index
    %c0_218 = arith.constant 0 : index
    %c0_219 = arith.constant 0 : index
    %303 = vector.load %arg2[%c6_217, %c0_218, %c0_219] : memref<11x48x48xbf16, #tpu.memory_space<vmem>>, vector<1x48x48xbf16>
    %304 = vector.shape_cast %303 : vector<1x48x48xbf16> to vector<48x48xbf16>
    %cst_220 = arith.constant dense<0.000000e+00> : vector<48x512xf32>
    %305 = tpu.matmul %304, %302, %cst_220 {dimension_numbers = #tpu.dot_dimension_numbers<[1], [0], [0], [1], [0, 0, 1, 1], [], []>} : vector<48x48xbf16>, vector<48x512xbf16>, vector<48x512xf32> -> vector<48x512xf32>
    %c6_221 = arith.constant 6 : index
    %c0_222 = arith.constant 0 : index
    %c0_223 = arith.constant 0 : index
    %306 = vector.load %arg3[%c6_221, %c0_222, %c0_223] : memref<11x48x1xf32, #tpu.memory_space<vmem>>, vector<1x48x1xf32>
    %307 = vector.shape_cast %306 : vector<1x48x1xf32> to vector<48x1xf32>
    %308 = vector.broadcast %307 : vector<48x1xf32> to vector<48x512xf32>
    %309 = arith.addf %305, %308 : vector<48x512xf32>
    %cst_224 = arith.constant 0.000000e+00 : f32
    %310 = vector.broadcast %cst_224 : f32 to vector<48x512xf32>
    %311 = arith.maximumf %309, %310 : vector<48x512xf32>
    %312 = arith.truncf %311 : vector<48x512xf32> to vector<48x512xbf16>
    %c7_225 = arith.constant 7 : index
    %c0_226 = arith.constant 0 : index
    %c0_227 = arith.constant 0 : index
    %313 = vector.load %arg2[%c7_225, %c0_226, %c0_227] : memref<11x48x48xbf16, #tpu.memory_space<vmem>>, vector<1x48x48xbf16>
    %314 = vector.shape_cast %313 : vector<1x48x48xbf16> to vector<48x48xbf16>
    %cst_228 = arith.constant dense<0.000000e+00> : vector<48x512xf32>
    %315 = tpu.matmul %314, %312, %cst_228 {dimension_numbers = #tpu.dot_dimension_numbers<[1], [0], [0], [1], [0, 0, 1, 1], [], []>} : vector<48x48xbf16>, vector<48x512xbf16>, vector<48x512xf32> -> vector<48x512xf32>
    %c7_229 = arith.constant 7 : index
    %c0_230 = arith.constant 0 : index
    %c0_231 = arith.constant 0 : index
    %316 = vector.load %arg3[%c7_229, %c0_230, %c0_231] : memref<11x48x1xf32, #tpu.memory_space<vmem>>, vector<1x48x1xf32>
    %317 = vector.shape_cast %316 : vector<1x48x1xf32> to vector<48x1xf32>
    %318 = vector.broadcast %317 : vector<48x1xf32> to vector<48x512xf32>
    %319 = arith.addf %315, %318 : vector<48x512xf32>
    %cst_232 = arith.constant 0.000000e+00 : f32
    %320 = vector.broadcast %cst_232 : f32 to vector<48x512xf32>
    %321 = arith.maximumf %319, %320 : vector<48x512xf32>
    %322 = arith.truncf %321 : vector<48x512xf32> to vector<48x512xbf16>
    %c8_233 = arith.constant 8 : index
    %c0_234 = arith.constant 0 : index
    %c0_235 = arith.constant 0 : index
    %323 = vector.load %arg2[%c8_233, %c0_234, %c0_235] : memref<11x48x48xbf16, #tpu.memory_space<vmem>>, vector<1x48x48xbf16>
    %324 = vector.shape_cast %323 : vector<1x48x48xbf16> to vector<48x48xbf16>
    %cst_236 = arith.constant dense<0.000000e+00> : vector<48x512xf32>
    %325 = tpu.matmul %324, %322, %cst_236 {dimension_numbers = #tpu.dot_dimension_numbers<[1], [0], [0], [1], [0, 0, 1, 1], [], []>} : vector<48x48xbf16>, vector<48x512xbf16>, vector<48x512xf32> -> vector<48x512xf32>
    %c8_237 = arith.constant 8 : index
    %c0_238 = arith.constant 0 : index
    %c0_239 = arith.constant 0 : index
    %326 = vector.load %arg3[%c8_237, %c0_238, %c0_239] : memref<11x48x1xf32, #tpu.memory_space<vmem>>, vector<1x48x1xf32>
    %327 = vector.shape_cast %326 : vector<1x48x1xf32> to vector<48x1xf32>
    %328 = vector.broadcast %327 : vector<48x1xf32> to vector<48x512xf32>
    %329 = arith.addf %325, %328 : vector<48x512xf32>
    %330 = vector.extract_strided_slice %329 {offsets = [0, 0], sizes = [32, 512], strides = [1, 1]} : vector<48x512xf32> to vector<32x512xf32>
    %331 = arith.truncf %330 : vector<32x512xf32> to vector<32x512xbf16>
    %332 = vector.extract_strided_slice %239 {offsets = [16, 0], sizes = [16, 512], strides = [1, 1]} : vector<48x512xbf16> to vector<16x512xbf16>
    %333 = tpu.concatenate %331, %332 in 0 : vector<32x512xbf16>, vector<16x512xbf16> -> vector<48x512xbf16>
    %c9_240 = arith.constant 9 : index
    %c0_241 = arith.constant 0 : index
    %c0_242 = arith.constant 0 : index
    %334 = vector.load %arg2[%c9_240, %c0_241, %c0_242] : memref<11x48x48xbf16, #tpu.memory_space<vmem>>, vector<1x48x48xbf16>
    %335 = vector.shape_cast %334 : vector<1x48x48xbf16> to vector<48x48xbf16>
    %cst_243 = arith.constant dense<0.000000e+00> : vector<48x512xf32>
    %336 = tpu.matmul %335, %333, %cst_243 {dimension_numbers = #tpu.dot_dimension_numbers<[1], [0], [0], [1], [0, 0, 1, 1], [], []>} : vector<48x48xbf16>, vector<48x512xbf16>, vector<48x512xf32> -> vector<48x512xf32>
    %c9_244 = arith.constant 9 : index
    %c0_245 = arith.constant 0 : index
    %c0_246 = arith.constant 0 : index
    %337 = vector.load %arg3[%c9_244, %c0_245, %c0_246] : memref<11x48x1xf32, #tpu.memory_space<vmem>>, vector<1x48x1xf32>
    %338 = vector.shape_cast %337 : vector<1x48x1xf32> to vector<48x1xf32>
    %339 = vector.broadcast %338 : vector<48x1xf32> to vector<48x512xf32>
    %340 = arith.addf %336, %339 : vector<48x512xf32>
    %cst_247 = arith.constant 0.000000e+00 : f32
    %341 = vector.broadcast %cst_247 : f32 to vector<48x512xf32>
    %342 = arith.maximumf %340, %341 : vector<48x512xf32>
    %343 = arith.truncf %342 : vector<48x512xf32> to vector<48x512xbf16>
    %c10_248 = arith.constant 10 : index
    %c0_249 = arith.constant 0 : index
    %c0_250 = arith.constant 0 : index
    %344 = vector.load %arg2[%c10_248, %c0_249, %c0_250] : memref<11x48x48xbf16, #tpu.memory_space<vmem>>, vector<1x48x48xbf16>
    %345 = vector.shape_cast %344 : vector<1x48x48xbf16> to vector<48x48xbf16>
    %cst_251 = arith.constant dense<0.000000e+00> : vector<48x512xf32>
    %346 = tpu.matmul %345, %343, %cst_251 {dimension_numbers = #tpu.dot_dimension_numbers<[1], [0], [0], [1], [0, 0, 1, 1], [], []>} : vector<48x48xbf16>, vector<48x512xbf16>, vector<48x512xf32> -> vector<48x512xf32>
    %c10_252 = arith.constant 10 : index
    %c0_253 = arith.constant 0 : index
    %c0_254 = arith.constant 0 : index
    %347 = vector.load %arg3[%c10_252, %c0_253, %c0_254] : memref<11x48x1xf32, #tpu.memory_space<vmem>>, vector<1x48x1xf32>
    %348 = vector.shape_cast %347 : vector<1x48x1xf32> to vector<48x1xf32>
    %349 = vector.broadcast %348 : vector<48x1xf32> to vector<48x512xf32>
    %350 = arith.addf %346, %349 : vector<48x512xf32>
    %351 = vector.extract_strided_slice %350 {offsets = [0, 0], sizes = [8, 512], strides = [1, 1]} : vector<48x512xf32> to vector<8x512xf32>
    %352 = vector.extract_strided_slice %329 {offsets = [32, 0], sizes = [8, 512], strides = [1, 1]} : vector<48x512xf32> to vector<8x512xf32>
    %353 = arith.addf %351, %352 : vector<8x512xf32>
    %c0_255 = arith.constant 0 : index
    %c1024_256 = arith.constant 1024 : index
    %354 = vector.load %arg4[%c0_255, %c1024_256] : memref<8x2048xf32, #tpu.memory_space<vmem>>, vector<8x512xf32>
    tpu.vector_store %arg4[%c0_255, %c1024_256], %353 {strides = array<i32>} : memref<8x2048xf32, #tpu.memory_space<vmem>>, vector<8x512xf32>,
    %c0_257 = arith.constant 0 : index
    %c1536 = arith.constant 1536 : index
    %355 = vector.load %arg1[%c0_257, %c1536] : memref<24x2048xf32, #tpu.memory_space<vmem>>, vector<24x512xf32>
    %356 = tpu.concatenate %355, %0 in 0 : vector<24x512xf32>, vector<24x512xf32> -> vector<48x512xf32>
    %357 = arith.truncf %356 : vector<48x512xf32> to vector<48x512xbf16>
    %c0_258 = arith.constant 0 : index
    %c0_259 = arith.constant 0 : index
    %c0_260 = arith.constant 0 : index
    %358 = vector.load %arg2[%c0_258, %c0_259, %c0_260] : memref<11x48x48xbf16, #tpu.memory_space<vmem>>, vector<1x48x48xbf16>
    %359 = vector.shape_cast %358 : vector<1x48x48xbf16> to vector<48x48xbf16>
    %cst_261 = arith.constant dense<0.000000e+00> : vector<48x512xf32>
    %360 = tpu.matmul %359, %357, %cst_261 {dimension_numbers = #tpu.dot_dimension_numbers<[1], [0], [0], [1], [0, 0, 1, 1], [], []>} : vector<48x48xbf16>, vector<48x512xbf16>, vector<48x512xf32> -> vector<48x512xf32>
    %c0_262 = arith.constant 0 : index
    %c0_263 = arith.constant 0 : index
    %c0_264 = arith.constant 0 : index
    %361 = vector.load %arg3[%c0_262, %c0_263, %c0_264] : memref<11x48x1xf32, #tpu.memory_space<vmem>>, vector<1x48x1xf32>
    %362 = vector.shape_cast %361 : vector<1x48x1xf32> to vector<48x1xf32>
    %363 = vector.broadcast %362 : vector<48x1xf32> to vector<48x512xf32>
    %364 = arith.addf %360, %363 : vector<48x512xf32>
    %cst_265 = arith.constant 0.000000e+00 : f32
    %365 = vector.broadcast %cst_265 : f32 to vector<48x512xf32>
    %366 = arith.maximumf %364, %365 : vector<48x512xf32>
    %367 = arith.truncf %366 : vector<48x512xf32> to vector<48x512xbf16>
    %c1_266 = arith.constant 1 : index
    %c0_267 = arith.constant 0 : index
    %c0_268 = arith.constant 0 : index
    %368 = vector.load %arg2[%c1_266, %c0_267, %c0_268] : memref<11x48x48xbf16, #tpu.memory_space<vmem>>, vector<1x48x48xbf16>
    %369 = vector.shape_cast %368 : vector<1x48x48xbf16> to vector<48x48xbf16>
    %cst_269 = arith.constant dense<0.000000e+00> : vector<48x512xf32>
    %370 = tpu.matmul %369, %367, %cst_269 {dimension_numbers = #tpu.dot_dimension_numbers<[1], [0], [0], [1], [0, 0, 1, 1], [], []>} : vector<48x48xbf16>, vector<48x512xbf16>, vector<48x512xf32> -> vector<48x512xf32>
    %c1_270 = arith.constant 1 : index
    %c0_271 = arith.constant 0 : index
    %c0_272 = arith.constant 0 : index
    %371 = vector.load %arg3[%c1_270, %c0_271, %c0_272] : memref<11x48x1xf32, #tpu.memory_space<vmem>>, vector<1x48x1xf32>
    %372 = vector.shape_cast %371 : vector<1x48x1xf32> to vector<48x1xf32>
    %373 = vector.broadcast %372 : vector<48x1xf32> to vector<48x512xf32>
    %374 = arith.addf %370, %373 : vector<48x512xf32>
    %cst_273 = arith.constant 0.000000e+00 : f32
    %375 = vector.broadcast %cst_273 : f32 to vector<48x512xf32>
    %376 = arith.maximumf %374, %375 : vector<48x512xf32>
    %377 = arith.truncf %376 : vector<48x512xf32> to vector<48x512xbf16>
    %c2_274 = arith.constant 2 : index
    %c0_275 = arith.constant 0 : index
    %c0_276 = arith.constant 0 : index
    %378 = vector.load %arg2[%c2_274, %c0_275, %c0_276] : memref<11x48x48xbf16, #tpu.memory_space<vmem>>, vector<1x48x48xbf16>
    %379 = vector.shape_cast %378 : vector<1x48x48xbf16> to vector<48x48xbf16>
    %cst_277 = arith.constant dense<0.000000e+00> : vector<48x512xf32>
    %380 = tpu.matmul %379, %377, %cst_277 {dimension_numbers = #tpu.dot_dimension_numbers<[1], [0], [0], [1], [0, 0, 1, 1], [], []>} : vector<48x48xbf16>, vector<48x512xbf16>, vector<48x512xf32> -> vector<48x512xf32>
    %c2_278 = arith.constant 2 : index
    %c0_279 = arith.constant 0 : index
    %c0_280 = arith.constant 0 : index
    %381 = vector.load %arg3[%c2_278, %c0_279, %c0_280] : memref<11x48x1xf32, #tpu.memory_space<vmem>>, vector<1x48x1xf32>
    %382 = vector.shape_cast %381 : vector<1x48x1xf32> to vector<48x1xf32>
    %383 = vector.broadcast %382 : vector<48x1xf32> to vector<48x512xf32>
    %384 = arith.addf %380, %383 : vector<48x512xf32>
    %cst_281 = arith.constant 0.000000e+00 : f32
    %385 = vector.broadcast %cst_281 : f32 to vector<48x512xf32>
    %386 = arith.maximumf %384, %385 : vector<48x512xf32>
    %387 = arith.truncf %386 : vector<48x512xf32> to vector<48x512xbf16>
    %c3_282 = arith.constant 3 : index
    %c0_283 = arith.constant 0 : index
    %c0_284 = arith.constant 0 : index
    %388 = vector.load %arg2[%c3_282, %c0_283, %c0_284] : memref<11x48x48xbf16, #tpu.memory_space<vmem>>, vector<1x48x48xbf16>
    %389 = vector.shape_cast %388 : vector<1x48x48xbf16> to vector<48x48xbf16>
    %cst_285 = arith.constant dense<0.000000e+00> : vector<48x512xf32>
    %390 = tpu.matmul %389, %387, %cst_285 {dimension_numbers = #tpu.dot_dimension_numbers<[1], [0], [0], [1], [0, 0, 1, 1], [], []>} : vector<48x48xbf16>, vector<48x512xbf16>, vector<48x512xf32> -> vector<48x512xf32>
    %c3_286 = arith.constant 3 : index
    %c0_287 = arith.constant 0 : index
    %c0_288 = arith.constant 0 : index
    %391 = vector.load %arg3[%c3_286, %c0_287, %c0_288] : memref<11x48x1xf32, #tpu.memory_space<vmem>>, vector<1x48x1xf32>
    %392 = vector.shape_cast %391 : vector<1x48x1xf32> to vector<48x1xf32>
    %393 = vector.broadcast %392 : vector<48x1xf32> to vector<48x512xf32>
    %394 = arith.addf %390, %393 : vector<48x512xf32>
    %cst_289 = arith.constant 0.000000e+00 : f32
    %395 = vector.broadcast %cst_289 : f32 to vector<48x512xf32>
    %396 = arith.maximumf %394, %395 : vector<48x512xf32>
    %397 = arith.truncf %396 : vector<48x512xf32> to vector<48x512xbf16>
    %c4_290 = arith.constant 4 : index
    %c0_291 = arith.constant 0 : index
    %c0_292 = arith.constant 0 : index
    %398 = vector.load %arg2[%c4_290, %c0_291, %c0_292] : memref<11x48x48xbf16, #tpu.memory_space<vmem>>, vector<1x48x48xbf16>
    %399 = vector.shape_cast %398 : vector<1x48x48xbf16> to vector<48x48xbf16>
    %cst_293 = arith.constant dense<0.000000e+00> : vector<48x512xf32>
    %400 = tpu.matmul %399, %397, %cst_293 {dimension_numbers = #tpu.dot_dimension_numbers<[1], [0], [0], [1], [0, 0, 1, 1], [], []>} : vector<48x48xbf16>, vector<48x512xbf16>, vector<48x512xf32> -> vector<48x512xf32>
    %c4_294 = arith.constant 4 : index
    %c0_295 = arith.constant 0 : index
    %c0_296 = arith.constant 0 : index
    %401 = vector.load %arg3[%c4_294, %c0_295, %c0_296] : memref<11x48x1xf32, #tpu.memory_space<vmem>>, vector<1x48x1xf32>
    %402 = vector.shape_cast %401 : vector<1x48x1xf32> to vector<48x1xf32>
    %403 = vector.broadcast %402 : vector<48x1xf32> to vector<48x512xf32>
    %404 = arith.addf %400, %403 : vector<48x512xf32>
    %cst_297 = arith.constant 0.000000e+00 : f32
    %405 = vector.broadcast %cst_297 : f32 to vector<48x512xf32>
    %406 = arith.maximumf %404, %405 : vector<48x512xf32>
    %407 = arith.truncf %406 : vector<48x512xf32> to vector<48x512xbf16>
    %408 = vector.extract_strided_slice %357 {offsets = [0, 0], sizes = [16, 512], strides = [1, 1]} : vector<48x512xbf16> to vector<16x512xbf16>
    %409 = vector.extract_strided_slice %407 {offsets = [0, 0], sizes = [32, 512], strides = [1, 1]} : vector<48x512xbf16> to vector<32x512xbf16>
    %410 = tpu.concatenate %408, %409 in 0 : vector<16x512xbf16>, vector<32x512xbf16> -> vector<48x512xbf16>
    %c5_298 = arith.constant 5 : index
    %c0_299 = arith.constant 0 : index
    %c0_300 = arith.constant 0 : index
    %411 = vector.load %arg2[%c5_298, %c0_299, %c0_300] : memref<11x48x48xbf16, #tpu.memory_space<vmem>>, vector<1x48x48xbf16>
    %412 = vector.shape_cast %411 : vector<1x48x48xbf16> to vector<48x48xbf16>
    %cst_301 = arith.constant dense<0.000000e+00> : vector<48x512xf32>
    %413 = tpu.matmul %412, %410, %cst_301 {dimension_numbers = #tpu.dot_dimension_numbers<[1], [0], [0], [1], [0, 0, 1, 1], [], []>} : vector<48x48xbf16>, vector<48x512xbf16>, vector<48x512xf32> -> vector<48x512xf32>
    %c5_302 = arith.constant 5 : index
    %c0_303 = arith.constant 0 : index
    %c0_304 = arith.constant 0 : index
    %414 = vector.load %arg3[%c5_302, %c0_303, %c0_304] : memref<11x48x1xf32, #tpu.memory_space<vmem>>, vector<1x48x1xf32>
    %415 = vector.shape_cast %414 : vector<1x48x1xf32> to vector<48x1xf32>
    %416 = vector.broadcast %415 : vector<48x1xf32> to vector<48x512xf32>
    %417 = arith.addf %413, %416 : vector<48x512xf32>
    %cst_305 = arith.constant 0.000000e+00 : f32
    %418 = vector.broadcast %cst_305 : f32 to vector<48x512xf32>
    %419 = arith.maximumf %417, %418 : vector<48x512xf32>
    %420 = arith.truncf %419 : vector<48x512xf32> to vector<48x512xbf16>
    %c6_306 = arith.constant 6 : index
    %c0_307 = arith.constant 0 : index
    %c0_308 = arith.constant 0 : index
    %421 = vector.load %arg2[%c6_306, %c0_307, %c0_308] : memref<11x48x48xbf16, #tpu.memory_space<vmem>>, vector<1x48x48xbf16>
    %422 = vector.shape_cast %421 : vector<1x48x48xbf16> to vector<48x48xbf16>
    %cst_309 = arith.constant dense<0.000000e+00> : vector<48x512xf32>
    %423 = tpu.matmul %422, %420, %cst_309 {dimension_numbers = #tpu.dot_dimension_numbers<[1], [0], [0], [1], [0, 0, 1, 1], [], []>} : vector<48x48xbf16>, vector<48x512xbf16>, vector<48x512xf32> -> vector<48x512xf32>
    %c6_310 = arith.constant 6 : index
    %c0_311 = arith.constant 0 : index
    %c0_312 = arith.constant 0 : index
    %424 = vector.load %arg3[%c6_310, %c0_311, %c0_312] : memref<11x48x1xf32, #tpu.memory_space<vmem>>, vector<1x48x1xf32>
    %425 = vector.shape_cast %424 : vector<1x48x1xf32> to vector<48x1xf32>
    %426 = vector.broadcast %425 : vector<48x1xf32> to vector<48x512xf32>
    %427 = arith.addf %423, %426 : vector<48x512xf32>
    %cst_313 = arith.constant 0.000000e+00 : f32
    %428 = vector.broadcast %cst_313 : f32 to vector<48x512xf32>
    %429 = arith.maximumf %427, %428 : vector<48x512xf32>
    %430 = arith.truncf %429 : vector<48x512xf32> to vector<48x512xbf16>
    %c7_314 = arith.constant 7 : index
    %c0_315 = arith.constant 0 : index
    %c0_316 = arith.constant 0 : index
    %431 = vector.load %arg2[%c7_314, %c0_315, %c0_316] : memref<11x48x48xbf16, #tpu.memory_space<vmem>>, vector<1x48x48xbf16>
    %432 = vector.shape_cast %431 : vector<1x48x48xbf16> to vector<48x48xbf16>
    %cst_317 = arith.constant dense<0.000000e+00> : vector<48x512xf32>
    %433 = tpu.matmul %432, %430, %cst_317 {dimension_numbers = #tpu.dot_dimension_numbers<[1], [0], [0], [1], [0, 0, 1, 1], [], []>} : vector<48x48xbf16>, vector<48x512xbf16>, vector<48x512xf32> -> vector<48x512xf32>
    %c7_318 = arith.constant 7 : index
    %c0_319 = arith.constant 0 : index
    %c0_320 = arith.constant 0 : index
    %434 = vector.load %arg3[%c7_318, %c0_319, %c0_320] : memref<11x48x1xf32, #tpu.memory_space<vmem>>, vector<1x48x1xf32>
    %435 = vector.shape_cast %434 : vector<1x48x1xf32> to vector<48x1xf32>
    %436 = vector.broadcast %435 : vector<48x1xf32> to vector<48x512xf32>
    %437 = arith.addf %433, %436 : vector<48x512xf32>
    %cst_321 = arith.constant 0.000000e+00 : f32
    %438 = vector.broadcast %cst_321 : f32 to vector<48x512xf32>
    %439 = arith.maximumf %437, %438 : vector<48x512xf32>
    %440 = arith.truncf %439 : vector<48x512xf32> to vector<48x512xbf16>
    %c8_322 = arith.constant 8 : index
    %c0_323 = arith.constant 0 : index
    %c0_324 = arith.constant 0 : index
    %441 = vector.load %arg2[%c8_322, %c0_323, %c0_324] : memref<11x48x48xbf16, #tpu.memory_space<vmem>>, vector<1x48x48xbf16>
    %442 = vector.shape_cast %441 : vector<1x48x48xbf16> to vector<48x48xbf16>
    %cst_325 = arith.constant dense<0.000000e+00> : vector<48x512xf32>
    %443 = tpu.matmul %442, %440, %cst_325 {dimension_numbers = #tpu.dot_dimension_numbers<[1], [0], [0], [1], [0, 0, 1, 1], [], []>} : vector<48x48xbf16>, vector<48x512xbf16>, vector<48x512xf32> -> vector<48x512xf32>
    %c8_326 = arith.constant 8 : index
    %c0_327 = arith.constant 0 : index
    %c0_328 = arith.constant 0 : index
    %444 = vector.load %arg3[%c8_326, %c0_327, %c0_328] : memref<11x48x1xf32, #tpu.memory_space<vmem>>, vector<1x48x1xf32>
    %445 = vector.shape_cast %444 : vector<1x48x1xf32> to vector<48x1xf32>
    %446 = vector.broadcast %445 : vector<48x1xf32> to vector<48x512xf32>
    %447 = arith.addf %443, %446 : vector<48x512xf32>
    %448 = vector.extract_strided_slice %447 {offsets = [0, 0], sizes = [32, 512], strides = [1, 1]} : vector<48x512xf32> to vector<32x512xf32>
    %449 = arith.truncf %448 : vector<32x512xf32> to vector<32x512xbf16>
    %450 = vector.extract_strided_slice %357 {offsets = [16, 0], sizes = [16, 512], strides = [1, 1]} : vector<48x512xbf16> to vector<16x512xbf16>
    %451 = tpu.concatenate %449, %450 in 0 : vector<32x512xbf16>, vector<16x512xbf16> -> vector<48x512xbf16>
    %c9_329 = arith.constant 9 : index
    %c0_330 = arith.constant 0 : index
    %c0_331 = arith.constant 0 : index
    %452 = vector.load %arg2[%c9_329, %c0_330, %c0_331] : memref<11x48x48xbf16, #tpu.memory_space<vmem>>, vector<1x48x48xbf16>
    %453 = vector.shape_cast %452 : vector<1x48x48xbf16> to vector<48x48xbf16>
    %cst_332 = arith.constant dense<0.000000e+00> : vector<48x512xf32>
    %454 = tpu.matmul %453, %451, %cst_332 {dimension_numbers = #tpu.dot_dimension_numbers<[1], [0], [0], [1], [0, 0, 1, 1], [], []>} : vector<48x48xbf16>, vector<48x512xbf16>, vector<48x512xf32> -> vector<48x512xf32>
    %c9_333 = arith.constant 9 : index
    %c0_334 = arith.constant 0 : index
    %c0_335 = arith.constant 0 : index
    %455 = vector.load %arg3[%c9_333, %c0_334, %c0_335] : memref<11x48x1xf32, #tpu.memory_space<vmem>>, vector<1x48x1xf32>
    %456 = vector.shape_cast %455 : vector<1x48x1xf32> to vector<48x1xf32>
    %457 = vector.broadcast %456 : vector<48x1xf32> to vector<48x512xf32>
    %458 = arith.addf %454, %457 : vector<48x512xf32>
    %cst_336 = arith.constant 0.000000e+00 : f32
    %459 = vector.broadcast %cst_336 : f32 to vector<48x512xf32>
    %460 = arith.maximumf %458, %459 : vector<48x512xf32>
    %461 = arith.truncf %460 : vector<48x512xf32> to vector<48x512xbf16>
    %c10_337 = arith.constant 10 : index
    %c0_338 = arith.constant 0 : index
    %c0_339 = arith.constant 0 : index
    %462 = vector.load %arg2[%c10_337, %c0_338, %c0_339] : memref<11x48x48xbf16, #tpu.memory_space<vmem>>, vector<1x48x48xbf16>
    %463 = vector.shape_cast %462 : vector<1x48x48xbf16> to vector<48x48xbf16>
    %cst_340 = arith.constant dense<0.000000e+00> : vector<48x512xf32>
    %464 = tpu.matmul %463, %461, %cst_340 {dimension_numbers = #tpu.dot_dimension_numbers<[1], [0], [0], [1], [0, 0, 1, 1], [], []>} : vector<48x48xbf16>, vector<48x512xbf16>, vector<48x512xf32> -> vector<48x512xf32>
    %c10_341 = arith.constant 10 : index
    %c0_342 = arith.constant 0 : index
    %c0_343 = arith.constant 0 : index
    %465 = vector.load %arg3[%c10_341, %c0_342, %c0_343] : memref<11x48x1xf32, #tpu.memory_space<vmem>>, vector<1x48x1xf32>
    %466 = vector.shape_cast %465 : vector<1x48x1xf32> to vector<48x1xf32>
    %467 = vector.broadcast %466 : vector<48x1xf32> to vector<48x512xf32>
    %468 = arith.addf %464, %467 : vector<48x512xf32>
    %469 = vector.extract_strided_slice %468 {offsets = [0, 0], sizes = [8, 512], strides = [1, 1]} : vector<48x512xf32> to vector<8x512xf32>
    %470 = vector.extract_strided_slice %447 {offsets = [32, 0], sizes = [8, 512], strides = [1, 1]} : vector<48x512xf32> to vector<8x512xf32>
    %471 = arith.addf %469, %470 : vector<8x512xf32>
    %c0_344 = arith.constant 0 : index
    %c1536_345 = arith.constant 1536 : index
    %472 = vector.load %arg4[%c0_344, %c1536_345] : memref<8x2048xf32, #tpu.memory_space<vmem>>, vector<8x512xf32>
    tpu.vector_store %arg4[%c0_344, %c1536_345], %471 {strides = array<i32>} : memref<8x2048xf32, #tpu.memory_space<vmem>>, vector<8x512xf32>,
    return
  }
  func.func @transform_0(%arg0: i32) -> (i32, i32) {
    %c0_i32 = arith.constant 0 : i32
    %c0_i32_0 = arith.constant 0 : i32
    return %c0_i32, %arg0 : i32, i32
  }
  func.func @transform_1(%arg0: i32) -> (i32, i32, i32) {
    %c0_i32 = arith.constant 0 : i32
    %c0_i32_0 = arith.constant 0 : i32
    %c0_i32_1 = arith.constant 0 : i32
    %c0_i32_2 = arith.constant 0 : i32
    return %c0_i32, %c0_i32_0, %c0_i32_1 : i32, i32, i32
  }
  func.func @transform_2(%arg0: i32) -> (i32, i32, i32) {
    %c0_i32 = arith.constant 0 : i32
    %c0_i32_0 = arith.constant 0 : i32
    %c0_i32_1 = arith.constant 0 : i32
    %c0_i32_2 = arith.constant 0 : i32
    return %c0_i32, %c0_i32_0, %c0_i32_1 : i32, i32, i32
  }
  func.func @transform_3(%arg0: i32) -> (i32, i32) {
    %c0_i32 = arith.constant 0 : i32
    %c0_i32_0 = arith.constant 0 : i32
    return %c0_i32, %arg0 : i32, i32
  }
}

</mosaic_0001>

<bundles_post_ra>
// kernel: tpu_custom_call.1
= control target key start
LH: loop header
LB: loop body
LE: loop exit
PB: predicated region body
PF: predicated region fallthrough
CT: control target
= control target key end

     0   :  { %8 = vsyncpa [#allocation3], 0  ;;  %s14591_s0 = inlined_call_operand.hbm [shape: f32[24,4096], index: 0, kind: input, shape index: {}]   ;;  %s14592_s1 = inlined_call_operand.vmem [shape: bf16[11,48,48], index: 1, kind: input, shape index: {}]   ;;  %s14593_s2 = inlined_call_operand.vmem [shape: f32[11,48,1], index: 2, kind: input, shape index: {}]   ;;  %s14594_s3 = inlined_call_operand.hbm [shape: f32[8,4096], index: 3, kind: output, shape index: {}]  }
   0x1   :  { %10 = vsyncpa [#allocation3 + $0x1], 0 }
   0x2   :  { %11 = vsyncpa [#allocation4], 0 }
   0x3   :  { %13 = vsyncpa [#allocation4 + $0x1], 0  ;;  %s11273_s12 = smov 0   ;;  %s11275_s13 = smov 0  }
   0x4   :  { %s11277_s14 = smov 0   ;;  %s11279_s15 = smov 0  }
   0x5 LB: > { %s11294_s16 = sadd.s32 4294967295, %s11244_s15   ;;  %s9979_s17 = sadd.s32 4294967294, %s11244_s15   ;;  %s11244_s15 = sphi %s11279_s15, %s15165_s15   ;;  %s11240_s14 = sphi %s11277_s14, %s15164_s14   ;;  %s11236_s13 = sphi %s11275_s13, %s15163_s13   ;;  %s11232_s12 = sphi %s11273_s12, %s15162_s12  }
   0x6   : > { %s11298_s18 = sadd.s32 1, %s11244_s15   ;;  %s26_s19 = sadd.s32 1, %s11240_s14 }
   0x7   : > { %s23_s20 = ssub.s32 %s11244_s15, %s11298_s18  ;;  %p33_p0 = scmp.ne.s32.totalorder %s11240_s14, %s11236_s13 }
   0x8   : > { %p24_p1 = scmp.eq.s32.totalorder %s23_s20, 0  ;;  %p34_p2 = scmp.eq.s32.totalorder %s11244_s15, 0 }
   0x9   : > { %p39_p3 = scmp.ne.s32.totalorder %s11236_s13, %s11232_s12  ;;  %p40_p4 = scmp.eq.s32.totalorder %s11294_s16, 0 }
   0xa   : > { %s11310_s21 = scalar_select %p24_p1, %s11240_s14, %s26_s19  }
   0xb   : > { %p35_p5 = por %p34_p2, %p33_p0  ;;  %p11312_p6 = por %p40_p4, %p39_p3 }
   0xc   : > { %p105_p7 = scmp.eq.s32.totalorder %s11294_s16, 1  ;;  %p111_p8 = scmp.eq.s32.totalorder %s9979_s17, 1 }
   0xd   : > { %p10947_p10 = scmp.lt.s32.totalorder %s11244_s15, 2  ;;  %s137_s25 = sand.u32 1, %s11240_s14  }
   0xe   : > { %p11319_p11 = por %p105_p7, %p33_p0  ;;  %p11323_p12 = por %p111_p8, %p39_p3 }
   0xf   : > { %s10867_s26 = sshll.u32 %s11244_s15, 11  ;;  %s10933_s27 = smul.u32 384, %s137_s25 }
  0x10   : > { %s14785_s23 = scalar_select %p11319_p11, 1, 0 }
  0x11   : > { %s14786_s24 = scalar_select %p11323_p12, 1, 0 }
  0x12   : > { %s11332_s30 = scalar_lea.hbm %s14591_s0, %s10867_s26  ;;  %p11334_p13 = pnand %p10947_p10, %p35_p5 }
  0x13   : > { %s141_s5 = scalar_lea.vmem [#allocation2], %s10933_s27  ;;  %s11341_s7 = scalar_lea.sflag [#allocation3], %s137_s25 }
  0x14   : > { %s148_s6 = sshll.u32 %s141_s5, 4  ;;  %s11148_s8 = scalar_lea.hbm %s11332_s30, 6144  ;;  %s11338_s6 = int_to_ptr.vmem [resolvable:$true] %s148_s6 }
  0x15   : > { %p11149_p1 = scmp.ne.s32.totalorder %s11332_s30, %s11148_s8  ;;  %p11150_p2 = pneg %p11334_p13 }
  0x16   : > { %s11153_s11 = scalar_lea.hbm %s14591_s0, 12288  ;;  %p11154_p5 = scmp.lt.u32.totalorder %s11332_s30, %s14591_s0 }
  0x17   : > { %p11151_p3 = pnand %p11150_p2, %p11149_p1  ;;  %p11155_p7 = scmp.lt.u32.totalorder %s11153_s11, %s11148_s8 }
  0x18   : > { %p11157_p10 = scmp.lt.u32.totalorder %s11148_s8, %s11332_s30 }
  0x19   : > { %p11152_p4 = pneg %p11151_p3  ;;  %p11156_p8 = por %p11155_p7, %p11154_p5 }
  0x1b   : > { %p11158_p9 = por %p11157_p10, %p11156_p8 }
  0x1d   : > { %p11159_p0 = pnand %p11158_p9, %p11152_p4 }
  0x1f   : > { %11162 = shalt.err (!%p11159_p0)
}
  0x20   : > { %s11163_s20 = scalar_lea.vmem %s11338_s6, 6144  ;;  %s11246_s25 = smov [#allocation2]  }
  0x21   : > { %p11164_p1 = scmp.ne.s32.totalorder %s11338_s6, %s11163_s20  ;;  %s11168_s26 = sshll.u32 %s11246_s25, 4  ;;  %s11169_s26 = int_to_ptr.vmem [resolvable:$false] %s11168_s26 }
  0x22   : > { %s11170_s27 = scalar_lea.vmem %s11169_s26, 12288  ;;  %p11171_p11 = scmp.lt.s32.totalorder %s11338_s6, %s11169_s26 }
  0x23   : > { %p11166_p3 = pnand %p11164_p1, %p11150_p2  ;;  %p11172_p5 = scmp.lt.s32.totalorder %s11170_s27, %s11163_s20 }
  0x25   : > { %p11167_p12 = pneg %p11166_p3  ;;  %p11173_p7 = por %p11172_p5, %p11171_p11 }
  0x27   : > { %p11174_p8 = pnand %p11173_p7, %p11167_p12 }
  0x29   : > { %11177 = shalt.err (!%p11174_p8)
}
  0x2a   : > { %s11247_s28 = smov 4096   ;;  %s11248_s29 = smov 2048  }
  0x2b   : > { %s11249_s5 = smov 128   ;;  %p156_p9 = scmp.lt.s32.totalorder %s11244_s15, 3 }
  0x2c   : > { %10942 = dma.hbm_to_vmem [thread:$0]  (!%p11334_p13), %s11332_s30, 6144, %s11338_s6, %s11341_s7, %s11247_s28, %s11248_s29, %s11249_s5  }
  0x2d   : > { %p14788_p0 = scmp.ge.s32.totalorder %s11244_s15, 1 }
  0x2f   : > { %p157_p2 = pnand %p14788_p0, %p156_p9 }
  0x31   : > { %160 = sbr.rel (%p157_p2) target bundleno = 9969 (0x26f1), region = 32 }
  0x38   : > { %s11373_s8 = sand.u32 1, %s11236_s13  }
  0x39   : > { %s10934_s9 = smul.u32 384, %s11373_s8  ;;  %s163_s10 = scalar_lea.sflag [#allocation3], %s11373_s8 }
  0x3b   : > { %s11377_s11 = scalar_lea.vmem [#allocation2], %s10934_s9 }
  0x3c   : > { %11223 = dma.done.wait (%p11312_p6), %s163_s10, 6144  }
  0x3d   : > { %11225 = vsyncadd (%p11312_p6), %s163_s10, 4294961152  ;;  %v14598_v0 = vmov 0   ;;  %v11390_v1 = vld [vmem:[%s14593_s2 + $0x10] sm:$0xff]  ;;  %v11395_v2 = vld [vmem:[%s14593_s2] sm:$0xff]  ;;  %v14596_v20 = vmov 0.0   ;;  %vm270_vm0 = vcmask 392192  }
  0x3e   : > { %10987 = vset.pattern.permute.xlu1 %v14598_v0  ;;  %10986 = vset.pattern.permute.xlu0 %v14598_v0  ;;  %v193_v3 = vld [vmem:[%s11377_s11 + $0x8] sm:$0xff]  ;;  %v195_v5 = vld [vmem:[%s11377_s11 + $0x18] sm:$0xff]  ;;  %v192_v9 = vld [vmem:[%s11377_s11] sm:$0xff]  ;;  %s9985_s7 = sshll.u32 %s11373_s8, 7  ;;  %s10868_s5 = sshll.u32 %s11294_s16, 11 }
  0x3f   : > { %312 = vmatprep.mubr.bf16.mxu0 %v14598_v0  ;;  %375 = vmatprep.mubr.bf16.mxu1 %v14598_v0  ;;  %v197_v4 = vld [vmem:[%s11377_s11 + $0x88] sm:$0xff]  ;;  %v199_v6 = vld [vmem:[%s11377_s11 + $0x98] sm:$0xff]  ;;  %v196_v10 = vld [vmem:[%s11377_s11 + $0x80] sm:$0xff]  ;;  %s13078_s17 = scalar_lea.vmem [#allocation5], %s9985_s7  ;;  %s14544_s16 = scalar_lea.hbm %s14594_s3, %s10868_s5 }
  0x40   : > { %237 = vperm.xlu1 %10987, %v11390_v1   ;;  %227 = vperm.xlu0 %10986, %v11395_v2   ;;  %v11403_v7 = vpack.c.bf16 %v197_v4, %v193_v3  ;;  %v11405_v8 = vpack.c.bf16 %v199_v6, %v195_v5  ;;  %v194_v11 = vld [vmem:[%s11377_s11 + $0x10] sm:$0xff]  ;;  %v11410_v12 = vpack.c.bf16 %v196_v10, %v192_v9  ;;  %v11416_v14 = vld [vmem:[%s14593_s2 + $0x18] sm:$0xff]  ;;  %v11421_v15 = vld [vmem:[%s14593_s2 + $0x8] sm:$0xff]  ;;  %s9909_s9 = sshll.u32 %s13078_s17, 4  ;;  %s9895_s22 = scalar_lea.sflag [#allocation4], %s11373_s8  ;;  %s14546_s9 = int_to_ptr.vmem [resolvable:$true] %s9909_s9 }
  0x41   : > { %v198_v13 = vld [vmem:[%s11377_s11 + $0x90] sm:$0xff]  ;;  %v201_v17 = vld [vmem:[%s11377_s11 + $0x108] sm:$0xff]  ;;  %v203_v18 = vld [vmem:[%s11377_s11 + $0x118] sm:$0xff]  ;;  %s11178_s4 = scalar_lea.vmem %s14546_s9, 2048  ;;  %p15159_p11 = scmp.ne.s32.totalorder %s14785_s23, 0 }
  0x42   : > { %14789 = vst [vmem:[#allocation8_spill] sm:$0xff] %v11403_v7  ;;  %14790 = vst [vmem:[#allocation9_spill] sm:$0xff] %v11405_v8  ;;  %280 = vmatprep.subr.bf16.mxu0 %v11403_v7  ;;  %343 = vmatprep.subr.bf16.mxu1 %v11405_v8  ;;  %v11425_v16 = vpack.c.bf16 %v198_v13, %v194_v11  ;;  %v200_v19 = vld [vmem:[%s11377_s11 + $0x100] sm:$0xff]  ;;  %v11433_v21 = vpack.c.bf16 %v14596_v20, %v201_v17  ;;  %v202_v24 = vld [vmem:[%s11377_s11 + $0x110] sm:$0xff]  ;;  %p11179_p6 = scmp.ne.s32.totalorder %s14546_s9, %s11178_s4  ;;  %s11252_s6 = smov [#allocation5]  }
  0x43   : > { %14791 = vst [vmem:[#allocation10_spill] sm:$0xff] %v11410_v12  ;;  %281 = vmatpush1.bf16.msra.mxu0 %v11410_v12  ;;  %v11436_v22 = vpack.c.bf16 %v14596_v20, %v203_v18  ;;  %v11439_v23 = vpack.c.bf16 %v14596_v20, %v200_v19  ;;  %v11445_v25 = vpack.c.bf16 %v14596_v20, %v202_v24  ;;  %v11450_v26 = vld [vmem:[%s14593_s2 + $0x28] sm:$0xff]  ;;  %v11457_v27 = vld [vmem:[%s14593_s2 + $0x20] sm:$0xff]  ;;  %v11469_v29 = vld [vmem:[%s14593_s2 + $0x38] sm:$0xff]  ;;  %s11182_s7 = sshll.u32 %s11252_s6, 4  ;;  %s11183_s7 = int_to_ptr.vmem [resolvable:$false] %s11182_s7 }
  0x44   : > { %14792 = vst [vmem:[#allocation11_spill] sm:$0xff] %v11425_v16  ;;  %242 = vperm.xlu1 %10987, %v11416_v14   ;;  %14793 = vst [vmem:[#allocation12_spill] sm:$0xff] %v11433_v21  ;;  %344 = vmatpush1.bf16.msra.mxu1 %v11425_v16  ;;  %v10988_v28 = vld [vmem:[%s14592_s1] sm:$0xff]   ;;  %v11474_v30 = vld [vmem:[%s14593_s2 + $0x30] sm:$0xff]  ;;  %p11180_p12 = pnand %p11179_p6, %p15159_p11  ;;  %s11184_s19 = scalar_lea.vmem %s11183_s7, 4096 }
  0x45   : > { %14794 = vst [vmem:[#allocation13_spill] sm:$0xff] %v11436_v22  ;;  %14795 = vst [vmem:[#allocation14_spill] sm:$0xff] %v11439_v23  ;;  %232 = vperm.xlu0 %10986, %v11421_v15   ;;  %282 = vmatprep.subr.bf16.mxu0 %v11433_v21  ;;  %v11483_v31 = vld [vmem:[%s14593_s2 + $0x48] sm:$0xff]  ;;  %v11489_v32 = vld [vmem:[%s14593_s2 + $0x40] sm:$0xff]  ;;  %p11185_p4 = scmp.lt.s32.totalorder %s14546_s9, %s11183_s7  ;;  %p11186_p10 = scmp.lt.s32.totalorder %s11184_s19, %s11178_s4 }
  0x46   : > { %14796 = vst [vmem:[#allocation15_spill] sm:$0xff] %v11445_v25  ;;  %345 = vmatprep.subr.bf16.mxu1 %v11436_v22  ;;  %v10989_v33 = vld [vmem:[%s14592_s1 + $0x8] sm:$0xff]   ;;  %v11500_v34 = vld [vmem:[%s14593_s2 + $0x58] sm:$0xff]  ;;  %v11505_v35 = vld [vmem:[%s14593_s2 + $0x50] sm:$0xff]  ;;  %p11181_p13 = pneg %p11180_p12 }
  0x47   : > { %283 = vmatpush1.bf16.msra.mxu0 %v11439_v23  ;;  %v11514_v36 = vld [vmem:[%s14593_s2 + $0x68] sm:$0xff]  ;;  %v11520_v37 = vld [vmem:[%s14593_s2 + $0x60] sm:$0xff]  ;;  %v10990_v38 = vld [vmem:[%s14592_s1 + $0x10] sm:$0xff]   ;;  %p11187_p1 = por %p11186_p10, %p11185_p4 }
  0x48   : > { %252 = vperm.xlu1 %10987, %v11450_v26   ;;  %346 = vmatpush1.bf16.msra.mxu1 %v11445_v25  ;;  %v11530_v39 = vld [vmem:[%s14593_s2 + $0x78] sm:$0xff]  ;;  %v11535_v40 = vld [vmem:[%s14593_s2 + $0x70] sm:$0xff]  ;;  %v11542_v41 = vld [vmem:[%s14593_s2 + $0x88] sm:$0xff] }
  0x49   : > { %247 = vperm.xlu0 %10986, %v11457_v27   ;;  %v11549_v42 = vld [vmem:[%s14593_s2 + $0x80] sm:$0xff]  ;;  %v11557_v43 = vld [vmem:[%s14593_s2 + $0x98] sm:$0xff]  ;;  %v11563_v44 = vld [vmem:[%s14593_s2 + $0x90] sm:$0xff]  ;;  %p11188_p3 = pnand %p11187_p1, %p11181_p13 }
  0x4a   : > { %9989 = vmatmul.mubr.msk.bf16.vlgmr.msra.gmra.mrb[0].mxu0 %vm270_vm0, %v10988_v28  ;;  %v11569_v45 = vld [vmem:[%s14593_s2 + $0xa8] sm:$0xff]  ;;  %v11575_v46 = vld [vmem:[%s14593_s2 + $0xa0] sm:$0xff]  ;;  %v11581_v47 = vld [vmem:[%s14593_s2 + $0xb8] sm:$0xff] }
  0x4b   : > { %9992 = vmatmul.mubr.msk.bf16.vlgmr.msra.gmra.mrb[0].mxu1 %vm270_vm0, %v10988_v28  ;;  %322 = vmatprep.mubr.bf16.mxu0 %v14598_v0  ;;  %v11587_v48 = vld [vmem:[%s14593_s2 + $0xb0] sm:$0xff]  ;;  %v11593_v49 = vld [vmem:[%s14593_s2 + $0xc8] sm:$0xff]  ;;  %v11599_v50 = vld [vmem:[%s14593_s2 + $0xc0] sm:$0xff] }
  0x4c   : > { %463 = vperm.xlu1 %10987, %v11469_v29   ;;  %385 = vmatprep.mubr.bf16.mxu1 %v14598_v0  ;;  %v11605_v51 = vld [vmem:[%s14593_s2 + $0xd8] sm:$0xff]  ;;  %v11611_v52 = vld [vmem:[%s14593_s2 + $0xd0] sm:$0xff]  ;;  %v11629_v55 = vld [vmem:[%s14593_s2 + $0x108] sm:$0xff] }
  0x4d   : > { %458 = vperm.xlu0 %10986, %v11474_v30   ;;  %v11617_v53 = vld [vmem:[%s14593_s2 + $0xf8] sm:$0xff]  ;;  %v11623_v54 = vld [vmem:[%s14593_s2 + $0xf0] sm:$0xff]  ;;  %v11635_v56 = vld [vmem:[%s14593_s2 + $0x100] sm:$0xff] }
  0x4e   : > { %v11641_v57 = vld [vmem:[%s14593_s2 + $0x118] sm:$0xff]  ;;  %v11647_v58 = vld [vmem:[%s14593_s2 + $0x110] sm:$0xff]  ;;  %v11653_v59 = vld [vmem:[%s14593_s2 + $0x128] sm:$0xff] }
  0x4f   : > { %v11659_v60 = vld [vmem:[%s14593_s2 + $0x120] sm:$0xff]  ;;  %v11665_v61 = vld [vmem:[%s14593_s2 + $0x138] sm:$0xff]  ;;  %v11671_v62 = vld [vmem:[%s14593_s2 + $0x130] sm:$0xff] }
  0x50   : > { %473 = vperm.xlu1 %10987, %v11483_v31   ;;  %v11677_v63 = vld [vmem:[%s14593_s2 + $0x148] sm:$0xff]  ;;  %v11683_v3 = vld [vmem:[%s14593_s2 + $0x140] sm:$0xff]  ;;  %v11689_v4 = vld [vmem:[%s14593_s2 + $0x158] sm:$0xff] }
  0x51   : > { %468 = vperm.xlu0 %10986, %v11489_v32   ;;  %v11695_v5 = vld [vmem:[%s14593_s2 + $0x150] sm:$0xff]  ;;  %v11701_v6 = vld [vmem:[%s14593_s2 + $0x168] sm:$0xff]  ;;  %v11707_v9 = vld [vmem:[%s14593_s2 + $0x160] sm:$0xff] }
  0x52   : > { %9990 = vmatmul.mubr.msk.bf16.gmra.mrb[4].mxu0 %vm270_vm0, %v10989_v33  ;;  %v11713_v10 = vld [vmem:[%s14593_s2 + $0x178] sm:$0xff]  ;;  %v11719_v11 = vld [vmem:[%s14593_s2 + $0x170] sm:$0xff]  ;;  %v11725_v13 = vld [vmem:[%s14593_s2 + $0x188] sm:$0xff] }
  0x53   : > { %9993 = vmatmul.mubr.msk.bf16.gmra.mrb[4].mxu1 %vm270_vm0, %v10989_v33  ;;  %332 = vmatprep.mubr.bf16.mxu0 %v14598_v0  ;;  %v11731_v17 = vld [vmem:[%s14593_s2 + $0x180] sm:$0xff]  ;;  %v11737_v18 = vld [vmem:[%s14593_s2 + $0x198] sm:$0xff]  ;;  %v11743_v19 = vld [vmem:[%s14593_s2 + $0x190] sm:$0xff] }
  0x54   : > { %483 = vperm.xlu1 %10987, %v11500_v34   ;;  %395 = vmatprep.mubr.bf16.mxu1 %v14598_v0  ;;  %v11749_v24 = vld [vmem:[%s14593_s2 + $0x1b8] sm:$0xff]  ;;  %v11755_v28 = vld [vmem:[%s14593_s2 + $0x1b0] sm:$0xff]  ;;  %v11761_v33 = vld [vmem:[%s14593_s2 + $0x1c8] sm:$0xff] }
  0x55   : > { %478 = vperm.xlu0 %10986, %v11505_v35   ;;  %v11773_v20 = vld [vmem:[%s14593_s2 + $0x1d8] sm:$0xff]  ;;  %v11121_v7 = vld [vmem:[%s14593_s2] sm:$0xff] }
  0x58   : > { %693 = vperm.xlu1 %10987, %v11514_v36  }
  0x59   : > { %688 = vperm.xlu0 %10986, %v11520_v37  }
  0x5a   : > { %9991 = vmatmul.mubr.msk.bf16.gmra.mrb[8].mxu0 %vm270_vm0, %v10990_v38 }
  0x5b   : > { %9994 = vmatmul.mubr.msk.bf16.gmra.mrb[8].mxu1 %vm270_vm0, %v10990_v38  ;;  %542 = vmatprep.mubr.bf16.mxu0 %v14598_v0  ;;  %v11767_v38 = vld [vmem:[%s14593_s2 + $0x1c0] sm:$0xff] }
  0x5c   : > { %703 = vperm.xlu1 %10987, %v11530_v39   ;;  %605 = vmatprep.mubr.bf16.mxu1 %v14598_v0  ;;  %v11779_v0 = vld [vmem:[%s14593_s2 + $0x1d0] sm:$0xff] }
  0x5d   : > { %698 = vperm.xlu0 %10986, %v11535_v40  }
  0x60   : > { %713 = vperm.xlu1 %10987, %v11542_v41  }
  0x61   : > { %708 = vperm.xlu0 %10986, %v11549_v42  }
  0x64   : > { %923 = vperm.xlu1 %10987, %v11557_v43  }
  0x65   : > { %918 = vperm.xlu0 %10986, %v11563_v44  }
  0x68   : > { %933 = vperm.xlu1 %10987, %v11569_v45  }
  0x69   : > { %928 = vperm.xlu0 %10986, %v11575_v46  }
  0x6c   : > { %943 = vperm.xlu1 %10987, %v11581_v47  }
  0x6d   : > { %938 = vperm.xlu0 %10986, %v11587_v48  }
  0x70   : > { %1153 = vperm.xlu1 %10987, %v11593_v49  }
  0x71   : > { %1148 = vperm.xlu0 %10986, %v11599_v50  }
  0x74   : > { %1163 = vperm.xlu1 %10987, %v11605_v51  }
  0x75   : > { %1158 = vperm.xlu0 %10986, %v11611_v52  }
  0x78   : > { %1361 = vperm.xlu1 %10987, %v11617_v53  }
  0x79   : > { %1356 = vperm.xlu0 %10986, %v11623_v54  }
  0x7c   : > { %1371 = vperm.xlu1 %10987, %v11629_v55  }
  0x7d   : > { %1366 = vperm.xlu0 %10986, %v11635_v56  }
  0x80   : > { %1381 = vperm.xlu1 %10987, %v11641_v57  }
  0x81   : > { %1376 = vperm.xlu0 %10986, %v11647_v58  }
  0x84   : > { %1591 = vperm.xlu1 %10987, %v11653_v59  }
  0x85   : > { %1586 = vperm.xlu0 %10986, %v11659_v60  }
  0x88   : > { %1601 = vperm.xlu1 %10987, %v11665_v61  }
  0x89   : > { %1596 = vperm.xlu0 %10986, %v11671_v62  }
  0x8c   : > { %1611 = vperm.xlu1 %10987, %v11677_v63  }
  0x8d   : > { %1606 = vperm.xlu0 %10986, %v11683_v3  }
  0x90   : > { %1821 = vperm.xlu1 %10987, %v11689_v4  }
  0x91   : > { %1816 = vperm.xlu0 %10986, %v11695_v5  }
  0x94   : > { %1831 = vperm.xlu1 %10987, %v11701_v6  }
  0x95   : > { %1826 = vperm.xlu0 %10986, %v11707_v9  }
  0x98   : > { %1841 = vperm.xlu1 %10987, %v11713_v10  }
  0x99   : > { %1836 = vperm.xlu0 %10986, %v11719_v11  }
  0x9c   : > { %2051 = vperm.xlu1 %10987, %v11725_v13  }
  0x9d   : > { %2046 = vperm.xlu0 %10986, %v11731_v17  }
  0xa0   : > { %2061 = vperm.xlu1 %10987, %v11737_v18  }
  0xa1   : > { %2056 = vperm.xlu0 %10986, %v11743_v19  }
  0xa4   : > { %2248 = vperm.xlu1 %10987, %v11749_v24  }
  0xa5   : > { %2243 = vperm.xlu0 %10986, %v11755_v28  }
  0xa8   : > { %2258 = vperm.xlu1 %10987, %v11761_v33  }
  0xa9   : > { %2253 = vperm.xlu0 %10986, %v11767_v38  }
  0xac   : > { %2268 = vperm.xlu1 %10987, %v11773_v20  }
  0xad   : > { %2263 = vperm.xlu0 %10986, %v11779_v0  }
  0xb0   : > { %2673 = vperm.xlu1 %10987, %v11421_v15  }
  0xb1   : > { %2668 = vperm.xlu0 %10986, %v11395_v2  }
  0xb4   : > { %2683 = vperm.xlu1 %10987, %v11416_v14  }
  0xb5   : > { %2678 = vperm.xlu0 %10986, %v11390_v1  }
  0xb8   : > { %2693 = vperm.xlu1 %10987, %v11450_v26  }
  0xb9   : > { %2688 = vperm.xlu0 %10986, %v11457_v27  }
  0xbc   : > { %2901 = vperm.xlu1 %10987, %v11469_v29  }
  0xbd   : > { %2896 = vperm.xlu0 %10986, %v11474_v30  }
  0xbf   : > { %v11792_v25 = vpop.permute.xlu1 %237  ;;  %v11794_v23 = vpop.permute.xlu0 %227 }
  0xc0   : > { %2911 = vperm.xlu1 %10987, %v11483_v31  }
  0xc1   : > { %2906 = vperm.xlu0 %10986, %v11489_v32  }
  0xc3   : > { %v11798_v2 = vpop.permute.xlu1 %242 }
  0xc4   : > { %v11800_v14 = vpop.permute.xlu0 %232  ;;  %2921 = vperm.xlu1 %10987, %v11500_v34  }
  0xc5   : > { %2916 = vperm.xlu0 %10986, %v11505_v35  }
  0xc7   : > { %v11804_v1 = vpop.permute.xlu1 %252 }
  0xc8   : > { %v11806_v15 = vpop.permute.xlu0 %247  ;;  %3129 = vperm.xlu1 %10987, %v11514_v36  }
  0xc9   : > { %3124 = vperm.xlu0 %10986, %v11520_v37  }
  0xcb   : > { %v11810_v26 = vpop.permute.xlu1 %463 }
  0xcc   : > { %v11812_v27 = vpop.permute.xlu0 %458  ;;  %3139 = vperm.xlu1 %10987, %v11530_v39  }
  0xcd   : > { %3134 = vperm.xlu0 %10986, %v11535_v40  }
  0xcf   : > { %v11816_v29 = vpop.permute.xlu1 %473 }
  0xd0   : > { %v11818_v30 = vpop.permute.xlu0 %468  ;;  %3149 = vperm.xlu1 %10987, %v11542_v41  }
  0xd1   : > { %3144 = vperm.xlu0 %10986, %v11549_v42  }
  0xd3   : > { %v11822_v31 = vpop.permute.xlu1 %483 }
  0xd4   : > { %v11824_v32 = vpop.permute.xlu0 %478  ;;  %3357 = vperm.xlu1 %10987, %v11557_v43  }
  0xd5   : > { %3352 = vperm.xlu0 %10986, %v11563_v44  }
  0xd7   : > { %v11828_v34 = vpop.permute.xlu1 %693 }
  0xd8   : > { %v11830_v35 = vpop.permute.xlu0 %688  ;;  %3367 = vperm.xlu1 %10987, %v11569_v45  }
  0xd9   : > { %3362 = vperm.xlu0 %10986, %v11575_v46  }
  0xdb   : > { %v11834_v36 = vpop.permute.xlu1 %703 }
  0xdc   : > { %14797 = vst [vmem:[#allocation16_spill] sm:$0xff] %v11834_v36  ;;  %v11836_v37 = vpop.permute.xlu0 %698  ;;  %3377 = vperm.xlu1 %10987, %v11581_v47  }
  0xdd   : > { %3372 = vperm.xlu0 %10986, %v11587_v48  }
  0xdf   : > { %v11840_v39 = vpop.permute.xlu1 %713 }
  0xe0   : > { %14798 = vst [vmem:[#allocation17_spill] sm:$0xff] %v11840_v39  ;;  %v11842_v40 = vpop.permute.xlu0 %708  ;;  %3585 = vperm.xlu1 %10987, %v11593_v49  }
  0xe1   : > { %14799 = vst [vmem:[#allocation18_spill] sm:$0xff] %v11842_v40  ;;  %3580 = vperm.xlu0 %10986, %v11599_v50  }
  0xe3   : > { %v11846_v41 = vpop.permute.xlu1 %923 }
  0xe4   : > { %14800 = vst [vmem:[#allocation19_spill] sm:$0xff] %v11846_v41  ;;  %v11848_v42 = vpop.permute.xlu0 %918  ;;  %3595 = vperm.xlu1 %10987, %v11605_v51  }
  0xe5   : > { %14801 = vst [vmem:[#allocation20_spill] sm:$0xff] %v11848_v42  ;;  %3590 = vperm.xlu0 %10986, %v11611_v52  }
  0xe7   : > { %v11852_v43 = vpop.permute.xlu1 %933 }
  0xe8   : > { %14802 = vst [vmem:[#allocation21_spill] sm:$0xff] %v11852_v43  ;;  %v11854_v44 = vpop.permute.xlu0 %928  ;;  %3791 = vperm.xlu1 %10987, %v11617_v53  }
  0xe9   : > { %14803 = vst [vmem:[#allocation22_spill] sm:$0xff] %v11854_v44  ;;  %3786 = vperm.xlu0 %10986, %v11623_v54  }
  0xeb   : > { %v11858_v45 = vpop.permute.xlu1 %943 }
  0xec   : > { %14804 = vst [vmem:[#allocation23_spill] sm:$0xff] %v11858_v45  ;;  %v11860_v46 = vpop.permute.xlu0 %938  ;;  %3801 = vperm.xlu1 %10987, %v11629_v55  }
  0xed   : > { %14805 = vst [vmem:[#allocation24_spill] sm:$0xff] %v11860_v46  ;;  %3796 = vperm.xlu0 %10986, %v11635_v56  }
  0xef   : > { %v11864_v47 = vpop.permute.xlu1 %1153 }
  0xf0   : > { %14806 = vst [vmem:[#allocation25_spill] sm:$0xff] %v11864_v47  ;;  %v11866_v48 = vpop.permute.xlu0 %1148  ;;  %3811 = vperm.xlu1 %10987, %v11641_v57  }
  0xf1   : > { %14807 = vst [vmem:[#allocation26_spill] sm:$0xff] %v11866_v48  ;;  %3806 = vperm.xlu0 %10986, %v11647_v58  }
  0xf3   : > { %v11870_v49 = vpop.permute.xlu1 %1163 }
  0xf4   : > { %14808 = vst [vmem:[#allocation27_spill] sm:$0xff] %v11870_v49  ;;  %v11872_v50 = vpop.permute.xlu0 %1158  ;;  %4019 = vperm.xlu1 %10987, %v11653_v59  }
  0xf5   : > { %14809 = vst [vmem:[#allocation28_spill] sm:$0xff] %v11872_v50  ;;  %4014 = vperm.xlu0 %10986, %v11659_v60  }
  0xf7   : > { %v11876_v51 = vpop.permute.xlu1 %1361 }
  0xf8   : > { %14810 = vst [vmem:[#allocation29_spill] sm:$0xff] %v11876_v51  ;;  %v11878_v52 = vpop.permute.xlu0 %1356  ;;  %4029 = vperm.xlu1 %10987, %v11665_v61  }
  0xf9   : > { %14811 = vst [vmem:[#allocation30_spill] sm:$0xff] %v11878_v52  ;;  %4024 = vperm.xlu0 %10986, %v11671_v62  }
  0xfb   : > { %v11882_v22 = vpop.permute.xlu1 %1371 }
  0xfc   : > { %14812 = vst [vmem:[#allocation31_spill] sm:$0xff] %v11882_v22  ;;  %v11884_v21 = vpop.permute.xlu0 %1366  ;;  %4039 = vperm.xlu1 %10987, %v11677_v63  }
  0xfd   : > { %14813 = vst [vmem:[#allocation32_spill] sm:$0xff] %v11884_v21  ;;  %4034 = vperm.xlu0 %10986, %v11683_v3  }
  0xff   : > { %v11888_v49 = vpop.permute.xlu1 %1381 }
 0x100   : > { %14814 = vst [vmem:[#allocation33_spill] sm:$0xff] %v11888_v49  ;;  %v11890_v50 = vpop.permute.xlu0 %1376  ;;  %4247 = vperm.xlu1 %10987, %v11689_v4  }
 0x101   : > { %14815 = vst [vmem:[#allocation34_spill] sm:$0xff] %v11890_v50  ;;  %4242 = vperm.xlu0 %10986, %v11695_v5  }
 0x103   : > { %v11894_v51 = vpop.permute.xlu1 %1591 }
 0x104   : > { %14816 = vst [vmem:[#allocation35_spill] sm:$0xff] %v11894_v51  ;;  %v11896_v52 = vpop.permute.xlu0 %1586  ;;  %4257 = vperm.xlu1 %10987, %v11701_v6  }
 0x105   : > { %14817 = vst [vmem:[#allocation36_spill] sm:$0xff] %v11896_v52  ;;  %4252 = vperm.xlu0 %10986, %v11707_v9  }
 0x107   : > { %v11900_v22 = vpop.permute.xlu1 %1601 }
 0x108   : > { %14818 = vst [vmem:[#allocation37_spill] sm:$0xff] %v11900_v22  ;;  %v11902_v21 = vpop.permute.xlu0 %1596  ;;  %4267 = vperm.xlu1 %10987, %v11713_v10  }
 0x109   : > { %14819 = vst [vmem:[#allocation38_spill] sm:$0xff] %v11902_v21  ;;  %4262 = vperm.xlu0 %10986, %v11719_v11  }
 0x10b   : > { %v11906_v49 = vpop.permute.xlu1 %1611 }
 0x10c   : > { %14820 = vst [vmem:[#allocation39_spill] sm:$0xff] %v11906_v49  ;;  %v11908_v50 = vpop.permute.xlu0 %1606  ;;  %4475 = vperm.xlu1 %10987, %v11725_v13  }
 0x10d   : > { %14821 = vst [vmem:[#allocation40_spill] sm:$0xff] %v11908_v50  ;;  %4470 = vperm.xlu0 %10986, %v11731_v17  }
 0x10f   : > { %v11912_v51 = vpop.permute.xlu1 %1821 }
 0x110   : > { %14822 = vst [vmem:[#allocation41_spill] sm:$0xff] %v11912_v51  ;;  %v11914_v52 = vpop.permute.xlu0 %1816  ;;  %4485 = vperm.xlu1 %10987, %v11737_v18  }
 0x111   : > { %14823 = vst [vmem:[#allocation42_spill] sm:$0xff] %v11914_v52  ;;  %4480 = vperm.xlu0 %10986, %v11743_v19  }
 0x113   : > { %v11918_v22 = vpop.permute.xlu1 %1831 }
 0x114   : > { %14824 = vst [vmem:[#allocation43_spill] sm:$0xff] %v11918_v22  ;;  %v11920_v21 = vpop.permute.xlu0 %1826  ;;  %4670 = vperm.xlu1 %10987, %v11749_v24  }
 0x115   : > { %14825 = vst [vmem:[#allocation44_spill] sm:$0xff] %v11920_v21  ;;  %4665 = vperm.xlu0 %10986, %v11755_v28  }
 0x117   : > { %v11924_v49 = vpop.permute.xlu1 %1841 }
 0x118   : > { %14826 = vst [vmem:[#allocation45_spill] sm:$0xff] %v11924_v49  ;;  %v11926_v50 = vpop.permute.xlu0 %1836  ;;  %4680 = vperm.xlu1 %10987, %v11761_v33  }
 0x119   : > { %14827 = vst [vmem:[#allocation46_spill] sm:$0xff] %v11926_v50  ;;  %4675 = vperm.xlu0 %10986, %v11767_v38   ;;  %v11120_v50 = vld [vmem:[%s14593_s2 + $0x8] sm:$0xff] }
 0x11b   : > { %v11930_v51 = vpop.permute.xlu1 %2051 }
 0x11c   : > { %14828 = vst [vmem:[#allocation47_spill] sm:$0xff] %v11930_v51  ;;  %v11932_v52 = vpop.permute.xlu0 %2046  ;;  %4690 = vperm.xlu1 %10987, %v11773_v20  }
 0x11d   : > { %14829 = vst [vmem:[#allocation48_spill] sm:$0xff] %v11932_v52  ;;  %4685 = vperm.xlu0 %10986, %v11779_v0   ;;  %v314_v22 = vpop.f32.mrb[0].mxu0 }
 0x11e   : > { %v377_v21 = vpop.f32.mrb[0].mxu1  ;;  %v316_v47 = vpop.f32.mrb[1].mxu0  ;;  %v315_v48 = vadd.f32 %v314_v22, %v11794_v23 }
 0x11f   : > { %v379_v49 = vpop.f32.mrb[1].mxu1  ;;  %v11937_v16 = vpop.permute.xlu1 %2061  ;;  %v378_v51 = vadd.f32 %v377_v21, %v11794_v23  ;;  %v317_v52 = vadd.f32 %v316_v47, %v11794_v23 }
 0x120   : > { %14830 = vst [vmem:[#allocation49_spill] sm:$0xff] %v11937_v16  ;;  %5093 = vperm.xlu1 %10987, %v11120_v50   ;;  %v11944_v12 = vpop.permute.xlu0 %2056  ;;  %v318_v8 = vpop.f32.mrb[2].mxu0  ;;  %v380_v22 = vadd.f32 %v379_v49, %v11794_v23  ;;  %v406_v47 = vmax.f32 %v315_v48, 0.0 }
 0x121   : > { %14831 = vst [vmem:[#allocation50_spill] sm:$0xff] %v11944_v12  ;;  %5088 = vperm.xlu0 %10986, %v11121_v7   ;;  %v319_v16 = vadd.f32 %v318_v8, %v11800_v14  ;;  %v381_v45 = vpop.f32.mrb[2].mxu1  ;;  %v320_v46 = vpop.f32.mrb[3].mxu0  ;;  %v11122_v7 = vld [vmem:[%s14593_s2 + $0x18] sm:$0xff]  ;;  %v408_v23 = vmax.f32 %v378_v51, 0.0  ;;  %v407_v8 = vmax.f32 %v317_v52, 0.0 }
 0x122   : > { %v382_v50 = vadd.f32 %v381_v45, %v11800_v14  ;;  %v321_v21 = vadd.f32 %v320_v46, %v11800_v14  ;;  %v383_v43 = vpop.f32.mrb[3].mxu1  ;;  %v11123_v45 = vld [vmem:[%s14593_s2 + $0x10] sm:$0xff] }
 0x123   : > { %v410_v44 = vmax.f32 %v319_v16, 0.0  ;;  %v384_v12 = vadd.f32 %v383_v43, %v11800_v14  ;;  %v11954_v41 = vpop.permute.xlu1 %2248  ;;  %v409_v16 = vmax.f32 %v380_v22, 0.0 }
 0x124   : > { %14832 = vst [vmem:[#allocation51_spill] sm:$0xff] %v11954_v41  ;;  %5103 = vperm.xlu1 %10987, %v11122_v7   ;;  %v412_v49 = vmax.f32 %v382_v50, 0.0  ;;  %v411_v42 = vmax.f32 %v321_v21, 0.0  ;;  %v11959_v39 = vpop.permute.xlu0 %2243  ;;  %v11124_v7 = vld [vmem:[%s14593_s2 + $0x28] sm:$0xff] }
 0x125   : > { %5098 = vperm.xlu0 %10986, %v11123_v45   ;;  %v430_v14 = vpack.c.bf16 %v410_v44, %v406_v47  ;;  %v413_v43 = vmax.f32 %v384_v12, 0.0  ;;  %v324_v46 = vpop.f32.mrb[4].mxu0 }
 0x126   : > { %v432_v48 = vpack.c.bf16 %v412_v49, %v408_v23  ;;  %v387_v41 = vpop.f32.mrb[4].mxu1  ;;  %v326_v40 = vpop.f32.mrb[5].mxu0  ;;  %v431_v36 = vpack.c.bf16 %v411_v42, %v407_v8  ;;  %v325_v51 = vadd.f32 %v324_v46, %v11792_v25  ;;  %v11125_v42 = vld [vmem:[%s14593_s2 + $0x20] sm:$0xff] }
 0x127   : > { %v389_v52 = vpop.f32.mrb[5].mxu1  ;;  %v11965_v50 = vpop.permute.xlu1 %2258  ;;  %v433_v21 = vpack.c.bf16 %v413_v43, %v409_v16  ;;  %v388_v22 = vadd.f32 %v387_v41, %v11792_v25  ;;  %v327_v12 = vadd.f32 %v326_v40, %v11792_v25 }
 0x128   : > { %14833 = vst [vmem:[#allocation52_spill] sm:$0xff] %v11965_v50  ;;  %5113 = vperm.xlu1 %10987, %v11124_v7   ;;  %v11972_v44 = vpop.permute.xlu0 %2253  ;;  %v328_v47 = vpop.f32.mrb[6].mxu0  ;;  %510 = vmatprep.subr.bf16.mxu0 %v431_v36  ;;  %v390_v23 = vadd.f32 %v389_v52, %v11792_v25  ;;  %v414_v36 = vmax.f32 %v325_v51, 0.0  ;;  %v11126_v25 = vld [vmem:[%s14593_s2 + $0x38] sm:$0xff] }
 0x129   : > { %5108 = vperm.xlu0 %10986, %v11125_v42   ;;  %v329_v8 = vadd.f32 %v328_v47, %v11798_v2  ;;  %v391_v49 = vpop.f32.mrb[6].mxu1  ;;  %573 = vmatprep.subr.bf16.mxu1 %v433_v21  ;;  %v330_v45 = vpop.f32.mrb[7].mxu0  ;;  %v416_v52 = vmax.f32 %v388_v22, 0.0  ;;  %v415_v21 = vmax.f32 %v327_v12, 0.0 }
 0x12a   : > { %511 = vmatpush1.bf16.msra.mxu0 %v430_v14  ;;  %v392_v41 = vadd.f32 %v391_v49, %v11798_v2  ;;  %v331_v40 = vadd.f32 %v330_v45, %v11798_v2  ;;  %v393_v16 = vpop.f32.mrb[7].mxu1  ;;  %574 = vmatpush1.bf16.msra.mxu1 %v432_v48  ;;  %v11127_v48 = vld [vmem:[%s14593_s2 + $0x30] sm:$0xff]  ;;  %v417_v51 = vmax.f32 %v390_v23, 0.0 }
 0x12b   : > { %v418_v43 = vmax.f32 %v329_v8, 0.0  ;;  %v394_v46 = vadd.f32 %v393_v16, %v11798_v2  ;;  %v11982_v7 = vpop.permute.xlu1 %2268 }
 0x12c   : > { %14834 = vst [vmem:[#allocation53_spill] sm:$0xff] %v11982_v7  ;;  %5321 = vperm.xlu1 %10987, %v11126_v25   ;;  %v420_v14 = vmax.f32 %v392_v41, 0.0  ;;  %v419_v47 = vmax.f32 %v331_v40, 0.0  ;;  %v11987_v42 = vpop.permute.xlu0 %2263  ;;  %v11128_v25 = vld [vmem:[%s14593_s2 + $0x48] sm:$0xff] }
 0x12d   : > { %5316 = vperm.xlu0 %10986, %v11127_v48   ;;  %v434_v2 = vpack.c.bf16 %v418_v43, %v414_v36  ;;  %v421_v8 = vmax.f32 %v394_v46, 0.0  ;;  %v334_v49 = vpop.f32.mrb[8].mxu0 }
 0x12e   : > { %v436_v45 = vpack.c.bf16 %v420_v14, %v416_v52  ;;  %v397_v16 = vpop.f32.mrb[8].mxu1  ;;  %v336_v7 = vpop.f32.mrb[9].mxu0  ;;  %v435_v50 = vpack.c.bf16 %v419_v47, %v415_v21  ;;  %v335_v22 = vadd.f32 %v334_v49, %v11806_v15  ;;  %v11129_v52 = vld [vmem:[%s14593_s2 + $0x40] sm:$0xff] }
 0x12f   : > { %v399_v12 = vpop.f32.mrb[9].mxu1  ;;  %v11993_v41 = vpop.permute.xlu1 %2673  ;;  %v437_v40 = vpack.c.bf16 %v421_v8, %v417_v51  ;;  %v398_v23 = vadd.f32 %v397_v16, %v11806_v15  ;;  %v337_v36 = vadd.f32 %v336_v7, %v11806_v15 }
 0x130   : > { %5331 = vperm.xlu1 %10987, %v11128_v25   ;;  %v12000_v43 = vpop.permute.xlu0 %2668  ;;  %v338_v46 = vpop.f32.mrb[10].mxu0  ;;  %512 = vmatprep.subr.bf16.mxu0 %v435_v50  ;;  %v400_v21 = vadd.f32 %v399_v12, %v11806_v15  ;;  %v422_v50 = vmax.f32 %v335_v22, 0.0  ;;  %v11130_v15 = vld [vmem:[%s14593_s2 + $0x58] sm:$0xff] }
 0x131   : > { %5326 = vperm.xlu0 %10986, %v11129_v52   ;;  %v339_v14 = vadd.f32 %v338_v46, %v11804_v1  ;;  %v401_v47 = vpop.f32.mrb[10].mxu1  ;;  %575 = vmatprep.subr.bf16.mxu1 %v437_v40  ;;  %v340_v48 = vpop.f32.mrb[11].mxu0  ;;  %v424_v12 = vmax.f32 %v398_v23, 0.0  ;;  %v423_v40 = vmax.f32 %v337_v36, 0.0  ;;  %v11132_v23 = vld [vmem:[%s14593_s2 + $0x68] sm:$0xff] }
 0x132   : > { %513 = vmatpush1.bf16.msra.mxu0 %v434_v2  ;;  %v402_v51 = vadd.f32 %v401_v47, %v11804_v1  ;;  %v341_v7 = vadd.f32 %v340_v48, %v11804_v1  ;;  %v403_v8 = vpop.f32.mrb[11].mxu1  ;;  %576 = vmatpush1.bf16.msra.mxu1 %v436_v45  ;;  %v11131_v45 = vld [vmem:[%s14593_s2 + $0x50] sm:$0xff]  ;;  %v425_v22 = vmax.f32 %v400_v21, 0.0  ;;  %v10991_v21 = vld [vmem:[%s14592_s1 + $0x18] sm:$0xff]  }
 0x133   : > { %v426_v49 = vmax.f32 %v339_v14, 0.0  ;;  %v404_v16 = vadd.f32 %v403_v8, %v11804_v1  ;;  %v12010_v25 = vpop.permute.xlu1 %2683 }
 0x134   : > { %14835 = vst [vmem:[#allocation54_spill] sm:$0xff] %v12010_v25  ;;  %5341 = vperm.xlu1 %10987, %v11130_v15   ;;  %v428_v2 = vmax.f32 %v402_v51, 0.0  ;;  %v427_v46 = vmax.f32 %v341_v7, 0.0  ;;  %v12015_v52 = vpop.permute.xlu0 %2678  ;;  %v11133_v51 = vld [vmem:[%s14593_s2 + $0x60] sm:$0xff] }
 0x135   : > { %5336 = vperm.xlu0 %10986, %v11131_v45   ;;  %v438_v1 = vpack.c.bf16 %v426_v49, %v422_v50  ;;  %v429_v14 = vmax.f32 %v404_v16, 0.0  ;;  %v11134_v50 = vld [vmem:[%s14593_s2 + $0x78] sm:$0xff]  ;;  %v11135_v16 = vld [vmem:[%s14593_s2 + $0x70] sm:$0xff] }
 0x136   : > { %v440_v47 = vpack.c.bf16 %v428_v2, %v424_v12  ;;  %v439_v48 = vpack.c.bf16 %v427_v46, %v423_v40  ;;  %v11136_v12 = vld [vmem:[%s14593_s2 + $0x88] sm:$0xff]  ;;  %v11137_v2 = vld [vmem:[%s14593_s2 + $0x80] sm:$0xff]  ;;  %v11138_v45 = vld [vmem:[%s14593_s2 + $0x98] sm:$0xff] }
 0x137   : > { %v12020_v8 = vpop.permute.xlu1 %2693  ;;  %v441_v25 = vpack.c.bf16 %v429_v14, %v425_v22  ;;  %v10992_v46 = vld [vmem:[%s14592_s1 + $0x20] sm:$0xff]   ;;  %v11139_v22 = vld [vmem:[%s14593_s2 + $0x90] sm:$0xff] }
 0x138   : > { %5549 = vperm.xlu1 %10987, %v11132_v23   ;;  %v12025_v36 = vpop.permute.xlu0 %2688  ;;  %514 = vmatprep.subr.bf16.mxu0 %v439_v48  ;;  %v11141_v48 = vld [vmem:[%s14593_s2 + $0xa0] sm:$0xff]  ;;  %v10993_v23 = vld [vmem:[%s14592_s1 + $0x28] sm:$0xff]  }
 0x139   : > { %5544 = vperm.xlu0 %10986, %v11133_v51   ;;  %577 = vmatprep.subr.bf16.mxu1 %v441_v25  ;;  %v14836_v25 = vmov 0  }
 0x13a   : > { %515 = vmatpush1.bf16.msra.mxu0 %v438_v1  ;;  %578 = vmatpush1.bf16.msra.mxu1 %v440_v47  ;;  %v11140_v47 = vld [vmem:[%s14593_s2 + $0xa8] sm:$0xff] }
 0x13b   : > { %v12033_v7 = vpop.permute.xlu1 %2901 }
 0x13c   : > { %5559 = vperm.xlu1 %10987, %v11134_v50   ;;  %v12038_v49 = vpop.permute.xlu0 %2896 }
 0x13d   : > { %10010 = vmatmul.mubr.msk.bf16.vlgmr.msra.gmra.mrb[12].mxu0 %vm270_vm0, %v10991_v21  ;;  %5554 = vperm.xlu0 %10986, %v11135_v16   ;;  %v11143_v16 = vld [vmem:[%s14593_s2 + $0xb0] sm:$0xff] }
 0x13e   : > { %10013 = vmatmul.mubr.msk.bf16.vlgmr.msra.gmra.mrb[12].mxu1 %vm270_vm0, %v10991_v21  ;;  %552 = vmatprep.mubr.bf16.mxu0 %v14836_v25  ;;  %v11142_v21 = vld [vmem:[%s14593_s2 + $0xb8] sm:$0xff] }
 0x13f   : > { %615 = vmatprep.mubr.bf16.mxu1 %v14836_v25  ;;  %v12047_v15 = vpop.permute.xlu1 %2911 }
 0x140   : > { %5569 = vperm.xlu1 %10987, %v11136_v12   ;;  %v12052_v40 = vpop.permute.xlu0 %2906  ;;  %v11144_v12 = vld [vmem:[%s14593_s2 + $0xc8] sm:$0xff] }
 0x141   : > { %5564 = vperm.xlu0 %10986, %v11137_v2   ;;  %v11145_v2 = vld [vmem:[%s14593_s2 + $0xc0] sm:$0xff] }
 0x143   : > { %v12067_v1 = vpop.permute.xlu1 %2921 }
 0x144   : > { %5777 = vperm.xlu1 %10987, %v11138_v45   ;;  %v12071_v14 = vpop.permute.xlu0 %2916 }
 0x145   : > { %10011 = vmatmul.mubr.msk.bf16.gmra.mrb[16].mxu0 %vm270_vm0, %v10992_v46  ;;  %5772 = vperm.xlu0 %10986, %v11139_v22   ;;  %v11146_v22 = vld [vmem:[%s14593_s2 + $0xd8] sm:$0xff] }
 0x146   : > { %10014 = vmatmul.mubr.msk.bf16.gmra.mrb[16].mxu1 %vm270_vm0, %v10992_v46  ;;  %562 = vmatprep.mubr.bf16.mxu0 %v14836_v25 }
 0x147   : > { %625 = vmatprep.mubr.bf16.mxu1 %v14836_v25  ;;  %v12083_v51 = vpop.permute.xlu1 %3129 }
 0x148   : > { %5787 = vperm.xlu1 %10987, %v11140_v47   ;;  %v12088_v50 = vpop.permute.xlu0 %3124  ;;  %v11147_v47 = vld [vmem:[%s14593_s2 + $0xd0] sm:$0xff] }
 0x149   : > { %5782 = vperm.xlu0 %10986, %v11141_v48  }
 0x14b   : > { %v12103_v46 = vpop.permute.xlu1 %3139 }
 0x14c   : > { %5797 = vperm.xlu1 %10987, %v11142_v21   ;;  %v12105_v45 = vpop.permute.xlu0 %3134 }
 0x14d   : > { %10012 = vmatmul.mubr.msk.bf16.gmra.mrb[20].mxu0 %vm270_vm0, %v10993_v23  ;;  %5792 = vperm.xlu0 %10986, %v11143_v16  }
 0x14e   : > { %10015 = vmatmul.mubr.msk.bf16.gmra.mrb[20].mxu1 %vm270_vm0, %v10993_v23  ;;  %772 = vmatprep.mubr.bf16.mxu0 %v14836_v25 }
 0x14f   : > { %835 = vmatprep.mubr.bf16.mxu1 %v14836_v25  ;;  %v12113_v48 = vpop.permute.xlu1 %3149 }
 0x150   : > { %6005 = vperm.xlu1 %10987, %v11144_v12   ;;  %v12116_v23 = vpop.permute.xlu0 %3144 }
 0x151   : > { %6000 = vperm.xlu0 %10986, %v11145_v2   ;;  %v10660_v2 = vld [vmem:[%s14593_s2 + $0x40] sm:$0xff] }
 0x153   : > { %v12121_v21 = vpop.permute.xlu1 %3357 }
 0x154   : > { %6015 = vperm.xlu1 %10987, %v11146_v22   ;;  %v12123_v16 = vpop.permute.xlu0 %3352 }
 0x155   : > { %6010 = vperm.xlu0 %10986, %v11147_v47  }
 0x157   : > { %v12127_v12 = vpop.permute.xlu1 %3367 }
 0x158   : > { %6211 = vperm.xlu1 %10987, %v11617_v53   ;;  %v12130_v53 = vpop.permute.xlu0 %3362 }
 0x159   : > { %6206 = vperm.xlu0 %10986, %v11623_v54  }
 0x15b   : > { %v12135_v54 = vpop.permute.xlu1 %3377 }
 0x15c   : > { %6221 = vperm.xlu1 %10987, %v11629_v55   ;;  %v12137_v55 = vpop.permute.xlu0 %3372 }
 0x15d   : > { %6216 = vperm.xlu0 %10986, %v11635_v56  }
 0x15f   : > { %v12141_v56 = vpop.permute.xlu1 %3585 }
 0x160   : > { %6231 = vperm.xlu1 %10987, %v11641_v57   ;;  %v12144_v57 = vpop.permute.xlu0 %3580 }
 0x161   : > { %6226 = vperm.xlu0 %10986, %v11647_v58  }
 0x163   : > { %v12149_v58 = vpop.permute.xlu1 %3595 }
 0x164   : > { %6439 = vperm.xlu1 %10987, %v11653_v59   ;;  %14837 = vst [vmem:[#allocation55_spill] sm:$0xff] %v12149_v58  ;;  %v12151_v59 = vpop.permute.xlu0 %3590 }
 0x165   : > { %6434 = vperm.xlu0 %10986, %v11659_v60  }
 0x167   : > { %v12155_v60 = vpop.permute.xlu1 %3791 }
 0x168   : > { %6449 = vperm.xlu1 %10987, %v11665_v61   ;;  %14838 = vst [vmem:[#allocation56_spill] sm:$0xff] %v12155_v60  ;;  %v12158_v61 = vpop.permute.xlu0 %3786 }
 0x169   : > { %6444 = vperm.xlu0 %10986, %v11671_v62   ;;  %14839 = vst [vmem:[#allocation57_spill] sm:$0xff] %v12158_v61 }
 0x16b   : > { %v12163_v62 = vpop.permute.xlu1 %3801 }
 0x16c   : > { %6459 = vperm.xlu1 %10987, %v11677_v63   ;;  %14840 = vst [vmem:[#allocation58_spill] sm:$0xff] %v12163_v62  ;;  %v12165_v63 = vpop.permute.xlu0 %3796 }
 0x16d   : > { %6454 = vperm.xlu0 %10986, %v11683_v3   ;;  %14841 = vst [vmem:[#allocation59_spill] sm:$0xff] %v12165_v63 }
 0x16f   : > { %v12169_v3 = vpop.permute.xlu1 %3811 }
 0x170   : > { %6667 = vperm.xlu1 %10987, %v11689_v4   ;;  %14842 = vst [vmem:[#allocation60_spill] sm:$0xff] %v12169_v3  ;;  %v12172_v4 = vpop.permute.xlu0 %3806 }
 0x171   : > { %6662 = vperm.xlu0 %10986, %v11695_v5   ;;  %14843 = vst [vmem:[#allocation61_spill] sm:$0xff] %v12172_v4  ;;  %v7501_v5 = vld [vmem:[%s14593_s2 + $0x8] sm:$0xff] }
 0x174   : > { %6677 = vperm.xlu1 %10987, %v11701_v6   ;;  %v12180_v6 = vpop.permute.xlu1 %4019 }
 0x175   : > { %6672 = vperm.xlu0 %10986, %v11707_v9   ;;  %14844 = vst [vmem:[#allocation62_spill] sm:$0xff] %v12180_v6  ;;  %v7500_v9 = vld [vmem:[%s14593_s2] sm:$0xff] }
 0x178   : > { %6687 = vperm.xlu1 %10987, %v11713_v10   ;;  %v12185_v10 = vpop.permute.xlu0 %4014 }
 0x179   : > { %6682 = vperm.xlu0 %10986, %v11719_v11   ;;  %14845 = vst [vmem:[#allocation63_spill] sm:$0xff] %v12185_v10  ;;  %v12193_v11 = vpop.permute.xlu1 %4029 }
 0x17a   : > { %14846 = vst [vmem:[#allocation64_spill] sm:$0xff] %v12193_v11 }
 0x17c   : > { %6895 = vperm.xlu1 %10987, %v11725_v13   ;;  %v12195_v13 = vpop.permute.xlu0 %4024 }
 0x17d   : > { %6890 = vperm.xlu0 %10986, %v11731_v17   ;;  %14847 = vst [vmem:[#allocation65_spill] sm:$0xff] %v12195_v13  ;;  %v7505_v17 = vld [vmem:[%s14593_s2 + $0x28] sm:$0xff] }
 0x180   : > { %6905 = vperm.xlu1 %10987, %v11737_v18   ;;  %v7504_v18 = vld [vmem:[%s14593_s2 + $0x20] sm:$0xff] }
 0x181   : > { %6900 = vperm.xlu0 %10986, %v11743_v19   ;;  %v10659_v19 = vld [vmem:[%s14593_s2 + $0x38] sm:$0xff] }
 0x184   : > { %7090 = vperm.xlu1 %10987, %v11749_v24   ;;  %v12206_v24 = vpop.permute.xlu1 %4039 }
 0x185   : > { %7085 = vperm.xlu0 %10986, %v11755_v28   ;;  %14848 = vst [vmem:[#allocation66_spill] sm:$0xff] %v12206_v24  ;;  %v10658_v28 = vld [vmem:[%s14593_s2 + $0x30] sm:$0xff] }
 0x188   : > { %7100 = vperm.xlu1 %10987, %v11761_v33   ;;  %v12211_v33 = vpop.permute.xlu0 %4034  ;;  %v12219_v22 = vpop.permute.xlu1 %4247 }
 0x189   : > { %7095 = vperm.xlu0 %10986, %v11767_v38   ;;  %14849 = vst [vmem:[#allocation67_spill] sm:$0xff] %v12211_v33  ;;  %v10661_v38 = vld [vmem:[%s14593_s2 + $0x48] sm:$0xff]  ;;  %14850 = vst [vmem:[#allocation68_spill] sm:$0xff] %v12219_v22 }
 0x18c   : > { %7110 = vperm.xlu1 %10987, %v11773_v20   ;;  %v7503_v20 = vld [vmem:[%s14593_s2 + $0x18] sm:$0xff]  ;;  %v12221_v47 = vpop.permute.xlu0 %4242 }
 0x18d   : > { %7105 = vperm.xlu0 %10986, %v11779_v0   ;;  %v7502_v0 = vld [vmem:[%s14593_s2 + $0x10] sm:$0xff]  ;;  %14851 = vst [vmem:[#allocation69_spill] sm:$0xff] %v12221_v47 }
 0x190   : > { %7513 = vperm.xlu1 %10987, %v7501_v5   ;;  %v10663_v5 = vld [vmem:[%s14593_s2 + $0x58] sm:$0xff] }
 0x191   : > { %7508 = vperm.xlu0 %10986, %v7500_v9   ;;  %v10662_v9 = vld [vmem:[%s14593_s2 + $0x50] sm:$0xff] }
 0x194   : > { %7523 = vperm.xlu1 %10987, %v7503_v20   ;;  %v10680_v20 = vld [vmem:[%s14593_s2 + $0x68] sm:$0xff] }
 0x195   : > { %7518 = vperm.xlu0 %10986, %v7502_v0   ;;  %v12232_v0 = vpop.permute.xlu1 %4257 }
 0x196   : > { %14852 = vst [vmem:[#allocation70_spill] sm:$0xff] %v12232_v0 }
 0x198   : > { %7533 = vperm.xlu1 %10987, %v7505_v17   ;;  %v10679_v17 = vld [vmem:[%s14593_s2 + $0x60] sm:$0xff] }
 0x199   : > { %7528 = vperm.xlu0 %10986, %v7504_v18   ;;  %v12237_v18 = vpop.permute.xlu0 %4252 }
 0x19a   : > { %14853 = vst [vmem:[#allocation71_spill] sm:$0xff] %v12237_v18 }
 0x19c   : > { %7741 = vperm.xlu1 %10987, %v10659_v19   ;;  %v10682_v19 = vld [vmem:[%s14593_s2 + $0x78] sm:$0xff] }
 0x19d   : > { %7736 = vperm.xlu0 %10986, %v10658_v28   ;;  %v10681_v28 = vld [vmem:[%s14593_s2 + $0x70] sm:$0xff] }
 0x1a0   : > { %7751 = vperm.xlu1 %10987, %v10661_v38   ;;  %v12245_v38 = vpop.permute.xlu1 %4267 }
 0x1a1   : > { %7746 = vperm.xlu0 %10986, %v10660_v2   ;;  %14854 = vst [vmem:[#allocation72_spill] sm:$0xff] %v12245_v38  ;;  %v12247_v2 = vpop.permute.xlu0 %4262  ;;  %v10703_v38 = vld [vmem:[%s14593_s2 + $0xa8] sm:$0xff] }
 0x1a2   : > { %14855 = vst [vmem:[#allocation73_spill] sm:$0xff] %v12247_v2 }
 0x1a4   : > { %7761 = vperm.xlu1 %10987, %v10663_v5   ;;  %v10684_v5 = vld [vmem:[%s14593_s2 + $0x88] sm:$0xff] }
 0x1a5   : > { %7756 = vperm.xlu0 %10986, %v10662_v9   ;;  %v10683_v9 = vld [vmem:[%s14593_s2 + $0x80] sm:$0xff] }
 0x1a8   : > { %7969 = vperm.xlu1 %10987, %v10680_v20   ;;  %v10701_v20 = vld [vmem:[%s14593_s2 + $0x98] sm:$0xff] }
 0x1a9   : > { %7964 = vperm.xlu0 %10986, %v10679_v17   ;;  %v12258_v17 = vpop.permute.xlu1 %4475 }
 0x1aa   : > { %14856 = vst [vmem:[#allocation74_spill] sm:$0xff] %v12258_v17 }
 0x1ac   : > { %7979 = vperm.xlu1 %10987, %v10682_v19   ;;  %v10700_v19 = vld [vmem:[%s14593_s2 + $0x90] sm:$0xff] }
 0x1ad   : > { %7974 = vperm.xlu0 %10986, %v10681_v28   ;;  %v12263_v28 = vpop.permute.xlu0 %4470 }
 0x1ae   : > { %14857 = vst [vmem:[#allocation75_spill] sm:$0xff] %v12263_v28  ;;  %v10705_v28 = vld [vmem:[%s14593_s2 + $0xb8] sm:$0xff] }
 0x1b0   : > { %7989 = vperm.xlu1 %10987, %v10684_v5   ;;  %v10702_v5 = vld [vmem:[%s14593_s2 + $0xa0] sm:$0xff] }
 0x1b1   : > { %7984 = vperm.xlu0 %10986, %v10683_v9   ;;  %v12271_v9 = vpop.permute.xlu1 %4485  ;;  %v12273_v17 = vpop.permute.xlu0 %4480 }
 0x1b2   : > { %14858 = vst [vmem:[#allocation76_spill] sm:$0xff] %v12271_v9  ;;  %14859 = vst [vmem:[#allocation77_spill] sm:$0xff] %v12273_v17  ;;  %v10724_v9 = vld [vmem:[%s14593_s2 + $0xd8] sm:$0xff] }
 0x1b4   : > { %8197 = vperm.xlu1 %10987, %v10701_v20   ;;  %v10704_v20 = vld [vmem:[%s14593_s2 + $0xb0] sm:$0xff] }
 0x1b5   : > { %8192 = vperm.xlu0 %10986, %v10700_v19   ;;  %v10722_v19 = vld [vmem:[%s14593_s2 + $0xc8] sm:$0xff]  ;;  %v12284_v2 = vpop.permute.xlu1 %4670 }
 0x1b6   : > { %14860 = vst [vmem:[#allocation78_spill] sm:$0xff] %v12284_v2 }
 0x1b8   : > { %8207 = vperm.xlu1 %10987, %v10703_v38   ;;  %v10721_v38 = vld [vmem:[%s14593_s2 + $0xc0] sm:$0xff] }
 0x1b9   : > { %8202 = vperm.xlu0 %10986, %v10702_v5   ;;  %v12289_v5 = vpop.permute.xlu0 %4665 }
 0x1ba   : > { %14861 = vst [vmem:[#allocation79_spill] sm:$0xff] %v12289_v5  ;;  %v10743_v5 = vld [vmem:[%s14593_s2 + $0xf8] sm:$0xff] }
 0x1bc   : > { %8217 = vperm.xlu1 %10987, %v10705_v28   ;;  %v10723_v28 = vld [vmem:[%s14593_s2 + $0xd0] sm:$0xff] }
 0x1bd   : > { %8212 = vperm.xlu0 %10986, %v10704_v20   ;;  %v12297_v20 = vpop.permute.xlu1 %4680  ;;  %v12299_v2 = vpop.permute.xlu0 %4675 }
 0x1be   : > { %14862 = vst [vmem:[#allocation80_spill] sm:$0xff] %v12297_v20  ;;  %14863 = vst [vmem:[#allocation81_spill] sm:$0xff] %v12299_v2  ;;  %v10747_v20 = vld [vmem:[%s14593_s2 + $0x118] sm:$0xff] }
 0x1c0   : > { %8425 = vperm.xlu1 %10987, %v10722_v19   ;;  %v10742_v19 = vld [vmem:[%s14593_s2 + $0xf0] sm:$0xff] }
 0x1c1   : > { %8420 = vperm.xlu0 %10986, %v10721_v38   ;;  %v10745_v38 = vld [vmem:[%s14593_s2 + $0x108] sm:$0xff]  ;;  %v12310_v17 = vpop.permute.xlu1 %4690 }
 0x1c2   : > { %14864 = vst [vmem:[#allocation82_spill] sm:$0xff] %v12310_v17 }
 0x1c4   : > { %8435 = vperm.xlu1 %10987, %v10724_v9   ;;  %v10744_v9 = vld [vmem:[%s14593_s2 + $0x100] sm:$0xff] }
 0x1c5   : > { %8430 = vperm.xlu0 %10986, %v10723_v28   ;;  %v12315_v28 = vpop.permute.xlu0 %4685 }
 0x1c6   : > { %14865 = vst [vmem:[#allocation83_spill] sm:$0xff] %v12315_v28  ;;  %v10764_v28 = vld [vmem:[%s14593_s2 + $0x128] sm:$0xff] }
 0x1c8   : > { %8631 = vperm.xlu1 %10987, %v10743_v5   ;;  %v10746_v5 = vld [vmem:[%s14593_s2 + $0x110] sm:$0xff] }
 0x1c9   : > { %8626 = vperm.xlu0 %10986, %v10742_v19   ;;  %v12323_v19 = vpop.permute.xlu1 %5093  ;;  %v12325_v17 = vpop.permute.xlu0 %5088 }
 0x1ca   : > { %14866 = vst [vmem:[#allocation84_spill] sm:$0xff] %v12323_v19  ;;  %14867 = vst [vmem:[#allocation85_spill] sm:$0xff] %v12325_v17  ;;  %v10768_v19 = vld [vmem:[%s14593_s2 + $0x148] sm:$0xff] }
 0x1cc   : > { %8641 = vperm.xlu1 %10987, %v10745_v38   ;;  %v10763_v38 = vld [vmem:[%s14593_s2 + $0x120] sm:$0xff] }
 0x1cd   : > { %8636 = vperm.xlu0 %10986, %v10744_v9   ;;  %v10766_v9 = vld [vmem:[%s14593_s2 + $0x138] sm:$0xff]  ;;  %v12336_v2 = vpop.permute.xlu1 %5103 }
 0x1ce   : > { %14868 = vst [vmem:[#allocation86_spill] sm:$0xff] %v12336_v2 }
 0x1d0   : > { %8651 = vperm.xlu1 %10987, %v10747_v20   ;;  %v10765_v20 = vld [vmem:[%s14593_s2 + $0x130] sm:$0xff] }
 0x1d1   : > { %8646 = vperm.xlu0 %10986, %v10746_v5   ;;  %v12341_v5 = vpop.permute.xlu0 %5098 }
 0x1d2   : > { %14869 = vst [vmem:[#allocation87_spill] sm:$0xff] %v12341_v5  ;;  %v10785_v5 = vld [vmem:[%s14593_s2 + $0x158] sm:$0xff] }
 0x1d4   : > { %8859 = vperm.xlu1 %10987, %v10764_v28   ;;  %v10767_v28 = vld [vmem:[%s14593_s2 + $0x140] sm:$0xff] }
 0x1d5   : > { %8854 = vperm.xlu0 %10986, %v10763_v38   ;;  %v12349_v38 = vpop.permute.xlu1 %5113  ;;  %v12351_v2 = vpop.permute.xlu0 %5108 }
 0x1d6   : > { %14870 = vst [vmem:[#allocation88_spill] sm:$0xff] %v12349_v38  ;;  %14871 = vst [vmem:[#allocation89_spill] sm:$0xff] %v12351_v2  ;;  %v10789_v38 = vld [vmem:[%s14593_s2 + $0x178] sm:$0xff] }
 0x1d8   : > { %8869 = vperm.xlu1 %10987, %v10766_v9   ;;  %v10784_v9 = vld [vmem:[%s14593_s2 + $0x150] sm:$0xff] }
 0x1d9   : > { %8864 = vperm.xlu0 %10986, %v10765_v20   ;;  %v10787_v20 = vld [vmem:[%s14593_s2 + $0x168] sm:$0xff]  ;;  %v12362_v17 = vpop.permute.xlu1 %5321 }
 0x1da   : > { %14872 = vst [vmem:[#allocation90_spill] sm:$0xff] %v12362_v17 }
 0x1dc   : > { %8879 = vperm.xlu1 %10987, %v10768_v19   ;;  %v10786_v19 = vld [vmem:[%s14593_s2 + $0x160] sm:$0xff] }
 0x1dd   : > { %8874 = vperm.xlu0 %10986, %v10767_v28   ;;  %v12367_v28 = vpop.permute.xlu0 %5316 }
 0x1de   : > { %14873 = vst [vmem:[#allocation91_spill] sm:$0xff] %v12367_v28  ;;  %v10806_v28 = vld [vmem:[%s14593_s2 + $0x188] sm:$0xff] }
 0x1e0   : > { %9087 = vperm.xlu1 %10987, %v10785_v5   ;;  %v10788_v5 = vld [vmem:[%s14593_s2 + $0x170] sm:$0xff] }
 0x1e1   : > { %9082 = vperm.xlu0 %10986, %v10784_v9   ;;  %v12375_v9 = vpop.permute.xlu1 %5331  ;;  %v12377_v17 = vpop.permute.xlu0 %5326 }
 0x1e2   : > { %14874 = vst [vmem:[#allocation92_spill] sm:$0xff] %v12375_v9  ;;  %14875 = vst [vmem:[#allocation93_spill] sm:$0xff] %v12377_v17  ;;  %v10827_v9 = vld [vmem:[%s14593_s2 + $0x1b8] sm:$0xff] }
 0x1e4   : > { %9097 = vperm.xlu1 %10987, %v10787_v20   ;;  %v10805_v20 = vld [vmem:[%s14593_s2 + $0x180] sm:$0xff] }
 0x1e5   : > { %9092 = vperm.xlu0 %10986, %v10786_v19   ;;  %v10808_v19 = vld [vmem:[%s14593_s2 + $0x198] sm:$0xff]  ;;  %v12388_v2 = vpop.permute.xlu1 %5341 }
 0x1e6   : > { %14876 = vst [vmem:[#allocation94_spill] sm:$0xff] %v12388_v2 }
 0x1e8   : > { %9107 = vperm.xlu1 %10987, %v10789_v38   ;;  %v10807_v38 = vld [vmem:[%s14593_s2 + $0x190] sm:$0xff] }
 0x1e9   : > { %9102 = vperm.xlu0 %10986, %v10788_v5   ;;  %v12393_v5 = vpop.permute.xlu0 %5336 }
 0x1ea   : > { %14877 = vst [vmem:[#allocation95_spill] sm:$0xff] %v12393_v5  ;;  %v10829_v5 = vld [vmem:[%s14593_s2 + $0x1c8] sm:$0xff] }
 0x1ec   : > { %9315 = vperm.xlu1 %10987, %v10806_v28   ;;  %v10826_v28 = vld [vmem:[%s14593_s2 + $0x1b0] sm:$0xff] }
 0x1ed   : > { %9310 = vperm.xlu0 %10986, %v10805_v20   ;;  %v12401_v20 = vpop.permute.xlu1 %5549  ;;  %v12403_v2 = vpop.permute.xlu0 %5544 }
 0x1ee   : > { %14878 = vst [vmem:[#allocation96_spill] sm:$0xff] %v12401_v20  ;;  %14879 = vst [vmem:[#allocation97_spill] sm:$0xff] %v12403_v2  ;;  %v10190_v20 = vld [vmem:[%s14593_s2 + $0x1e0] sm:$0xff] }
 0x1f0   : > { %9325 = vperm.xlu1 %10987, %v10808_v19   ;;  %v10828_v19 = vld [vmem:[%s14593_s2 + $0x1c0] sm:$0xff] }
 0x1f1   : > { %9320 = vperm.xlu0 %10986, %v10807_v38   ;;  %v10831_v38 = vld [vmem:[%s14593_s2 + $0x1d8] sm:$0xff]  ;;  %v12414_v17 = vpop.permute.xlu1 %5559 }
 0x1f2   : > { %14880 = vst [vmem:[#allocation98_spill] sm:$0xff] %v12414_v17 }
 0x1f4   : > { %9510 = vperm.xlu1 %10987, %v10827_v9   ;;  %v10830_v9 = vld [vmem:[%s14593_s2 + $0x1d0] sm:$0xff] }
 0x1f5   : > { %9505 = vperm.xlu0 %10986, %v10826_v28   ;;  %v12419_v28 = vpop.permute.xlu0 %5554 }
 0x1f6   : > { %14881 = vst [vmem:[#allocation99_spill] sm:$0xff] %v12419_v28 }
 0x1f8   : > { %9520 = vperm.xlu1 %10987, %v10829_v5   ;;  %v10152_v5 = vld [vmem:[%s14593_s2 + $0x1a0] sm:$0xff] }
 0x1f9   : > { %9515 = vperm.xlu0 %10986, %v10828_v19   ;;  %v12427_v19 = vpop.permute.xlu1 %5569  ;;  %v12429_v17 = vpop.permute.xlu0 %5564 }
 0x1fa   : > { %14882 = vst [vmem:[#allocation100_spill] sm:$0xff] %v12427_v19  ;;  %14883 = vst [vmem:[#allocation101_spill] sm:$0xff] %v12429_v17 }
 0x1fc   : > { %9530 = vperm.xlu1 %10987, %v10831_v38  }
 0x1fd   : > { %9525 = vperm.xlu0 %10986, %v10830_v9   ;;  %v12431_v2 = vpop.permute.xlu1 %5777  ;;  %v12433_v38 = vpop.permute.xlu0 %5772 }
 0x1fe   : > { %14884 = vst [vmem:[#allocation102_spill] sm:$0xff] %v12431_v2  ;;  %14885 = vst [vmem:[#allocation103_spill] sm:$0xff] %v12433_v38 }
 0x200   : > { %2473 = vperm.xlu1 %10987, %v10190_v20  }
 0x201   : > { %2066 = vperm.xlu0 %10986, %v10152_v5   ;;  %v12435_v9 = vpop.permute.xlu1 %5787  ;;  %v12437_v28 = vpop.permute.xlu0 %5782 }
 0x202   : > { %14886 = vst [vmem:[#allocation104_spill] sm:$0xff] %v12435_v9  ;;  %14887 = vst [vmem:[#allocation105_spill] sm:$0xff] %v12437_v28 }
 0x204   : > { %4893 = vperm.xlu1 %10987, %v10190_v20  }
 0x205   : > { %4490 = vperm.xlu0 %10986, %v10152_v5  }
 0x208   : > { %7313 = vperm.xlu1 %10987, %v10190_v20  }
 0x209   : > { %6910 = vperm.xlu0 %10986, %v10152_v5  }
 0x20c   : > { %9733 = vperm.xlu1 %10987, %v10190_v20  }
 0x20d   : > { %9330 = vperm.xlu0 %10986, %v10152_v5  }
 0x210   : > { %v544_v0 = vpop.f32.mrb[12].mxu0 }
 0x211   : > { %v607_v19 = vpop.f32.mrb[12].mxu1  ;;  %v545_v18 = vadd.f32 %v544_v0, %v11812_v27  ;;  %v546_v22 = vpop.f32.mrb[13].mxu0 }
 0x212   : > { %v608_v17 = vadd.f32 %v607_v19, %v11812_v27  ;;  %v609_v47 = vpop.f32.mrb[13].mxu1  ;;  %v547_v2 = vadd.f32 %v546_v22, %v11812_v27  ;;  %v548_v24 = vpop.f32.mrb[14].mxu0 }
 0x213   : > { %v610_v38 = vadd.f32 %v609_v47, %v11812_v27  ;;  %v611_v33 = vpop.f32.mrb[14].mxu1  ;;  %v549_v9 = vadd.f32 %v548_v24, %v11810_v26  ;;  %v550_v28 = vpop.f32.mrb[15].mxu0  ;;  %v636_v13 = vmax.f32 %v545_v18, 0.0 }
 0x214   : > { %v612_v20 = vadd.f32 %v611_v33, %v11810_v26  ;;  %v613_v5 = vpop.f32.mrb[15].mxu1  ;;  %v551_v11 = vadd.f32 %v550_v28, %v11810_v26  ;;  %v638_v19 = vmax.f32 %v608_v17, 0.0  ;;  %v637_v3 = vmax.f32 %v547_v2, 0.0 }
 0x215   : > { %v614_v0 = vadd.f32 %v613_v5, %v11810_v26  ;;  %v640_v6 = vmax.f32 %v549_v9, 0.0  ;;  %v639_v22 = vmax.f32 %v610_v38, 0.0 }
 0x216   : > { %v642_v10 = vmax.f32 %v612_v20, 0.0  ;;  %v641_v4 = vmax.f32 %v551_v11, 0.0 }
 0x217   : > { %v643_v27 = vmax.f32 %v614_v0, 0.0  ;;  %v660_v47 = vpack.c.bf16 %v640_v6, %v636_v13 }
 0x218   : > { %v662_v62 = vpack.c.bf16 %v642_v10, %v638_v19  ;;  %v554_v63 = vpop.f32.mrb[16].mxu0  ;;  %v661_v60 = vpack.c.bf16 %v641_v4, %v637_v3 }
 0x219   : > { %v617_v24 = vpop.f32.mrb[16].mxu1  ;;  %v663_v33 = vpack.c.bf16 %v643_v27, %v639_v22  ;;  %v555_v61 = vadd.f32 %v554_v63, %v11818_v30  ;;  %v556_v58 = vpop.f32.mrb[17].mxu0 }
 0x21a   : > { %v618_v28 = vadd.f32 %v617_v24, %v11818_v30  ;;  %v557_v26 = vadd.f32 %v556_v58, %v11818_v30  ;;  %v619_v18 = vpop.f32.mrb[17].mxu1  ;;  %v558_v17 = vpop.f32.mrb[18].mxu0  ;;  %740 = vmatprep.subr.bf16.mxu0 %v661_v60 }
 0x21b   : > { %803 = vmatprep.subr.bf16.mxu1 %v663_v33  ;;  %v620_v11 = vadd.f32 %v619_v18, %v11818_v30  ;;  %v559_v6 = vadd.f32 %v558_v17, %v11816_v29  ;;  %v621_v10 = vpop.f32.mrb[18].mxu1  ;;  %v560_v13 = vpop.f32.mrb[19].mxu0  ;;  %741 = vmatpush1.bf16.msra.mxu0 %v660_v47  ;;  %v644_v2 = vmax.f32 %v555_v61, 0.0 }
 0x21c   : > { %804 = vmatpush1.bf16.msra.mxu1 %v662_v62  ;;  %v622_v3 = vadd.f32 %v621_v10, %v11816_v29  ;;  %v561_v63 = vadd.f32 %v560_v13, %v11816_v29  ;;  %v623_v4 = vpop.f32.mrb[19].mxu1  ;;  %v646_v9 = vmax.f32 %v618_v28, 0.0  ;;  %v645_v60 = vmax.f32 %v557_v26, 0.0 }
 0x21d   : > { %v648_v38 = vmax.f32 %v559_v6, 0.0  ;;  %v624_v58 = vadd.f32 %v623_v4, %v11816_v29  ;;  %v647_v30 = vmax.f32 %v620_v11, 0.0 }
 0x21e   : > { %v650_v20 = vmax.f32 %v622_v3, 0.0  ;;  %v649_v5 = vmax.f32 %v561_v63, 0.0 }
 0x21f   : > { %v664_v0 = vpack.c.bf16 %v648_v38, %v644_v2  ;;  %v651_v19 = vmax.f32 %v624_v58, 0.0 }
 0x220   : > { %v564_v22 = vpop.f32.mrb[20].mxu0  ;;  %v666_v27 = vpack.c.bf16 %v650_v20, %v646_v9  ;;  %v665_v62 = vpack.c.bf16 %v649_v5, %v645_v60 }
 0x221   : > { %v627_v47 = vpop.f32.mrb[20].mxu1  ;;  %v565_v24 = vadd.f32 %v564_v22, %v11824_v32  ;;  %v566_v33 = vpop.f32.mrb[21].mxu0  ;;  %v667_v18 = vpack.c.bf16 %v651_v19, %v647_v30 }
 0x222   : > { %v628_v61 = vadd.f32 %v627_v47, %v11824_v32  ;;  %v567_v17 = vadd.f32 %v566_v33, %v11824_v32  ;;  %v629_v29 = vpop.f32.mrb[21].mxu1  ;;  %v568_v28 = vpop.f32.mrb[22].mxu0  ;;  %742 = vmatprep.subr.bf16.mxu0 %v665_v62  ;;  %v10994_v47 = vld [vmem:[%s14592_s1 + $0x30] sm:$0xff]  }
 0x223   : > { %v630_v26 = vadd.f32 %v629_v29, %v11824_v32  ;;  %v569_v11 = vadd.f32 %v568_v28, %v11822_v31  ;;  %v631_v6 = vpop.f32.mrb[22].mxu1  ;;  %805 = vmatprep.subr.bf16.mxu1 %v667_v18  ;;  %v570_v10 = vpop.f32.mrb[23].mxu0  ;;  %743 = vmatpush1.bf16.msra.mxu0 %v664_v0  ;;  %v652_v4 = vmax.f32 %v565_v24, 0.0 }
 0x224   : > { %v632_v13 = vadd.f32 %v631_v6, %v11822_v31  ;;  %v571_v3 = vadd.f32 %v570_v10, %v11822_v31  ;;  %v633_v63 = vpop.f32.mrb[23].mxu1  ;;  %806 = vmatpush1.bf16.msra.mxu1 %v666_v27  ;;  %v654_v58 = vmax.f32 %v628_v61, 0.0  ;;  %v653_v9 = vmax.f32 %v567_v17, 0.0  ;;  %v10996_v27 = vld [vmem:[%s14592_s1 + $0x40] sm:$0xff]  }
 0x225   : > { %v656_v2 = vmax.f32 %v569_v11, 0.0  ;;  %v634_v38 = vadd.f32 %v633_v63, %v11822_v31  ;;  %v655_v20 = vmax.f32 %v630_v26, 0.0  ;;  %v10995_v31 = vld [vmem:[%s14592_s1 + $0x38] sm:$0xff]  }
 0x226   : > { %v658_v60 = vmax.f32 %v632_v13, 0.0  ;;  %v657_v32 = vmax.f32 %v571_v3, 0.0 }
 0x227   : > { %v668_v5 = vpack.c.bf16 %v656_v2, %v652_v4  ;;  %v659_v30 = vmax.f32 %v634_v38, 0.0 }
 0x228   : > { %v670_v19 = vpack.c.bf16 %v658_v60, %v654_v58  ;;  %v669_v22 = vpack.c.bf16 %v657_v32, %v653_v9 }
 0x229   : > { %v671_v0 = vpack.c.bf16 %v659_v30, %v655_v20 }
 0x22a   : > { %744 = vmatprep.subr.bf16.mxu0 %v669_v22 }
 0x22b   : > { %807 = vmatprep.subr.bf16.mxu1 %v671_v0  ;;  %745 = vmatpush1.bf16.msra.mxu0 %v668_v5 }
 0x22c   : > { %808 = vmatpush1.bf16.msra.mxu1 %v670_v19 }
 0x22e   : > { %10031 = vmatmul.mubr.msk.bf16.vlgmr.msra.gmra.mrb[24].mxu0 %vm270_vm0, %v10994_v47 }
 0x22f   : > { %10034 = vmatmul.mubr.msk.bf16.vlgmr.msra.gmra.mrb[24].mxu1 %vm270_vm0, %v10994_v47  ;;  %782 = vmatprep.mubr.bf16.mxu0 %v14836_v25 }
 0x230   : > { %845 = vmatprep.mubr.bf16.mxu1 %v14836_v25 }
 0x236   : > { %10032 = vmatmul.mubr.msk.bf16.gmra.mrb[28].mxu0 %vm270_vm0, %v10995_v31 }
 0x237   : > { %10035 = vmatmul.mubr.msk.bf16.gmra.mrb[28].mxu1 %vm270_vm0, %v10995_v31  ;;  %792 = vmatprep.mubr.bf16.mxu0 %v14836_v25 }
 0x238   : > { %855 = vmatprep.mubr.bf16.mxu1 %v14836_v25 }
 0x23e   : > { %10033 = vmatmul.mubr.msk.bf16.gmra.mrb[32].mxu0 %vm270_vm0, %v10996_v27 }
 0x23f   : > { %10036 = vmatmul.mubr.msk.bf16.gmra.mrb[32].mxu1 %vm270_vm0, %v10996_v27  ;;  %1002 = vmatprep.mubr.bf16.mxu0 %v14836_v25 }
 0x240   : > { %1065 = vmatprep.mubr.bf16.mxu1 %v14836_v25 }
 0x301   : > { %v774_v62 = vpop.f32.mrb[24].mxu0 }
 0x302   : > { %v775_v24 = vadd.f32 %v774_v62, %v11830_v35  ;;  %v837_v33 = vpop.f32.mrb[24].mxu1  ;;  %v776_v18 = vpop.f32.mrb[25].mxu0 }
 0x303   : > { %v838_v61 = vadd.f32 %v837_v33, %v11830_v35  ;;  %v777_v17 = vadd.f32 %v776_v18, %v11830_v35  ;;  %v839_v29 = vpop.f32.mrb[25].mxu1  ;;  %v778_v28 = vpop.f32.mrb[26].mxu0 }
 0x304   : > { %v840_v26 = vadd.f32 %v839_v29, %v11830_v35  ;;  %v779_v11 = vadd.f32 %v778_v28, %v11828_v34  ;;  %v841_v6 = vpop.f32.mrb[26].mxu1  ;;  %v780_v10 = vpop.f32.mrb[27].mxu0  ;;  %v866_v4 = vmax.f32 %v775_v24, 0.0 }
 0x305   : > { %v842_v13 = vadd.f32 %v841_v6, %v11828_v34  ;;  %v781_v3 = vadd.f32 %v780_v10, %v11828_v34  ;;  %v843_v63 = vpop.f32.mrb[27].mxu1  ;;  %v868_v58 = vmax.f32 %v838_v61, 0.0  ;;  %v867_v9 = vmax.f32 %v777_v17, 0.0  ;;  %v14888_v61 = vld [vmem:[#allocation16_spill] sm:$0xff] }
 0x306   : > { %v870_v2 = vmax.f32 %v779_v11, 0.0  ;;  %v844_v38 = vadd.f32 %v843_v63, %v11828_v34  ;;  %v869_v20 = vmax.f32 %v840_v26, 0.0 }
 0x307   : > { %v872_v60 = vmax.f32 %v842_v13, 0.0  ;;  %v871_v32 = vmax.f32 %v781_v3, 0.0 }
 0x308   : > { %v890_v5 = vpack.c.bf16 %v870_v2, %v866_v4  ;;  %v873_v35 = vmax.f32 %v844_v38, 0.0 }
 0x309   : > { %v892_v30 = vpack.c.bf16 %v872_v60, %v868_v58  ;;  %v784_v19 = vpop.f32.mrb[28].mxu0  ;;  %v891_v22 = vpack.c.bf16 %v871_v32, %v867_v9 }
 0x30a   : > { %v785_v0 = vadd.f32 %v784_v19, %v11836_v37  ;;  %v847_v47 = vpop.f32.mrb[28].mxu1  ;;  %v786_v31 = vpop.f32.mrb[29].mxu0  ;;  %v893_v27 = vpack.c.bf16 %v873_v35, %v869_v20 }
 0x30b   : > { %v848_v62 = vadd.f32 %v847_v47, %v11836_v37  ;;  %v787_v24 = vadd.f32 %v786_v31, %v11836_v37  ;;  %v849_v34 = vpop.f32.mrb[29].mxu1  ;;  %v788_v33 = vpop.f32.mrb[30].mxu0  ;;  %970 = vmatprep.subr.bf16.mxu0 %v891_v22 }
 0x30c   : > { %v850_v18 = vadd.f32 %v849_v34, %v11836_v37  ;;  %v789_v17 = vadd.f32 %v788_v33, %v14888_v61  ;;  %v851_v29 = vpop.f32.mrb[30].mxu1  ;;  %1033 = vmatprep.subr.bf16.mxu1 %v893_v27  ;;  %v790_v28 = vpop.f32.mrb[31].mxu0  ;;  %971 = vmatpush1.bf16.msra.mxu0 %v890_v5  ;;  %v874_v10 = vmax.f32 %v785_v0, 0.0  ;;  %v14889_v5 = vld [vmem:[#allocation18_spill] sm:$0xff] }
 0x30d   : > { %v852_v26 = vadd.f32 %v851_v29, %v14888_v61  ;;  %v791_v11 = vadd.f32 %v790_v28, %v14888_v61  ;;  %v853_v6 = vpop.f32.mrb[31].mxu1  ;;  %1034 = vmatpush1.bf16.msra.mxu1 %v892_v30  ;;  %v876_v63 = vmax.f32 %v848_v62, 0.0  ;;  %v875_v4 = vmax.f32 %v787_v24, 0.0  ;;  %v14890_v24 = vld [vmem:[#allocation17_spill] sm:$0xff] }
 0x30e   : > { %v878_v13 = vmax.f32 %v789_v17, 0.0  ;;  %v854_v3 = vadd.f32 %v853_v6, %v14888_v61  ;;  %v877_v38 = vmax.f32 %v850_v18, 0.0 }
 0x30f   : > { %v880_v2 = vmax.f32 %v852_v26, 0.0  ;;  %v879_v37 = vmax.f32 %v791_v11, 0.0 }
 0x310   : > { %v894_v58 = vpack.c.bf16 %v878_v13, %v874_v10  ;;  %v881_v9 = vmax.f32 %v854_v3, 0.0 }
 0x311   : > { %v896_v60 = vpack.c.bf16 %v880_v2, %v876_v63  ;;  %v794_v32 = vpop.f32.mrb[32].mxu0  ;;  %v895_v20 = vpack.c.bf16 %v879_v37, %v875_v4 }
 0x312   : > { %v795_v35 = vadd.f32 %v794_v32, %v14889_v5  ;;  %v857_v19 = vpop.f32.mrb[32].mxu1  ;;  %v796_v22 = vpop.f32.mrb[33].mxu0  ;;  %v897_v47 = vpack.c.bf16 %v881_v9, %v877_v38  ;;  %v10997_v9 = vld [vmem:[%s14592_s1 + $0x48] sm:$0xff]   ;;  %v10999_v32 = vld [vmem:[%s14592_s1 + $0x58] sm:$0xff]  }
 0x313   : > { %v858_v30 = vadd.f32 %v857_v19, %v14889_v5  ;;  %v797_v0 = vadd.f32 %v796_v22, %v14889_v5  ;;  %v859_v31 = vpop.f32.mrb[33].mxu1  ;;  %v798_v27 = vpop.f32.mrb[34].mxu0  ;;  %972 = vmatprep.subr.bf16.mxu0 %v895_v20 }
 0x314   : > { %v860_v62 = vadd.f32 %v859_v31, %v14889_v5  ;;  %v799_v34 = vadd.f32 %v798_v27, %v14890_v24  ;;  %v861_v33 = vpop.f32.mrb[34].mxu1  ;;  %1035 = vmatprep.subr.bf16.mxu1 %v897_v47  ;;  %v800_v18 = vpop.f32.mrb[35].mxu0  ;;  %973 = vmatpush1.bf16.msra.mxu0 %v894_v58  ;;  %v882_v28 = vmax.f32 %v795_v35, 0.0  ;;  %v14891_v5 = vld [vmem:[#allocation20_spill] sm:$0xff] }
 0x315   : > { %v862_v61 = vadd.f32 %v861_v33, %v14890_v24  ;;  %v801_v17 = vadd.f32 %v800_v18, %v14890_v24  ;;  %v863_v29 = vpop.f32.mrb[35].mxu1  ;;  %1036 = vmatpush1.bf16.msra.mxu1 %v896_v60  ;;  %v884_v6 = vmax.f32 %v858_v30, 0.0  ;;  %v883_v10 = vmax.f32 %v797_v0, 0.0  ;;  %v10998_v60 = vld [vmem:[%s14592_s1 + $0x50] sm:$0xff]  }
 0x316   : > { %v886_v26 = vmax.f32 %v799_v34, 0.0  ;;  %v864_v11 = vadd.f32 %v863_v29, %v14890_v24  ;;  %v885_v63 = vmax.f32 %v860_v62, 0.0  ;;  %v14892_v62 = vld [vmem:[#allocation19_spill] sm:$0xff] }
 0x317   : > { %v888_v13 = vmax.f32 %v862_v61, 0.0  ;;  %v887_v3 = vmax.f32 %v801_v17, 0.0 }
 0x318   : > { %v898_v4 = vpack.c.bf16 %v886_v26, %v882_v28  ;;  %v889_v2 = vmax.f32 %v864_v11, 0.0 }
 0x319   : > { %v900_v37 = vpack.c.bf16 %v888_v13, %v884_v6  ;;  %v899_v38 = vpack.c.bf16 %v887_v3, %v883_v10 }
 0x31a   : > { %v901_v58 = vpack.c.bf16 %v889_v2, %v885_v63 }
 0x31b   : > { %974 = vmatprep.subr.bf16.mxu0 %v899_v38 }
 0x31c   : > { %1037 = vmatprep.subr.bf16.mxu1 %v901_v58  ;;  %975 = vmatpush1.bf16.msra.mxu0 %v898_v4  ;;  %v14893_v58 = vld [vmem:[#allocation22_spill] sm:$0xff] }
 0x31d   : > { %1038 = vmatpush1.bf16.msra.mxu1 %v900_v37 }
 0x31f   : > { %10052 = vmatmul.mubr.msk.bf16.vlgmr.msra.gmra.mrb[36].mxu0 %vm270_vm0, %v10997_v9 }
 0x320   : > { %10055 = vmatmul.mubr.msk.bf16.vlgmr.msra.gmra.mrb[36].mxu1 %vm270_vm0, %v10997_v9  ;;  %1012 = vmatprep.mubr.bf16.mxu0 %v14836_v25 }
 0x321   : > { %1075 = vmatprep.mubr.bf16.mxu1 %v14836_v25 }
 0x327   : > { %10053 = vmatmul.mubr.msk.bf16.gmra.mrb[40].mxu0 %vm270_vm0, %v10998_v60 }
 0x328   : > { %10056 = vmatmul.mubr.msk.bf16.gmra.mrb[40].mxu1 %vm270_vm0, %v10998_v60  ;;  %1022 = vmatprep.mubr.bf16.mxu0 %v14836_v25 }
 0x329   : > { %1085 = vmatprep.mubr.bf16.mxu1 %v14836_v25 }
 0x32f   : > { %10054 = vmatmul.mubr.msk.bf16.gmra.mrb[44].mxu0 %vm270_vm0, %v10999_v32 }
 0x330   : > { %10057 = vmatmul.mubr.msk.bf16.gmra.mrb[44].mxu1 %vm270_vm0, %v10999_v32  ;;  %1230 = vmatprep.mubr.bf16.mxu0 %v14836_v25 }
 0x331   : > { %1289 = vmatprep.mubr.bf16.mxu1 %v14836_v25 }
 0x3f2   : > { %v1004_v20 = vpop.f32.mrb[36].mxu0 }
 0x3f3   : > { %v1005_v35 = vadd.f32 %v1004_v20, %v14891_v5  ;;  %v1067_v19 = vpop.f32.mrb[36].mxu1  ;;  %v1006_v22 = vpop.f32.mrb[37].mxu0 }
 0x3f4   : > { %v1068_v47 = vadd.f32 %v1067_v19, %v14891_v5  ;;  %v1007_v30 = vadd.f32 %v1006_v22, %v14891_v5  ;;  %v1069_v0 = vpop.f32.mrb[37].mxu1  ;;  %v1008_v31 = vpop.f32.mrb[38].mxu0 }
 0x3f5   : > { %v1070_v27 = vadd.f32 %v1069_v0, %v14891_v5  ;;  %v1009_v24 = vadd.f32 %v1008_v31, %v14892_v62  ;;  %v1071_v34 = vpop.f32.mrb[38].mxu1  ;;  %v1010_v33 = vpop.f32.mrb[39].mxu0  ;;  %v1096_v29 = vmax.f32 %v1005_v35, 0.0 }
 0x3f6   : > { %v1072_v18 = vadd.f32 %v1071_v34, %v14892_v62  ;;  %v1011_v61 = vadd.f32 %v1010_v33, %v14892_v62  ;;  %v1073_v17 = vpop.f32.mrb[39].mxu1  ;;  %v1098_v11 = vmax.f32 %v1068_v47, 0.0  ;;  %v1097_v6 = vmax.f32 %v1007_v30, 0.0  ;;  %v14894_v30 = vld [vmem:[#allocation21_spill] sm:$0xff] }
 0x3f7   : > { %v1100_v28 = vmax.f32 %v1009_v24, 0.0  ;;  %v1074_v26 = vadd.f32 %v1073_v17, %v14892_v62  ;;  %v1099_v3 = vmax.f32 %v1070_v27, 0.0 }
 0x3f8   : > { %v1102_v10 = vmax.f32 %v1072_v18, 0.0  ;;  %v1101_v13 = vmax.f32 %v1011_v61, 0.0 }
 0x3f9   : > { %v1120_v63 = vpack.c.bf16 %v1100_v28, %v1096_v29  ;;  %v1103_v4 = vmax.f32 %v1074_v26, 0.0 }
 0x3fa   : > { %v1122_v2 = vpack.c.bf16 %v1102_v10, %v1098_v11  ;;  %v1014_v37 = vpop.f32.mrb[40].mxu0  ;;  %v1121_v38 = vpack.c.bf16 %v1101_v13, %v1097_v6 }
 0x3fb   : > { %v1015_v9 = vadd.f32 %v1014_v37, %v14893_v58  ;;  %v1077_v60 = vpop.f32.mrb[40].mxu1  ;;  %v1016_v32 = vpop.f32.mrb[41].mxu0  ;;  %v1123_v20 = vpack.c.bf16 %v1103_v4, %v1099_v3  ;;  %v14895_v4 = vld [vmem:[#allocation24_spill] sm:$0xff] }
 0x3fc   : > { %v1078_v5 = vadd.f32 %v1077_v60, %v14893_v58  ;;  %v1017_v35 = vadd.f32 %v1016_v32, %v14893_v58  ;;  %v1079_v19 = vpop.f32.mrb[41].mxu1  ;;  %v1018_v22 = vpop.f32.mrb[42].mxu0  ;;  %1198 = vmatprep.subr.bf16.mxu0 %v1121_v38 }
 0x3fd   : > { %v1080_v47 = vadd.f32 %v1079_v19, %v14893_v58  ;;  %v1019_v0 = vadd.f32 %v1018_v22, %v14894_v30  ;;  %v1081_v31 = vpop.f32.mrb[42].mxu1  ;;  %1257 = vmatprep.subr.bf16.mxu1 %v1123_v20  ;;  %v1020_v27 = vpop.f32.mrb[43].mxu0  ;;  %1199 = vmatpush1.bf16.msra.mxu0 %v1120_v63  ;;  %v1104_v33 = vmax.f32 %v1015_v9, 0.0 }
 0x3fe   : > { %v1082_v62 = vadd.f32 %v1081_v31, %v14894_v30  ;;  %v1021_v24 = vadd.f32 %v1020_v27, %v14894_v30  ;;  %v1083_v34 = vpop.f32.mrb[43].mxu1  ;;  %1258 = vmatpush1.bf16.msra.mxu1 %v1122_v2  ;;  %v1106_v17 = vmax.f32 %v1078_v5, 0.0  ;;  %v1105_v29 = vmax.f32 %v1017_v35, 0.0  ;;  %v14896_v35 = vld [vmem:[#allocation23_spill] sm:$0xff] }
 0x3ff   : > { %v1108_v18 = vmax.f32 %v1019_v0, 0.0  ;;  %v1084_v61 = vadd.f32 %v1083_v34, %v14894_v30  ;;  %v1107_v11 = vmax.f32 %v1080_v47, 0.0 }
 0x400   : > { %v1110_v28 = vmax.f32 %v1082_v62, 0.0  ;;  %v1109_v26 = vmax.f32 %v1021_v24, 0.0 }
 0x401   : > { %v1124_v6 = vpack.c.bf16 %v1108_v18, %v1104_v33  ;;  %v1111_v10 = vmax.f32 %v1084_v61, 0.0 }
 0x402   : > { %v1126_v13 = vpack.c.bf16 %v1110_v28, %v1106_v17  ;;  %v1024_v3 = vpop.f32.mrb[44].mxu0  ;;  %v1125_v63 = vpack.c.bf16 %v1109_v26, %v1105_v29 }
 0x403   : > { %v1025_v37 = vadd.f32 %v1024_v3, %v14895_v4  ;;  %v1087_v38 = vpop.f32.mrb[44].mxu1  ;;  %v1026_v58 = vpop.f32.mrb[45].mxu0  ;;  %v1127_v60 = vpack.c.bf16 %v1111_v10, %v1107_v11  ;;  %v11000_v10 = vld [vmem:[%s14592_s1 + $0x60] sm:$0xff]   ;;  %v14898_v3 = vld [vmem:[#allocation9_spill] sm:$0xff] }
 0x404   : > { %v1088_v2 = vadd.f32 %v1087_v38, %v14895_v4  ;;  %v1027_v9 = vadd.f32 %v1026_v58, %v14895_v4  ;;  %v1089_v32 = vpop.f32.mrb[45].mxu1  ;;  %v1028_v20 = vpop.f32.mrb[46].mxu0  ;;  %1200 = vmatprep.subr.bf16.mxu0 %v1125_v63  ;;  %v14899_v63 = vld [vmem:[#allocation10_spill] sm:$0xff] }
 0x405   : > { %v1090_v5 = vadd.f32 %v1089_v32, %v14895_v4  ;;  %v1029_v19 = vadd.f32 %v1028_v20, %v14896_v35  ;;  %v1091_v22 = vpop.f32.mrb[46].mxu1  ;;  %1259 = vmatprep.subr.bf16.mxu1 %v1127_v60  ;;  %v1030_v47 = vpop.f32.mrb[47].mxu0  ;;  %1201 = vmatpush1.bf16.msra.mxu0 %v1124_v6  ;;  %v1112_v27 = vmax.f32 %v1025_v37, 0.0  ;;  %v14900_v4 = vld [vmem:[#allocation11_spill] sm:$0xff]  ;;  %v11001_v37 = vld [vmem:[%s14592_s1 + $0x68] sm:$0xff]   ;;  %v11002_v38 = vld [vmem:[%s14592_s1 + $0x70] sm:$0xff]  }
 0x406   : > { %v1092_v30 = vadd.f32 %v1091_v22, %v14896_v35  ;;  %v1031_v0 = vadd.f32 %v1030_v47, %v14896_v35  ;;  %v1093_v31 = vpop.f32.mrb[47].mxu1  ;;  %1260 = vmatpush1.bf16.msra.mxu1 %v1126_v13  ;;  %v1114_v34 = vmax.f32 %v1088_v2, 0.0  ;;  %v1113_v33 = vmax.f32 %v1027_v9, 0.0  ;;  %v14897_v13 = vld [vmem:[#allocation8_spill] sm:$0xff]  ;;  %v14901_v60 = vld [vmem:[#allocation26_spill] sm:$0xff]  ;;  %v14902_v47 = vld [vmem:[#allocation25_spill] sm:$0xff] }
 0x407   : > { %v1116_v62 = vmax.f32 %v1029_v19, 0.0  ;;  %v1094_v24 = vadd.f32 %v1093_v31, %v14896_v35  ;;  %v1115_v17 = vmax.f32 %v1090_v5, 0.0 }
 0x408   : > { %v1118_v18 = vmax.f32 %v1092_v30, 0.0  ;;  %v1117_v61 = vmax.f32 %v1031_v0, 0.0 }
 0x409   : > { %v1128_v29 = vpack.c.bf16 %v1116_v62, %v1112_v27  ;;  %v1119_v28 = vmax.f32 %v1094_v24, 0.0 }
 0x40a   : > { %v1130_v26 = vpack.c.bf16 %v1118_v18, %v1114_v34  ;;  %v1129_v11 = vpack.c.bf16 %v1117_v61, %v1113_v33 }
 0x40b   : > { %v1131_v6 = vpack.c.bf16 %v1119_v28, %v1115_v17 }
 0x40c   : > { %1202 = vmatprep.subr.bf16.mxu0 %v1129_v11 }
 0x40d   : > { %1261 = vmatprep.subr.bf16.mxu1 %v1131_v6  ;;  %1203 = vmatpush1.bf16.msra.mxu0 %v1128_v29 }
 0x40e   : > { %1262 = vmatpush1.bf16.msra.mxu1 %v1130_v26  ;;  %1408 = vmatprep.subr.bf16.mxu0 %v14897_v13 }
 0x40f   : > { %1471 = vmatprep.subr.bf16.mxu1 %v14898_v3 }
 0x410   : > { %10073 = vmatmul.mubr.msk.bf16.vlgmr.msra.gmra.mrb[48].mxu0 %vm270_vm0, %v11000_v10 }
 0x411   : > { %10076 = vmatmul.mubr.msk.bf16.vlgmr.msra.gmra.mrb[48].mxu1 %vm270_vm0, %v11000_v10  ;;  %1240 = vmatprep.mubr.bf16.mxu0 %v14836_v25 }
 0x412   : > { %1299 = vmatprep.mubr.bf16.mxu1 %v14836_v25  ;;  %1409 = vmatpush1.bf16.msra.mxu0 %v14899_v63  ;;  %v14903_v63 = vld [vmem:[#allocation28_spill] sm:$0xff] }
 0x413   : > { %1472 = vmatpush1.bf16.msra.mxu1 %v14900_v4 }
 0x418   : > { %10074 = vmatmul.mubr.msk.bf16.gmra.mrb[52].mxu0 %vm270_vm0, %v11001_v37 }
 0x419   : > { %10077 = vmatmul.mubr.msk.bf16.gmra.mrb[52].mxu1 %vm270_vm0, %v11001_v37  ;;  %1250 = vmatprep.mubr.bf16.mxu0 %v14836_v25 }
 0x41a   : > { %1309 = vmatprep.mubr.bf16.mxu1 %v14836_v25 }
 0x420   : > { %10075 = vmatmul.mubr.msk.bf16.gmra.mrb[56].mxu0 %vm270_vm0, %v11002_v38 }
 0x421   : > { %10078 = vmatmul.mubr.msk.bf16.gmra.mrb[56].mxu1 %vm270_vm0, %v11002_v38  ;;  %1440 = vmatprep.mubr.bf16.mxu0 %v14836_v25 }
 0x422   : > { %1503 = vmatprep.mubr.bf16.mxu1 %v14836_v25 }
 0x4e3   : > { %v1232_v58 = vpop.f32.mrb[48].mxu0 }
 0x4e4   : > { %v1233_v2 = vadd.f32 %v1232_v58, %v14901_v60  ;;  %v1291_v9 = vpop.f32.mrb[48].mxu1  ;;  %v1234_v32 = vpop.f32.mrb[49].mxu0 }
 0x4e5   : > { %v1292_v20 = vadd.f32 %v1291_v9, %v14901_v60  ;;  %v1235_v5 = vadd.f32 %v1234_v32, %v14901_v60  ;;  %v1293_v35 = vpop.f32.mrb[49].mxu1  ;;  %v1236_v19 = vpop.f32.mrb[50].mxu0 }
 0x4e6   : > { %v1294_v22 = vadd.f32 %v1293_v35, %v14901_v60  ;;  %v1237_v30 = vadd.f32 %v1236_v19, %v14902_v47  ;;  %v1295_v0 = vpop.f32.mrb[50].mxu1  ;;  %v1238_v31 = vpop.f32.mrb[51].mxu0  ;;  %v1316_v34 = vmax.f32 %v1233_v2, 0.0 }
 0x4e7   : > { %v1296_v27 = vadd.f32 %v1295_v0, %v14902_v47  ;;  %v1239_v62 = vadd.f32 %v1238_v31, %v14902_v47  ;;  %v1297_v24 = vpop.f32.mrb[51].mxu1  ;;  %v1318_v61 = vmax.f32 %v1292_v20, 0.0  ;;  %v1317_v17 = vmax.f32 %v1235_v5, 0.0  ;;  %v14904_v5 = vld [vmem:[#allocation27_spill] sm:$0xff] }
 0x4e8   : > { %v1320_v33 = vmax.f32 %v1237_v30, 0.0  ;;  %v1298_v18 = vadd.f32 %v1297_v24, %v14902_v47  ;;  %v1319_v26 = vmax.f32 %v1294_v22, 0.0 }
 0x4e9   : > { %v1322_v29 = vmax.f32 %v1296_v27, 0.0  ;;  %v1321_v28 = vmax.f32 %v1239_v62, 0.0 }
 0x4ea   : > { %v1332_v11 = vpack.c.bf16 %v1320_v33, %v1316_v34  ;;  %v1323_v6 = vmax.f32 %v1298_v18, 0.0 }
 0x4eb   : > { %v1334_v10 = vpack.c.bf16 %v1322_v29, %v1318_v61  ;;  %v1242_v13 = vpop.f32.mrb[52].mxu0  ;;  %v1333_v3 = vpack.c.bf16 %v1321_v28, %v1317_v17 }
 0x4ec   : > { %v1243_v4 = vadd.f32 %v1242_v13, %v14903_v63  ;;  %v1301_v37 = vpop.f32.mrb[52].mxu1  ;;  %v1244_v38 = vpop.f32.mrb[53].mxu0  ;;  %v1335_v58 = vpack.c.bf16 %v1323_v6, %v1319_v26  ;;  %v11003_v6 = vld [vmem:[%s14592_s1 + $0x78] sm:$0xff]   ;;  %v11005_v13 = vld [vmem:[%s14592_s1 + $0x88] sm:$0xff]  }
 0x4ed   : > { %v1302_v60 = vadd.f32 %v1301_v37, %v14903_v63  ;;  %v1245_v2 = vadd.f32 %v1244_v38, %v14903_v63  ;;  %v1303_v9 = vpop.f32.mrb[53].mxu1  ;;  %v1246_v32 = vpop.f32.mrb[54].mxu0  ;;  %1410 = vmatprep.subr.bf16.mxu0 %v1333_v3 }
 0x4ee   : > { %v1304_v20 = vadd.f32 %v1303_v9, %v14903_v63  ;;  %v1247_v35 = vadd.f32 %v1246_v32, %v14904_v5  ;;  %v1305_v19 = vpop.f32.mrb[54].mxu1  ;;  %1473 = vmatprep.subr.bf16.mxu1 %v1335_v58  ;;  %v1248_v22 = vpop.f32.mrb[55].mxu0  ;;  %1411 = vmatpush1.bf16.msra.mxu0 %v1332_v11  ;;  %v1324_v31 = vmax.f32 %v1243_v4, 0.0  ;;  %v14905_v32 = vld [vmem:[#allocation30_spill] sm:$0xff] }
 0x4ef   : > { %v1306_v47 = vadd.f32 %v1305_v19, %v14904_v5  ;;  %v1249_v30 = vadd.f32 %v1248_v22, %v14904_v5  ;;  %v1307_v0 = vpop.f32.mrb[55].mxu1  ;;  %1474 = vmatpush1.bf16.msra.mxu1 %v1334_v10  ;;  %v1326_v24 = vmax.f32 %v1302_v60, 0.0  ;;  %v1325_v34 = vmax.f32 %v1245_v2, 0.0  ;;  %v11004_v10 = vld [vmem:[%s14592_s1 + $0x80] sm:$0xff]  }
 0x4f0   : > { %v1328_v27 = vmax.f32 %v1247_v35, 0.0  ;;  %v1308_v62 = vadd.f32 %v1307_v0, %v14904_v5  ;;  %v1327_v61 = vmax.f32 %v1304_v20, 0.0 }
 0x4f1   : > { %v1330_v33 = vmax.f32 %v1306_v47, 0.0  ;;  %v1329_v18 = vmax.f32 %v1249_v30, 0.0 }
 0x4f2   : > { %v1336_v17 = vpack.c.bf16 %v1328_v27, %v1324_v31  ;;  %v1331_v29 = vmax.f32 %v1308_v62, 0.0  ;;  %v14906_v31 = vld [vmem:[#allocation29_spill] sm:$0xff] }
 0x4f3   : > { %v1338_v28 = vpack.c.bf16 %v1330_v33, %v1326_v24  ;;  %v1337_v26 = vpack.c.bf16 %v1329_v18, %v1325_v34  ;;  %v1252_v3 = vpop.f32.mrb[56].mxu0 }
 0x4f4   : > { %v1339_v11 = vpack.c.bf16 %v1331_v29, %v1327_v61  ;;  %v1311_v63 = vpop.f32.mrb[56].mxu1  ;;  %v1253_v4 = vpop.f32.mrb[57].mxu0 }
 0x4f5   : > { %1412 = vmatprep.subr.bf16.mxu0 %v1337_v26  ;;  %v1312_v37 = vpop.f32.mrb[57].mxu1  ;;  %v1254_v38 = vpop.f32.mrb[58].mxu0 }
 0x4f6   : > { %1475 = vmatprep.subr.bf16.mxu1 %v1339_v11  ;;  %1413 = vmatpush1.bf16.msra.mxu0 %v1336_v17  ;;  %v1313_v58 = vpop.f32.mrb[58].mxu1  ;;  %v1255_v60 = vpop.f32.mrb[59].mxu0  ;;  %v14907_v38 = vld [vmem:[#allocation32_spill] sm:$0xff] }
 0x4f7   : > { %1476 = vmatpush1.bf16.msra.mxu1 %v1338_v28  ;;  %v1314_v2 = vpop.f32.mrb[59].mxu1 }
 0x4f9   : > { %10094 = vmatmul.mubr.msk.bf16.vlgmr.msra.gmra.mrb[60].mxu0 %vm270_vm0, %v11003_v6 }
 0x4fa   : > { %10097 = vmatmul.mubr.msk.bf16.vlgmr.msra.gmra.mrb[60].mxu1 %vm270_vm0, %v11003_v6  ;;  %1450 = vmatprep.mubr.bf16.mxu0 %v14836_v25 }
 0x4fb   : > { %1513 = vmatprep.mubr.bf16.mxu1 %v14836_v25 }
 0x501   : > { %10095 = vmatmul.mubr.msk.bf16.gmra.mrb[64].mxu0 %vm270_vm0, %v11004_v10 }
 0x502   : > { %10098 = vmatmul.mubr.msk.bf16.gmra.mrb[64].mxu1 %vm270_vm0, %v11004_v10  ;;  %1460 = vmatprep.mubr.bf16.mxu0 %v14836_v25 }
 0x503   : > { %1523 = vmatprep.mubr.bf16.mxu1 %v14836_v25 }
 0x509   : > { %10096 = vmatmul.mubr.msk.bf16.gmra.mrb[68].mxu0 %vm270_vm0, %v11005_v13 }
 0x50a   : > { %10099 = vmatmul.mubr.msk.bf16.gmra.mrb[68].mxu1 %vm270_vm0, %v11005_v13  ;;  %1670 = vmatprep.mubr.bf16.mxu0 %v14836_v25 }
 0x50b   : > { %1733 = vmatprep.mubr.bf16.mxu1 %v14836_v25 }
 0x5cc   : > { %v1442_v9 = vpop.f32.mrb[60].mxu0 }
 0x5cd   : > { %v1443_v20 = vadd.f32 %v1442_v9, %v14905_v32  ;;  %v1505_v5 = vpop.f32.mrb[60].mxu1  ;;  %v1444_v35 = vpop.f32.mrb[61].mxu0 }
 0x5ce   : > { %v1506_v19 = vadd.f32 %v1505_v5, %v14905_v32  ;;  %v1445_v22 = vadd.f32 %v1444_v35, %v14905_v32  ;;  %v1507_v47 = vpop.f32.mrb[61].mxu1  ;;  %v1446_v30 = vpop.f32.mrb[62].mxu0 }
 0x5cf   : > { %v1508_v0 = vadd.f32 %v1507_v47, %v14905_v32  ;;  %v1447_v27 = vadd.f32 %v1446_v30, %v14906_v31  ;;  %v1509_v62 = vpop.f32.mrb[62].mxu1  ;;  %v1448_v24 = vpop.f32.mrb[63].mxu0  ;;  %v1534_v61 = vmax.f32 %v1443_v20, 0.0 }
 0x5d0   : > { %v1510_v34 = vadd.f32 %v1509_v62, %v14906_v31  ;;  %v1449_v33 = vadd.f32 %v1448_v24, %v14906_v31  ;;  %v1511_v18 = vpop.f32.mrb[63].mxu1  ;;  %v1536_v28 = vmax.f32 %v1506_v19, 0.0  ;;  %v1535_v26 = vmax.f32 %v1445_v22, 0.0  ;;  %v14908_v22 = vld [vmem:[#allocation31_spill] sm:$0xff] }
 0x5d1   : > { %v1538_v17 = vmax.f32 %v1447_v27, 0.0  ;;  %v1512_v29 = vadd.f32 %v1511_v18, %v14906_v31  ;;  %v1537_v10 = vmax.f32 %v1508_v0, 0.0 }
 0x5d2   : > { %v1540_v11 = vmax.f32 %v1510_v34, 0.0  ;;  %v1539_v6 = vmax.f32 %v1449_v33, 0.0 }
 0x5d3   : > { %v1558_v13 = vpack.c.bf16 %v1538_v17, %v1534_v61  ;;  %v1541_v3 = vmax.f32 %v1512_v29, 0.0 }
 0x5d4   : > { %v1560_v63 = vpack.c.bf16 %v1540_v11, %v1536_v28  ;;  %v1452_v4 = vpop.f32.mrb[64].mxu0  ;;  %v1559_v37 = vpack.c.bf16 %v1539_v6, %v1535_v26 }
 0x5d5   : > { %v1453_v58 = vadd.f32 %v1452_v4, %v14907_v38  ;;  %v1515_v60 = vpop.f32.mrb[64].mxu1  ;;  %v1454_v2 = vpop.f32.mrb[65].mxu0  ;;  %v1561_v9 = vpack.c.bf16 %v1541_v3, %v1537_v10  ;;  %v14909_v3 = vld [vmem:[#allocation34_spill] sm:$0xff] }
 0x5d6   : > { %v1516_v32 = vadd.f32 %v1515_v60, %v14907_v38  ;;  %v1455_v20 = vadd.f32 %v1454_v2, %v14907_v38  ;;  %v1517_v5 = vpop.f32.mrb[65].mxu1  ;;  %v1456_v35 = vpop.f32.mrb[66].mxu0  ;;  %1638 = vmatprep.subr.bf16.mxu0 %v1559_v37 }
 0x5d7   : > { %v1518_v19 = vadd.f32 %v1517_v5, %v14907_v38  ;;  %v1457_v47 = vadd.f32 %v1456_v35, %v14908_v22  ;;  %v1519_v30 = vpop.f32.mrb[66].mxu1  ;;  %1701 = vmatprep.subr.bf16.mxu1 %v1561_v9  ;;  %v1458_v0 = vpop.f32.mrb[67].mxu0  ;;  %1639 = vmatpush1.bf16.msra.mxu0 %v1558_v13  ;;  %v1542_v24 = vmax.f32 %v1453_v58, 0.0 }
 0x5d8   : > { %v1520_v31 = vadd.f32 %v1519_v30, %v14908_v22  ;;  %v1459_v27 = vadd.f32 %v1458_v0, %v14908_v22  ;;  %v1521_v62 = vpop.f32.mrb[67].mxu1  ;;  %1702 = vmatpush1.bf16.msra.mxu1 %v1560_v63  ;;  %v1544_v18 = vmax.f32 %v1516_v32, 0.0  ;;  %v1543_v61 = vmax.f32 %v1455_v20, 0.0  ;;  %v14910_v20 = vld [vmem:[#allocation33_spill] sm:$0xff] }
 0x5d9   : > { %v1546_v34 = vmax.f32 %v1457_v47, 0.0  ;;  %v1522_v33 = vadd.f32 %v1521_v62, %v14908_v22  ;;  %v1545_v28 = vmax.f32 %v1518_v19, 0.0 }
 0x5da   : > { %v1548_v17 = vmax.f32 %v1520_v31, 0.0  ;;  %v1547_v29 = vmax.f32 %v1459_v27, 0.0 }
 0x5db   : > { %v1562_v26 = vpack.c.bf16 %v1546_v34, %v1542_v24  ;;  %v1549_v11 = vmax.f32 %v1522_v33, 0.0 }
 0x5dc   : > { %v1564_v6 = vpack.c.bf16 %v1548_v17, %v1544_v18  ;;  %v1462_v10 = vpop.f32.mrb[68].mxu0  ;;  %v1563_v13 = vpack.c.bf16 %v1547_v29, %v1543_v61 }
 0x5dd   : > { %v1463_v4 = vadd.f32 %v1462_v10, %v14909_v3  ;;  %v1525_v37 = vpop.f32.mrb[68].mxu1  ;;  %v1464_v38 = vpop.f32.mrb[69].mxu0  ;;  %v1565_v60 = vpack.c.bf16 %v1549_v11, %v1545_v28  ;;  %v11006_v11 = vld [vmem:[%s14592_s1 + $0x90] sm:$0xff]   ;;  %v11008_v10 = vld [vmem:[%s14592_s1 + $0xa0] sm:$0xff]  }
 0x5de   : > { %v1526_v63 = vadd.f32 %v1525_v37, %v14909_v3  ;;  %v1465_v58 = vadd.f32 %v1464_v38, %v14909_v3  ;;  %v1527_v2 = vpop.f32.mrb[69].mxu1  ;;  %v1466_v9 = vpop.f32.mrb[70].mxu0  ;;  %1640 = vmatprep.subr.bf16.mxu0 %v1563_v13 }
 0x5df   : > { %v1528_v32 = vadd.f32 %v1527_v2, %v14909_v3  ;;  %v1467_v5 = vadd.f32 %v1466_v9, %v14910_v20  ;;  %v1529_v35 = vpop.f32.mrb[70].mxu1  ;;  %1703 = vmatprep.subr.bf16.mxu1 %v1565_v60  ;;  %v1468_v19 = vpop.f32.mrb[71].mxu0  ;;  %1641 = vmatpush1.bf16.msra.mxu0 %v1562_v26  ;;  %v1550_v0 = vmax.f32 %v1463_v4, 0.0  ;;  %v14911_v3 = vld [vmem:[#allocation36_spill] sm:$0xff] }
 0x5e0   : > { %v1530_v22 = vadd.f32 %v1529_v35, %v14910_v20  ;;  %v1469_v47 = vadd.f32 %v1468_v19, %v14910_v20  ;;  %v1531_v30 = vpop.f32.mrb[71].mxu1  ;;  %1704 = vmatpush1.bf16.msra.mxu1 %v1564_v6  ;;  %v1552_v62 = vmax.f32 %v1526_v63, 0.0  ;;  %v1551_v24 = vmax.f32 %v1465_v58, 0.0  ;;  %v11007_v6 = vld [vmem:[%s14592_s1 + $0x98] sm:$0xff]  }
 0x5e1   : > { %v1554_v31 = vmax.f32 %v1467_v5, 0.0  ;;  %v1532_v27 = vadd.f32 %v1531_v30, %v14910_v20  ;;  %v1553_v18 = vmax.f32 %v1528_v32, 0.0  ;;  %v14912_v32 = vld [vmem:[#allocation35_spill] sm:$0xff] }
 0x5e2   : > { %v1556_v34 = vmax.f32 %v1530_v22, 0.0  ;;  %v1555_v33 = vmax.f32 %v1469_v47, 0.0 }
 0x5e3   : > { %v1566_v61 = vpack.c.bf16 %v1554_v31, %v1550_v0  ;;  %v1557_v17 = vmax.f32 %v1532_v27, 0.0 }
 0x5e4   : > { %v1568_v29 = vpack.c.bf16 %v1556_v34, %v1552_v62  ;;  %v1567_v28 = vpack.c.bf16 %v1555_v33, %v1551_v24 }
 0x5e5   : > { %v1569_v26 = vpack.c.bf16 %v1557_v17, %v1553_v18 }
 0x5e6   : > { %1642 = vmatprep.subr.bf16.mxu0 %v1567_v28 }
 0x5e7   : > { %1705 = vmatprep.subr.bf16.mxu1 %v1569_v26  ;;  %1643 = vmatpush1.bf16.msra.mxu0 %v1566_v61  ;;  %v14913_v26 = vld [vmem:[#allocation38_spill] sm:$0xff] }
 0x5e8   : > { %1706 = vmatpush1.bf16.msra.mxu1 %v1568_v29 }
 0x5ea   : > { %10115 = vmatmul.mubr.msk.bf16.vlgmr.msra.gmra.mrb[72].mxu0 %vm270_vm0, %v11006_v11 }
 0x5eb   : > { %10118 = vmatmul.mubr.msk.bf16.vlgmr.msra.gmra.mrb[72].mxu1 %vm270_vm0, %v11006_v11  ;;  %1680 = vmatprep.mubr.bf16.mxu0 %v14836_v25 }
 0x5ec   : > { %1743 = vmatprep.mubr.bf16.mxu1 %v14836_v25 }
 0x5f2   : > { %10116 = vmatmul.mubr.msk.bf16.gmra.mrb[76].mxu0 %vm270_vm0, %v11007_v6 }
 0x5f3   : > { %10119 = vmatmul.mubr.msk.bf16.gmra.mrb[76].mxu1 %vm270_vm0, %v11007_v6  ;;  %1690 = vmatprep.mubr.bf16.mxu0 %v14836_v25 }
 0x5f4   : > { %1753 = vmatprep.mubr.bf16.mxu1 %v14836_v25 }
 0x5fa   : > { %10117 = vmatmul.mubr.msk.bf16.gmra.mrb[80].mxu0 %vm270_vm0, %v11008_v10 }
 0x5fb   : > { %10120 = vmatmul.mubr.msk.bf16.gmra.mrb[80].mxu1 %vm270_vm0, %v11008_v10  ;;  %1900 = vmatprep.mubr.bf16.mxu0 %v14836_v25 }
 0x5fc   : > { %1963 = vmatprep.mubr.bf16.mxu1 %v14836_v25 }
 0x6bd   : > { %v1672_v13 = vpop.f32.mrb[72].mxu0 }
 0x6be   : > { %v1673_v4 = vadd.f32 %v1672_v13, %v14911_v3  ;;  %v1735_v37 = vpop.f32.mrb[72].mxu1  ;;  %v1674_v38 = vpop.f32.mrb[73].mxu0 }
 0x6bf   : > { %v1736_v60 = vadd.f32 %v1735_v37, %v14911_v3  ;;  %v1675_v63 = vadd.f32 %v1674_v38, %v14911_v3  ;;  %v1737_v58 = vpop.f32.mrb[73].mxu1  ;;  %v1676_v2 = vpop.f32.mrb[74].mxu0 }
 0x6c0   : > { %v1738_v9 = vadd.f32 %v1737_v58, %v14911_v3  ;;  %v1677_v20 = vadd.f32 %v1676_v2, %v14912_v32  ;;  %v1739_v5 = vpop.f32.mrb[74].mxu1  ;;  %v1678_v35 = vpop.f32.mrb[75].mxu0  ;;  %v1764_v30 = vmax.f32 %v1673_v4, 0.0 }
 0x6c1   : > { %v1740_v19 = vadd.f32 %v1739_v5, %v14912_v32  ;;  %v1679_v22 = vadd.f32 %v1678_v35, %v14912_v32  ;;  %v1741_v47 = vpop.f32.mrb[75].mxu1  ;;  %v1766_v27 = vmax.f32 %v1736_v60, 0.0  ;;  %v1765_v62 = vmax.f32 %v1675_v63, 0.0  ;;  %v14914_v63 = vld [vmem:[#allocation37_spill] sm:$0xff] }
 0x6c2   : > { %v1768_v0 = vmax.f32 %v1677_v20, 0.0  ;;  %v1742_v31 = vadd.f32 %v1741_v47, %v14912_v32  ;;  %v1767_v33 = vmax.f32 %v1738_v9, 0.0 }
 0x6c3   : > { %v1770_v24 = vmax.f32 %v1740_v19, 0.0  ;;  %v1769_v34 = vmax.f32 %v1679_v22, 0.0 }
 0x6c4   : > { %v1788_v18 = vpack.c.bf16 %v1768_v0, %v1764_v30  ;;  %v1771_v61 = vmax.f32 %v1742_v31, 0.0 }
 0x6c5   : > { %v1790_v17 = vpack.c.bf16 %v1770_v24, %v1766_v27  ;;  %v1682_v29 = vpop.f32.mrb[76].mxu0  ;;  %v1789_v28 = vpack.c.bf16 %v1769_v34, %v1765_v62 }
 0x6c6   : > { %v1683_v11 = vadd.f32 %v1682_v29, %v14913_v26  ;;  %v1745_v6 = vpop.f32.mrb[76].mxu1  ;;  %v1684_v10 = vpop.f32.mrb[77].mxu0  ;;  %v1791_v13 = vpack.c.bf16 %v1771_v61, %v1767_v33  ;;  %v14915_v61 = vld [vmem:[#allocation40_spill] sm:$0xff] }
 0x6c7   : > { %v1746_v3 = vadd.f32 %v1745_v6, %v14913_v26  ;;  %v1685_v4 = vadd.f32 %v1684_v10, %v14913_v26  ;;  %v1747_v37 = vpop.f32.mrb[77].mxu1  ;;  %v1686_v38 = vpop.f32.mrb[78].mxu0  ;;  %1868 = vmatprep.subr.bf16.mxu0 %v1789_v28 }
 0x6c8   : > { %v1748_v60 = vadd.f32 %v1747_v37, %v14913_v26  ;;  %v1687_v58 = vadd.f32 %v1686_v38, %v14914_v63  ;;  %v1749_v2 = vpop.f32.mrb[78].mxu1  ;;  %1931 = vmatprep.subr.bf16.mxu1 %v1791_v13  ;;  %v1688_v9 = vpop.f32.mrb[79].mxu0  ;;  %1869 = vmatpush1.bf16.msra.mxu0 %v1788_v18  ;;  %v1772_v35 = vmax.f32 %v1683_v11, 0.0 }
 0x6c9   : > { %v1750_v32 = vadd.f32 %v1749_v2, %v14914_v63  ;;  %v1689_v20 = vadd.f32 %v1688_v9, %v14914_v63  ;;  %v1751_v5 = vpop.f32.mrb[79].mxu1  ;;  %1932 = vmatpush1.bf16.msra.mxu1 %v1790_v17  ;;  %v1774_v47 = vmax.f32 %v1746_v3, 0.0  ;;  %v1773_v30 = vmax.f32 %v1685_v4, 0.0  ;;  %v14916_v4 = vld [vmem:[#allocation39_spill] sm:$0xff] }
 0x6ca   : > { %v1776_v19 = vmax.f32 %v1687_v58, 0.0  ;;  %v1752_v22 = vadd.f32 %v1751_v5, %v14914_v63  ;;  %v1775_v27 = vmax.f32 %v1748_v60, 0.0 }
 0x6cb   : > { %v1778_v0 = vmax.f32 %v1750_v32, 0.0  ;;  %v1777_v31 = vmax.f32 %v1689_v20, 0.0 }
 0x6cc   : > { %v1792_v62 = vpack.c.bf16 %v1776_v19, %v1772_v35  ;;  %v1779_v24 = vmax.f32 %v1752_v22, 0.0 }
 0x6cd   : > { %v1794_v34 = vpack.c.bf16 %v1778_v0, %v1774_v47  ;;  %v1692_v33 = vpop.f32.mrb[80].mxu0  ;;  %v1793_v18 = vpack.c.bf16 %v1777_v31, %v1773_v30 }
 0x6ce   : > { %v1693_v29 = vadd.f32 %v1692_v33, %v14915_v61  ;;  %v1755_v28 = vpop.f32.mrb[80].mxu1  ;;  %v1694_v26 = vpop.f32.mrb[81].mxu0  ;;  %v1795_v6 = vpack.c.bf16 %v1779_v24, %v1775_v27  ;;  %v11009_v24 = vld [vmem:[%s14592_s1 + $0xa8] sm:$0xff]   ;;  %v11011_v33 = vld [vmem:[%s14592_s1 + $0xb8] sm:$0xff]  }
 0x6cf   : > { %v1756_v17 = vadd.f32 %v1755_v28, %v14915_v61  ;;  %v1695_v11 = vadd.f32 %v1694_v26, %v14915_v61  ;;  %v1757_v10 = vpop.f32.mrb[81].mxu1  ;;  %v1696_v13 = vpop.f32.mrb[82].mxu0  ;;  %1870 = vmatprep.subr.bf16.mxu0 %v1793_v18 }
 0x6d0   : > { %v1758_v3 = vadd.f32 %v1757_v10, %v14915_v61  ;;  %v1697_v37 = vadd.f32 %v1696_v13, %v14916_v4  ;;  %v1759_v38 = vpop.f32.mrb[82].mxu1  ;;  %1933 = vmatprep.subr.bf16.mxu1 %v1795_v6  ;;  %v1698_v60 = vpop.f32.mrb[83].mxu0  ;;  %1871 = vmatpush1.bf16.msra.mxu0 %v1792_v62  ;;  %v1780_v9 = vmax.f32 %v1693_v29, 0.0  ;;  %v14917_v61 = vld [vmem:[#allocation42_spill] sm:$0xff] }
 0x6d1   : > { %v1760_v63 = vadd.f32 %v1759_v38, %v14916_v4  ;;  %v1699_v58 = vadd.f32 %v1698_v60, %v14916_v4  ;;  %v1761_v2 = vpop.f32.mrb[83].mxu1  ;;  %1934 = vmatpush1.bf16.msra.mxu1 %v1794_v34  ;;  %v1782_v5 = vmax.f32 %v1756_v17, 0.0  ;;  %v1781_v35 = vmax.f32 %v1695_v11, 0.0  ;;  %v11010_v34 = vld [vmem:[%s14592_s1 + $0xb0] sm:$0xff]  }
 0x6d2   : > { %v1784_v32 = vmax.f32 %v1697_v37, 0.0  ;;  %v1762_v20 = vadd.f32 %v1761_v2, %v14916_v4  ;;  %v1783_v47 = vmax.f32 %v1758_v3, 0.0  ;;  %v14918_v3 = vld [vmem:[#allocation41_spill] sm:$0xff] }
 0x6d3   : > { %v1786_v19 = vmax.f32 %v1760_v63, 0.0  ;;  %v1785_v22 = vmax.f32 %v1699_v58, 0.0 }
 0x6d4   : > { %v1796_v30 = vpack.c.bf16 %v1784_v32, %v1780_v9  ;;  %v1787_v0 = vmax.f32 %v1762_v20, 0.0 }
 0x6d5   : > { %v1798_v31 = vpack.c.bf16 %v1786_v19, %v1782_v5  ;;  %v1797_v27 = vpack.c.bf16 %v1785_v22, %v1781_v35 }
 0x6d6   : > { %v1799_v62 = vpack.c.bf16 %v1787_v0, %v1783_v47 }
 0x6d7   : > { %1872 = vmatprep.subr.bf16.mxu0 %v1797_v27 }
 0x6d8   : > { %1935 = vmatprep.subr.bf16.mxu1 %v1799_v62  ;;  %1873 = vmatpush1.bf16.msra.mxu0 %v1796_v30  ;;  %v14919_v62 = vld [vmem:[#allocation44_spill] sm:$0xff] }
 0x6d9   : > { %1936 = vmatpush1.bf16.msra.mxu1 %v1798_v31 }
 0x6db   : > { %10136 = vmatmul.mubr.msk.bf16.vlgmr.msra.gmra.mrb[84].mxu0 %vm270_vm0, %v11009_v24 }
 0x6dc   : > { %10139 = vmatmul.mubr.msk.bf16.vlgmr.msra.gmra.mrb[84].mxu1 %vm270_vm0, %v11009_v24  ;;  %1910 = vmatprep.mubr.bf16.mxu0 %v14836_v25 }
 0x6dd   : > { %1973 = vmatprep.mubr.bf16.mxu1 %v14836_v25 }
 0x6e3   : > { %10137 = vmatmul.mubr.msk.bf16.gmra.mrb[88].mxu0 %vm270_vm0, %v11010_v34 }
 0x6e4   : > { %10140 = vmatmul.mubr.msk.bf16.gmra.mrb[88].mxu1 %vm270_vm0, %v11010_v34  ;;  %1920 = vmatprep.mubr.bf16.mxu0 %v14836_v25 }
 0x6e5   : > { %1983 = vmatprep.mubr.bf16.mxu1 %v14836_v25 }
 0x6eb   : > { %10138 = vmatmul.mubr.msk.bf16.gmra.mrb[92].mxu0 %vm270_vm0, %v11011_v33 }
 0x6ec   : > { %10141 = vmatmul.mubr.msk.bf16.gmra.mrb[92].mxu1 %vm270_vm0, %v11011_v33  ;;  %2129 = vmatprep.mubr.bf16.mxu0 %v14836_v25 }
 0x6ed   : > { %2190 = vmatprep.mubr.bf16.mxu1 %v14836_v25 }
 0x7ae   : > { %v1902_v18 = vpop.f32.mrb[84].mxu0 }
 0x7af   : > { %v1903_v29 = vadd.f32 %v1902_v18, %v14917_v61  ;;  %v1965_v28 = vpop.f32.mrb[84].mxu1  ;;  %v1904_v26 = vpop.f32.mrb[85].mxu0 }
 0x7b0   : > { %v1966_v6 = vadd.f32 %v1965_v28, %v14917_v61  ;;  %v1905_v17 = vadd.f32 %v1904_v26, %v14917_v61  ;;  %v1967_v11 = vpop.f32.mrb[85].mxu1  ;;  %v1906_v10 = vpop.f32.mrb[86].mxu0 }
 0x7b1   : > { %v1968_v13 = vadd.f32 %v1967_v11, %v14917_v61  ;;  %v1907_v4 = vadd.f32 %v1906_v10, %v14918_v3  ;;  %v1969_v37 = vpop.f32.mrb[86].mxu1  ;;  %v1908_v38 = vpop.f32.mrb[87].mxu0  ;;  %v1994_v2 = vmax.f32 %v1903_v29, 0.0 }
 0x7b2   : > { %v1970_v60 = vadd.f32 %v1969_v37, %v14918_v3  ;;  %v1909_v63 = vadd.f32 %v1908_v38, %v14918_v3  ;;  %v1971_v58 = vpop.f32.mrb[87].mxu1  ;;  %v1996_v20 = vmax.f32 %v1966_v6, 0.0  ;;  %v1995_v5 = vmax.f32 %v1905_v17, 0.0  ;;  %v14920_v17 = vld [vmem:[#allocation43_spill] sm:$0xff] }
 0x7b3   : > { %v1998_v9 = vmax.f32 %v1907_v4, 0.0  ;;  %v1972_v32 = vadd.f32 %v1971_v58, %v14918_v3  ;;  %v1997_v22 = vmax.f32 %v1968_v13, 0.0 }
 0x7b4   : > { %v2000_v35 = vmax.f32 %v1970_v60, 0.0  ;;  %v1999_v19 = vmax.f32 %v1909_v63, 0.0 }
 0x7b5   : > { %v2018_v47 = vpack.c.bf16 %v1998_v9, %v1994_v2  ;;  %v2001_v30 = vmax.f32 %v1972_v32, 0.0 }
 0x7b6   : > { %v2020_v0 = vpack.c.bf16 %v2000_v35, %v1996_v20  ;;  %v1912_v31 = vpop.f32.mrb[88].mxu0  ;;  %v2019_v27 = vpack.c.bf16 %v1999_v19, %v1995_v5 }
 0x7b7   : > { %v1913_v24 = vadd.f32 %v1912_v31, %v14919_v62  ;;  %v1975_v34 = vpop.f32.mrb[88].mxu1  ;;  %v1914_v33 = vpop.f32.mrb[89].mxu0  ;;  %v2021_v18 = vpack.c.bf16 %v2001_v30, %v1997_v22  ;;  %v14921_v30 = vld [vmem:[#allocation46_spill] sm:$0xff] }
 0x7b8   : > { %v1976_v61 = vadd.f32 %v1975_v34, %v14919_v62  ;;  %v1915_v29 = vadd.f32 %v1914_v33, %v14919_v62  ;;  %v1977_v28 = vpop.f32.mrb[89].mxu1  ;;  %v1916_v26 = vpop.f32.mrb[90].mxu0  ;;  %2097 = vmatprep.subr.bf16.mxu0 %v2019_v27 }
 0x7b9   : > { %v1978_v6 = vadd.f32 %v1977_v28, %v14919_v62  ;;  %v1917_v11 = vadd.f32 %v1916_v26, %v14920_v17  ;;  %v1979_v10 = vpop.f32.mrb[90].mxu1  ;;  %2158 = vmatprep.subr.bf16.mxu1 %v2021_v18  ;;  %v1918_v13 = vpop.f32.mrb[91].mxu0  ;;  %2098 = vmatpush1.bf16.msra.mxu0 %v2018_v47  ;;  %v2002_v38 = vmax.f32 %v1913_v24, 0.0 }
 0x7ba   : > { %v1980_v3 = vadd.f32 %v1979_v10, %v14920_v17  ;;  %v1919_v4 = vadd.f32 %v1918_v13, %v14920_v17  ;;  %v1981_v37 = vpop.f32.mrb[91].mxu1  ;;  %2159 = vmatpush1.bf16.msra.mxu1 %v2020_v0  ;;  %v2004_v58 = vmax.f32 %v1976_v61, 0.0  ;;  %v2003_v2 = vmax.f32 %v1915_v29, 0.0  ;;  %v14922_v29 = vld [vmem:[#allocation45_spill] sm:$0xff] }
 0x7bb   : > { %v2006_v60 = vmax.f32 %v1917_v11, 0.0  ;;  %v1982_v63 = vadd.f32 %v1981_v37, %v14920_v17  ;;  %v2005_v20 = vmax.f32 %v1978_v6, 0.0 }
 0x7bc   : > { %v2008_v9 = vmax.f32 %v1980_v3, 0.0  ;;  %v2007_v32 = vmax.f32 %v1919_v4, 0.0 }
 0x7bd   : > { %v2022_v5 = vpack.c.bf16 %v2006_v60, %v2002_v38  ;;  %v2009_v35 = vmax.f32 %v1982_v63, 0.0 }
 0x7be   : > { %v2024_v19 = vpack.c.bf16 %v2008_v9, %v2004_v58  ;;  %v1922_v22 = vpop.f32.mrb[92].mxu0  ;;  %v2023_v47 = vpack.c.bf16 %v2007_v32, %v2003_v2 }
 0x7bf   : > { %v1923_v31 = vadd.f32 %v1922_v22, %v14921_v30  ;;  %v1985_v27 = vpop.f32.mrb[92].mxu1  ;;  %v1924_v62 = vpop.f32.mrb[93].mxu0  ;;  %v2025_v34 = vpack.c.bf16 %v2009_v35, %v2005_v20  ;;  %v11012_v35 = vld [vmem:[%s14592_s1 + $0xc0] sm:$0xff]   ;;  %v11014_v22 = vld [vmem:[%s14592_s1 + $0xd0] sm:$0xff]  }
 0x7c0   : > { %v1986_v0 = vadd.f32 %v1985_v27, %v14921_v30  ;;  %v1925_v24 = vadd.f32 %v1924_v62, %v14921_v30  ;;  %v1987_v33 = vpop.f32.mrb[93].mxu1  ;;  %v1926_v18 = vpop.f32.mrb[94].mxu0  ;;  %2099 = vmatprep.subr.bf16.mxu0 %v2023_v47 }
 0x7c1   : > { %v1988_v61 = vadd.f32 %v1987_v33, %v14921_v30  ;;  %v1927_v28 = vadd.f32 %v1926_v18, %v14922_v29  ;;  %v1989_v26 = vpop.f32.mrb[94].mxu1  ;;  %2160 = vmatprep.subr.bf16.mxu1 %v2025_v34  ;;  %v1928_v6 = vpop.f32.mrb[95].mxu0  ;;  %2100 = vmatpush1.bf16.msra.mxu0 %v2022_v5  ;;  %v2010_v13 = vmax.f32 %v1923_v31, 0.0  ;;  %v14923_v34 = vld [vmem:[#allocation48_spill] sm:$0xff] }
 0x7c2   : > { %v1990_v17 = vadd.f32 %v1989_v26, %v14922_v29  ;;  %v1929_v11 = vadd.f32 %v1928_v6, %v14922_v29  ;;  %v1991_v10 = vpop.f32.mrb[95].mxu1  ;;  %2161 = vmatpush1.bf16.msra.mxu1 %v2024_v19  ;;  %v2012_v37 = vmax.f32 %v1986_v0, 0.0  ;;  %v2011_v38 = vmax.f32 %v1925_v24, 0.0  ;;  %v11013_v19 = vld [vmem:[%s14592_s1 + $0xc8] sm:$0xff]   ;;  %v14924_v24 = vld [vmem:[#allocation47_spill] sm:$0xff] }
 0x7c3   : > { %v2014_v3 = vmax.f32 %v1927_v28, 0.0  ;;  %v1992_v4 = vadd.f32 %v1991_v10, %v14922_v29  ;;  %v2013_v58 = vmax.f32 %v1988_v61, 0.0 }
 0x7c4   : > { %v2016_v60 = vmax.f32 %v1990_v17, 0.0  ;;  %v2015_v63 = vmax.f32 %v1929_v11, 0.0 }
 0x7c5   : > { %v2026_v2 = vpack.c.bf16 %v2014_v3, %v2010_v13  ;;  %v2017_v9 = vmax.f32 %v1992_v4, 0.0 }
 0x7c6   : > { %v2028_v32 = vpack.c.bf16 %v2016_v60, %v2012_v37  ;;  %v2027_v20 = vpack.c.bf16 %v2015_v63, %v2011_v38 }
 0x7c7   : > { %v2029_v5 = vpack.c.bf16 %v2017_v9, %v2013_v58  ;;  %v14925_v9 = vld [vmem:[#allocation50_spill] sm:$0xff] }
 0x7c8   : > { %2101 = vmatprep.subr.bf16.mxu0 %v2027_v20  ;;  %v14926_v20 = vld [vmem:[#allocation49_spill] sm:$0xff] }
 0x7c9   : > { %2162 = vmatprep.subr.bf16.mxu1 %v2029_v5  ;;  %2102 = vmatpush1.bf16.msra.mxu0 %v2026_v2 }
 0x7ca   : > { %2163 = vmatpush1.bf16.msra.mxu1 %v2028_v32 }
 0x7cc   : > { %10157 = vmatmul.mubr.msk.bf16.vlgmr.msra.gmra.mrb[96].mxu0 %vm270_vm0, %v11012_v35 }
 0x7cd   : > { %10160 = vmatmul.mubr.msk.bf16.vlgmr.msra.gmra.mrb[96].mxu1 %vm270_vm0, %v11012_v35  ;;  %2139 = vmatprep.mubr.bf16.mxu0 %v14836_v25 }
 0x7ce   : > { %2200 = vmatprep.mubr.bf16.mxu1 %v14836_v25 }
 0x7d4   : > { %10158 = vmatmul.mubr.msk.bf16.gmra.mrb[100].mxu0 %vm270_vm0, %v11013_v19 }
 0x7d5   : > { %10161 = vmatmul.mubr.msk.bf16.gmra.mrb[100].mxu1 %vm270_vm0, %v11013_v19  ;;  %2149 = vmatprep.mubr.bf16.mxu0 %v14836_v25 }
 0x7d6   : > { %2210 = vmatprep.mubr.bf16.mxu1 %v14836_v25 }
 0x7dc   : > { %10159 = vmatmul.mubr.msk.bf16.gmra.mrb[104].mxu0 %vm270_vm0, %v11014_v22 }
 0x7dd   : > { %10162 = vmatmul.mubr.msk.bf16.gmra.mrb[104].mxu1 %vm270_vm0, %v11014_v22  ;;  %2327 = vmatprep.mubr.bf16.mxu0 %v14836_v25 }
 0x7de   : > { %2390 = vmatprep.mubr.bf16.mxu1 %v14836_v25 }
 0x89f   : > { %v2131_v47 = vpop.f32.mrb[96].mxu0 }
 0x8a0   : > { %v2192_v30 = vpop.f32.mrb[96].mxu1  ;;  %v2133_v31 = vpop.f32.mrb[97].mxu0  ;;  %v2132_v0 = vadd.f32 %v2131_v47, %v14923_v34 }
 0x8a1   : > { %v2194_v27 = vpop.f32.mrb[97].mxu1  ;;  %v2135_v62 = vpop.f32.mrb[98].mxu0  ;;  %v2193_v29 = vadd.f32 %v2192_v30, %v14923_v34  ;;  %v2134_v28 = vadd.f32 %v2133_v31, %v14923_v34 }
 0x8a2   : > { %v2136_v33 = vadd.f32 %v2135_v62, %v14924_v24  ;;  %v2196_v18 = vpop.f32.mrb[98].mxu1  ;;  %v2137_v61 = vpop.f32.mrb[99].mxu0  ;;  %v2195_v11 = vadd.f32 %v2194_v27, %v14923_v34 }
 0x8a3   : > { %v2197_v26 = vadd.f32 %v2196_v18, %v14924_v24  ;;  %v2138_v6 = vadd.f32 %v2137_v61, %v14924_v24  ;;  %v2198_v17 = vpop.f32.mrb[99].mxu1  ;;  %v14927_v61 = vld [vmem:[#allocation12_spill] sm:$0xff] }
 0x8a4   : > { %v2219_v10 = vpack.c.bf16 %v2136_v33, %v2132_v0  ;;  %v2199_v13 = vadd.f32 %v2198_v17, %v14924_v24  ;;  %v11016_v17 = vld [vmem:[%s14592_s1 + $0xe0] sm:$0xff]  }
 0x8a5   : > { %v2221_v3 = vpack.c.bf16 %v2197_v26, %v2193_v29  ;;  %v2220_v4 = vpack.c.bf16 %v2138_v6, %v2134_v28  ;;  %v14928_v29 = vld [vmem:[#allocation13_spill] sm:$0xff]  ;;  %v11015_v28 = vld [vmem:[%s14592_s1 + $0xd8] sm:$0xff]   ;;  %v14929_v26 = vld [vmem:[#allocation14_spill] sm:$0xff] }
 0x8a6   : > { %v2222_v37 = vpack.c.bf16 %v2199_v13, %v2195_v11  ;;  %v14930_v6 = vld [vmem:[#allocation15_spill] sm:$0xff]  ;;  %v11017_v11 = vld [vmem:[%s14592_s1 + $0xe8] sm:$0xff]   ;;  %v12793_v13 = vpop.permute.xlu0 %5792 }
 0x8a7   : > { %v2141_v38 = vpop.f32.mrb[100].mxu0  ;;  %2295 = vmatprep.subr.bf16.mxu0 %v2220_v4 }
 0x8a8   : > { %v2202_v60 = vpop.f32.mrb[100].mxu1  ;;  %2358 = vmatprep.subr.bf16.mxu1 %v2222_v37  ;;  %v2143_v63 = vpop.f32.mrb[101].mxu0  ;;  %2296 = vmatpush1.bf16.msra.mxu0 %v2219_v10  ;;  %v2142_v32 = vadd.f32 %v2141_v38, %v14925_v9 }
 0x8a9   : > { %v2204_v58 = vpop.f32.mrb[101].mxu1  ;;  %2359 = vmatpush1.bf16.msra.mxu1 %v2221_v3  ;;  %v2145_v2 = vpop.f32.mrb[102].mxu0  ;;  %v2203_v22 = vadd.f32 %v2202_v60, %v14925_v9  ;;  %v2144_v47 = vadd.f32 %v2143_v63, %v14925_v9 }
 0x8aa   : > { %v2146_v5 = vadd.f32 %v2145_v2, %v14926_v20  ;;  %v2206_v35 = vpop.f32.mrb[102].mxu1  ;;  %v2147_v19 = vpop.f32.mrb[103].mxu0  ;;  %v2205_v62 = vadd.f32 %v2204_v58, %v14925_v9 }
 0x8ab   : > { %v2207_v30 = vadd.f32 %v2206_v35, %v14926_v20  ;;  %v2148_v31 = vadd.f32 %v2147_v19, %v14926_v20  ;;  %v2208_v27 = vpop.f32.mrb[103].mxu1  ;;  %v12791_v10 = vpop.permute.xlu1 %5797 }
 0x8ac   : > { %v2223_v34 = vpack.c.bf16 %v2146_v5, %v2142_v32  ;;  %v2209_v0 = vadd.f32 %v2208_v27, %v14926_v20  ;;  %v12797_v4 = vpop.permute.xlu0 %6000 }
 0x8ad   : > { %v2225_v24 = vpack.c.bf16 %v2207_v30, %v2203_v22  ;;  %v2224_v33 = vpack.c.bf16 %v2148_v31, %v2144_v47 }
 0x8ae   : > { %v2226_v18 = vpack.c.bf16 %v2209_v0, %v2205_v62  ;;  %v14941_v0 = vld [vmem:[#allocation51_spill] sm:$0xff] }
 0x8af   : > { %2297 = vmatprep.subr.bf16.mxu0 %v2224_v33  ;;  %v12795_v3 = vpop.permute.xlu1 %6005 }
 0x8b0   : > { %2360 = vmatprep.subr.bf16.mxu1 %v2226_v18  ;;  %2298 = vmatpush1.bf16.msra.mxu0 %v2223_v34  ;;  %v12801_v38 = vpop.permute.xlu0 %6010 }
 0x8b1   : > { %2361 = vmatpush1.bf16.msra.mxu1 %v2225_v24  ;;  %2299 = vmatprep.subr.bf16.mxu0 %v14927_v61  ;;  %14932 = vst [vmem:[#allocation18_spill] sm:$0xff] %v12801_v38 }
 0x8b2   : > { %2362 = vmatprep.subr.bf16.mxu1 %v14928_v29 }
 0x8b3   : > { %v12799_v37 = vpop.permute.xlu1 %6015 }
 0x8b4   : > { %2300 = vmatpush1.bf16.msra.mxu0 %v14929_v26  ;;  %14931 = vst [vmem:[#allocation16_spill] sm:$0xff] %v12799_v37  ;;  %v12805_v63 = vpop.permute.xlu0 %6206 }
 0x8b5   : > { %2363 = vmatpush1.bf16.msra.mxu1 %v14930_v6  ;;  %14934 = vst [vmem:[#allocation20_spill] sm:$0xff] %v12805_v63 }
 0x8b7   : > { %10178 = vmatmul.mubr.msk.bf16.vlgmr.msra.gmra.mrb[108].mxu0 %vm270_vm0, %v11015_v28  ;;  %v12803_v60 = vpop.permute.xlu1 %6211 }
 0x8b8   : > { %10181 = vmatmul.mubr.msk.bf16.vlgmr.msra.gmra.mrb[108].mxu1 %vm270_vm0, %v11015_v28  ;;  %2337 = vmatprep.mubr.bf16.mxu0 %v14836_v25  ;;  %14933 = vst [vmem:[#allocation17_spill] sm:$0xff] %v12803_v60  ;;  %v12809_v2 = vpop.permute.xlu0 %6216 }
 0x8b9   : > { %2400 = vmatprep.mubr.bf16.mxu1 %v14836_v25  ;;  %14936 = vst [vmem:[#allocation22_spill] sm:$0xff] %v12809_v2 }
 0x8bb   : > { %v12807_v58 = vpop.permute.xlu1 %6221 }
 0x8bc   : > { %14935 = vst [vmem:[#allocation19_spill] sm:$0xff] %v12807_v58  ;;  %v12813_v32 = vpop.permute.xlu0 %6226 }
 0x8bd   : > { %14938 = vst [vmem:[#allocation24_spill] sm:$0xff] %v12813_v32 }
 0x8bf   : > { %10179 = vmatmul.mubr.msk.bf16.gmra.mrb[112].mxu0 %vm270_vm0, %v11016_v17  ;;  %v12811_v9 = vpop.permute.xlu1 %6231 }
 0x8c0   : > { %10182 = vmatmul.mubr.msk.bf16.gmra.mrb[112].mxu1 %vm270_vm0, %v11016_v17  ;;  %2347 = vmatprep.mubr.bf16.mxu0 %v14836_v25  ;;  %14937 = vst [vmem:[#allocation21_spill] sm:$0xff] %v12811_v9  ;;  %v12817_v5 = vpop.permute.xlu0 %6434 }
 0x8c1   : > { %2410 = vmatprep.mubr.bf16.mxu1 %v14836_v25  ;;  %14940 = vst [vmem:[#allocation8_spill] sm:$0xff] %v12817_v5 }
 0x8c3   : > { %v12815_v20 = vpop.permute.xlu1 %6439 }
 0x8c4   : > { %14939 = vst [vmem:[#allocation23_spill] sm:$0xff] %v12815_v20  ;;  %v12829_v5 = vpop.permute.xlu0 %6444 }
 0x8c5   : > { %14943 = vst [vmem:[#allocation10_spill] sm:$0xff] %v12829_v5 }
 0x8c7   : > { %10180 = vmatmul.mubr.msk.bf16.gmra.mrb[116].mxu0 %vm270_vm0, %v11017_v11  ;;  %v12827_v20 = vpop.permute.xlu1 %6449 }
 0x8c8   : > { %10183 = vmatmul.mubr.msk.bf16.gmra.mrb[116].mxu1 %vm270_vm0, %v11017_v11  ;;  %2552 = vmatprep.mubr.bf16.mxu0 %v14836_v25  ;;  %14942 = vst [vmem:[#allocation9_spill] sm:$0xff] %v12827_v20 }
 0x8c9   : > { %2605 = vmatprep.mubr.bf16.mxu1 %v14836_v25 }
 0x98a   : > { %v2329_v35 = vpop.f32.mrb[108].mxu0 }
 0x98b   : > { %v2330_v19 = vadd.f32 %v2329_v35, %v11959_v39  ;;  %v2392_v22 = vpop.f32.mrb[108].mxu1  ;;  %v2331_v47 = vpop.f32.mrb[109].mxu0 }
 0x98c   : > { %v2393_v30 = vadd.f32 %v2392_v22, %v11959_v39  ;;  %v2332_v31 = vadd.f32 %v2331_v47, %v11959_v39  ;;  %v2394_v27 = vpop.f32.mrb[109].mxu1  ;;  %v2333_v62 = vpop.f32.mrb[110].mxu0 }
 0x98d   : > { %v2395_v34 = vadd.f32 %v2394_v27, %v11959_v39  ;;  %v2334_v24 = vadd.f32 %v2333_v62, %v14941_v0  ;;  %v2396_v33 = vpop.f32.mrb[110].mxu1  ;;  %v2335_v18 = vpop.f32.mrb[111].mxu0  ;;  %v2421_v26 = vmax.f32 %v2330_v19, 0.0 }
 0x98e   : > { %v2397_v61 = vadd.f32 %v2396_v33, %v14941_v0  ;;  %v2336_v29 = vadd.f32 %v2335_v18, %v14941_v0  ;;  %v2398_v28 = vpop.f32.mrb[111].mxu1  ;;  %v2423_v11 = vmax.f32 %v2393_v30, 0.0  ;;  %v2422_v22 = vmax.f32 %v2332_v31, 0.0 }
 0x98f   : > { %v2425_v6 = vmax.f32 %v2334_v24, 0.0  ;;  %v2399_v17 = vadd.f32 %v2398_v28, %v14941_v0  ;;  %v2424_v39 = vmax.f32 %v2395_v34, 0.0 }
 0x990   : > { %v2427_v35 = vmax.f32 %v2397_v61, 0.0  ;;  %v2426_v47 = vmax.f32 %v2336_v29, 0.0  ;;  %v14944_v29 = vld [vmem:[#allocation52_spill] sm:$0xff] }
 0x991   : > { %v2428_v27 = vmax.f32 %v2399_v17, 0.0  ;;  %v2445_v62 = vpack.c.bf16 %v2425_v6, %v2421_v26 }
 0x992   : > { %v2339_v9 = vpop.f32.mrb[112].mxu0  ;;  %v2446_v33 = vpack.c.bf16 %v2426_v47, %v2422_v22  ;;  %v2447_v32 = vpack.c.bf16 %v2427_v35, %v2423_v11 }
 0x993   : > { %v2340_v18 = vadd.f32 %v2339_v9, %v11972_v44  ;;  %v2402_v19 = vpop.f32.mrb[112].mxu1  ;;  %v2341_v24 = vpop.f32.mrb[113].mxu0  ;;  %v2448_v58 = vpack.c.bf16 %v2428_v27, %v2424_v39 }
 0x994   : > { %v2403_v30 = vadd.f32 %v2402_v19, %v11972_v44  ;;  %v2342_v31 = vadd.f32 %v2341_v24, %v11972_v44  ;;  %v2404_v0 = vpop.f32.mrb[113].mxu1  ;;  %v2343_v61 = vpop.f32.mrb[114].mxu0  ;;  %2520 = vmatprep.subr.bf16.mxu0 %v2446_v33 }
 0x995   : > { %v2405_v34 = vadd.f32 %v2404_v0, %v11972_v44  ;;  %v2344_v28 = vadd.f32 %v2343_v61, %v14944_v29  ;;  %v2406_v26 = vpop.f32.mrb[114].mxu1  ;;  %2573 = vmatprep.subr.bf16.mxu1 %v2448_v58  ;;  %v2345_v6 = vpop.f32.mrb[115].mxu0  ;;  %2521 = vmatpush1.bf16.msra.mxu0 %v2445_v62  ;;  %v2429_v35 = vmax.f32 %v2340_v18, 0.0 }
 0x996   : > { %v2407_v9 = vadd.f32 %v2406_v26, %v14944_v29  ;;  %v2346_v17 = vadd.f32 %v2345_v6, %v14944_v29  ;;  %v2408_v11 = vpop.f32.mrb[115].mxu1  ;;  %2574 = vmatpush1.bf16.msra.mxu1 %v2447_v32  ;;  %v2431_v39 = vmax.f32 %v2403_v30, 0.0  ;;  %v2430_v27 = vmax.f32 %v2342_v31, 0.0  ;;  %v12839_v19 = vpop.permute.xlu1 %6459 }
 0x997   : > { %v2433_v22 = vmax.f32 %v2344_v28, 0.0  ;;  %v2409_v47 = vadd.f32 %v2408_v11, %v14944_v29  ;;  %14945 = vst [vmem:[#allocation11_spill] sm:$0xff] %v12839_v19  ;;  %v12841_v24 = vpop.permute.xlu0 %6454  ;;  %v2432_v58 = vmax.f32 %v2405_v34, 0.0 }
 0x998   : > { %v2435_v33 = vmax.f32 %v2407_v9, 0.0  ;;  %v2434_v44 = vmax.f32 %v2346_v17, 0.0  ;;  %14946 = vst [vmem:[#allocation26_spill] sm:$0xff] %v12841_v24  ;;  %v14947_v17 = vld [vmem:[#allocation53_spill] sm:$0xff] }
 0x999   : > { %v2449_v62 = vpack.c.bf16 %v2433_v22, %v2429_v35  ;;  %v2436_v0 = vmax.f32 %v2409_v47, 0.0 }
 0x99a   : > { %v2451_v61 = vpack.c.bf16 %v2435_v33, %v2431_v39  ;;  %v2349_v26 = vpop.f32.mrb[116].mxu0  ;;  %v2450_v6 = vpack.c.bf16 %v2434_v44, %v2430_v27  ;;  %v12850_v33 = vpop.permute.xlu1 %6667 }
 0x99b   : > { %v2350_v32 = vadd.f32 %v2349_v26, %v11987_v42  ;;  %v2412_v18 = vpop.f32.mrb[116].mxu1  ;;  %v2351_v28 = vpop.f32.mrb[117].mxu0  ;;  %v2452_v20 = vpack.c.bf16 %v2436_v0, %v2432_v58  ;;  %14948 = vst [vmem:[#allocation25_spill] sm:$0xff] %v12850_v33  ;;  %v2635_v26 = vld [vmem:[%s11377_s11 + $0x28] sm:$0xff]  ;;  %v2636_v33 = vld [vmem:[%s11377_s11 + $0x30] sm:$0xff] }
 0x99c   : > { %v2413_v30 = vadd.f32 %v2412_v18, %v11987_v42  ;;  %v2352_v31 = vadd.f32 %v2351_v28, %v11987_v42  ;;  %v2414_v29 = vpop.f32.mrb[117].mxu1  ;;  %v2353_v9 = vpop.f32.mrb[118].mxu0  ;;  %2522 = vmatprep.subr.bf16.mxu0 %v2450_v6 }
 0x99d   : > { %v2415_v34 = vadd.f32 %v2414_v29, %v11987_v42  ;;  %v2354_v11 = vadd.f32 %v2353_v9, %v14947_v17  ;;  %v2416_v35 = vpop.f32.mrb[118].mxu1  ;;  %2575 = vmatprep.subr.bf16.mxu1 %v2452_v20  ;;  %v2355_v22 = vpop.f32.mrb[119].mxu0  ;;  %2523 = vmatpush1.bf16.msra.mxu0 %v2449_v62  ;;  %v2437_v42 = vmax.f32 %v2350_v32, 0.0  ;;  %v2639_v20 = vld [vmem:[%s11377_s11 + $0xa8] sm:$0xff]  ;;  %v2637_v29 = vld [vmem:[%s11377_s11 + $0x38] sm:$0xff] }
 0x99e   : > { %v2417_v47 = vadd.f32 %v2416_v35, %v14947_v17  ;;  %v2356_v39 = vadd.f32 %v2355_v22, %v14947_v17  ;;  %v2418_v27 = vpop.f32.mrb[119].mxu1  ;;  %2576 = vmatpush1.bf16.msra.mxu1 %v2451_v61  ;;  %v12852_v44 = vpop.permute.xlu0 %6662  ;;  %v2439_v62 = vmax.f32 %v2413_v30, 0.0  ;;  %v2438_v6 = vmax.f32 %v2352_v31, 0.0  ;;  %v2641_v61 = vld [vmem:[%s11377_s11 + $0xb8] sm:$0xff]  ;;  %v11018_v30 = vld [vmem:[%s14592_s1 + $0xf0] sm:$0xff]  }
 0x99f   : > { %14949 = vst [vmem:[#allocation28_spill] sm:$0xff] %v12852_v44  ;;  %v2441_v58 = vmax.f32 %v2354_v11, 0.0  ;;  %v2419_v0 = vadd.f32 %v2418_v27, %v14947_v17  ;;  %v2440_v9 = vmax.f32 %v2415_v34, 0.0  ;;  %v12859_v17 = vpack.c.bf16 %v2639_v20, %v2635_v26  ;;  %v2640_v34 = vld [vmem:[%s11377_s11 + $0xb0] sm:$0xff]  ;;  %v2645_v26 = vld [vmem:[%s11377_s11 + $0x138] sm:$0xff] }
 0x9a0   : > { %v2443_v18 = vmax.f32 %v2417_v47, 0.0  ;;  %v2442_v28 = vmax.f32 %v2356_v39, 0.0  ;;  %v12864_v31 = vpack.c.bf16 %v2641_v61, %v2637_v29  ;;  %v2634_v47 = vld [vmem:[%s11377_s11 + $0x20] sm:$0xff]  ;;  %v2644_v61 = vld [vmem:[%s11377_s11 + $0x130] sm:$0xff] }
 0x9a1   : > { %v2453_v35 = vpack.c.bf16 %v2441_v58, %v2437_v42  ;;  %v2444_v22 = vmax.f32 %v2419_v0, 0.0  ;;  %v2638_v39 = vld [vmem:[%s11377_s11 + $0xa0] sm:$0xff]  ;;  %v2643_v42 = vld [vmem:[%s11377_s11 + $0x128] sm:$0xff]  ;;  %v12871_v58 = vpop.permute.xlu1 %6677 }
 0x9a2   : > { %v2455_v32 = vpack.c.bf16 %v2443_v18, %v2439_v62  ;;  %v2454_v11 = vpack.c.bf16 %v2442_v28, %v2438_v6  ;;  %14950 = vst [vmem:[#allocation27_spill] sm:$0xff] %v12871_v58  ;;  %v12873_v0 = vpop.permute.xlu0 %6672  ;;  %v12877_v20 = vpack.c.bf16 %v2638_v39, %v2634_v47  ;;  %v12880_v62 = vpack.c.bf16 %v2640_v34, %v2636_v33  ;;  %v2642_v28 = vld [vmem:[%s11377_s11 + $0x120] sm:$0xff] }
 0x9a3   : > { %v2456_v27 = vpack.c.bf16 %v2444_v22, %v2440_v9  ;;  %14951 = vst [vmem:[#allocation30_spill] sm:$0xff] %v12873_v0  ;;  %v14952_v6 = vmov 0.0   ;;  %v11021_v34 = vld [vmem:[%s14592_s1] sm:$0xff]  }
 0x9a4   : > { %2524 = vmatprep.subr.bf16.mxu0 %v2454_v11  ;;  %v12883_v18 = vpack.c.bf16 %v14952_v6, %v2643_v42  ;;  %v12888_v29 = vpack.c.bf16 %v14952_v6, %v2645_v26  ;;  %v12896_v33 = vpack.c.bf16 %v14952_v6, %v2642_v28  ;;  %v12905_v22 = vpack.c.bf16 %v14952_v6, %v2644_v61 }
 0x9a5   : > { %2577 = vmatprep.subr.bf16.mxu1 %v2456_v27  ;;  %2525 = vmatpush1.bf16.msra.mxu0 %v2453_v35  ;;  %v12898_v9 = vpop.permute.xlu1 %6687 }
 0x9a6   : > { %2578 = vmatpush1.bf16.msra.mxu1 %v2455_v32  ;;  %2720 = vmatprep.subr.bf16.mxu0 %v12859_v17  ;;  %14953 = vst [vmem:[#allocation29_spill] sm:$0xff] %v12898_v9  ;;  %v12900_v35 = vpop.permute.xlu0 %6682  ;;  %v11019_v32 = vld [vmem:[%s14592_s1 + $0xf8] sm:$0xff]  }
 0x9a7   : > { %2783 = vmatprep.subr.bf16.mxu1 %v12864_v31  ;;  %14954 = vst [vmem:[#allocation32_spill] sm:$0xff] %v12900_v35 }
 0x9a8   : > { %10199 = vmatmul.mubr.msk.bf16.vlgmr.msra.gmra.mrb[104].mxu0 %vm270_vm0, %v11018_v30 }
 0x9a9   : > { %10202 = vmatmul.mubr.msk.bf16.vlgmr.msra.gmra.mrb[104].mxu1 %vm270_vm0, %v11018_v30  ;;  %2560 = vmatprep.mubr.bf16.mxu0 %v14836_v25  ;;  %v12914_v11 = vpop.permute.xlu1 %6895  ;;  %v11020_v30 = vld [vmem:[%s14592_s1 + $0x100] sm:$0xff]  }
 0x9aa   : > { %2613 = vmatprep.mubr.bf16.mxu1 %v14836_v25  ;;  %2721 = vmatpush1.bf16.msra.mxu0 %v12877_v20  ;;  %14955 = vst [vmem:[#allocation31_spill] sm:$0xff] %v12914_v11  ;;  %v12916_v27 = vpop.permute.xlu0 %6890 }
 0x9ab   : > { %2784 = vmatpush1.bf16.msra.mxu1 %v12880_v62  ;;  %2722 = vmatprep.subr.bf16.mxu0 %v12883_v18  ;;  %14956 = vst [vmem:[#allocation34_spill] sm:$0xff] %v12916_v27 }
 0x9ac   : > { %2785 = vmatprep.subr.bf16.mxu1 %v12888_v29 }
 0x9ad   : > { %v12924_v47 = vpop.permute.xlu1 %6905 }
 0x9ae   : > { %2723 = vmatpush1.bf16.msra.mxu0 %v12896_v33  ;;  %14957 = vst [vmem:[#allocation33_spill] sm:$0xff] %v12924_v47  ;;  %v12926_v39 = vpop.permute.xlu0 %6900 }
 0x9af   : > { %2786 = vmatpush1.bf16.msra.mxu1 %v12905_v22  ;;  %14958 = vst [vmem:[#allocation36_spill] sm:$0xff] %v12926_v39 }
 0x9b0   : > { %10200 = vmatmul.mubr.msk.bf16.gmra.mrb[120].mxu0 %vm270_vm0, %v11019_v32 }
 0x9b1   : > { %10203 = vmatmul.mubr.msk.bf16.gmra.mrb[120].mxu1 %vm270_vm0, %v11019_v32  ;;  %2566 = vmatprep.mubr.bf16.mxu0 %v14836_v25  ;;  %v12935_v42 = vpop.permute.xlu1 %7090  ;;  %v11022_v32 = vld [vmem:[%s14592_s1 + $0x8] sm:$0xff]  }
 0x9b2   : > { %2619 = vmatprep.mubr.bf16.mxu1 %v14836_v25  ;;  %14959 = vst [vmem:[#allocation35_spill] sm:$0xff] %v12935_v42  ;;  %v12937_v26 = vpop.permute.xlu0 %7085 }
 0x9b3   : > { %14960 = vst [vmem:[#allocation38_spill] sm:$0xff] %v12937_v26 }
 0x9b5   : > { %v12943_v28 = vpop.permute.xlu1 %7100 }
 0x9b6   : > { %14961 = vst [vmem:[#allocation37_spill] sm:$0xff] %v12943_v28  ;;  %v12945_v61 = vpop.permute.xlu0 %7095 }
 0x9b7   : > { %14962 = vst [vmem:[#allocation40_spill] sm:$0xff] %v12945_v61 }
 0x9b8   : > { %10201 = vmatmul.mubr.msk.bf16.gmra.mrb[124].mxu0 %vm270_vm0, %v11020_v30 }
 0x9b9   : > { %10204 = vmatmul.mubr.msk.bf16.gmra.mrb[124].mxu1 %vm270_vm0, %v11020_v30  ;;  %2752 = vmatprep.mubr.bf16.mxu0 %v14836_v25  ;;  %v12951_v30 = vpop.permute.xlu1 %7110 }
 0x9ba   : > { %2815 = vmatprep.mubr.bf16.mxu1 %v14836_v25  ;;  %14963 = vst [vmem:[#allocation39_spill] sm:$0xff] %v12951_v30  ;;  %v12953_v42 = vpop.permute.xlu0 %7105 }
 0x9bb   : > { %14964 = vst [vmem:[#allocation42_spill] sm:$0xff] %v12953_v42 }
 0x9bd   : > { %v12961_v28 = vpop.permute.xlu1 %7513 }
 0x9be   : > { %14965 = vst [vmem:[#allocation41_spill] sm:$0xff] %v12961_v28  ;;  %v12963_v61 = vpop.permute.xlu0 %7508 }
 0x9bf   : > { %14966 = vst [vmem:[#allocation44_spill] sm:$0xff] %v12963_v61 }
 0x9c0   : > { %10208 = vmatmul.mubr.msk.bf16.vlgmr.msra.gmra.mrb[128].mxu0 %vm270_vm0, %v11021_v34 }
 0x9c1   : > { %10211 = vmatmul.mubr.msk.bf16.vlgmr.msra.gmra.mrb[128].mxu1 %vm270_vm0, %v11021_v34  ;;  %2762 = vmatprep.mubr.bf16.mxu0 %v14836_v25  ;;  %v11023_v34 = vld [vmem:[%s14592_s1 + $0x10] sm:$0xff]  }
 0x9c2   : > { %2825 = vmatprep.mubr.bf16.mxu1 %v14836_v25  ;;  %v12971_v30 = vpop.permute.xlu0 %7518 }
 0x9c3   : > { %14968 = vst [vmem:[#allocation46_spill] sm:$0xff] %v12971_v30 }
 0x9c6   : > { %v12975_v26 = vpop.permute.xlu0 %7528 }
 0x9c7   : > { %14970 = vst [vmem:[#allocation48_spill] sm:$0xff] %v12975_v26 }
 0x9c8   : > { %10209 = vmatmul.mubr.msk.bf16.gmra.mrb[132].mxu0 %vm270_vm0, %v11022_v32 }
 0x9c9   : > { %10212 = vmatmul.mubr.msk.bf16.gmra.mrb[132].mxu1 %vm270_vm0, %v11022_v32  ;;  %2772 = vmatprep.mubr.bf16.mxu0 %v14836_v25  ;;  %v12969_v32 = vpop.permute.xlu1 %7523 }
 0x9ca   : > { %2835 = vmatprep.mubr.bf16.mxu1 %v14836_v25  ;;  %14967 = vst [vmem:[#allocation43_spill] sm:$0xff] %v12969_v32  ;;  %v12979_v28 = vpop.permute.xlu0 %7736 }
 0x9cb   : > { %14972 = vst [vmem:[#allocation50_spill] sm:$0xff] %v12979_v28 }
 0x9cd   : > { %v12973_v42 = vpop.permute.xlu1 %7533 }
 0x9ce   : > { %14969 = vst [vmem:[#allocation45_spill] sm:$0xff] %v12973_v42  ;;  %v12983_v39 = vpop.permute.xlu0 %7746 }
 0x9cf   : > { %14974 = vst [vmem:[#allocation12_spill] sm:$0xff] %v12983_v39 }
 0x9d0   : > { %10210 = vmatmul.mubr.msk.bf16.gmra.mrb[136].mxu0 %vm270_vm0, %v11023_v34 }
 0x9d1   : > { %10213 = vmatmul.mubr.msk.bf16.gmra.mrb[136].mxu1 %vm270_vm0, %v11023_v34  ;;  %2980 = vmatprep.mubr.bf16.mxu0 %v14836_v25  ;;  %v12977_v47 = vpop.permute.xlu1 %7741 }
 0x9d2   : > { %3043 = vmatprep.mubr.bf16.mxu1 %v14836_v25  ;;  %14971 = vst [vmem:[#allocation47_spill] sm:$0xff] %v12977_v47  ;;  %v12987_v11 = vpop.permute.xlu0 %7756 }
 0x9d3   : > { %14976 = vst [vmem:[#allocation14_spill] sm:$0xff] %v12987_v11 }
 0x9d5   : > { %v12981_v61 = vpop.permute.xlu1 %7751 }
 0x9d6   : > { %14973 = vst [vmem:[#allocation49_spill] sm:$0xff] %v12981_v61  ;;  %v12991_v32 = vpop.permute.xlu0 %7964 }
 0x9d7   : > { %14978 = vst [vmem:[#allocation51_spill] sm:$0xff] %v12991_v32 }
 0x9d9   : > { %v12985_v34 = vpop.permute.xlu1 %7761 }
 0x9da   : > { %14975 = vst [vmem:[#allocation13_spill] sm:$0xff] %v12985_v34  ;;  %v12995_v42 = vpop.permute.xlu0 %7974 }
 0x9db   : > { %14980 = vst [vmem:[#allocation53_spill] sm:$0xff] %v12995_v42 }
 0x9dd   : > { %v12989_v27 = vpop.permute.xlu1 %7969 }
 0x9de   : > { %14977 = vst [vmem:[#allocation15_spill] sm:$0xff] %v12989_v27  ;;  %v12999_v47 = vpop.permute.xlu0 %7984 }
 0x9df   : > { %14982 = vst [vmem:[#allocation107_spill] sm:$0xff] %v12999_v47 }
 0x9e1   : > { %v12993_v30 = vpop.permute.xlu1 %7979 }
 0x9e2   : > { %14979 = vst [vmem:[#allocation52_spill] sm:$0xff] %v12993_v30  ;;  %v13003_v61 = vpop.permute.xlu0 %8192 }
 0x9e3   : > { %14984 = vst [vmem:[#allocation109_spill] sm:$0xff] %v13003_v61 }
 0x9e5   : > { %v12997_v26 = vpop.permute.xlu1 %7989 }
 0x9e6   : > { %14981 = vst [vmem:[#allocation106_spill] sm:$0xff] %v12997_v26  ;;  %v13007_v34 = vpop.permute.xlu0 %8202 }
 0x9e7   : > { %14986 = vst [vmem:[#allocation111_spill] sm:$0xff] %v13007_v34 }
 0x9e9   : > { %v13001_v28 = vpop.permute.xlu1 %8197 }
 0x9ea   : > { %14983 = vst [vmem:[#allocation108_spill] sm:$0xff] %v13001_v28  ;;  %v13011_v27 = vpop.permute.xlu0 %8212 }
 0x9eb   : > { %14988 = vst [vmem:[#allocation113_spill] sm:$0xff] %v13011_v27 }
 0x9ed   : > { %v13005_v39 = vpop.permute.xlu1 %8207 }
 0x9ee   : > { %14985 = vst [vmem:[#allocation110_spill] sm:$0xff] %v13005_v39  ;;  %v13015_v30 = vpop.permute.xlu0 %8420 }
 0x9ef   : > { %14990 = vst [vmem:[#allocation115_spill] sm:$0xff] %v13015_v30 }
 0x9f1   : > { %v13009_v11 = vpop.permute.xlu1 %8217 }
 0x9f2   : > { %14987 = vst [vmem:[#allocation112_spill] sm:$0xff] %v13009_v11  ;;  %v13019_v26 = vpop.permute.xlu0 %8430 }
 0x9f3   : > { %14992 = vst [vmem:[#allocation117_spill] sm:$0xff] %v13019_v26 }
 0x9f5   : > { %v13013_v32 = vpop.permute.xlu1 %8425 }
 0x9f6   : > { %14989 = vst [vmem:[#allocation114_spill] sm:$0xff] %v13013_v32  ;;  %v13023_v28 = vpop.permute.xlu0 %8626 }
 0x9f7   : > { %14994 = vst [vmem:[#allocation119_spill] sm:$0xff] %v13023_v28 }
 0x9f9   : > { %v13017_v42 = vpop.permute.xlu1 %8435 }
 0x9fa   : > { %14991 = vst [vmem:[#allocation116_spill] sm:$0xff] %v13017_v42  ;;  %v13027_v39 = vpop.permute.xlu0 %8636 }
 0x9fb   : > { %14996 = vst [vmem:[#allocation121_spill] sm:$0xff] %v13027_v39 }
 0x9fd   : > { %v13021_v47 = vpop.permute.xlu1 %8631 }
 0x9fe   : > { %14993 = vst [vmem:[#allocation118_spill] sm:$0xff] %v13021_v47  ;;  %v13031_v11 = vpop.permute.xlu0 %8646 }
 0x9ff   : > { %14998 = vst [vmem:[#allocation123_spill] sm:$0xff] %v13031_v11 }
 0xa01   : > { %v13025_v61 = vpop.permute.xlu1 %8641 }
 0xa02   : > { %14995 = vst [vmem:[#allocation120_spill] sm:$0xff] %v13025_v61  ;;  %v13035_v32 = vpop.permute.xlu0 %8854 }
 0xa03   : > { %15000 = vst [vmem:[#allocation125_spill] sm:$0xff] %v13035_v32 }
 0xa05   : > { %v13029_v34 = vpop.permute.xlu1 %8651 }
 0xa06   : > { %14997 = vst [vmem:[#allocation122_spill] sm:$0xff] %v13029_v34  ;;  %v13039_v42 = vpop.permute.xlu0 %8864 }
 0xa07   : > { %15002 = vst [vmem:[#allocation127_spill] sm:$0xff] %v13039_v42 }
 0xa09   : > { %v13033_v27 = vpop.permute.xlu1 %8859 }
 0xa0a   : > { %14999 = vst [vmem:[#allocation124_spill] sm:$0xff] %v13033_v27  ;;  %v13043_v47 = vpop.permute.xlu0 %8874 }
 0xa0b   : > { %15004 = vst [vmem:[#allocation129_spill] sm:$0xff] %v13043_v47 }
 0xa0d   : > { %v13037_v30 = vpop.permute.xlu1 %8869 }
 0xa0e   : > { %15001 = vst [vmem:[#allocation126_spill] sm:$0xff] %v13037_v30  ;;  %v13047_v61 = vpop.permute.xlu0 %9082 }
 0xa0f   : > { %15006 = vst [vmem:[#allocation131_spill] sm:$0xff] %v13047_v61 }
 0xa11   : > { %v13041_v26 = vpop.permute.xlu1 %8879 }
 0xa12   : > { %15003 = vst [vmem:[#allocation128_spill] sm:$0xff] %v13041_v26  ;;  %v13051_v34 = vpop.permute.xlu0 %9092 }
 0xa13   : > { %15008 = vst [vmem:[#allocation133_spill] sm:$0xff] %v13051_v34 }
 0xa15   : > { %v13045_v28 = vpop.permute.xlu1 %9087 }
 0xa16   : > { %15005 = vst [vmem:[#allocation130_spill] sm:$0xff] %v13045_v28  ;;  %v13055_v32 = vpop.permute.xlu0 %9102 }
 0xa17   : > { %15010 = vst [vmem:[#allocation135_spill] sm:$0xff] %v13055_v32 }
 0xa19   : > { %v13049_v39 = vpop.permute.xlu1 %9097 }
 0xa1a   : > { %15007 = vst [vmem:[#allocation132_spill] sm:$0xff] %v13049_v39  ;;  %v13059_v42 = vpop.permute.xlu0 %9310 }
 0xa1b   : > { %15012 = vst [vmem:[#allocation137_spill] sm:$0xff] %v13059_v42 }
 0xa1d   : > { %v13053_v27 = vpop.permute.xlu1 %9107 }
 0xa1e   : > { %15009 = vst [vmem:[#allocation134_spill] sm:$0xff] %v13053_v27  ;;  %v13063_v47 = vpop.permute.xlu0 %9320 }
 0xa1f   : > { %15014 = vst [vmem:[#allocation139_spill] sm:$0xff] %v13063_v47 }
 0xa21   : > { %v13057_v30 = vpop.permute.xlu1 %9315 }
 0xa22   : > { %15011 = vst [vmem:[#allocation136_spill] sm:$0xff] %v13057_v30  ;;  %v13067_v61 = vpop.permute.xlu0 %9505 }
 0xa23   : > { %15016 = vst [vmem:[#allocation141_spill] sm:$0xff] %v13067_v61 }
 0xa25   : > { %v13061_v26 = vpop.permute.xlu1 %9325 }
 0xa26   : > { %15013 = vst [vmem:[#allocation138_spill] sm:$0xff] %v13061_v26  ;;  %v13071_v11 = vpop.permute.xlu0 %9515 }
 0xa27   : > { %15018 = vst [vmem:[#allocation143_spill] sm:$0xff] %v13071_v11 }
 0xa29   : > { %v13065_v28 = vpop.permute.xlu1 %9510 }
 0xa2a   : > { %15015 = vst [vmem:[#allocation140_spill] sm:$0xff] %v13065_v28  ;;  %v13075_v27 = vpop.permute.xlu0 %9525 }
 0xa2b   : > { %15020 = vst [vmem:[#allocation145_spill] sm:$0xff] %v13075_v27 }
 0xa2d   : > { %v13069_v39 = vpop.permute.xlu1 %9520 }
 0xa2e   : > { %15017 = vst [vmem:[#allocation142_spill] sm:$0xff] %v13069_v39  ;;  %v2067_v30 = vpop.permute.xlu0 %2066 }
 0xa31   : > { %v13073_v34 = vpop.permute.xlu1 %9530 }
 0xa32   : > { %15019 = vst [vmem:[#allocation144_spill] sm:$0xff] %v13073_v34 }
 0xa35   : > { %v2474_v32 = vpop.permute.xlu1 %2473 }
 0xa36   : > { %v10869_v42 = vadd.f32 %v2474_v32, %v2067_v30 }
 0xa7b   : > { %v2554_v9 = vpop.f32.mrb[104].mxu0 }
 0xa7c   : > { %v10870_v26 = vadd.f32 %v10869_v42, %v2554_v9  ;;  %v2607_v35 = vpop.f32.mrb[104].mxu1  ;;  %v2556_v47 = vpop.f32.mrb[105].mxu0 }
 0xa7d   : > { %v10874_v58 = vadd.f32 %v10869_v42, %v2607_v35  ;;  %v10872_v28 = vadd.f32 %v10869_v42, %v2556_v47  ;;  %v2609_v0 = vpop.f32.mrb[105].mxu1  ;;  %v2558_v61 = vpop.f32.mrb[106].mxu0 }
 0xa7e   : > { %2630 = vst [vmem:[%s13078_s17] sm:$0xff] %v10870_v26  ;;  %v10876_v34 = vadd.f32 %v10869_v42, %v2609_v0  ;;  %v2611_v27 = vpop.f32.mrb[106].mxu1  ;;  %v2559_v39 = vpop.f32.mrb[107].mxu0 }
 0xa7f   : > { %2632 = vst [vmem:[%s13078_s17 + $0x10] sm:$0xff] %v10874_v58  ;;  %2631 = vst [vmem:[%s13078_s17 + $0x8] sm:$0xff] %v10872_v28  ;;  %v2612_v30 = vpop.f32.mrb[107].mxu1 }
 0xa80   : > { %2633 = vst [vmem:[%s13078_s17 + $0x18] sm:$0xff] %v10876_v34 }
 0xa83   : > { %v2562_v9 = vpop.f32.mrb[120].mxu0 }
 0xa84   : > { %v2615_v32 = vpop.f32.mrb[120].mxu1  ;;  %v2563_v35 = vpop.f32.mrb[121].mxu0 }
 0xa85   : > { %v2616_v47 = vpop.f32.mrb[121].mxu1  ;;  %v2564_v11 = vpop.f32.mrb[122].mxu0 }
 0xa86   : > { %v2617_v61 = vpop.f32.mrb[122].mxu1  ;;  %v2565_v44 = vpop.f32.mrb[123].mxu0 }
 0xa87   : > { %v2618_v19 = vpop.f32.mrb[123].mxu1 }
 0xa8b   : > { %v2568_v24 = vpop.f32.mrb[124].mxu0 }
 0xa8c   : > { %v2621_v5 = vpop.f32.mrb[124].mxu1  ;;  %v2569_v2 = vpop.f32.mrb[125].mxu0 }
 0xa8d   : > { %v2622_v60 = vpop.f32.mrb[125].mxu1  ;;  %v2570_v26 = vpop.f32.mrb[126].mxu0 }
 0xa8e   : > { %v2623_v0 = vpop.f32.mrb[126].mxu1  ;;  %v2571_v27 = vpop.f32.mrb[127].mxu0 }
 0xa8f   : > { %v2624_v39 = vpop.f32.mrb[127].mxu1 }
 0xa93   : > { %v2754_v58 = vpop.f32.mrb[128].mxu0 }
 0xa94   : > { %v2755_v42 = vadd.f32 %v2754_v58, %v12000_v43  ;;  %v2817_v28 = vpop.f32.mrb[128].mxu1  ;;  %v2756_v34 = vpop.f32.mrb[129].mxu0 }
 0xa95   : > { %v2818_v30 = vadd.f32 %v2817_v28, %v12000_v43  ;;  %v2757_v11 = vadd.f32 %v2756_v34, %v12000_v43  ;;  %v2819_v9 = vpop.f32.mrb[129].mxu1  ;;  %v2758_v44 = vpop.f32.mrb[130].mxu0 }
 0xa96   : > { %v2820_v19 = vadd.f32 %v2819_v9, %v12000_v43  ;;  %v2759_v2 = vadd.f32 %v2758_v44, %v11993_v41  ;;  %v2821_v60 = vpop.f32.mrb[130].mxu1  ;;  %v2760_v5 = vpop.f32.mrb[131].mxu0  ;;  %v2846_v47 = vmax.f32 %v2755_v42, 0.0 }
 0xa97   : > { %v2822_v24 = vadd.f32 %v2821_v60, %v11993_v41  ;;  %v2761_v32 = vadd.f32 %v2760_v5, %v11993_v41  ;;  %v2823_v35 = vpop.f32.mrb[131].mxu1  ;;  %v2848_v0 = vmax.f32 %v2818_v30, 0.0  ;;  %v2847_v27 = vmax.f32 %v2757_v11, 0.0 }
 0xa98   : > { %v2850_v61 = vmax.f32 %v2759_v2, 0.0  ;;  %v2824_v26 = vadd.f32 %v2823_v35, %v11993_v41  ;;  %v2849_v28 = vmax.f32 %v2820_v19, 0.0  ;;  %v15021_v19 = vld [vmem:[#allocation54_spill] sm:$0xff] }
 0xa99   : > { %v2852_v39 = vmax.f32 %v2822_v24, 0.0  ;;  %v2851_v58 = vmax.f32 %v2761_v32, 0.0 }
 0xa9a   : > { %v2870_v34 = vpack.c.bf16 %v2850_v61, %v2846_v47  ;;  %v2853_v43 = vmax.f32 %v2824_v26, 0.0 }
 0xa9b   : > { %v2872_v9 = vpack.c.bf16 %v2852_v39, %v2848_v0  ;;  %v2764_v44 = vpop.f32.mrb[132].mxu0  ;;  %v2871_v63 = vpack.c.bf16 %v2851_v58, %v2847_v27 }
 0xa9c   : > { %v2765_v37 = vadd.f32 %v2764_v44, %v12015_v52  ;;  %v2827_v60 = vpop.f32.mrb[132].mxu1  ;;  %v2766_v38 = vpop.f32.mrb[133].mxu0  ;;  %v2873_v5 = vpack.c.bf16 %v2853_v43, %v2849_v28 }
 0xa9d   : > { %v2828_v42 = vadd.f32 %v2827_v60, %v12015_v52  ;;  %v2767_v2 = vadd.f32 %v2766_v38, %v12015_v52  ;;  %v2829_v41 = vpop.f32.mrb[133].mxu1  ;;  %v2768_v30 = vpop.f32.mrb[134].mxu0  ;;  %2948 = vmatprep.subr.bf16.mxu0 %v2871_v63 }
 0xa9e   : > { %v2830_v11 = vadd.f32 %v2829_v41, %v12015_v52  ;;  %v2769_v24 = vadd.f32 %v2768_v30, %v15021_v19  ;;  %v2831_v32 = vpop.f32.mrb[134].mxu1  ;;  %3011 = vmatprep.subr.bf16.mxu1 %v2873_v5  ;;  %v2770_v35 = vpop.f32.mrb[135].mxu0  ;;  %2949 = vmatpush1.bf16.msra.mxu0 %v2870_v34  ;;  %v2854_v0 = vmax.f32 %v2765_v37, 0.0 }
 0xa9f   : > { %v2832_v47 = vadd.f32 %v2831_v32, %v15021_v19  ;;  %v2771_v61 = vadd.f32 %v2770_v35, %v15021_v19  ;;  %v2833_v26 = vpop.f32.mrb[135].mxu1  ;;  %3012 = vmatpush1.bf16.msra.mxu1 %v2872_v9  ;;  %v2856_v39 = vmax.f32 %v2828_v42, 0.0  ;;  %v2855_v63 = vmax.f32 %v2767_v2, 0.0 }
 0xaa0   : > { %v2858_v27 = vmax.f32 %v2769_v24, 0.0  ;;  %v2834_v38 = vadd.f32 %v2833_v26, %v15021_v19  ;;  %v2857_v28 = vmax.f32 %v2830_v11, 0.0 }
 0xaa1   : > { %v2860_v58 = vmax.f32 %v2832_v47, 0.0  ;;  %v2859_v52 = vmax.f32 %v2771_v61, 0.0 }
 0xaa2   : > { %v2874_v43 = vpack.c.bf16 %v2858_v27, %v2854_v0  ;;  %v2861_v44 = vmax.f32 %v2834_v38, 0.0 }
 0xaa3   : > { %v2876_v60 = vpack.c.bf16 %v2860_v58, %v2856_v39  ;;  %v2774_v5 = vpop.f32.mrb[136].mxu0  ;;  %v2875_v34 = vpack.c.bf16 %v2859_v52, %v2855_v63 }
 0xaa4   : > { %v2775_v41 = vadd.f32 %v2774_v5, %v12025_v36  ;;  %v2837_v30 = vpop.f32.mrb[136].mxu1  ;;  %v2776_v32 = vpop.f32.mrb[137].mxu0  ;;  %v2877_v35 = vpack.c.bf16 %v2861_v44, %v2857_v28 }
 0xaa5   : > { %v2838_v37 = vadd.f32 %v2837_v30, %v12025_v36  ;;  %v2777_v9 = vadd.f32 %v2776_v32, %v12025_v36  ;;  %v2839_v19 = vpop.f32.mrb[137].mxu1  ;;  %v2778_v42 = vpop.f32.mrb[138].mxu0  ;;  %2950 = vmatprep.subr.bf16.mxu0 %v2875_v34  ;;  %v11024_v32 = vld [vmem:[%s14592_s1 + $0x18] sm:$0xff]  }
 0xaa6   : > { %v2840_v2 = vadd.f32 %v2839_v19, %v12025_v36  ;;  %v2779_v11 = vadd.f32 %v2778_v42, %v12020_v8  ;;  %v2841_v24 = vpop.f32.mrb[138].mxu1  ;;  %3013 = vmatprep.subr.bf16.mxu1 %v2877_v35  ;;  %v2780_v47 = vpop.f32.mrb[139].mxu0  ;;  %2951 = vmatpush1.bf16.msra.mxu0 %v2874_v43  ;;  %v2862_v27 = vmax.f32 %v2775_v41, 0.0 }
 0xaa7   : > { %v2842_v61 = vadd.f32 %v2841_v24, %v12020_v8  ;;  %v2781_v26 = vadd.f32 %v2780_v47, %v12020_v8  ;;  %v2843_v0 = vpop.f32.mrb[139].mxu1  ;;  %3014 = vmatpush1.bf16.msra.mxu1 %v2876_v60  ;;  %v2864_v63 = vmax.f32 %v2838_v37, 0.0  ;;  %v2863_v58 = vmax.f32 %v2777_v9, 0.0  ;;  %v11026_v60 = vld [vmem:[%s14592_s1 + $0x28] sm:$0xff]  }
 0xaa8   : > { %v2866_v38 = vmax.f32 %v2779_v11, 0.0  ;;  %v2844_v39 = vadd.f32 %v2843_v0, %v12020_v8  ;;  %v2865_v28 = vmax.f32 %v2840_v2, 0.0  ;;  %v11025_v8 = vld [vmem:[%s14592_s1 + $0x20] sm:$0xff]  }
 0xaa9   : > { %v2868_v52 = vmax.f32 %v2842_v61, 0.0  ;;  %v2867_v36 = vmax.f32 %v2781_v26, 0.0 }
 0xaaa   : > { %v2878_v44 = vpack.c.bf16 %v2866_v38, %v2862_v27  ;;  %v2869_v5 = vmax.f32 %v2844_v39, 0.0 }
 0xaab   : > { %v2880_v34 = vpack.c.bf16 %v2868_v52, %v2864_v63  ;;  %v2879_v30 = vpack.c.bf16 %v2867_v36, %v2863_v58 }
 0xaac   : > { %v2881_v43 = vpack.c.bf16 %v2869_v5, %v2865_v28 }
 0xaad   : > { %2952 = vmatprep.subr.bf16.mxu0 %v2879_v30 }
 0xaae   : > { %3015 = vmatprep.subr.bf16.mxu1 %v2881_v43  ;;  %2953 = vmatpush1.bf16.msra.mxu0 %v2878_v44 }
 0xaaf   : > { %3016 = vmatpush1.bf16.msra.mxu1 %v2880_v34 }
 0xab1   : > { %10229 = vmatmul.mubr.msk.bf16.vlgmr.msra.gmra.mrb[140].mxu0 %vm270_vm0, %v11024_v32 }
 0xab2   : > { %10232 = vmatmul.mubr.msk.bf16.vlgmr.msra.gmra.mrb[140].mxu1 %vm270_vm0, %v11024_v32  ;;  %2990 = vmatprep.mubr.bf16.mxu0 %v14836_v25 }
 0xab3   : > { %3053 = vmatprep.mubr.bf16.mxu1 %v14836_v25 }
 0xab9   : > { %10230 = vmatmul.mubr.msk.bf16.gmra.mrb[144].mxu0 %vm270_vm0, %v11025_v8 }
 0xaba   : > { %10233 = vmatmul.mubr.msk.bf16.gmra.mrb[144].mxu1 %vm270_vm0, %v11025_v8  ;;  %3000 = vmatprep.mubr.bf16.mxu0 %v14836_v25 }
 0xabb   : > { %3063 = vmatprep.mubr.bf16.mxu1 %v14836_v25 }
 0xac1   : > { %10231 = vmatmul.mubr.msk.bf16.gmra.mrb[148].mxu0 %vm270_vm0, %v11026_v60 }
 0xac2   : > { %10234 = vmatmul.mubr.msk.bf16.gmra.mrb[148].mxu1 %vm270_vm0, %v11026_v60  ;;  %3208 = vmatprep.mubr.bf16.mxu0 %v14836_v25 }
 0xac3   : > { %3271 = vmatprep.mubr.bf16.mxu1 %v14836_v25 }
 0xb84   : > { %v2982_v41 = vpop.f32.mrb[140].mxu0 }
 0xb85   : > { %v2983_v35 = vadd.f32 %v2982_v41, %v12038_v49  ;;  %v3045_v37 = vpop.f32.mrb[140].mxu1  ;;  %v2984_v9 = vpop.f32.mrb[141].mxu0 }
 0xb86   : > { %v3046_v19 = vadd.f32 %v3045_v37, %v12038_v49  ;;  %v2985_v42 = vadd.f32 %v2984_v9, %v12038_v49  ;;  %v3047_v2 = vpop.f32.mrb[141].mxu1  ;;  %v2986_v11 = vpop.f32.mrb[142].mxu0 }
 0xb87   : > { %v3048_v24 = vadd.f32 %v3047_v2, %v12038_v49  ;;  %v2987_v47 = vadd.f32 %v2986_v11, %v12033_v7  ;;  %v3049_v61 = vpop.f32.mrb[142].mxu1  ;;  %v2988_v26 = vpop.f32.mrb[143].mxu0  ;;  %v3074_v39 = vmax.f32 %v2983_v35, 0.0 }
 0xb88   : > { %v3050_v0 = vadd.f32 %v3049_v61, %v12033_v7  ;;  %v2989_v27 = vadd.f32 %v2988_v26, %v12033_v7  ;;  %v3051_v38 = vpop.f32.mrb[143].mxu1  ;;  %v3076_v52 = vmax.f32 %v3046_v19, 0.0  ;;  %v3075_v36 = vmax.f32 %v2985_v42, 0.0 }
 0xb89   : > { %v3078_v63 = vmax.f32 %v2987_v47, 0.0  ;;  %v3052_v58 = vadd.f32 %v3051_v38, %v12033_v7  ;;  %v3077_v5 = vmax.f32 %v3048_v24, 0.0 }
 0xb8a   : > { %v3080_v28 = vmax.f32 %v3050_v0, 0.0  ;;  %v3079_v44 = vmax.f32 %v2989_v27, 0.0 }
 0xb8b   : > { %v3098_v34 = vpack.c.bf16 %v3078_v63, %v3074_v39  ;;  %v3081_v49 = vmax.f32 %v3052_v58, 0.0 }
 0xb8c   : > { %v3100_v30 = vpack.c.bf16 %v3080_v28, %v3076_v52  ;;  %v2992_v43 = vpop.f32.mrb[144].mxu0  ;;  %v3099_v32 = vpack.c.bf16 %v3079_v44, %v3075_v36 }
 0xb8d   : > { %v2993_v8 = vadd.f32 %v2992_v43, %v12052_v40  ;;  %v3055_v60 = vpop.f32.mrb[144].mxu1  ;;  %v2994_v41 = vpop.f32.mrb[145].mxu0  ;;  %v3101_v37 = vpack.c.bf16 %v3081_v49, %v3077_v5 }
 0xb8e   : > { %v3056_v35 = vadd.f32 %v3055_v60, %v12052_v40  ;;  %v2995_v9 = vadd.f32 %v2994_v41, %v12052_v40  ;;  %v3057_v7 = vpop.f32.mrb[145].mxu1  ;;  %v2996_v19 = vpop.f32.mrb[146].mxu0  ;;  %3176 = vmatprep.subr.bf16.mxu0 %v3099_v32 }
 0xb8f   : > { %v3058_v42 = vadd.f32 %v3057_v7, %v12052_v40  ;;  %v2997_v2 = vadd.f32 %v2996_v19, %v12047_v15  ;;  %v3059_v11 = vpop.f32.mrb[146].mxu1  ;;  %3239 = vmatprep.subr.bf16.mxu1 %v3101_v37  ;;  %v2998_v24 = vpop.f32.mrb[147].mxu0  ;;  %3177 = vmatpush1.bf16.msra.mxu0 %v3098_v34  ;;  %v3082_v0 = vmax.f32 %v2993_v8, 0.0 }
 0xb90   : > { %v3060_v47 = vadd.f32 %v3059_v11, %v12047_v15  ;;  %v2999_v61 = vadd.f32 %v2998_v24, %v12047_v15  ;;  %v3061_v26 = vpop.f32.mrb[147].mxu1  ;;  %3240 = vmatpush1.bf16.msra.mxu1 %v3100_v30  ;;  %v3084_v39 = vmax.f32 %v3056_v35, 0.0  ;;  %v3083_v63 = vmax.f32 %v2995_v9, 0.0 }
 0xb91   : > { %v3086_v27 = vmax.f32 %v2997_v2, 0.0  ;;  %v3062_v38 = vadd.f32 %v3061_v26, %v12047_v15  ;;  %v3085_v52 = vmax.f32 %v3058_v42, 0.0 }
 0xb92   : > { %v3088_v58 = vmax.f32 %v3060_v47, 0.0  ;;  %v3087_v40 = vmax.f32 %v2999_v61, 0.0 }
 0xb93   : > { %v3102_v36 = vpack.c.bf16 %v3086_v27, %v3082_v0  ;;  %v3089_v28 = vmax.f32 %v3062_v38, 0.0 }
 0xb94   : > { %v3104_v44 = vpack.c.bf16 %v3088_v58, %v3084_v39  ;;  %v3002_v5 = vpop.f32.mrb[148].mxu0  ;;  %v3103_v34 = vpack.c.bf16 %v3087_v40, %v3083_v63 }
 0xb95   : > { %v3003_v49 = vadd.f32 %v3002_v5, %v12071_v14  ;;  %v3065_v43 = vpop.f32.mrb[148].mxu1  ;;  %v3004_v32 = vpop.f32.mrb[149].mxu0  ;;  %v3105_v60 = vpack.c.bf16 %v3089_v28, %v3085_v52  ;;  %v11027_v52 = vld [vmem:[%s14592_s1 + $0x30] sm:$0xff]  }
 0xb96   : > { %v3066_v30 = vadd.f32 %v3065_v43, %v12071_v14  ;;  %v3005_v8 = vadd.f32 %v3004_v32, %v12071_v14  ;;  %v3067_v15 = vpop.f32.mrb[149].mxu1  ;;  %v3006_v41 = vpop.f32.mrb[150].mxu0  ;;  %3178 = vmatprep.subr.bf16.mxu0 %v3103_v34 }
 0xb97   : > { %v3068_v37 = vadd.f32 %v3067_v15, %v12071_v14  ;;  %v3007_v35 = vadd.f32 %v3006_v41, %v12067_v1  ;;  %v3069_v9 = vpop.f32.mrb[150].mxu1  ;;  %3241 = vmatprep.subr.bf16.mxu1 %v3105_v60  ;;  %v3008_v7 = vpop.f32.mrb[151].mxu0  ;;  %3179 = vmatpush1.bf16.msra.mxu0 %v3102_v36  ;;  %v3090_v11 = vmax.f32 %v3003_v49, 0.0  ;;  %v11029_v36 = vld [vmem:[%s14592_s1 + $0x40] sm:$0xff]  }
 0xb98   : > { %v3070_v19 = vadd.f32 %v3069_v9, %v12067_v1  ;;  %v3009_v42 = vadd.f32 %v3008_v7, %v12067_v1  ;;  %v3071_v2 = vpop.f32.mrb[151].mxu1  ;;  %3242 = vmatpush1.bf16.msra.mxu1 %v3104_v44  ;;  %v3092_v61 = vmax.f32 %v3066_v30, 0.0  ;;  %v3091_v26 = vmax.f32 %v3005_v8, 0.0 }
 0xb99   : > { %v3094_v24 = vmax.f32 %v3007_v35, 0.0  ;;  %v3072_v47 = vadd.f32 %v3071_v2, %v12067_v1  ;;  %v3093_v27 = vmax.f32 %v3068_v37, 0.0  ;;  %v11028_v1 = vld [vmem:[%s14592_s1 + $0x38] sm:$0xff]  }
 0xb9a   : > { %v3096_v0 = vmax.f32 %v3070_v19, 0.0  ;;  %v3095_v14 = vmax.f32 %v3009_v42, 0.0 }
 0xb9b   : > { %v3106_v38 = vpack.c.bf16 %v3094_v24, %v3090_v11  ;;  %v3097_v39 = vmax.f32 %v3072_v47, 0.0 }
 0xb9c   : > { %v3108_v63 = vpack.c.bf16 %v3096_v0, %v3092_v61  ;;  %v3107_v58 = vpack.c.bf16 %v3095_v14, %v3091_v26 }
 0xb9d   : > { %v3109_v40 = vpack.c.bf16 %v3097_v39, %v3093_v27 }
 0xb9e   : > { %3180 = vmatprep.subr.bf16.mxu0 %v3107_v58 }
 0xb9f   : > { %3243 = vmatprep.subr.bf16.mxu1 %v3109_v40  ;;  %3181 = vmatpush1.bf16.msra.mxu0 %v3106_v38 }
 0xba0   : > { %3244 = vmatpush1.bf16.msra.mxu1 %v3108_v63 }
 0xba2   : > { %10250 = vmatmul.mubr.msk.bf16.vlgmr.msra.gmra.mrb[152].mxu0 %vm270_vm0, %v11027_v52 }
 0xba3   : > { %10253 = vmatmul.mubr.msk.bf16.vlgmr.msra.gmra.mrb[152].mxu1 %vm270_vm0, %v11027_v52  ;;  %3218 = vmatprep.mubr.bf16.mxu0 %v14836_v25 }
 0xba4   : > { %3281 = vmatprep.mubr.bf16.mxu1 %v14836_v25 }
 0xbaa   : > { %10251 = vmatmul.mubr.msk.bf16.gmra.mrb[156].mxu0 %vm270_vm0, %v11028_v1 }
 0xbab   : > { %10254 = vmatmul.mubr.msk.bf16.gmra.mrb[156].mxu1 %vm270_vm0, %v11028_v1  ;;  %3228 = vmatprep.mubr.bf16.mxu0 %v14836_v25 }
 0xbac   : > { %3291 = vmatprep.mubr.bf16.mxu1 %v14836_v25 }
 0xbb2   : > { %10252 = vmatmul.mubr.msk.bf16.gmra.mrb[160].mxu0 %vm270_vm0, %v11029_v36 }
 0xbb3   : > { %10255 = vmatmul.mubr.msk.bf16.gmra.mrb[160].mxu1 %vm270_vm0, %v11029_v36  ;;  %3436 = vmatprep.mubr.bf16.mxu0 %v14836_v25 }
 0xbb4   : > { %3499 = vmatprep.mubr.bf16.mxu1 %v14836_v25 }
 0xc75   : > { %v3210_v28 = vpop.f32.mrb[152].mxu0 }
 0xc76   : > { %v3211_v44 = vadd.f32 %v3210_v28, %v12088_v50  ;;  %v3273_v5 = vpop.f32.mrb[152].mxu1  ;;  %v3212_v34 = vpop.f32.mrb[153].mxu0 }
 0xc77   : > { %v3274_v49 = vadd.f32 %v3273_v5, %v12088_v50  ;;  %v3213_v43 = vadd.f32 %v3212_v34, %v12088_v50  ;;  %v3275_v32 = vpop.f32.mrb[153].mxu1  ;;  %v3214_v60 = vpop.f32.mrb[154].mxu0 }
 0xc78   : > { %v3276_v30 = vadd.f32 %v3275_v32, %v12088_v50  ;;  %v3215_v8 = vadd.f32 %v3214_v60, %v12083_v51  ;;  %v3277_v15 = vpop.f32.mrb[154].mxu1  ;;  %v3216_v41 = vpop.f32.mrb[155].mxu0  ;;  %v3302_v7 = vmax.f32 %v3211_v44, 0.0 }
 0xc79   : > { %v3278_v37 = vadd.f32 %v3277_v15, %v12083_v51  ;;  %v3217_v35 = vadd.f32 %v3216_v41, %v12083_v51  ;;  %v3279_v9 = vpop.f32.mrb[155].mxu1  ;;  %v3304_v2 = vmax.f32 %v3274_v49, 0.0  ;;  %v3303_v11 = vmax.f32 %v3213_v43, 0.0 }
 0xc7a   : > { %v3306_v19 = vmax.f32 %v3215_v8, 0.0  ;;  %v3280_v42 = vadd.f32 %v3279_v9, %v12083_v51  ;;  %v3305_v61 = vmax.f32 %v3276_v30, 0.0 }
 0xc7b   : > { %v3308_v24 = vmax.f32 %v3278_v37, 0.0  ;;  %v3307_v47 = vmax.f32 %v3217_v35, 0.0 }
 0xc7c   : > { %v3326_v26 = vpack.c.bf16 %v3306_v19, %v3302_v7  ;;  %v3309_v50 = vmax.f32 %v3280_v42, 0.0 }
 0xc7d   : > { %v3328_v0 = vpack.c.bf16 %v3308_v24, %v3304_v2  ;;  %v3220_v14 = vpop.f32.mrb[156].mxu0  ;;  %v3327_v27 = vpack.c.bf16 %v3307_v47, %v3303_v11 }
 0xc7e   : > { %v3221_v38 = vadd.f32 %v3220_v14, %v12105_v45  ;;  %v3283_v39 = vpop.f32.mrb[156].mxu1  ;;  %v3222_v63 = vpop.f32.mrb[157].mxu0  ;;  %v3329_v58 = vpack.c.bf16 %v3309_v50, %v3305_v61 }
 0xc7f   : > { %v3284_v40 = vadd.f32 %v3283_v39, %v12105_v45  ;;  %v3223_v52 = vadd.f32 %v3222_v63, %v12105_v45  ;;  %v3285_v51 = vpop.f32.mrb[157].mxu1  ;;  %v3224_v1 = vpop.f32.mrb[158].mxu0  ;;  %3404 = vmatprep.subr.bf16.mxu0 %v3327_v27 }
 0xc80   : > { %v3286_v36 = vadd.f32 %v3285_v51, %v12105_v45  ;;  %v3225_v28 = vadd.f32 %v3224_v1, %v12103_v46  ;;  %v3287_v44 = vpop.f32.mrb[158].mxu1  ;;  %3467 = vmatprep.subr.bf16.mxu1 %v3329_v58  ;;  %v3226_v5 = vpop.f32.mrb[159].mxu0  ;;  %3405 = vmatpush1.bf16.msra.mxu0 %v3326_v26  ;;  %v3310_v32 = vmax.f32 %v3221_v38, 0.0 }
 0xc81   : > { %v3288_v34 = vadd.f32 %v3287_v44, %v12103_v46  ;;  %v3227_v49 = vadd.f32 %v3226_v5, %v12103_v46  ;;  %v3289_v43 = vpop.f32.mrb[159].mxu1  ;;  %3468 = vmatpush1.bf16.msra.mxu1 %v3328_v0  ;;  %v3312_v8 = vmax.f32 %v3284_v40, 0.0  ;;  %v3311_v15 = vmax.f32 %v3223_v52, 0.0 }
 0xc82   : > { %v3314_v60 = vmax.f32 %v3225_v28, 0.0  ;;  %v3290_v30 = vadd.f32 %v3289_v43, %v12103_v46  ;;  %v3313_v37 = vmax.f32 %v3286_v36, 0.0 }
 0xc83   : > { %v3316_v41 = vmax.f32 %v3288_v34, 0.0  ;;  %v3315_v45 = vmax.f32 %v3227_v49, 0.0 }
 0xc84   : > { %v3330_v35 = vpack.c.bf16 %v3314_v60, %v3310_v32  ;;  %v3317_v9 = vmax.f32 %v3290_v30, 0.0  ;;  %v11030_v60 = vld [vmem:[%s14592_s1 + $0x48] sm:$0xff]   ;;  %v11032_v30 = vld [vmem:[%s14592_s1 + $0x58] sm:$0xff]  }
 0xc85   : > { %v3332_v7 = vpack.c.bf16 %v3316_v41, %v3312_v8  ;;  %v3230_v19 = vpop.f32.mrb[160].mxu0  ;;  %v3331_v42 = vpack.c.bf16 %v3315_v45, %v3311_v15 }
 0xc86   : > { %v3231_v2 = vadd.f32 %v3230_v19, %v12116_v23  ;;  %v3293_v11 = vpop.f32.mrb[160].mxu1  ;;  %v3232_v24 = vpop.f32.mrb[161].mxu0  ;;  %v3333_v47 = vpack.c.bf16 %v3317_v9, %v3313_v37 }
 0xc87   : > { %v3294_v61 = vadd.f32 %v3293_v11, %v12116_v23  ;;  %v3233_v26 = vadd.f32 %v3232_v24, %v12116_v23  ;;  %v3295_v46 = vpop.f32.mrb[161].mxu1  ;;  %v3234_v50 = vpop.f32.mrb[162].mxu0  ;;  %3406 = vmatprep.subr.bf16.mxu0 %v3331_v42 }
 0xc88   : > { %v3296_v0 = vadd.f32 %v3295_v46, %v12116_v23  ;;  %v3235_v14 = vadd.f32 %v3234_v50, %v12113_v48  ;;  %v3297_v27 = vpop.f32.mrb[162].mxu1  ;;  %3469 = vmatprep.subr.bf16.mxu1 %v3333_v47  ;;  %v3236_v38 = vpop.f32.mrb[163].mxu0  ;;  %3407 = vmatpush1.bf16.msra.mxu0 %v3330_v35  ;;  %v3318_v40 = vmax.f32 %v3231_v2, 0.0 }
 0xc89   : > { %v3298_v39 = vadd.f32 %v3297_v27, %v12113_v48  ;;  %v3237_v63 = vadd.f32 %v3236_v38, %v12113_v48  ;;  %v3299_v58 = vpop.f32.mrb[163].mxu1  ;;  %3470 = vmatpush1.bf16.msra.mxu1 %v3332_v7  ;;  %v3320_v1 = vmax.f32 %v3294_v61, 0.0  ;;  %v3319_v36 = vmax.f32 %v3233_v26, 0.0 }
 0xc8a   : > { %v3322_v52 = vmax.f32 %v3235_v14, 0.0  ;;  %v3300_v51 = vadd.f32 %v3299_v58, %v12113_v48  ;;  %v3321_v44 = vmax.f32 %v3296_v0, 0.0  ;;  %v11031_v48 = vld [vmem:[%s14592_s1 + $0x50] sm:$0xff]  }
 0xc8b   : > { %v3324_v28 = vmax.f32 %v3298_v39, 0.0  ;;  %v3323_v23 = vmax.f32 %v3237_v63, 0.0 }
 0xc8c   : > { %v3334_v5 = vpack.c.bf16 %v3322_v52, %v3318_v40  ;;  %v3325_v34 = vmax.f32 %v3300_v51, 0.0 }
 0xc8d   : > { %v3336_v49 = vpack.c.bf16 %v3324_v28, %v3320_v1  ;;  %v3335_v43 = vpack.c.bf16 %v3323_v23, %v3319_v36 }
 0xc8e   : > { %v3337_v32 = vpack.c.bf16 %v3325_v34, %v3321_v44 }
 0xc8f   : > { %3408 = vmatprep.subr.bf16.mxu0 %v3335_v43 }
 0xc90   : > { %3471 = vmatprep.subr.bf16.mxu1 %v3337_v32  ;;  %3409 = vmatpush1.bf16.msra.mxu0 %v3334_v5 }
 0xc91   : > { %3472 = vmatpush1.bf16.msra.mxu1 %v3336_v49 }
 0xc93   : > { %10271 = vmatmul.mubr.msk.bf16.vlgmr.msra.gmra.mrb[164].mxu0 %vm270_vm0, %v11030_v60 }
 0xc94   : > { %10274 = vmatmul.mubr.msk.bf16.vlgmr.msra.gmra.mrb[164].mxu1 %vm270_vm0, %v11030_v60  ;;  %3446 = vmatprep.mubr.bf16.mxu0 %v14836_v25 }
 0xc95   : > { %3509 = vmatprep.mubr.bf16.mxu1 %v14836_v25 }
 0xc9b   : > { %10272 = vmatmul.mubr.msk.bf16.gmra.mrb[168].mxu0 %vm270_vm0, %v11031_v48 }
 0xc9c   : > { %10275 = vmatmul.mubr.msk.bf16.gmra.mrb[168].mxu1 %vm270_vm0, %v11031_v48  ;;  %3456 = vmatprep.mubr.bf16.mxu0 %v14836_v25 }
 0xc9d   : > { %3519 = vmatprep.mubr.bf16.mxu1 %v14836_v25 }
 0xca3   : > { %10273 = vmatmul.mubr.msk.bf16.gmra.mrb[172].mxu0 %vm270_vm0, %v11032_v30 }
 0xca4   : > { %10276 = vmatmul.mubr.msk.bf16.gmra.mrb[172].mxu1 %vm270_vm0, %v11032_v30  ;;  %3662 = vmatprep.mubr.bf16.mxu0 %v14836_v25 }
 0xca5   : > { %3721 = vmatprep.mubr.bf16.mxu1 %v14836_v25 }
 0xd66   : > { %v3438_v8 = vpop.f32.mrb[164].mxu0 }
 0xd67   : > { %v3439_v15 = vadd.f32 %v3438_v8, %v12123_v16  ;;  %v3501_v41 = vpop.f32.mrb[164].mxu1  ;;  %v3440_v45 = vpop.f32.mrb[165].mxu0 }
 0xd68   : > { %v3502_v37 = vadd.f32 %v3501_v41, %v12123_v16  ;;  %v3441_v35 = vadd.f32 %v3440_v45, %v12123_v16  ;;  %v3503_v9 = vpop.f32.mrb[165].mxu1  ;;  %v3442_v7 = vpop.f32.mrb[166].mxu0 }
 0xd69   : > { %v3504_v19 = vadd.f32 %v3503_v9, %v12123_v16  ;;  %v3443_v42 = vadd.f32 %v3442_v7, %v12121_v21  ;;  %v3505_v2 = vpop.f32.mrb[166].mxu1  ;;  %v3444_v11 = vpop.f32.mrb[167].mxu0  ;;  %v3530_v26 = vmax.f32 %v3439_v15, 0.0 }
 0xd6a   : > { %v3506_v24 = vadd.f32 %v3505_v2, %v12121_v21  ;;  %v3445_v47 = vadd.f32 %v3444_v11, %v12121_v21  ;;  %v3507_v61 = vpop.f32.mrb[167].mxu1  ;;  %v3532_v0 = vmax.f32 %v3502_v37, 0.0  ;;  %v3531_v14 = vmax.f32 %v3441_v35, 0.0 }
 0xd6b   : > { %v3534_v46 = vmax.f32 %v3443_v42, 0.0  ;;  %v3508_v50 = vadd.f32 %v3507_v61, %v12121_v21  ;;  %v3533_v39 = vmax.f32 %v3504_v19, 0.0 }
 0xd6c   : > { %v3536_v27 = vmax.f32 %v3506_v24, 0.0  ;;  %v3535_v38 = vmax.f32 %v3445_v47, 0.0 }
 0xd6d   : > { %v3554_v63 = vpack.c.bf16 %v3534_v46, %v3530_v26  ;;  %v3537_v16 = vmax.f32 %v3508_v50, 0.0 }
 0xd6e   : > { %v3556_v58 = vpack.c.bf16 %v3536_v27, %v3532_v0  ;;  %v3448_v40 = vpop.f32.mrb[168].mxu0  ;;  %v3555_v52 = vpack.c.bf16 %v3535_v38, %v3531_v14 }
 0xd6f   : > { %v3449_v51 = vadd.f32 %v3448_v40, %v12130_v53  ;;  %v3511_v1 = vpop.f32.mrb[168].mxu1  ;;  %v3450_v36 = vpop.f32.mrb[169].mxu0  ;;  %v3557_v28 = vpack.c.bf16 %v3537_v16, %v3533_v39 }
 0xd70   : > { %v3512_v23 = vadd.f32 %v3511_v1, %v12130_v53  ;;  %v3451_v44 = vadd.f32 %v3450_v36, %v12130_v53  ;;  %v3513_v21 = vpop.f32.mrb[169].mxu1  ;;  %v3452_v5 = vpop.f32.mrb[170].mxu0  ;;  %3630 = vmatprep.subr.bf16.mxu0 %v3555_v52 }
 0xd71   : > { %v3514_v34 = vadd.f32 %v3513_v21, %v12130_v53  ;;  %v3453_v49 = vadd.f32 %v3452_v5, %v12127_v12  ;;  %v3515_v43 = vpop.f32.mrb[170].mxu1  ;;  %3689 = vmatprep.subr.bf16.mxu1 %v3557_v28  ;;  %v3454_v32 = vpop.f32.mrb[171].mxu0  ;;  %3631 = vmatpush1.bf16.msra.mxu0 %v3554_v63  ;;  %v3538_v8 = vmax.f32 %v3449_v51, 0.0 }
 0xd72   : > { %v3516_v60 = vadd.f32 %v3515_v43, %v12127_v12  ;;  %v3455_v48 = vadd.f32 %v3454_v32, %v12127_v12  ;;  %v3517_v30 = vpop.f32.mrb[171].mxu1  ;;  %3690 = vmatpush1.bf16.msra.mxu1 %v3556_v58  ;;  %v3540_v45 = vmax.f32 %v3512_v23, 0.0  ;;  %v3539_v37 = vmax.f32 %v3451_v44, 0.0  ;;  %v11033_v43 = vld [vmem:[%s14592_s1 + $0x60] sm:$0xff]  }
 0xd73   : > { %v3542_v15 = vmax.f32 %v3453_v49, 0.0  ;;  %v3518_v41 = vadd.f32 %v3517_v30, %v12127_v12  ;;  %v3541_v9 = vmax.f32 %v3514_v34, 0.0 }
 0xd74   : > { %v3544_v35 = vmax.f32 %v3516_v60, 0.0  ;;  %v3543_v53 = vmax.f32 %v3455_v48, 0.0 }
 0xd75   : > { %v3558_v7 = vpack.c.bf16 %v3542_v15, %v3538_v8  ;;  %v3545_v19 = vmax.f32 %v3518_v41, 0.0 }
 0xd76   : > { %v3560_v42 = vpack.c.bf16 %v3544_v35, %v3540_v45  ;;  %v3458_v2 = vpop.f32.mrb[172].mxu0  ;;  %v3559_v11 = vpack.c.bf16 %v3543_v53, %v3539_v37 }
 0xd77   : > { %v3459_v24 = vadd.f32 %v3458_v2, %v12137_v55  ;;  %v3521_v47 = vpop.f32.mrb[172].mxu1  ;;  %v3460_v61 = vpop.f32.mrb[173].mxu0  ;;  %v3561_v26 = vpack.c.bf16 %v3545_v19, %v3541_v9 }
 0xd78   : > { %v3522_v46 = vadd.f32 %v3521_v47, %v12137_v55  ;;  %v3461_v50 = vadd.f32 %v3460_v61, %v12137_v55  ;;  %v3523_v12 = vpop.f32.mrb[173].mxu1  ;;  %v3462_v0 = vpop.f32.mrb[174].mxu0  ;;  %3632 = vmatprep.subr.bf16.mxu0 %v3559_v11 }
 0xd79   : > { %v3524_v14 = vadd.f32 %v3523_v12, %v12137_v55  ;;  %v3463_v27 = vadd.f32 %v3462_v0, %v12135_v54  ;;  %v3525_v38 = vpop.f32.mrb[174].mxu1  ;;  %3691 = vmatprep.subr.bf16.mxu1 %v3561_v26  ;;  %v3464_v39 = vpop.f32.mrb[175].mxu0  ;;  %3633 = vmatpush1.bf16.msra.mxu0 %v3558_v7  ;;  %v3546_v40 = vmax.f32 %v3459_v24, 0.0 }
 0xd7a   : > { %v3526_v63 = vadd.f32 %v3525_v38, %v12135_v54  ;;  %v3465_v16 = vadd.f32 %v3464_v39, %v12135_v54  ;;  %v3527_v58 = vpop.f32.mrb[175].mxu1  ;;  %3692 = vmatpush1.bf16.msra.mxu1 %v3560_v42  ;;  %v3548_v1 = vmax.f32 %v3522_v46, 0.0  ;;  %v3547_v36 = vmax.f32 %v3461_v50, 0.0 }
 0xd7b   : > { %v3550_v52 = vmax.f32 %v3463_v27, 0.0  ;;  %v3528_v51 = vadd.f32 %v3527_v58, %v12135_v54  ;;  %v3549_v23 = vmax.f32 %v3524_v14, 0.0  ;;  %v11034_v54 = vld [vmem:[%s14592_s1 + $0x68] sm:$0xff]  }
 0xd7c   : > { %v3552_v28 = vmax.f32 %v3526_v63, 0.0  ;;  %v3551_v55 = vmax.f32 %v3465_v16, 0.0 }
 0xd7d   : > { %v3562_v44 = vpack.c.bf16 %v3550_v52, %v3546_v40  ;;  %v3553_v21 = vmax.f32 %v3528_v51, 0.0  ;;  %v15022_v40 = vld [vmem:[#allocation55_spill] sm:$0xff] }
 0xd7e   : > { %v3564_v5 = vpack.c.bf16 %v3552_v28, %v3548_v1  ;;  %v3563_v34 = vpack.c.bf16 %v3551_v55, %v3547_v36 }
 0xd7f   : > { %v3565_v49 = vpack.c.bf16 %v3553_v21, %v3549_v23 }
 0xd80   : > { %3634 = vmatprep.subr.bf16.mxu0 %v3563_v34 }
 0xd81   : > { %3693 = vmatprep.subr.bf16.mxu1 %v3565_v49  ;;  %3635 = vmatpush1.bf16.msra.mxu0 %v3562_v44 }
 0xd82   : > { %3694 = vmatpush1.bf16.msra.mxu1 %v3564_v5  ;;  %3838 = vmatprep.subr.bf16.mxu0 %v12859_v17  ;;  %v11035_v17 = vld [vmem:[%s14592_s1 + $0x70] sm:$0xff]  }
 0xd83   : > { %3901 = vmatprep.subr.bf16.mxu1 %v12864_v31 }
 0xd84   : > { %10292 = vmatmul.mubr.msk.bf16.vlgmr.msra.gmra.mrb[176].mxu0 %vm270_vm0, %v11033_v43 }
 0xd85   : > { %10295 = vmatmul.mubr.msk.bf16.vlgmr.msra.gmra.mrb[176].mxu1 %vm270_vm0, %v11033_v43  ;;  %3672 = vmatprep.mubr.bf16.mxu0 %v14836_v25 }
 0xd86   : > { %3731 = vmatprep.mubr.bf16.mxu1 %v14836_v25  ;;  %3839 = vmatpush1.bf16.msra.mxu0 %v12877_v20 }
 0xd87   : > { %3902 = vmatpush1.bf16.msra.mxu1 %v12880_v62 }
 0xd8c   : > { %10293 = vmatmul.mubr.msk.bf16.gmra.mrb[180].mxu0 %vm270_vm0, %v11034_v54 }
 0xd8d   : > { %10296 = vmatmul.mubr.msk.bf16.gmra.mrb[180].mxu1 %vm270_vm0, %v11034_v54  ;;  %3682 = vmatprep.mubr.bf16.mxu0 %v14836_v25 }
 0xd8e   : > { %3741 = vmatprep.mubr.bf16.mxu1 %v14836_v25 }
 0xd94   : > { %10294 = vmatmul.mubr.msk.bf16.gmra.mrb[184].mxu0 %vm270_vm0, %v11035_v17 }
 0xd95   : > { %10297 = vmatmul.mubr.msk.bf16.gmra.mrb[184].mxu1 %vm270_vm0, %v11035_v17  ;;  %3870 = vmatprep.mubr.bf16.mxu0 %v14836_v25 }
 0xd96   : > { %3933 = vmatprep.mubr.bf16.mxu1 %v14836_v25 }
 0xe57   : > { %v3664_v31 = vpop.f32.mrb[176].mxu0 }
 0xe58   : > { %v3665_v20 = vadd.f32 %v3664_v31, %v12144_v57  ;;  %v3723_v62 = vpop.f32.mrb[176].mxu1  ;;  %v3666_v32 = vpop.f32.mrb[177].mxu0 }
 0xe59   : > { %v3724_v60 = vadd.f32 %v3723_v62, %v12144_v57  ;;  %v3667_v48 = vadd.f32 %v3666_v32, %v12144_v57  ;;  %v3725_v30 = vpop.f32.mrb[177].mxu1  ;;  %v3668_v8 = vpop.f32.mrb[178].mxu0  ;;  %v11036_v32 = vld [vmem:[%s14592_s1 + $0x78] sm:$0xff]  }
 0xe5a   : > { %v3726_v15 = vadd.f32 %v3725_v30, %v12144_v57  ;;  %v3669_v41 = vadd.f32 %v3668_v8, %v12141_v56  ;;  %v3727_v45 = vpop.f32.mrb[178].mxu1  ;;  %v3670_v37 = vpop.f32.mrb[179].mxu0  ;;  %v3748_v7 = vmax.f32 %v3665_v20, 0.0 }
 0xe5b   : > { %v3728_v35 = vadd.f32 %v3727_v45, %v12141_v56  ;;  %v3671_v53 = vadd.f32 %v3670_v37, %v12141_v56  ;;  %v3729_v9 = vpop.f32.mrb[179].mxu1  ;;  %v3750_v2 = vmax.f32 %v3724_v60, 0.0  ;;  %v3749_v11 = vmax.f32 %v3667_v48, 0.0  ;;  %v11037_v60 = vld [vmem:[%s14592_s1 + $0x80] sm:$0xff]   ;;  %v11038_v48 = vld [vmem:[%s14592_s1 + $0x88] sm:$0xff]  }
 0xe5c   : > { %v3752_v19 = vmax.f32 %v3669_v41, 0.0  ;;  %v3730_v42 = vadd.f32 %v3729_v9, %v12141_v56  ;;  %v3751_v61 = vmax.f32 %v3726_v15, 0.0 }
 0xe5d   : > { %v3754_v24 = vmax.f32 %v3728_v35, 0.0  ;;  %v3753_v47 = vmax.f32 %v3671_v53, 0.0 }
 0xe5e   : > { %v3764_v26 = vpack.c.bf16 %v3752_v19, %v3748_v7  ;;  %v3755_v57 = vmax.f32 %v3730_v42, 0.0  ;;  %v15023_v7 = vld [vmem:[#allocation57_spill] sm:$0xff] }
 0xe5f   : > { %v3766_v46 = vpack.c.bf16 %v3754_v24, %v3750_v2  ;;  %v3674_v50 = vpop.f32.mrb[180].mxu0  ;;  %v3765_v12 = vpack.c.bf16 %v3753_v47, %v3749_v11 }
 0xe60   : > { %v3675_v0 = vadd.f32 %v3674_v50, %v12151_v59  ;;  %v3733_v14 = vpop.f32.mrb[180].mxu1  ;;  %v3676_v27 = vpop.f32.mrb[181].mxu0  ;;  %v3767_v38 = vpack.c.bf16 %v3755_v57, %v3751_v61  ;;  %v15024_v57 = vld [vmem:[#allocation56_spill] sm:$0xff] }
 0xe61   : > { %v3734_v39 = vadd.f32 %v3733_v14, %v12151_v59  ;;  %v3677_v63 = vadd.f32 %v3676_v27, %v12151_v59  ;;  %v3735_v56 = vpop.f32.mrb[181].mxu1  ;;  %v3678_v16 = vpop.f32.mrb[182].mxu0  ;;  %3840 = vmatprep.subr.bf16.mxu0 %v3765_v12 }
 0xe62   : > { %v3736_v58 = vadd.f32 %v3735_v56, %v12151_v59  ;;  %v3679_v52 = vadd.f32 %v3678_v16, %v15022_v40  ;;  %v3737_v51 = vpop.f32.mrb[182].mxu1  ;;  %3903 = vmatprep.subr.bf16.mxu1 %v3767_v38  ;;  %v3680_v1 = vpop.f32.mrb[183].mxu0  ;;  %3841 = vmatpush1.bf16.msra.mxu0 %v3764_v26  ;;  %v3756_v23 = vmax.f32 %v3675_v0, 0.0 }
 0xe63   : > { %v3738_v36 = vadd.f32 %v3737_v51, %v15022_v40  ;;  %v3681_v28 = vadd.f32 %v3680_v1, %v15022_v40  ;;  %v3739_v55 = vpop.f32.mrb[183].mxu1  ;;  %3904 = vmatpush1.bf16.msra.mxu1 %v3766_v46  ;;  %v3758_v5 = vmax.f32 %v3734_v39, 0.0  ;;  %v3757_v34 = vmax.f32 %v3677_v63, 0.0 }
 0xe64   : > { %v3760_v44 = vmax.f32 %v3679_v52, 0.0  ;;  %v3740_v21 = vadd.f32 %v3739_v55, %v15022_v40  ;;  %v3759_v43 = vmax.f32 %v3736_v58, 0.0 }
 0xe65   : > { %v3762_v49 = vmax.f32 %v3738_v36, 0.0  ;;  %v3761_v59 = vmax.f32 %v3681_v28, 0.0 }
 0xe66   : > { %v3768_v54 = vpack.c.bf16 %v3760_v44, %v3756_v23  ;;  %v3763_v17 = vmax.f32 %v3740_v21, 0.0  ;;  %v15025_v23 = vld [vmem:[#allocation59_spill] sm:$0xff] }
 0xe67   : > { %v3770_v31 = vpack.c.bf16 %v3762_v49, %v3758_v5  ;;  %v3769_v20 = vpack.c.bf16 %v3761_v59, %v3757_v34  ;;  %v3684_v30 = vpop.f32.mrb[184].mxu0 }
 0xe68   : > { %v3771_v62 = vpack.c.bf16 %v3763_v17, %v3759_v43  ;;  %v3743_v8 = vpop.f32.mrb[184].mxu1  ;;  %v3685_v15 = vpop.f32.mrb[185].mxu0 }
 0xe69   : > { %3842 = vmatprep.subr.bf16.mxu0 %v3769_v20  ;;  %v3744_v41 = vpop.f32.mrb[185].mxu1  ;;  %v3686_v45 = vpop.f32.mrb[186].mxu0 }
 0xe6a   : > { %3905 = vmatprep.subr.bf16.mxu1 %v3771_v62  ;;  %3843 = vmatpush1.bf16.msra.mxu0 %v3768_v54  ;;  %v3745_v37 = vpop.f32.mrb[186].mxu1  ;;  %v3687_v35 = vpop.f32.mrb[187].mxu0 }
 0xe6b   : > { %3906 = vmatpush1.bf16.msra.mxu1 %v3770_v31  ;;  %v3746_v53 = vpop.f32.mrb[187].mxu1  ;;  %v15026_v31 = vld [vmem:[#allocation58_spill] sm:$0xff] }
 0xe6d   : > { %10313 = vmatmul.mubr.msk.bf16.vlgmr.msra.gmra.mrb[188].mxu0 %vm270_vm0, %v11036_v32 }
 0xe6e   : > { %10316 = vmatmul.mubr.msk.bf16.vlgmr.msra.gmra.mrb[188].mxu1 %vm270_vm0, %v11036_v32  ;;  %3880 = vmatprep.mubr.bf16.mxu0 %v14836_v25 }
 0xe6f   : > { %3943 = vmatprep.mubr.bf16.mxu1 %v14836_v25 }
 0xe75   : > { %10314 = vmatmul.mubr.msk.bf16.gmra.mrb[192].mxu0 %vm270_vm0, %v11037_v60 }
 0xe76   : > { %10317 = vmatmul.mubr.msk.bf16.gmra.mrb[192].mxu1 %vm270_vm0, %v11037_v60  ;;  %3890 = vmatprep.mubr.bf16.mxu0 %v14836_v25 }
 0xe77   : > { %3953 = vmatprep.mubr.bf16.mxu1 %v14836_v25 }
 0xe7d   : > { %10315 = vmatmul.mubr.msk.bf16.gmra.mrb[196].mxu0 %vm270_vm0, %v11038_v48 }
 0xe7e   : > { %10318 = vmatmul.mubr.msk.bf16.gmra.mrb[196].mxu1 %vm270_vm0, %v11038_v48  ;;  %4098 = vmatprep.mubr.bf16.mxu0 %v14836_v25 }
 0xe7f   : > { %4161 = vmatprep.mubr.bf16.mxu1 %v14836_v25 }
 0xf40   : > { %v3872_v9 = vpop.f32.mrb[188].mxu0 }
 0xf41   : > { %v3873_v19 = vadd.f32 %v3872_v9, %v15023_v7  ;;  %v3935_v42 = vpop.f32.mrb[188].mxu1  ;;  %v3874_v2 = vpop.f32.mrb[189].mxu0 }
 0xf42   : > { %v3936_v11 = vadd.f32 %v3935_v42, %v15023_v7  ;;  %v3875_v24 = vadd.f32 %v3874_v2, %v15023_v7  ;;  %v3937_v47 = vpop.f32.mrb[189].mxu1  ;;  %v3876_v61 = vpop.f32.mrb[190].mxu0 }
 0xf43   : > { %v3938_v26 = vadd.f32 %v3937_v47, %v15023_v7  ;;  %v3877_v46 = vadd.f32 %v3876_v61, %v15024_v57  ;;  %v3939_v50 = vpop.f32.mrb[190].mxu1  ;;  %v3878_v12 = vpop.f32.mrb[191].mxu0  ;;  %v3964_v38 = vmax.f32 %v3873_v19, 0.0 }
 0xf44   : > { %v3940_v0 = vadd.f32 %v3939_v50, %v15024_v57  ;;  %v3879_v14 = vadd.f32 %v3878_v12, %v15024_v57  ;;  %v3941_v27 = vpop.f32.mrb[191].mxu1  ;;  %v3966_v56 = vmax.f32 %v3936_v11, 0.0  ;;  %v3965_v16 = vmax.f32 %v3875_v24, 0.0  ;;  %v15027_v24 = vld [vmem:[#allocation61_spill] sm:$0xff] }
 0xf45   : > { %v3968_v39 = vmax.f32 %v3877_v46, 0.0  ;;  %v3942_v63 = vadd.f32 %v3941_v27, %v15024_v57  ;;  %v3967_v52 = vmax.f32 %v3938_v26, 0.0  ;;  %v15028_v27 = vld [vmem:[#allocation60_spill] sm:$0xff] }
 0xf46   : > { %v3970_v58 = vmax.f32 %v3940_v0, 0.0  ;;  %v3969_v40 = vmax.f32 %v3879_v14, 0.0 }
 0xf47   : > { %v3988_v51 = vpack.c.bf16 %v3968_v39, %v3964_v38  ;;  %v3971_v1 = vmax.f32 %v3942_v63, 0.0 }
 0xf48   : > { %v3990_v36 = vpack.c.bf16 %v3970_v58, %v3966_v56  ;;  %v3882_v28 = vpop.f32.mrb[192].mxu0  ;;  %v3989_v55 = vpack.c.bf16 %v3969_v40, %v3965_v16 }
 0xf49   : > { %v3883_v44 = vadd.f32 %v3882_v28, %v15025_v23  ;;  %v3945_v21 = vpop.f32.mrb[192].mxu1  ;;  %v3884_v5 = vpop.f32.mrb[193].mxu0  ;;  %v3991_v34 = vpack.c.bf16 %v3971_v1, %v3967_v52 }
 0xf4a   : > { %v3946_v49 = vadd.f32 %v3945_v21, %v15025_v23  ;;  %v3885_v59 = vadd.f32 %v3884_v5, %v15025_v23  ;;  %v3947_v43 = vpop.f32.mrb[193].mxu1  ;;  %v3886_v54 = vpop.f32.mrb[194].mxu0  ;;  %4066 = vmatprep.subr.bf16.mxu0 %v3989_v55 }
 0xf4b   : > { %v3948_v17 = vadd.f32 %v3947_v43, %v15025_v23  ;;  %v3887_v20 = vadd.f32 %v3886_v54, %v15026_v31  ;;  %v3949_v62 = vpop.f32.mrb[194].mxu1  ;;  %4129 = vmatprep.subr.bf16.mxu1 %v3991_v34  ;;  %v3888_v32 = vpop.f32.mrb[195].mxu0  ;;  %4067 = vmatpush1.bf16.msra.mxu0 %v3988_v51  ;;  %v3972_v8 = vmax.f32 %v3883_v44, 0.0  ;;  %v11040_v43 = vld [vmem:[%s14592_s1 + $0x98] sm:$0xff]   ;;  %v11041_v54 = vld [vmem:[%s14592_s1 + $0xa0] sm:$0xff]  }
 0xf4c   : > { %v3950_v60 = vadd.f32 %v3949_v62, %v15026_v31  ;;  %v3889_v48 = vadd.f32 %v3888_v32, %v15026_v31  ;;  %v3951_v30 = vpop.f32.mrb[195].mxu1  ;;  %4130 = vmatpush1.bf16.msra.mxu1 %v3990_v36  ;;  %v3974_v45 = vmax.f32 %v3946_v49, 0.0  ;;  %v3973_v37 = vmax.f32 %v3885_v59, 0.0  ;;  %v11039_v59 = vld [vmem:[%s14592_s1 + $0x90] sm:$0xff]  }
 0xf4d   : > { %v3976_v15 = vmax.f32 %v3887_v20, 0.0  ;;  %v3952_v41 = vadd.f32 %v3951_v30, %v15026_v31  ;;  %v3975_v9 = vmax.f32 %v3948_v17, 0.0  ;;  %v15029_v31 = vld [vmem:[#allocation63_spill] sm:$0xff] }
 0xf4e   : > { %v3978_v35 = vmax.f32 %v3950_v60, 0.0  ;;  %v3977_v53 = vmax.f32 %v3889_v48, 0.0 }
 0xf4f   : > { %v3992_v7 = vpack.c.bf16 %v3976_v15, %v3972_v8  ;;  %v3979_v19 = vmax.f32 %v3952_v41, 0.0  ;;  %v15030_v41 = vld [vmem:[#allocation62_spill] sm:$0xff] }
 0xf50   : > { %v3994_v42 = vpack.c.bf16 %v3978_v35, %v3974_v45  ;;  %v3892_v2 = vpop.f32.mrb[196].mxu0  ;;  %v3993_v11 = vpack.c.bf16 %v3977_v53, %v3973_v37 }
 0xf51   : > { %v3893_v47 = vadd.f32 %v3892_v2, %v15027_v24  ;;  %v3955_v61 = vpop.f32.mrb[196].mxu1  ;;  %v3894_v26 = vpop.f32.mrb[197].mxu0  ;;  %v3995_v57 = vpack.c.bf16 %v3979_v19, %v3975_v9 }
 0xf52   : > { %v3956_v46 = vadd.f32 %v3955_v61, %v15027_v24  ;;  %v3895_v50 = vadd.f32 %v3894_v26, %v15027_v24  ;;  %v3957_v12 = vpop.f32.mrb[197].mxu1  ;;  %v3896_v0 = vpop.f32.mrb[198].mxu0  ;;  %4068 = vmatprep.subr.bf16.mxu0 %v3993_v11 }
 0xf53   : > { %v3958_v14 = vadd.f32 %v3957_v12, %v15027_v24  ;;  %v3897_v38 = vadd.f32 %v3896_v0, %v15028_v27  ;;  %v3959_v39 = vpop.f32.mrb[198].mxu1  ;;  %4131 = vmatprep.subr.bf16.mxu1 %v3995_v57  ;;  %v3898_v63 = vpop.f32.mrb[199].mxu0  ;;  %4069 = vmatpush1.bf16.msra.mxu0 %v3992_v7  ;;  %v3980_v40 = vmax.f32 %v3893_v47, 0.0 }
 0xf54   : > { %v3960_v56 = vadd.f32 %v3959_v39, %v15028_v27  ;;  %v3899_v16 = vadd.f32 %v3898_v63, %v15028_v27  ;;  %v3961_v58 = vpop.f32.mrb[199].mxu1  ;;  %4132 = vmatpush1.bf16.msra.mxu1 %v3994_v42  ;;  %v3982_v1 = vmax.f32 %v3956_v46, 0.0  ;;  %v3981_v36 = vmax.f32 %v3895_v50, 0.0 }
 0xf55   : > { %v3984_v52 = vmax.f32 %v3897_v38, 0.0  ;;  %v3962_v51 = vadd.f32 %v3961_v58, %v15028_v27  ;;  %v3983_v23 = vmax.f32 %v3958_v14, 0.0  ;;  %v15031_v14 = vld [vmem:[#allocation65_spill] sm:$0xff] }
 0xf56   : > { %v3986_v28 = vmax.f32 %v3960_v56, 0.0  ;;  %v3985_v55 = vmax.f32 %v3899_v16, 0.0 }
 0xf57   : > { %v3996_v44 = vpack.c.bf16 %v3984_v52, %v3980_v40  ;;  %v3987_v21 = vmax.f32 %v3962_v51, 0.0  ;;  %v15032_v51 = vld [vmem:[#allocation64_spill] sm:$0xff] }
 0xf58   : > { %v3998_v5 = vpack.c.bf16 %v3986_v28, %v3982_v1  ;;  %v3997_v34 = vpack.c.bf16 %v3985_v55, %v3981_v36 }
 0xf59   : > { %v3999_v49 = vpack.c.bf16 %v3987_v21, %v3983_v23 }
 0xf5a   : > { %4070 = vmatprep.subr.bf16.mxu0 %v3997_v34 }
 0xf5b   : > { %4133 = vmatprep.subr.bf16.mxu1 %v3999_v49  ;;  %4071 = vmatpush1.bf16.msra.mxu0 %v3996_v44 }
 0xf5c   : > { %4134 = vmatpush1.bf16.msra.mxu1 %v3998_v5 }
 0xf5e   : > { %10334 = vmatmul.mubr.msk.bf16.vlgmr.msra.gmra.mrb[200].mxu0 %vm270_vm0, %v11039_v59 }
 0xf5f   : > { %10337 = vmatmul.mubr.msk.bf16.vlgmr.msra.gmra.mrb[200].mxu1 %vm270_vm0, %v11039_v59  ;;  %4108 = vmatprep.mubr.bf16.mxu0 %v14836_v25 }
 0xf60   : > { %4171 = vmatprep.mubr.bf16.mxu1 %v14836_v25 }
 0xf66   : > { %10335 = vmatmul.mubr.msk.bf16.gmra.mrb[204].mxu0 %vm270_vm0, %v11040_v43 }
 0xf67   : > { %10338 = vmatmul.mubr.msk.bf16.gmra.mrb[204].mxu1 %vm270_vm0, %v11040_v43  ;;  %4118 = vmatprep.mubr.bf16.mxu0 %v14836_v25 }
 0xf68   : > { %4181 = vmatprep.mubr.bf16.mxu1 %v14836_v25 }
 0xf6e   : > { %10336 = vmatmul.mubr.msk.bf16.gmra.mrb[208].mxu0 %vm270_vm0, %v11041_v54 }
 0xf6f   : > { %10339 = vmatmul.mubr.msk.bf16.gmra.mrb[208].mxu1 %vm270_vm0, %v11041_v54  ;;  %4326 = vmatprep.mubr.bf16.mxu0 %v14836_v25 }
 0xf70   : > { %4389 = vmatprep.mubr.bf16.mxu1 %v14836_v25 }
0x1031   : > { %v4100_v17 = vpop.f32.mrb[200].mxu0 }
0x1032   : > { %v4101_v20 = vadd.f32 %v4100_v17, %v15029_v31  ;;  %v4163_v62 = vpop.f32.mrb[200].mxu1  ;;  %v4102_v32 = vpop.f32.mrb[201].mxu0 }
0x1033   : > { %v4164_v60 = vadd.f32 %v4163_v62, %v15029_v31  ;;  %v4103_v48 = vadd.f32 %v4102_v32, %v15029_v31  ;;  %v4165_v30 = vpop.f32.mrb[201].mxu1  ;;  %v4104_v8 = vpop.f32.mrb[202].mxu0 }
0x1034   : > { %v4166_v15 = vadd.f32 %v4165_v30, %v15029_v31  ;;  %v4105_v45 = vadd.f32 %v4104_v8, %v15030_v41  ;;  %v4167_v37 = vpop.f32.mrb[202].mxu1  ;;  %v4106_v35 = vpop.f32.mrb[203].mxu0  ;;  %v4192_v19 = vmax.f32 %v4101_v20, 0.0 }
0x1035   : > { %v4168_v53 = vadd.f32 %v4167_v37, %v15030_v41  ;;  %v4107_v9 = vadd.f32 %v4106_v35, %v15030_v41  ;;  %v4169_v7 = vpop.f32.mrb[203].mxu1  ;;  %v4194_v11 = vmax.f32 %v4164_v60, 0.0  ;;  %v4193_v24 = vmax.f32 %v4103_v48, 0.0  ;;  %v15033_v48 = vld [vmem:[#allocation67_spill] sm:$0xff] }
0x1036   : > { %v4196_v42 = vmax.f32 %v4105_v45, 0.0  ;;  %v4170_v2 = vadd.f32 %v4169_v7, %v15030_v41  ;;  %v4195_v26 = vmax.f32 %v4166_v15, 0.0  ;;  %v15034_v7 = vld [vmem:[#allocation66_spill] sm:$0xff] }
0x1037   : > { %v4198_v47 = vmax.f32 %v4168_v53, 0.0  ;;  %v4197_v61 = vmax.f32 %v4107_v9, 0.0 }
0x1038   : > { %v4216_v57 = vpack.c.bf16 %v4196_v42, %v4192_v19  ;;  %v4199_v46 = vmax.f32 %v4170_v2, 0.0 }
0x1039   : > { %v4218_v50 = vpack.c.bf16 %v4198_v47, %v4194_v11  ;;  %v4110_v12 = vpop.f32.mrb[204].mxu0  ;;  %v4217_v0 = vpack.c.bf16 %v4197_v61, %v4193_v24 }
0x103a   : > { %v4111_v27 = vadd.f32 %v4110_v12, %v15031_v14  ;;  %v4173_v38 = vpop.f32.mrb[204].mxu1  ;;  %v4112_v39 = vpop.f32.mrb[205].mxu0  ;;  %v4219_v63 = vpack.c.bf16 %v4199_v46, %v4195_v26 }
0x103b   : > { %v4174_v56 = vadd.f32 %v4173_v38, %v15031_v14  ;;  %v4113_v16 = vadd.f32 %v4112_v39, %v15031_v14  ;;  %v4175_v58 = vpop.f32.mrb[205].mxu1  ;;  %v4114_v40 = vpop.f32.mrb[206].mxu0  ;;  %4294 = vmatprep.subr.bf16.mxu0 %v4217_v0 }
0x103c   : > { %v4176_v52 = vadd.f32 %v4175_v58, %v15031_v14  ;;  %v4115_v1 = vadd.f32 %v4114_v40, %v15032_v51  ;;  %v4177_v36 = vpop.f32.mrb[206].mxu1  ;;  %4357 = vmatprep.subr.bf16.mxu1 %v4219_v63  ;;  %v4116_v28 = vpop.f32.mrb[207].mxu0  ;;  %4295 = vmatpush1.bf16.msra.mxu0 %v4216_v57  ;;  %v4200_v21 = vmax.f32 %v4111_v27, 0.0  ;;  %v11043_v58 = vld [vmem:[%s14592_s1 + $0xb0] sm:$0xff]   ;;  %v11044_v40 = vld [vmem:[%s14592_s1 + $0xb8] sm:$0xff]  }
0x103d   : > { %v4178_v55 = vadd.f32 %v4177_v36, %v15032_v51  ;;  %v4117_v23 = vadd.f32 %v4116_v28, %v15032_v51  ;;  %v4179_v44 = vpop.f32.mrb[207].mxu1  ;;  %4358 = vmatpush1.bf16.msra.mxu1 %v4218_v50  ;;  %v4202_v49 = vmax.f32 %v4174_v56, 0.0  ;;  %v4201_v59 = vmax.f32 %v4113_v16, 0.0  ;;  %v11042_v16 = vld [vmem:[%s14592_s1 + $0xa8] sm:$0xff]  }
0x103e   : > { %v4204_v5 = vmax.f32 %v4115_v1, 0.0  ;;  %v4180_v34 = vadd.f32 %v4179_v44, %v15032_v51  ;;  %v4203_v17 = vmax.f32 %v4176_v52, 0.0  ;;  %v15035_v51 = vld [vmem:[#allocation69_spill] sm:$0xff] }
0x103f   : > { %v4206_v43 = vmax.f32 %v4178_v55, 0.0  ;;  %v4205_v54 = vmax.f32 %v4117_v23, 0.0 }
0x1040   : > { %v4220_v31 = vpack.c.bf16 %v4204_v5, %v4200_v21  ;;  %v4207_v20 = vmax.f32 %v4180_v34, 0.0  ;;  %v15036_v34 = vld [vmem:[#allocation68_spill] sm:$0xff] }
0x1041   : > { %v4222_v62 = vpack.c.bf16 %v4206_v43, %v4202_v49  ;;  %v4120_v32 = vpop.f32.mrb[208].mxu0  ;;  %v4221_v60 = vpack.c.bf16 %v4205_v54, %v4201_v59 }
0x1042   : > { %v4121_v30 = vadd.f32 %v4120_v32, %v15033_v48  ;;  %v4183_v8 = vpop.f32.mrb[208].mxu1  ;;  %v4122_v15 = vpop.f32.mrb[209].mxu0  ;;  %v4223_v41 = vpack.c.bf16 %v4207_v20, %v4203_v17 }
0x1043   : > { %v4184_v45 = vadd.f32 %v4183_v8, %v15033_v48  ;;  %v4123_v37 = vadd.f32 %v4122_v15, %v15033_v48  ;;  %v4185_v35 = vpop.f32.mrb[209].mxu1  ;;  %v4124_v53 = vpop.f32.mrb[210].mxu0  ;;  %4296 = vmatprep.subr.bf16.mxu0 %v4221_v60 }
0x1044   : > { %v4186_v9 = vadd.f32 %v4185_v35, %v15033_v48  ;;  %v4125_v19 = vadd.f32 %v4124_v53, %v15034_v7  ;;  %v4187_v42 = vpop.f32.mrb[210].mxu1  ;;  %4359 = vmatprep.subr.bf16.mxu1 %v4223_v41  ;;  %v4126_v2 = vpop.f32.mrb[211].mxu0  ;;  %4297 = vmatpush1.bf16.msra.mxu0 %v4220_v31  ;;  %v4208_v61 = vmax.f32 %v4121_v30, 0.0 }
0x1045   : > { %v4188_v11 = vadd.f32 %v4187_v42, %v15034_v7  ;;  %v4127_v24 = vadd.f32 %v4126_v2, %v15034_v7  ;;  %v4189_v47 = vpop.f32.mrb[211].mxu1  ;;  %4360 = vmatpush1.bf16.msra.mxu1 %v4222_v62  ;;  %v4210_v46 = vmax.f32 %v4184_v45, 0.0  ;;  %v4209_v50 = vmax.f32 %v4123_v37, 0.0 }
0x1046   : > { %v4212_v26 = vmax.f32 %v4125_v19, 0.0  ;;  %v4190_v57 = vadd.f32 %v4189_v47, %v15034_v7  ;;  %v4211_v14 = vmax.f32 %v4186_v9, 0.0  ;;  %v15037_v9 = vld [vmem:[#allocation71_spill] sm:$0xff] }
0x1047   : > { %v4214_v12 = vmax.f32 %v4188_v11, 0.0  ;;  %v4213_v0 = vmax.f32 %v4127_v24, 0.0 }
0x1048   : > { %v4224_v27 = vpack.c.bf16 %v4212_v26, %v4208_v61  ;;  %v4215_v38 = vmax.f32 %v4190_v57, 0.0  ;;  %v15038_v57 = vld [vmem:[#allocation70_spill] sm:$0xff] }
0x1049   : > { %v4226_v39 = vpack.c.bf16 %v4214_v12, %v4210_v46  ;;  %v4225_v63 = vpack.c.bf16 %v4213_v0, %v4209_v50 }
0x104a   : > { %v4227_v56 = vpack.c.bf16 %v4215_v38, %v4211_v14 }
0x104b   : > { %4298 = vmatprep.subr.bf16.mxu0 %v4225_v63 }
0x104c   : > { %4361 = vmatprep.subr.bf16.mxu1 %v4227_v56  ;;  %4299 = vmatpush1.bf16.msra.mxu0 %v4224_v27 }
0x104d   : > { %4362 = vmatpush1.bf16.msra.mxu1 %v4226_v39 }
0x104f   : > { %10355 = vmatmul.mubr.msk.bf16.vlgmr.msra.gmra.mrb[212].mxu0 %vm270_vm0, %v11042_v16 }
0x1050   : > { %10358 = vmatmul.mubr.msk.bf16.vlgmr.msra.gmra.mrb[212].mxu1 %vm270_vm0, %v11042_v16  ;;  %4336 = vmatprep.mubr.bf16.mxu0 %v14836_v25 }
0x1051   : > { %4399 = vmatprep.mubr.bf16.mxu1 %v14836_v25 }
0x1057   : > { %10356 = vmatmul.mubr.msk.bf16.gmra.mrb[216].mxu0 %vm270_vm0, %v11043_v58 }
0x1058   : > { %10359 = vmatmul.mubr.msk.bf16.gmra.mrb[216].mxu1 %vm270_vm0, %v11043_v58  ;;  %4346 = vmatprep.mubr.bf16.mxu0 %v14836_v25 }
0x1059   : > { %4409 = vmatprep.mubr.bf16.mxu1 %v14836_v25 }
0x105f   : > { %10357 = vmatmul.mubr.msk.bf16.gmra.mrb[220].mxu0 %vm270_vm0, %v11044_v40 }
0x1060   : > { %10360 = vmatmul.mubr.msk.bf16.gmra.mrb[220].mxu1 %vm270_vm0, %v11044_v40  ;;  %4553 = vmatprep.mubr.bf16.mxu0 %v14836_v25 }
0x1061   : > { %4614 = vmatprep.mubr.bf16.mxu1 %v14836_v25 }
0x1122   : > { %v4328_v52 = vpop.f32.mrb[212].mxu0 }
0x1123   : > { %v4329_v1 = vadd.f32 %v4328_v52, %v15035_v51  ;;  %v4391_v36 = vpop.f32.mrb[212].mxu1  ;;  %v4330_v28 = vpop.f32.mrb[213].mxu0 }
0x1124   : > { %v4392_v55 = vadd.f32 %v4391_v36, %v15035_v51  ;;  %v4331_v23 = vadd.f32 %v4330_v28, %v15035_v51  ;;  %v4393_v44 = vpop.f32.mrb[213].mxu1  ;;  %v4332_v21 = vpop.f32.mrb[214].mxu0 }
0x1125   : > { %v4394_v5 = vadd.f32 %v4393_v44, %v15035_v51  ;;  %v4333_v49 = vadd.f32 %v4332_v21, %v15036_v34  ;;  %v4395_v59 = vpop.f32.mrb[214].mxu1  ;;  %v4334_v43 = vpop.f32.mrb[215].mxu0  ;;  %v4420_v20 = vmax.f32 %v4329_v1, 0.0 }
0x1126   : > { %v4396_v54 = vadd.f32 %v4395_v59, %v15036_v34  ;;  %v4335_v17 = vadd.f32 %v4334_v43, %v15036_v34  ;;  %v4397_v31 = vpop.f32.mrb[215].mxu1  ;;  %v4422_v60 = vmax.f32 %v4392_v55, 0.0  ;;  %v4421_v48 = vmax.f32 %v4331_v23, 0.0  ;;  %v15039_v23 = vld [vmem:[#allocation73_spill] sm:$0xff] }
0x1127   : > { %v4424_v62 = vmax.f32 %v4333_v49, 0.0  ;;  %v4398_v32 = vadd.f32 %v4397_v31, %v15036_v34  ;;  %v4423_v15 = vmax.f32 %v4394_v5, 0.0  ;;  %v15040_v31 = vld [vmem:[#allocation72_spill] sm:$0xff] }
0x1128   : > { %v4426_v30 = vmax.f32 %v4396_v54, 0.0  ;;  %v4425_v8 = vmax.f32 %v4335_v17, 0.0 }
0x1129   : > { %v4444_v41 = vpack.c.bf16 %v4424_v62, %v4420_v20  ;;  %v4427_v45 = vmax.f32 %v4398_v32, 0.0 }
0x112a   : > { %v4446_v37 = vpack.c.bf16 %v4426_v30, %v4422_v60  ;;  %v4338_v35 = vpop.f32.mrb[216].mxu0  ;;  %v4445_v53 = vpack.c.bf16 %v4425_v8, %v4421_v48 }
0x112b   : > { %v4339_v7 = vadd.f32 %v4338_v35, %v15037_v9  ;;  %v4401_v19 = vpop.f32.mrb[216].mxu1  ;;  %v4340_v42 = vpop.f32.mrb[217].mxu0  ;;  %v4447_v2 = vpack.c.bf16 %v4427_v45, %v4423_v15 }
0x112c   : > { %v4402_v11 = vadd.f32 %v4401_v19, %v15037_v9  ;;  %v4341_v24 = vadd.f32 %v4340_v42, %v15037_v9  ;;  %v4403_v47 = vpop.f32.mrb[217].mxu1  ;;  %v4342_v61 = vpop.f32.mrb[218].mxu0  ;;  %4521 = vmatprep.subr.bf16.mxu0 %v4445_v53 }
0x112d   : > { %v4404_v26 = vadd.f32 %v4403_v47, %v15037_v9  ;;  %v4343_v46 = vadd.f32 %v4342_v61, %v15038_v57  ;;  %v4405_v50 = vpop.f32.mrb[218].mxu1  ;;  %4582 = vmatprep.subr.bf16.mxu1 %v4447_v2  ;;  %v4344_v12 = vpop.f32.mrb[219].mxu0  ;;  %4522 = vmatpush1.bf16.msra.mxu0 %v4444_v41  ;;  %v4428_v38 = vmax.f32 %v4339_v7, 0.0  ;;  %v11046_v47 = vld [vmem:[%s14592_s1 + $0xc8] sm:$0xff]   ;;  %v11047_v61 = vld [vmem:[%s14592_s1 + $0xd0] sm:$0xff]  }
0x112e   : > { %v4406_v0 = vadd.f32 %v4405_v50, %v15038_v57  ;;  %v4345_v14 = vadd.f32 %v4344_v12, %v15038_v57  ;;  %v4407_v27 = vpop.f32.mrb[219].mxu1  ;;  %4583 = vmatpush1.bf16.msra.mxu1 %v4446_v37  ;;  %v4430_v56 = vmax.f32 %v4402_v11, 0.0  ;;  %v4429_v16 = vmax.f32 %v4341_v24, 0.0  ;;  %v11045_v24 = vld [vmem:[%s14592_s1 + $0xc0] sm:$0xff]  }
0x112f   : > { %v4432_v39 = vmax.f32 %v4343_v46, 0.0  ;;  %v4408_v63 = vadd.f32 %v4407_v27, %v15038_v57  ;;  %v4431_v52 = vmax.f32 %v4404_v26, 0.0  ;;  %v15042_v27 = vld [vmem:[#allocation74_spill] sm:$0xff] }
0x1130   : > { %v4434_v58 = vmax.f32 %v4406_v0, 0.0  ;;  %v4433_v40 = vmax.f32 %v4345_v14, 0.0  ;;  %v15041_v0 = vld [vmem:[#allocation75_spill] sm:$0xff] }
0x1131   : > { %v4448_v51 = vpack.c.bf16 %v4432_v39, %v4428_v38  ;;  %v4435_v1 = vmax.f32 %v4408_v63, 0.0 }
0x1132   : > { %v4450_v36 = vpack.c.bf16 %v4434_v58, %v4430_v56  ;;  %v4348_v28 = vpop.f32.mrb[220].mxu0  ;;  %v4449_v55 = vpack.c.bf16 %v4433_v40, %v4429_v16 }
0x1133   : > { %v4349_v44 = vadd.f32 %v4348_v28, %v15039_v23  ;;  %v4411_v21 = vpop.f32.mrb[220].mxu1  ;;  %v4350_v5 = vpop.f32.mrb[221].mxu0  ;;  %v4451_v34 = vpack.c.bf16 %v4435_v1, %v4431_v52 }
0x1134   : > { %v4412_v49 = vadd.f32 %v4411_v21, %v15039_v23  ;;  %v4351_v59 = vadd.f32 %v4350_v5, %v15039_v23  ;;  %v4413_v43 = vpop.f32.mrb[221].mxu1  ;;  %v4352_v54 = vpop.f32.mrb[222].mxu0  ;;  %4523 = vmatprep.subr.bf16.mxu0 %v4449_v55 }
0x1135   : > { %v4414_v17 = vadd.f32 %v4413_v43, %v15039_v23  ;;  %v4353_v20 = vadd.f32 %v4352_v54, %v15040_v31  ;;  %v4415_v62 = vpop.f32.mrb[222].mxu1  ;;  %4584 = vmatprep.subr.bf16.mxu1 %v4451_v34  ;;  %v4354_v32 = vpop.f32.mrb[223].mxu0  ;;  %4524 = vmatpush1.bf16.msra.mxu0 %v4448_v51  ;;  %v4436_v8 = vmax.f32 %v4349_v44, 0.0  ;;  %v15044_v54 = vld [vmem:[#allocation76_spill] sm:$0xff] }
0x1136   : > { %v4416_v60 = vadd.f32 %v4415_v62, %v15040_v31  ;;  %v4355_v48 = vadd.f32 %v4354_v32, %v15040_v31  ;;  %v4417_v30 = vpop.f32.mrb[223].mxu1  ;;  %4585 = vmatpush1.bf16.msra.mxu1 %v4450_v36  ;;  %v4438_v45 = vmax.f32 %v4412_v49, 0.0  ;;  %v4437_v37 = vmax.f32 %v4351_v59, 0.0  ;;  %v15043_v59 = vld [vmem:[#allocation77_spill] sm:$0xff] }
0x1137   : > { %v4440_v15 = vmax.f32 %v4353_v20, 0.0  ;;  %v4418_v41 = vadd.f32 %v4417_v30, %v15040_v31  ;;  %v4439_v9 = vmax.f32 %v4414_v17, 0.0 }
0x1138   : > { %v4442_v35 = vmax.f32 %v4416_v60, 0.0  ;;  %v4441_v53 = vmax.f32 %v4355_v48, 0.0 }
0x1139   : > { %v4452_v7 = vpack.c.bf16 %v4440_v15, %v4436_v8  ;;  %v4443_v19 = vmax.f32 %v4418_v41, 0.0 }
0x113a   : > { %v4454_v42 = vpack.c.bf16 %v4442_v35, %v4438_v45  ;;  %v4453_v2 = vpack.c.bf16 %v4441_v53, %v4437_v37  ;;  %v11048_v53 = vld [vmem:[%s14592_s1 + $0xd8] sm:$0xff]  }
0x113b   : > { %v4455_v11 = vpack.c.bf16 %v4443_v19, %v4439_v9 }
0x113c   : > { %4525 = vmatprep.subr.bf16.mxu0 %v4453_v2 }
0x113d   : > { %4586 = vmatprep.subr.bf16.mxu1 %v4455_v11  ;;  %4526 = vmatpush1.bf16.msra.mxu0 %v4452_v7 }
0x113e   : > { %4587 = vmatpush1.bf16.msra.mxu1 %v4454_v42 }
0x1140   : > { %10376 = vmatmul.mubr.msk.bf16.vlgmr.msra.gmra.mrb[224].mxu0 %vm270_vm0, %v11045_v24 }
0x1141   : > { %10379 = vmatmul.mubr.msk.bf16.vlgmr.msra.gmra.mrb[224].mxu1 %vm270_vm0, %v11045_v24  ;;  %4563 = vmatprep.mubr.bf16.mxu0 %v14836_v25 }
0x1142   : > { %4624 = vmatprep.mubr.bf16.mxu1 %v14836_v25 }
0x1148   : > { %10377 = vmatmul.mubr.msk.bf16.gmra.mrb[228].mxu0 %vm270_vm0, %v11046_v47 }
0x1149   : > { %10380 = vmatmul.mubr.msk.bf16.gmra.mrb[228].mxu1 %vm270_vm0, %v11046_v47  ;;  %4573 = vmatprep.mubr.bf16.mxu0 %v14836_v25 }
0x114a   : > { %4634 = vmatprep.mubr.bf16.mxu1 %v14836_v25 }
0x1150   : > { %10378 = vmatmul.mubr.msk.bf16.gmra.mrb[232].mxu0 %vm270_vm0, %v11047_v61 }
0x1151   : > { %10381 = vmatmul.mubr.msk.bf16.gmra.mrb[232].mxu1 %vm270_vm0, %v11047_v61  ;;  %4749 = vmatprep.mubr.bf16.mxu0 %v14836_v25  ;;  %v15046_v61 = vld [vmem:[#allocation78_spill] sm:$0xff] }
0x1152   : > { %4812 = vmatprep.mubr.bf16.mxu1 %v14836_v25 }
0x1213   : > { %v4555_v26 = vpop.f32.mrb[224].mxu0 }
0x1214   : > { %v4616_v57 = vpop.f32.mrb[224].mxu1  ;;  %v4557_v46 = vpop.f32.mrb[225].mxu0  ;;  %v4556_v14 = vadd.f32 %v4555_v26, %v15041_v0 }
0x1215   : > { %v4618_v50 = vpop.f32.mrb[225].mxu1  ;;  %v4559_v12 = vpop.f32.mrb[226].mxu0  ;;  %v4617_v56 = vadd.f32 %v4616_v57, %v15041_v0  ;;  %v4558_v16 = vadd.f32 %v4557_v46, %v15041_v0 }
0x1216   : > { %v4560_v38 = vadd.f32 %v4559_v12, %v15042_v27  ;;  %v4620_v39 = vpop.f32.mrb[226].mxu1  ;;  %v4561_v63 = vpop.f32.mrb[227].mxu0  ;;  %v4619_v51 = vadd.f32 %v4618_v50, %v15041_v0 }
0x1217   : > { %v4621_v58 = vadd.f32 %v4620_v39, %v15042_v27  ;;  %v4562_v40 = vadd.f32 %v4561_v63, %v15042_v27  ;;  %v4622_v52 = vpop.f32.mrb[227].mxu1 }
0x1218   : > { %v4643_v1 = vpack.c.bf16 %v4560_v38, %v4556_v14  ;;  %v4623_v36 = vadd.f32 %v4622_v52, %v15042_v27 }
0x1219   : > { %v4645_v28 = vpack.c.bf16 %v4621_v58, %v4617_v56  ;;  %v4644_v55 = vpack.c.bf16 %v4562_v40, %v4558_v16 }
0x121a   : > { %v4646_v23 = vpack.c.bf16 %v4623_v36, %v4619_v51 }
0x121b   : > { %v4565_v44 = vpop.f32.mrb[228].mxu0  ;;  %4717 = vmatprep.subr.bf16.mxu0 %v4644_v55 }
0x121c   : > { %v4626_v21 = vpop.f32.mrb[228].mxu1  ;;  %4780 = vmatprep.subr.bf16.mxu1 %v4646_v23  ;;  %v4567_v5 = vpop.f32.mrb[229].mxu0  ;;  %4718 = vmatpush1.bf16.msra.mxu0 %v4643_v1  ;;  %v4566_v43 = vadd.f32 %v4565_v44, %v15043_v59 }
0x121d   : > { %v4628_v34 = vpop.f32.mrb[229].mxu1  ;;  %4781 = vmatpush1.bf16.msra.mxu1 %v4645_v28  ;;  %v4569_v49 = vpop.f32.mrb[230].mxu0  ;;  %v4627_v62 = vadd.f32 %v4626_v21, %v15043_v59  ;;  %v4568_v32 = vadd.f32 %v4567_v5, %v15043_v59  ;;  %v15047_v28 = vld [vmem:[#allocation81_spill] sm:$0xff] }
0x121e   : > { %v4570_v17 = vadd.f32 %v4569_v49, %v15044_v54  ;;  %v4630_v31 = vpop.f32.mrb[230].mxu1  ;;  %v4571_v20 = vpop.f32.mrb[231].mxu0  ;;  %v4629_v8 = vadd.f32 %v4628_v34, %v15043_v59 }
0x121f   : > { %v4631_v60 = vadd.f32 %v4630_v31, %v15044_v54  ;;  %v4572_v48 = vadd.f32 %v4571_v20, %v15044_v54  ;;  %v4632_v30 = vpop.f32.mrb[231].mxu1 }
0x1220   : > { %v4647_v15 = vpack.c.bf16 %v4570_v17, %v4566_v43  ;;  %v4633_v41 = vadd.f32 %v4632_v30, %v15044_v54  ;;  %v15048_v54 = vld [vmem:[#allocation80_spill] sm:$0xff] }
0x1221   : > { %v4649_v45 = vpack.c.bf16 %v4631_v60, %v4627_v62  ;;  %v4648_v37 = vpack.c.bf16 %v4572_v48, %v4568_v32 }
0x1222   : > { %v4650_v35 = vpack.c.bf16 %v4633_v41, %v4629_v8 }
0x1223   : > { %4719 = vmatprep.subr.bf16.mxu0 %v4648_v37 }
0x1224   : > { %4782 = vmatprep.subr.bf16.mxu1 %v4650_v35  ;;  %4720 = vmatpush1.bf16.msra.mxu0 %v4647_v15 }
0x1225   : > { %4783 = vmatpush1.bf16.msra.mxu1 %v4649_v45  ;;  %4721 = vmatprep.subr.bf16.mxu0 %v12883_v18  ;;  %v11049_v18 = vld [vmem:[%s14592_s1 + $0xe0] sm:$0xff]  }
0x1226   : > { %4784 = vmatprep.subr.bf16.mxu1 %v12888_v29  ;;  %v11050_v29 = vld [vmem:[%s14592_s1 + $0xe8] sm:$0xff]  }
0x1228   : > { %4722 = vmatpush1.bf16.msra.mxu0 %v12896_v33 }
0x1229   : > { %4785 = vmatpush1.bf16.msra.mxu1 %v12905_v22  ;;  %v15045_v22 = vld [vmem:[#allocation79_spill] sm:$0xff] }
0x122b   : > { %10397 = vmatmul.mubr.msk.bf16.vlgmr.msra.gmra.mrb[236].mxu0 %vm270_vm0, %v11048_v53 }
0x122c   : > { %10400 = vmatmul.mubr.msk.bf16.vlgmr.msra.gmra.mrb[236].mxu1 %vm270_vm0, %v11048_v53  ;;  %4759 = vmatprep.mubr.bf16.mxu0 %v14836_v25 }
0x122d   : > { %4822 = vmatprep.mubr.bf16.mxu1 %v14836_v25 }
0x1233   : > { %10398 = vmatmul.mubr.msk.bf16.gmra.mrb[240].mxu0 %vm270_vm0, %v11049_v18 }
0x1234   : > { %10401 = vmatmul.mubr.msk.bf16.gmra.mrb[240].mxu1 %vm270_vm0, %v11049_v18  ;;  %4769 = vmatprep.mubr.bf16.mxu0 %v14836_v25 }
0x1235   : > { %4832 = vmatprep.mubr.bf16.mxu1 %v14836_v25 }
0x123b   : > { %10399 = vmatmul.mubr.msk.bf16.gmra.mrb[244].mxu0 %vm270_vm0, %v11050_v29 }
0x123c   : > { %10402 = vmatmul.mubr.msk.bf16.gmra.mrb[244].mxu1 %vm270_vm0, %v11050_v29  ;;  %4972 = vmatprep.mubr.bf16.mxu0 %v14836_v25 }
0x123d   : > { %5025 = vmatprep.mubr.bf16.mxu1 %v14836_v25 }
0x12fe   : > { %v4751_v33 = vpop.f32.mrb[236].mxu0 }
0x12ff   : > { %v4752_v9 = vadd.f32 %v4751_v33, %v15045_v22  ;;  %v4814_v7 = vpop.f32.mrb[236].mxu1  ;;  %v4753_v19 = vpop.f32.mrb[237].mxu0 }
0x1300   : > { %v4815_v42 = vadd.f32 %v4814_v7, %v15045_v22  ;;  %v4754_v2 = vadd.f32 %v4753_v19, %v15045_v22  ;;  %v4816_v11 = vpop.f32.mrb[237].mxu1  ;;  %v4755_v24 = vpop.f32.mrb[238].mxu0 }
0x1301   : > { %v4817_v47 = vadd.f32 %v4816_v11, %v15045_v22  ;;  %v4756_v26 = vadd.f32 %v4755_v24, %v15046_v61  ;;  %v4818_v57 = vpop.f32.mrb[238].mxu1  ;;  %v4757_v46 = vpop.f32.mrb[239].mxu0  ;;  %v4843_v14 = vmax.f32 %v4752_v9, 0.0  ;;  %v15049_v9 = vld [vmem:[#allocation83_spill] sm:$0xff] }
0x1302   : > { %v4819_v50 = vadd.f32 %v4818_v57, %v15046_v61  ;;  %v4758_v12 = vadd.f32 %v4757_v46, %v15046_v61  ;;  %v4820_v0 = vpop.f32.mrb[239].mxu1  ;;  %v4845_v39 = vmax.f32 %v4815_v42, 0.0  ;;  %v4844_v56 = vmax.f32 %v4754_v2, 0.0  ;;  %v15050_v57 = vld [vmem:[#allocation82_spill] sm:$0xff] }
0x1303   : > { %v4847_v27 = vmax.f32 %v4756_v26, 0.0  ;;  %v4821_v38 = vadd.f32 %v4820_v0, %v15046_v61  ;;  %v4846_v58 = vmax.f32 %v4817_v47, 0.0 }
0x1304   : > { %v4849_v63 = vmax.f32 %v4819_v50, 0.0  ;;  %v4848_v16 = vmax.f32 %v4758_v12, 0.0 }
0x1305   : > { %v4850_v40 = vmax.f32 %v4821_v38, 0.0  ;;  %v4867_v52 = vpack.c.bf16 %v4847_v27, %v4843_v14 }
0x1306   : > { %v4761_v51 = vpop.f32.mrb[240].mxu0  ;;  %v4868_v1 = vpack.c.bf16 %v4848_v16, %v4844_v56  ;;  %v4869_v36 = vpack.c.bf16 %v4849_v63, %v4845_v39  ;;  %v5055_v56 = vld [vmem:[%s11377_s11 + $0x48] sm:$0xff] }
0x1307   : > { %v4762_v55 = vadd.f32 %v4761_v51, %v15047_v28  ;;  %v4824_v23 = vpop.f32.mrb[240].mxu1  ;;  %v4763_v44 = vpop.f32.mrb[241].mxu0  ;;  %v4870_v21 = vpack.c.bf16 %v4850_v40, %v4846_v58  ;;  %v5059_v16 = vld [vmem:[%s11377_s11 + $0xc8] sm:$0xff] }
0x1308   : > { %v4825_v5 = vadd.f32 %v4824_v23, %v15047_v28  ;;  %v4764_v34 = vadd.f32 %v4763_v44, %v15047_v28  ;;  %v4826_v49 = vpop.f32.mrb[241].mxu1  ;;  %v4765_v59 = vpop.f32.mrb[242].mxu0  ;;  %4940 = vmatprep.subr.bf16.mxu0 %v4868_v1  ;;  %v5057_v1 = vld [vmem:[%s11377_s11 + $0x58] sm:$0xff] }
0x1309   : > { %v4827_v43 = vadd.f32 %v4826_v49, %v15047_v28  ;;  %v4766_v17 = vadd.f32 %v4765_v59, %v15048_v54  ;;  %v4828_v31 = vpop.f32.mrb[242].mxu1  ;;  %4993 = vmatprep.subr.bf16.mxu1 %v4870_v21  ;;  %v4767_v20 = vpop.f32.mrb[243].mxu0  ;;  %4941 = vmatpush1.bf16.msra.mxu0 %v4867_v52  ;;  %v4851_v48 = vmax.f32 %v4762_v55, 0.0  ;;  %v11051_v49 = vld [vmem:[%s14592_s1 + $0xf0] sm:$0xff]  }
0x130a   : > { %v4829_v62 = vadd.f32 %v4828_v31, %v15048_v54  ;;  %v4768_v32 = vadd.f32 %v4767_v20, %v15048_v54  ;;  %v4830_v60 = vpop.f32.mrb[243].mxu1  ;;  %4994 = vmatpush1.bf16.msra.mxu1 %v4869_v36  ;;  %v4853_v15 = vmax.f32 %v4825_v5, 0.0  ;;  %v4852_v41 = vmax.f32 %v4764_v34, 0.0  ;;  %v5061_v36 = vld [vmem:[%s11377_s11 + $0xd8] sm:$0xff]  ;;  %v5060_v31 = vld [vmem:[%s11377_s11 + $0xd0] sm:$0xff]  ;;  %v5063_v20 = vld [vmem:[%s11377_s11 + $0x148] sm:$0xff] }
0x130b   : > { %v4855_v30 = vmax.f32 %v4766_v17, 0.0  ;;  %v4831_v8 = vadd.f32 %v4830_v60, %v15048_v54  ;;  %v4854_v35 = vmax.f32 %v4827_v43, 0.0  ;;  %v13509_v5 = vpack.c.bf16 %v5059_v16, %v5055_v56  ;;  %v5054_v43 = vld [vmem:[%s11377_s11 + $0x40] sm:$0xff]  ;;  %v5056_v17 = vld [vmem:[%s11377_s11 + $0x50] sm:$0xff] }
0x130c   : > { %v4857_v45 = vmax.f32 %v4829_v62, 0.0  ;;  %v4856_v37 = vmax.f32 %v4768_v32, 0.0  ;;  %v13514_v59 = vpack.c.bf16 %v5061_v36, %v5057_v1  ;;  %v5058_v54 = vld [vmem:[%s11377_s11 + $0xc0] sm:$0xff]  ;;  %v5065_v62 = vld [vmem:[%s11377_s11 + $0x158] sm:$0xff]  ;;  %v13526_v60 = vpack.c.bf16 %v5060_v31, %v5056_v17 }
0x130d   : > { %v4871_v53 = vpack.c.bf16 %v4855_v30, %v4851_v48  ;;  %v4858_v18 = vmax.f32 %v4831_v8, 0.0  ;;  %v13523_v32 = vpack.c.bf16 %v5058_v54, %v5054_v43  ;;  %v13529_v48 = vpack.c.bf16 %v14952_v6, %v5063_v20  ;;  %v5062_v30 = vld [vmem:[%s11377_s11 + $0x140] sm:$0xff] }
0x130e   : > { %v4873_v29 = vpack.c.bf16 %v4857_v45, %v4853_v15  ;;  %v4771_v33 = vpop.f32.mrb[244].mxu0  ;;  %v4872_v22 = vpack.c.bf16 %v4856_v37, %v4852_v41  ;;  %v13534_v8 = vpack.c.bf16 %v14952_v6, %v5065_v62  ;;  %v5064_v15 = vld [vmem:[%s11377_s11 + $0x150] sm:$0xff]  ;;  %v13542_v41 = vpack.c.bf16 %v14952_v6, %v5062_v30  ;;  %v11052_v37 = vld [vmem:[%s14592_s1 + $0xf8] sm:$0xff]   ;;  %v15052_v20 = vld [vmem:[#allocation84_spill] sm:$0xff] }
0x130f   : > { %v4772_v7 = vadd.f32 %v4771_v33, %v15049_v9  ;;  %v4834_v19 = vpop.f32.mrb[244].mxu1  ;;  %v4773_v42 = vpop.f32.mrb[245].mxu0  ;;  %v4874_v2 = vpack.c.bf16 %v4858_v18, %v4854_v35  ;;  %v13547_v45 = vpack.c.bf16 %v14952_v6, %v5064_v15  ;;  %v11053_v35 = vld [vmem:[%s14592_s1 + $0x100] sm:$0xff]   ;;  %v11055_v18 = vld [vmem:[%s14592_s1 + $0x8] sm:$0xff]  }
0x1310   : > { %v4835_v11 = vadd.f32 %v4834_v19, %v15049_v9  ;;  %v4774_v24 = vadd.f32 %v4773_v42, %v15049_v9  ;;  %v4836_v47 = vpop.f32.mrb[245].mxu1  ;;  %v4775_v61 = vpop.f32.mrb[246].mxu0  ;;  %4942 = vmatprep.subr.bf16.mxu0 %v4872_v22 }
0x1311   : > { %v4837_v26 = vadd.f32 %v4836_v47, %v15049_v9  ;;  %v4776_v46 = vadd.f32 %v4775_v61, %v15050_v57  ;;  %v4838_v50 = vpop.f32.mrb[246].mxu1  ;;  %4995 = vmatprep.subr.bf16.mxu1 %v4874_v2  ;;  %v4777_v12 = vpop.f32.mrb[247].mxu0  ;;  %4943 = vmatpush1.bf16.msra.mxu0 %v4871_v53  ;;  %v4859_v38 = vmax.f32 %v4772_v7, 0.0  ;;  %v11054_v53 = vld [vmem:[%s14592_s1] sm:$0xff]  }
0x1312   : > { %v4839_v0 = vadd.f32 %v4838_v50, %v15050_v57  ;;  %v4778_v14 = vadd.f32 %v4777_v12, %v15050_v57  ;;  %v4840_v27 = vpop.f32.mrb[247].mxu1  ;;  %4996 = vmatpush1.bf16.msra.mxu1 %v4873_v29  ;;  %v4861_v58 = vmax.f32 %v4835_v11, 0.0  ;;  %v4860_v40 = vmax.f32 %v4774_v24, 0.0  ;;  %v11056_v29 = vld [vmem:[%s14592_s1 + $0x10] sm:$0xff]   ;;  %v4894_v33 = vpop.permute.xlu1 %4893 }
0x1313   : > { %v4863_v39 = vmax.f32 %v4776_v46, 0.0  ;;  %v4841_v63 = vadd.f32 %v4840_v27, %v15050_v57  ;;  %v4862_v28 = vmax.f32 %v4837_v26, 0.0  ;;  %v4491_v22 = vpop.permute.xlu0 %4490 }
0x1314   : > { %v4865_v52 = vmax.f32 %v4839_v0, 0.0  ;;  %v4864_v51 = vmax.f32 %v4778_v14, 0.0  ;;  %v10877_v9 = vadd.f32 %v4894_v33, %v4491_v22 }
0x1315   : > { %v4875_v55 = vpack.c.bf16 %v4863_v39, %v4859_v38  ;;  %v4866_v23 = vmax.f32 %v4841_v63, 0.0 }
0x1316   : > { %v4877_v44 = vpack.c.bf16 %v4865_v52, %v4861_v58  ;;  %v4876_v21 = vpack.c.bf16 %v4864_v51, %v4860_v40 }
0x1317   : > { %v4878_v34 = vpack.c.bf16 %v4866_v23, %v4862_v28  ;;  %v15051_v23 = vld [vmem:[#allocation85_spill] sm:$0xff] }
0x1318   : > { %4944 = vmatprep.subr.bf16.mxu0 %v4876_v21 }
0x1319   : > { %4997 = vmatprep.subr.bf16.mxu1 %v4878_v34  ;;  %4945 = vmatpush1.bf16.msra.mxu0 %v4875_v55 }
0x131a   : > { %4998 = vmatpush1.bf16.msra.mxu1 %v4877_v44  ;;  %5140 = vmatprep.subr.bf16.mxu0 %v13509_v5 }
0x131b   : > { %5203 = vmatprep.subr.bf16.mxu1 %v13514_v59 }
0x131c   : > { %10418 = vmatmul.mubr.msk.bf16.vlgmr.msra.gmra.mrb[232].mxu0 %vm270_vm0, %v11051_v49 }
0x131d   : > { %10421 = vmatmul.mubr.msk.bf16.vlgmr.msra.gmra.mrb[232].mxu1 %vm270_vm0, %v11051_v49  ;;  %4980 = vmatprep.mubr.bf16.mxu0 %v14836_v25 }
0x131e   : > { %5033 = vmatprep.mubr.bf16.mxu1 %v14836_v25  ;;  %5141 = vmatpush1.bf16.msra.mxu0 %v13523_v32 }
0x131f   : > { %5204 = vmatpush1.bf16.msra.mxu1 %v13526_v60  ;;  %5142 = vmatprep.subr.bf16.mxu0 %v13529_v48 }
0x1320   : > { %5205 = vmatprep.subr.bf16.mxu1 %v13534_v8 }
0x1322   : > { %5143 = vmatpush1.bf16.msra.mxu0 %v13542_v41 }
0x1323   : > { %5206 = vmatpush1.bf16.msra.mxu1 %v13547_v45 }
0x1324   : > { %10419 = vmatmul.mubr.msk.bf16.gmra.mrb[248].mxu0 %vm270_vm0, %v11052_v37 }
0x1325   : > { %10422 = vmatmul.mubr.msk.bf16.gmra.mrb[248].mxu1 %vm270_vm0, %v11052_v37  ;;  %4986 = vmatprep.mubr.bf16.mxu0 %v14836_v25 }
0x1326   : > { %5039 = vmatprep.mubr.bf16.mxu1 %v14836_v25 }
0x132c   : > { %10420 = vmatmul.mubr.msk.bf16.gmra.mrb[252].mxu0 %vm270_vm0, %v11053_v35 }
0x132d   : > { %10423 = vmatmul.mubr.msk.bf16.gmra.mrb[252].mxu1 %vm270_vm0, %v11053_v35  ;;  %5172 = vmatprep.mubr.bf16.mxu0 %v14836_v25 }
0x132e   : > { %5235 = vmatprep.mubr.bf16.mxu1 %v14836_v25 }
0x1334   : > { %10427 = vmatmul.mubr.msk.bf16.vlgmr.msra.gmra.mrb[0].mxu0 %vm270_vm0, %v11054_v53 }
0x1335   : > { %10430 = vmatmul.mubr.msk.bf16.vlgmr.msra.gmra.mrb[0].mxu1 %vm270_vm0, %v11054_v53  ;;  %5182 = vmatprep.mubr.bf16.mxu0 %v14836_v25 }
0x1336   : > { %5245 = vmatprep.mubr.bf16.mxu1 %v14836_v25 }
0x133c   : > { %10428 = vmatmul.mubr.msk.bf16.gmra.mrb[4].mxu0 %vm270_vm0, %v11055_v18 }
0x133d   : > { %10431 = vmatmul.mubr.msk.bf16.gmra.mrb[4].mxu1 %vm270_vm0, %v11055_v18  ;;  %5192 = vmatprep.mubr.bf16.mxu0 %v14836_v25 }
0x133e   : > { %5255 = vmatprep.mubr.bf16.mxu1 %v14836_v25 }
0x1344   : > { %10429 = vmatmul.mubr.msk.bf16.gmra.mrb[8].mxu0 %vm270_vm0, %v11056_v29 }
0x1345   : > { %10432 = vmatmul.mubr.msk.bf16.gmra.mrb[8].mxu1 %vm270_vm0, %v11056_v29  ;;  %5400 = vmatprep.mubr.bf16.mxu0 %v14836_v25 }
0x1346   : > { %5463 = vmatprep.mubr.bf16.mxu1 %v14836_v25 }
0x13ef   : > { %v4974_v7 = vpop.f32.mrb[232].mxu0 }
0x13f0   : > { %v10878_v19 = vadd.f32 %v10877_v9, %v4974_v7  ;;  %v5027_v42 = vpop.f32.mrb[232].mxu1  ;;  %v4976_v2 = vpop.f32.mrb[233].mxu0 }
0x13f1   : > { %v10882_v11 = vadd.f32 %v10877_v9, %v5027_v42  ;;  %v10880_v24 = vadd.f32 %v10877_v9, %v4976_v2  ;;  %v5029_v47 = vpop.f32.mrb[233].mxu1  ;;  %v4978_v61 = vpop.f32.mrb[234].mxu0 }
0x13f2   : > { %5050 = vst [vmem:[%s13078_s17 + $0x20] sm:$0xff] %v10878_v19  ;;  %v10884_v26 = vadd.f32 %v10877_v9, %v5029_v47  ;;  %v5031_v57 = vpop.f32.mrb[234].mxu1  ;;  %v4979_v46 = vpop.f32.mrb[235].mxu0 }
0x13f3   : > { %5052 = vst [vmem:[%s13078_s17 + $0x30] sm:$0xff] %v10882_v11  ;;  %5051 = vst [vmem:[%s13078_s17 + $0x28] sm:$0xff] %v10880_v24  ;;  %v5032_v50 = vpop.f32.mrb[235].mxu1  ;;  %v15053_v57 = vld [vmem:[#allocation87_spill] sm:$0xff] }
0x13f4   : > { %5053 = vst [vmem:[%s13078_s17 + $0x38] sm:$0xff] %v10884_v26 }
0x13f7   : > { %v4982_v12 = vpop.f32.mrb[248].mxu0 }
0x13f8   : > { %v5035_v0 = vpop.f32.mrb[248].mxu1  ;;  %v4983_v14 = vpop.f32.mrb[249].mxu0 }
0x13f9   : > { %v5036_v27 = vpop.f32.mrb[249].mxu1  ;;  %v4984_v38 = vpop.f32.mrb[250].mxu0 }
0x13fa   : > { %v5037_v39 = vpop.f32.mrb[250].mxu1  ;;  %v4985_v63 = vpop.f32.mrb[251].mxu0 }
0x13fb   : > { %v5038_v56 = vpop.f32.mrb[251].mxu1  ;;  %v15054_v63 = vld [vmem:[#allocation86_spill] sm:$0xff] }
0x13ff   : > { %v4988_v16 = vpop.f32.mrb[252].mxu0 }
0x1400   : > { %v5041_v58 = vpop.f32.mrb[252].mxu1  ;;  %v4989_v40 = vpop.f32.mrb[253].mxu0 }
0x1401   : > { %v5042_v52 = vpop.f32.mrb[253].mxu1  ;;  %v4990_v51 = vpop.f32.mrb[254].mxu0 }
0x1402   : > { %v5043_v1 = vpop.f32.mrb[254].mxu1  ;;  %v4991_v36 = vpop.f32.mrb[255].mxu0 }
0x1403   : > { %v5044_v28 = vpop.f32.mrb[255].mxu1 }
0x1407   : > { %v5174_v55 = vpop.f32.mrb[0].mxu0 }
0x1408   : > { %v5175_v44 = vadd.f32 %v5174_v55, %v15051_v23  ;;  %v5237_v21 = vpop.f32.mrb[0].mxu1  ;;  %v5176_v34 = vpop.f32.mrb[1].mxu0 }
0x1409   : > { %v5238_v49 = vadd.f32 %v5237_v21, %v15051_v23  ;;  %v5177_v43 = vadd.f32 %v5176_v34, %v15051_v23  ;;  %v5239_v54 = vpop.f32.mrb[1].mxu1  ;;  %v5178_v17 = vpop.f32.mrb[2].mxu0 }
0x140a   : > { %v5240_v31 = vadd.f32 %v5239_v54, %v15051_v23  ;;  %v5179_v62 = vadd.f32 %v5178_v17, %v15052_v20  ;;  %v5241_v30 = vpop.f32.mrb[2].mxu1  ;;  %v5180_v15 = vpop.f32.mrb[3].mxu0  ;;  %v5266_v18 = vmax.f32 %v5175_v44, 0.0 }
0x140b   : > { %v5242_v37 = vadd.f32 %v5241_v30, %v15052_v20  ;;  %v5181_v35 = vadd.f32 %v5180_v15, %v15052_v20  ;;  %v5243_v53 = vpop.f32.mrb[3].mxu1  ;;  %v5268_v22 = vmax.f32 %v5238_v49, 0.0  ;;  %v5267_v9 = vmax.f32 %v5177_v43, 0.0 }
0x140c   : > { %v5270_v29 = vmax.f32 %v5179_v62, 0.0  ;;  %v5244_v33 = vadd.f32 %v5243_v53, %v15052_v20  ;;  %v5269_v42 = vmax.f32 %v5240_v31, 0.0  ;;  %v15055_v62 = vld [vmem:[#allocation89_spill] sm:$0xff] }
0x140d   : > { %v5272_v7 = vmax.f32 %v5242_v37, 0.0  ;;  %v5271_v19 = vmax.f32 %v5181_v35, 0.0 }
0x140e   : > { %v5290_v2 = vpack.c.bf16 %v5270_v29, %v5266_v18  ;;  %v5273_v11 = vmax.f32 %v5244_v33, 0.0 }
0x140f   : > { %v5292_v24 = vpack.c.bf16 %v5272_v7, %v5268_v22  ;;  %v5291_v47 = vpack.c.bf16 %v5271_v19, %v5267_v9  ;;  %v5184_v61 = vpop.f32.mrb[4].mxu0  ;;  %v15056_v22 = vld [vmem:[#allocation88_spill] sm:$0xff] }
0x1410   : > { %v5293_v26 = vpack.c.bf16 %v5273_v11, %v5269_v42  ;;  %v5185_v46 = vadd.f32 %v5184_v61, %v15053_v57  ;;  %v5247_v50 = vpop.f32.mrb[4].mxu1  ;;  %v5186_v12 = vpop.f32.mrb[5].mxu0 }
0x1411   : > { %v5248_v0 = vadd.f32 %v5247_v50, %v15053_v57  ;;  %v5187_v14 = vadd.f32 %v5186_v12, %v15053_v57  ;;  %v5249_v27 = vpop.f32.mrb[5].mxu1  ;;  %v5188_v38 = vpop.f32.mrb[6].mxu0  ;;  %5368 = vmatprep.subr.bf16.mxu0 %v5291_v47 }
0x1412   : > { %v5250_v39 = vadd.f32 %v5249_v27, %v15053_v57  ;;  %v5189_v56 = vadd.f32 %v5188_v38, %v15054_v63  ;;  %v5251_v16 = vpop.f32.mrb[6].mxu1  ;;  %5431 = vmatprep.subr.bf16.mxu1 %v5293_v26  ;;  %v5190_v58 = vpop.f32.mrb[7].mxu0  ;;  %5369 = vmatpush1.bf16.msra.mxu0 %v5290_v2  ;;  %v5274_v1 = vmax.f32 %v5185_v46, 0.0 }
0x1413   : > { %v5252_v40 = vadd.f32 %v5251_v16, %v15054_v63  ;;  %v5191_v52 = vadd.f32 %v5190_v58, %v15054_v63  ;;  %v5253_v51 = vpop.f32.mrb[7].mxu1  ;;  %5432 = vmatpush1.bf16.msra.mxu1 %v5292_v24  ;;  %v5276_v55 = vmax.f32 %v5248_v0, 0.0  ;;  %v5275_v23 = vmax.f32 %v5187_v14, 0.0  ;;  %v11059_v16 = vld [vmem:[%s14592_s1 + $0x28] sm:$0xff]  }
0x1414   : > { %v5278_v36 = vmax.f32 %v5189_v56, 0.0  ;;  %v5254_v28 = vadd.f32 %v5253_v51, %v15054_v63  ;;  %v5277_v34 = vmax.f32 %v5250_v39, 0.0  ;;  %v11057_v63 = vld [vmem:[%s14592_s1 + $0x18] sm:$0xff]   ;;  %v11058_v56 = vld [vmem:[%s14592_s1 + $0x20] sm:$0xff]  }
0x1415   : > { %v5280_v44 = vmax.f32 %v5252_v40, 0.0  ;;  %v5279_v21 = vmax.f32 %v5191_v52, 0.0  ;;  %v15057_v40 = vld [vmem:[#allocation91_spill] sm:$0xff] }
0x1416   : > { %v5294_v49 = vpack.c.bf16 %v5278_v36, %v5274_v1  ;;  %v5281_v43 = vmax.f32 %v5254_v28, 0.0 }
0x1417   : > { %v5296_v54 = vpack.c.bf16 %v5280_v44, %v5276_v55  ;;  %v5295_v17 = vpack.c.bf16 %v5279_v21, %v5275_v23  ;;  %v5194_v31 = vpop.f32.mrb[8].mxu0  ;;  %v15058_v21 = vld [vmem:[#allocation90_spill] sm:$0xff] }
0x1418   : > { %v5297_v20 = vpack.c.bf16 %v5281_v43, %v5277_v34  ;;  %v5195_v30 = vadd.f32 %v5194_v31, %v15055_v62  ;;  %v5257_v15 = vpop.f32.mrb[8].mxu1  ;;  %v5196_v37 = vpop.f32.mrb[9].mxu0 }
0x1419   : > { %v5258_v35 = vadd.f32 %v5257_v15, %v15055_v62  ;;  %v5197_v53 = vadd.f32 %v5196_v37, %v15055_v62  ;;  %v5259_v18 = vpop.f32.mrb[9].mxu1  ;;  %v5198_v29 = vpop.f32.mrb[10].mxu0  ;;  %5370 = vmatprep.subr.bf16.mxu0 %v5295_v17 }
0x141a   : > { %v5260_v33 = vadd.f32 %v5259_v18, %v15055_v62  ;;  %v5199_v9 = vadd.f32 %v5198_v29, %v15056_v22  ;;  %v5261_v7 = vpop.f32.mrb[10].mxu1  ;;  %5433 = vmatprep.subr.bf16.mxu1 %v5297_v20  ;;  %v5200_v19 = vpop.f32.mrb[11].mxu0  ;;  %5371 = vmatpush1.bf16.msra.mxu0 %v5294_v49  ;;  %v5282_v24 = vmax.f32 %v5195_v30, 0.0 }
0x141b   : > { %v5262_v42 = vadd.f32 %v5261_v7, %v15056_v22  ;;  %v5201_v2 = vadd.f32 %v5200_v19, %v15056_v22  ;;  %v5263_v11 = vpop.f32.mrb[11].mxu1  ;;  %5434 = vmatpush1.bf16.msra.mxu1 %v5296_v54  ;;  %v5284_v26 = vmax.f32 %v5258_v35, 0.0  ;;  %v5283_v57 = vmax.f32 %v5197_v53, 0.0 }
0x141c   : > { %v5286_v47 = vmax.f32 %v5199_v9, 0.0  ;;  %v5264_v61 = vadd.f32 %v5263_v11, %v15056_v22  ;;  %v5285_v12 = vmax.f32 %v5260_v33, 0.0 }
0x141d   : > { %v5288_v46 = vmax.f32 %v5262_v42, 0.0  ;;  %v5287_v50 = vmax.f32 %v5201_v2, 0.0  ;;  %v15059_v42 = vld [vmem:[#allocation93_spill] sm:$0xff] }
0x141e   : > { %v5298_v0 = vpack.c.bf16 %v5286_v47, %v5282_v24  ;;  %v5289_v14 = vmax.f32 %v5264_v61, 0.0 }
0x141f   : > { %v5300_v27 = vpack.c.bf16 %v5288_v46, %v5284_v26  ;;  %v5299_v38 = vpack.c.bf16 %v5287_v50, %v5283_v57  ;;  %v15060_v50 = vld [vmem:[#allocation92_spill] sm:$0xff] }
0x1420   : > { %v5301_v39 = vpack.c.bf16 %v5289_v14, %v5285_v12 }
0x1421   : > { %5372 = vmatprep.subr.bf16.mxu0 %v5299_v38 }
0x1422   : > { %5435 = vmatprep.subr.bf16.mxu1 %v5301_v39  ;;  %5373 = vmatpush1.bf16.msra.mxu0 %v5298_v0 }
0x1423   : > { %5436 = vmatpush1.bf16.msra.mxu1 %v5300_v27 }
0x1425   : > { %10448 = vmatmul.mubr.msk.bf16.vlgmr.msra.gmra.mrb[12].mxu0 %vm270_vm0, %v11057_v63 }
0x1426   : > { %10451 = vmatmul.mubr.msk.bf16.vlgmr.msra.gmra.mrb[12].mxu1 %vm270_vm0, %v11057_v63  ;;  %5410 = vmatprep.mubr.bf16.mxu0 %v14836_v25 }
0x1427   : > { %5473 = vmatprep.mubr.bf16.mxu1 %v14836_v25 }
0x142d   : > { %10449 = vmatmul.mubr.msk.bf16.gmra.mrb[16].mxu0 %vm270_vm0, %v11058_v56 }
0x142e   : > { %10452 = vmatmul.mubr.msk.bf16.gmra.mrb[16].mxu1 %vm270_vm0, %v11058_v56  ;;  %5420 = vmatprep.mubr.bf16.mxu0 %v14836_v25 }
0x142f   : > { %5483 = vmatprep.mubr.bf16.mxu1 %v14836_v25 }
0x1435   : > { %10450 = vmatmul.mubr.msk.bf16.gmra.mrb[20].mxu0 %vm270_vm0, %v11059_v16 }
0x1436   : > { %10453 = vmatmul.mubr.msk.bf16.gmra.mrb[20].mxu1 %vm270_vm0, %v11059_v16  ;;  %5628 = vmatprep.mubr.bf16.mxu0 %v14836_v25 }
0x1437   : > { %5691 = vmatprep.mubr.bf16.mxu1 %v14836_v25 }
0x14f8   : > { %v5402_v58 = vpop.f32.mrb[12].mxu0 }
0x14f9   : > { %v5403_v52 = vadd.f32 %v5402_v58, %v15057_v40  ;;  %v5465_v51 = vpop.f32.mrb[12].mxu1  ;;  %v5404_v1 = vpop.f32.mrb[13].mxu0 }
0x14fa   : > { %v5466_v36 = vadd.f32 %v5465_v51, %v15057_v40  ;;  %v5405_v28 = vadd.f32 %v5404_v1, %v15057_v40  ;;  %v5467_v55 = vpop.f32.mrb[13].mxu1  ;;  %v5406_v23 = vpop.f32.mrb[14].mxu0 }
0x14fb   : > { %v5468_v44 = vadd.f32 %v5467_v55, %v15057_v40  ;;  %v5407_v34 = vadd.f32 %v5406_v23, %v15058_v21  ;;  %v5469_v49 = vpop.f32.mrb[14].mxu1  ;;  %v5408_v43 = vpop.f32.mrb[15].mxu0  ;;  %v5494_v20 = vmax.f32 %v5403_v52, 0.0 }
0x14fc   : > { %v5470_v54 = vadd.f32 %v5469_v49, %v15058_v21  ;;  %v5409_v17 = vadd.f32 %v5408_v43, %v15058_v21  ;;  %v5471_v31 = vpop.f32.mrb[15].mxu1  ;;  %v5496_v15 = vmax.f32 %v5466_v36, 0.0  ;;  %v5495_v37 = vmax.f32 %v5405_v28, 0.0 }
0x14fd   : > { %v5498_v62 = vmax.f32 %v5407_v34, 0.0  ;;  %v5472_v30 = vadd.f32 %v5471_v31, %v15058_v21  ;;  %v5497_v18 = vmax.f32 %v5468_v44, 0.0  ;;  %v15061_v34 = vld [vmem:[#allocation95_spill] sm:$0xff] }
0x14fe   : > { %v5500_v35 = vmax.f32 %v5470_v54, 0.0  ;;  %v5499_v53 = vmax.f32 %v5409_v17, 0.0 }
0x14ff   : > { %v5518_v29 = vpack.c.bf16 %v5498_v62, %v5494_v20  ;;  %v5501_v33 = vmax.f32 %v5472_v30, 0.0 }
0x1500   : > { %v5520_v22 = vpack.c.bf16 %v5500_v35, %v5496_v15  ;;  %v5519_v9 = vpack.c.bf16 %v5499_v53, %v5495_v37  ;;  %v5412_v7 = vpop.f32.mrb[16].mxu0  ;;  %v15062_v15 = vld [vmem:[#allocation94_spill] sm:$0xff] }
0x1501   : > { %v5521_v19 = vpack.c.bf16 %v5501_v33, %v5497_v18  ;;  %v5413_v2 = vadd.f32 %v5412_v7, %v15059_v42  ;;  %v5475_v11 = vpop.f32.mrb[16].mxu1  ;;  %v5414_v24 = vpop.f32.mrb[17].mxu0 }
0x1502   : > { %v5476_v47 = vadd.f32 %v5475_v11, %v15059_v42  ;;  %v5415_v61 = vadd.f32 %v5414_v24, %v15059_v42  ;;  %v5477_v26 = vpop.f32.mrb[17].mxu1  ;;  %v5416_v57 = vpop.f32.mrb[18].mxu0  ;;  %5596 = vmatprep.subr.bf16.mxu0 %v5519_v9 }
0x1503   : > { %v5478_v46 = vadd.f32 %v5477_v26, %v15059_v42  ;;  %v5417_v12 = vadd.f32 %v5416_v57, %v15060_v50  ;;  %v5479_v0 = vpop.f32.mrb[18].mxu1  ;;  %5659 = vmatprep.subr.bf16.mxu1 %v5521_v19  ;;  %v5418_v14 = vpop.f32.mrb[19].mxu0  ;;  %5597 = vmatpush1.bf16.msra.mxu0 %v5518_v29  ;;  %v5502_v63 = vmax.f32 %v5413_v2, 0.0 }
0x1504   : > { %v5480_v27 = vadd.f32 %v5479_v0, %v15060_v50  ;;  %v5419_v38 = vadd.f32 %v5418_v14, %v15060_v50  ;;  %v5481_v39 = vpop.f32.mrb[19].mxu1  ;;  %5660 = vmatpush1.bf16.msra.mxu1 %v5520_v22  ;;  %v5504_v58 = vmax.f32 %v5476_v47, 0.0  ;;  %v5503_v40 = vmax.f32 %v5415_v61, 0.0  ;;  %v11062_v0 = vld [vmem:[%s14592_s1 + $0x40] sm:$0xff]  }
0x1505   : > { %v5506_v56 = vmax.f32 %v5417_v12, 0.0  ;;  %v5482_v16 = vadd.f32 %v5481_v39, %v15060_v50  ;;  %v5505_v1 = vmax.f32 %v5478_v46, 0.0  ;;  %v11060_v50 = vld [vmem:[%s14592_s1 + $0x30] sm:$0xff]   ;;  %v11061_v12 = vld [vmem:[%s14592_s1 + $0x38] sm:$0xff]  }
0x1506   : > { %v5508_v52 = vmax.f32 %v5480_v27, 0.0  ;;  %v5507_v51 = vmax.f32 %v5419_v38, 0.0  ;;  %v15063_v27 = vld [vmem:[#allocation97_spill] sm:$0xff] }
0x1507   : > { %v5522_v36 = vpack.c.bf16 %v5506_v56, %v5502_v63  ;;  %v5509_v28 = vmax.f32 %v5482_v16, 0.0 }
0x1508   : > { %v5524_v55 = vpack.c.bf16 %v5508_v52, %v5504_v58  ;;  %v5523_v23 = vpack.c.bf16 %v5507_v51, %v5503_v40  ;;  %v5422_v44 = vpop.f32.mrb[20].mxu0  ;;  %v15064_v51 = vld [vmem:[#allocation96_spill] sm:$0xff] }
0x1509   : > { %v5525_v21 = vpack.c.bf16 %v5509_v28, %v5505_v1  ;;  %v5423_v49 = vadd.f32 %v5422_v44, %v15061_v34  ;;  %v5485_v43 = vpop.f32.mrb[20].mxu1  ;;  %v5424_v54 = vpop.f32.mrb[21].mxu0 }
0x150a   : > { %v5486_v17 = vadd.f32 %v5485_v43, %v15061_v34  ;;  %v5425_v31 = vadd.f32 %v5424_v54, %v15061_v34  ;;  %v5487_v20 = vpop.f32.mrb[21].mxu1  ;;  %v5426_v62 = vpop.f32.mrb[22].mxu0  ;;  %5598 = vmatprep.subr.bf16.mxu0 %v5523_v23 }
0x150b   : > { %v5488_v30 = vadd.f32 %v5487_v20, %v15061_v34  ;;  %v5427_v37 = vadd.f32 %v5426_v62, %v15062_v15  ;;  %v5489_v35 = vpop.f32.mrb[22].mxu1  ;;  %5661 = vmatprep.subr.bf16.mxu1 %v5525_v21  ;;  %v5428_v53 = vpop.f32.mrb[23].mxu0  ;;  %5599 = vmatpush1.bf16.msra.mxu0 %v5522_v36  ;;  %v5510_v22 = vmax.f32 %v5423_v49, 0.0 }
0x150c   : > { %v5490_v18 = vadd.f32 %v5489_v35, %v15062_v15  ;;  %v5429_v29 = vadd.f32 %v5428_v53, %v15062_v15  ;;  %v5491_v33 = vpop.f32.mrb[23].mxu1  ;;  %5662 = vmatpush1.bf16.msra.mxu1 %v5524_v55  ;;  %v5512_v19 = vmax.f32 %v5486_v17, 0.0  ;;  %v5511_v42 = vmax.f32 %v5425_v31, 0.0 }
0x150d   : > { %v5514_v9 = vmax.f32 %v5427_v37, 0.0  ;;  %v5492_v7 = vadd.f32 %v5491_v33, %v15062_v15  ;;  %v5513_v24 = vmax.f32 %v5488_v30, 0.0 }
0x150e   : > { %v5516_v2 = vmax.f32 %v5490_v18, 0.0  ;;  %v5515_v11 = vmax.f32 %v5429_v29, 0.0  ;;  %v15065_v18 = vld [vmem:[#allocation99_spill] sm:$0xff] }
0x150f   : > { %v5526_v47 = vpack.c.bf16 %v5514_v9, %v5510_v22  ;;  %v5517_v61 = vmax.f32 %v5492_v7, 0.0 }
0x1510   : > { %v5528_v26 = vpack.c.bf16 %v5516_v2, %v5512_v19  ;;  %v5527_v57 = vpack.c.bf16 %v5515_v11, %v5511_v42  ;;  %v15066_v11 = vld [vmem:[#allocation98_spill] sm:$0xff] }
0x1511   : > { %v5529_v46 = vpack.c.bf16 %v5517_v61, %v5513_v24 }
0x1512   : > { %5600 = vmatprep.subr.bf16.mxu0 %v5527_v57 }
0x1513   : > { %5663 = vmatprep.subr.bf16.mxu1 %v5529_v46  ;;  %5601 = vmatpush1.bf16.msra.mxu0 %v5526_v47 }
0x1514   : > { %5664 = vmatpush1.bf16.msra.mxu1 %v5528_v26 }
0x1516   : > { %10469 = vmatmul.mubr.msk.bf16.vlgmr.msra.gmra.mrb[24].mxu0 %vm270_vm0, %v11060_v50 }
0x1517   : > { %10472 = vmatmul.mubr.msk.bf16.vlgmr.msra.gmra.mrb[24].mxu1 %vm270_vm0, %v11060_v50  ;;  %5638 = vmatprep.mubr.bf16.mxu0 %v14836_v25 }
0x1518   : > { %5701 = vmatprep.mubr.bf16.mxu1 %v14836_v25 }
0x151e   : > { %10470 = vmatmul.mubr.msk.bf16.gmra.mrb[28].mxu0 %vm270_vm0, %v11061_v12 }
0x151f   : > { %10473 = vmatmul.mubr.msk.bf16.gmra.mrb[28].mxu1 %vm270_vm0, %v11061_v12  ;;  %5648 = vmatprep.mubr.bf16.mxu0 %v14836_v25 }
0x1520   : > { %5711 = vmatprep.mubr.bf16.mxu1 %v14836_v25 }
0x1526   : > { %10471 = vmatmul.mubr.msk.bf16.gmra.mrb[32].mxu0 %vm270_vm0, %v11062_v0 }
0x1527   : > { %10474 = vmatmul.mubr.msk.bf16.gmra.mrb[32].mxu1 %vm270_vm0, %v11062_v0  ;;  %5856 = vmatprep.mubr.bf16.mxu0 %v14836_v25 }
0x1528   : > { %5919 = vmatprep.mubr.bf16.mxu1 %v14836_v25 }
0x15e9   : > { %v5630_v14 = vpop.f32.mrb[24].mxu0 }
0x15ea   : > { %v5631_v38 = vadd.f32 %v5630_v14, %v15063_v27  ;;  %v5693_v39 = vpop.f32.mrb[24].mxu1  ;;  %v5632_v63 = vpop.f32.mrb[25].mxu0 }
0x15eb   : > { %v5694_v56 = vadd.f32 %v5693_v39, %v15063_v27  ;;  %v5633_v16 = vadd.f32 %v5632_v63, %v15063_v27  ;;  %v5695_v58 = vpop.f32.mrb[25].mxu1  ;;  %v5634_v40 = vpop.f32.mrb[26].mxu0 }
0x15ec   : > { %v5696_v52 = vadd.f32 %v5695_v58, %v15063_v27  ;;  %v5635_v1 = vadd.f32 %v5634_v40, %v15064_v51  ;;  %v5697_v36 = vpop.f32.mrb[26].mxu1  ;;  %v5636_v28 = vpop.f32.mrb[27].mxu0  ;;  %v5722_v21 = vmax.f32 %v5631_v38, 0.0 }
0x15ed   : > { %v5698_v55 = vadd.f32 %v5697_v36, %v15064_v51  ;;  %v5637_v23 = vadd.f32 %v5636_v28, %v15064_v51  ;;  %v5699_v44 = vpop.f32.mrb[27].mxu1  ;;  %v5724_v43 = vmax.f32 %v5694_v56, 0.0  ;;  %v5723_v54 = vmax.f32 %v5633_v16, 0.0 }
0x15ee   : > { %v5726_v34 = vmax.f32 %v5635_v1, 0.0  ;;  %v5700_v49 = vadd.f32 %v5699_v44, %v15064_v51  ;;  %v5725_v20 = vmax.f32 %v5696_v52, 0.0  ;;  %v15067_v1 = vld [vmem:[#allocation101_spill] sm:$0xff] }
0x15ef   : > { %v5728_v17 = vmax.f32 %v5698_v55, 0.0  ;;  %v5727_v31 = vmax.f32 %v5637_v23, 0.0 }
0x15f0   : > { %v5746_v62 = vpack.c.bf16 %v5726_v34, %v5722_v21  ;;  %v5729_v30 = vmax.f32 %v5700_v49, 0.0 }
0x15f1   : > { %v5748_v15 = vpack.c.bf16 %v5728_v17, %v5724_v43  ;;  %v5747_v37 = vpack.c.bf16 %v5727_v31, %v5723_v54  ;;  %v5640_v35 = vpop.f32.mrb[28].mxu0  ;;  %v15068_v43 = vld [vmem:[#allocation100_spill] sm:$0xff] }
0x15f2   : > { %v5749_v53 = vpack.c.bf16 %v5729_v30, %v5725_v20  ;;  %v5641_v29 = vadd.f32 %v5640_v35, %v15065_v18  ;;  %v5703_v33 = vpop.f32.mrb[28].mxu1  ;;  %v5642_v22 = vpop.f32.mrb[29].mxu0 }
0x15f3   : > { %v5704_v9 = vadd.f32 %v5703_v33, %v15065_v18  ;;  %v5643_v7 = vadd.f32 %v5642_v22, %v15065_v18  ;;  %v5705_v19 = vpop.f32.mrb[29].mxu1  ;;  %v5644_v42 = vpop.f32.mrb[30].mxu0  ;;  %5824 = vmatprep.subr.bf16.mxu0 %v5747_v37 }
0x15f4   : > { %v5706_v2 = vadd.f32 %v5705_v19, %v15065_v18  ;;  %v5645_v24 = vadd.f32 %v5644_v42, %v15066_v11  ;;  %v5707_v47 = vpop.f32.mrb[30].mxu1  ;;  %5887 = vmatprep.subr.bf16.mxu1 %v5749_v53  ;;  %v5646_v61 = vpop.f32.mrb[31].mxu0  ;;  %5825 = vmatpush1.bf16.msra.mxu0 %v5746_v62  ;;  %v5730_v50 = vmax.f32 %v5641_v29, 0.0 }
0x15f5   : > { %v5708_v26 = vadd.f32 %v5707_v47, %v15066_v11  ;;  %v5647_v57 = vadd.f32 %v5646_v61, %v15066_v11  ;;  %v5709_v46 = vpop.f32.mrb[31].mxu1  ;;  %5888 = vmatpush1.bf16.msra.mxu1 %v5748_v15  ;;  %v5732_v14 = vmax.f32 %v5704_v9, 0.0  ;;  %v5731_v27 = vmax.f32 %v5643_v7, 0.0  ;;  %v11065_v47 = vld [vmem:[%s14592_s1 + $0x58] sm:$0xff]  }
0x15f6   : > { %v5734_v12 = vmax.f32 %v5645_v24, 0.0  ;;  %v5710_v0 = vadd.f32 %v5709_v46, %v15066_v11  ;;  %v5733_v63 = vmax.f32 %v5706_v2, 0.0  ;;  %v11063_v11 = vld [vmem:[%s14592_s1 + $0x48] sm:$0xff]   ;;  %v11064_v24 = vld [vmem:[%s14592_s1 + $0x50] sm:$0xff]  }
0x15f7   : > { %v5736_v38 = vmax.f32 %v5708_v26, 0.0  ;;  %v5735_v39 = vmax.f32 %v5647_v57, 0.0  ;;  %v15069_v26 = vld [vmem:[#allocation103_spill] sm:$0xff] }
0x15f8   : > { %v5750_v56 = vpack.c.bf16 %v5734_v12, %v5730_v50  ;;  %v5737_v16 = vmax.f32 %v5710_v0, 0.0 }
0x15f9   : > { %v5752_v58 = vpack.c.bf16 %v5736_v38, %v5732_v14  ;;  %v5751_v40 = vpack.c.bf16 %v5735_v39, %v5731_v27  ;;  %v5650_v52 = vpop.f32.mrb[32].mxu0  ;;  %v15070_v39 = vld [vmem:[#allocation102_spill] sm:$0xff] }
0x15fa   : > { %v5753_v51 = vpack.c.bf16 %v5737_v16, %v5733_v63  ;;  %v5651_v36 = vadd.f32 %v5650_v52, %v15067_v1  ;;  %v5713_v28 = vpop.f32.mrb[32].mxu1  ;;  %v5652_v55 = vpop.f32.mrb[33].mxu0 }
0x15fb   : > { %v5714_v23 = vadd.f32 %v5713_v28, %v15067_v1  ;;  %v5653_v44 = vadd.f32 %v5652_v55, %v15067_v1  ;;  %v5715_v21 = vpop.f32.mrb[33].mxu1  ;;  %v5654_v34 = vpop.f32.mrb[34].mxu0  ;;  %5826 = vmatprep.subr.bf16.mxu0 %v5751_v40 }
0x15fc   : > { %v5716_v49 = vadd.f32 %v5715_v21, %v15067_v1  ;;  %v5655_v54 = vadd.f32 %v5654_v34, %v15068_v43  ;;  %v5717_v17 = vpop.f32.mrb[34].mxu1  ;;  %5889 = vmatprep.subr.bf16.mxu1 %v5753_v51  ;;  %v5656_v31 = vpop.f32.mrb[35].mxu0  ;;  %5827 = vmatpush1.bf16.msra.mxu0 %v5750_v56  ;;  %v5738_v15 = vmax.f32 %v5651_v36, 0.0 }
0x15fd   : > { %v5718_v20 = vadd.f32 %v5717_v17, %v15068_v43  ;;  %v5657_v62 = vadd.f32 %v5656_v31, %v15068_v43  ;;  %v5719_v30 = vpop.f32.mrb[35].mxu1  ;;  %5890 = vmatpush1.bf16.msra.mxu1 %v5752_v58  ;;  %v5740_v53 = vmax.f32 %v5714_v23, 0.0  ;;  %v5739_v18 = vmax.f32 %v5653_v44, 0.0 }
0x15fe   : > { %v5742_v37 = vmax.f32 %v5655_v54, 0.0  ;;  %v5720_v35 = vadd.f32 %v5719_v30, %v15068_v43  ;;  %v5741_v22 = vmax.f32 %v5716_v49, 0.0 }
0x15ff   : > { %v5744_v29 = vmax.f32 %v5718_v20, 0.0  ;;  %v5743_v33 = vmax.f32 %v5657_v62, 0.0  ;;  %v15071_v20 = vld [vmem:[#allocation105_spill] sm:$0xff] }
0x1600   : > { %v5754_v9 = vpack.c.bf16 %v5742_v37, %v5738_v15  ;;  %v5745_v7 = vmax.f32 %v5720_v35, 0.0 }
0x1601   : > { %v5756_v19 = vpack.c.bf16 %v5744_v29, %v5740_v53  ;;  %v5755_v42 = vpack.c.bf16 %v5743_v33, %v5739_v18  ;;  %v15072_v33 = vld [vmem:[#allocation104_spill] sm:$0xff] }
0x1602   : > { %v5757_v2 = vpack.c.bf16 %v5745_v7, %v5741_v22 }
0x1603   : > { %5828 = vmatprep.subr.bf16.mxu0 %v5755_v42 }
0x1604   : > { %5891 = vmatprep.subr.bf16.mxu1 %v5757_v2  ;;  %5829 = vmatpush1.bf16.msra.mxu0 %v5754_v9 }
0x1605   : > { %5892 = vmatpush1.bf16.msra.mxu1 %v5756_v19 }
0x1607   : > { %10490 = vmatmul.mubr.msk.bf16.vlgmr.msra.gmra.mrb[36].mxu0 %vm270_vm0, %v11063_v11 }
0x1608   : > { %10493 = vmatmul.mubr.msk.bf16.vlgmr.msra.gmra.mrb[36].mxu1 %vm270_vm0, %v11063_v11  ;;  %5866 = vmatprep.mubr.bf16.mxu0 %v14836_v25 }
0x1609   : > { %5929 = vmatprep.mubr.bf16.mxu1 %v14836_v25 }
0x160f   : > { %10491 = vmatmul.mubr.msk.bf16.gmra.mrb[40].mxu0 %vm270_vm0, %v11064_v24 }
0x1610   : > { %10494 = vmatmul.mubr.msk.bf16.gmra.mrb[40].mxu1 %vm270_vm0, %v11064_v24  ;;  %5876 = vmatprep.mubr.bf16.mxu0 %v14836_v25 }
0x1611   : > { %5939 = vmatprep.mubr.bf16.mxu1 %v14836_v25 }
0x1617   : > { %10492 = vmatmul.mubr.msk.bf16.gmra.mrb[44].mxu0 %vm270_vm0, %v11065_v47 }
0x1618   : > { %10495 = vmatmul.mubr.msk.bf16.gmra.mrb[44].mxu1 %vm270_vm0, %v11065_v47  ;;  %6082 = vmatprep.mubr.bf16.mxu0 %v14836_v25 }
0x1619   : > { %6141 = vmatprep.mubr.bf16.mxu1 %v14836_v25 }
0x16da   : > { %v5858_v61 = vpop.f32.mrb[36].mxu0 }
0x16db   : > { %v5859_v57 = vadd.f32 %v5858_v61, %v15069_v26  ;;  %v5921_v46 = vpop.f32.mrb[36].mxu1  ;;  %v5860_v50 = vpop.f32.mrb[37].mxu0 }
0x16dc   : > { %v5922_v12 = vadd.f32 %v5921_v46, %v15069_v26  ;;  %v5861_v0 = vadd.f32 %v5860_v50, %v15069_v26  ;;  %v5923_v14 = vpop.f32.mrb[37].mxu1  ;;  %v5862_v27 = vpop.f32.mrb[38].mxu0 }
0x16dd   : > { %v5924_v38 = vadd.f32 %v5923_v14, %v15069_v26  ;;  %v5863_v63 = vadd.f32 %v5862_v27, %v15070_v39  ;;  %v5925_v56 = vpop.f32.mrb[38].mxu1  ;;  %v5864_v16 = vpop.f32.mrb[39].mxu0  ;;  %v5950_v51 = vmax.f32 %v5859_v57, 0.0 }
0x16de   : > { %v5926_v58 = vadd.f32 %v5925_v56, %v15070_v39  ;;  %v5865_v40 = vadd.f32 %v5864_v16, %v15070_v39  ;;  %v5927_v52 = vpop.f32.mrb[39].mxu1  ;;  %v5952_v28 = vmax.f32 %v5922_v12, 0.0  ;;  %v5951_v55 = vmax.f32 %v5861_v0, 0.0 }
0x16df   : > { %v5954_v1 = vmax.f32 %v5863_v63, 0.0  ;;  %v5928_v36 = vadd.f32 %v5927_v52, %v15070_v39  ;;  %v5953_v21 = vmax.f32 %v5924_v38, 0.0 }
0x16e0   : > { %v5956_v23 = vmax.f32 %v5926_v58, 0.0  ;;  %v5955_v44 = vmax.f32 %v5865_v40, 0.0 }
0x16e1   : > { %v5974_v34 = vpack.c.bf16 %v5954_v1, %v5950_v51  ;;  %v5957_v49 = vmax.f32 %v5928_v36, 0.0 }
0x16e2   : > { %v5976_v43 = vpack.c.bf16 %v5956_v23, %v5952_v28  ;;  %v5975_v54 = vpack.c.bf16 %v5955_v44, %v5951_v55  ;;  %v5868_v17 = vpop.f32.mrb[40].mxu0 }
0x16e3   : > { %v5977_v31 = vpack.c.bf16 %v5957_v49, %v5953_v21  ;;  %v5869_v62 = vadd.f32 %v5868_v17, %v15071_v20  ;;  %v5931_v30 = vpop.f32.mrb[40].mxu1  ;;  %v5870_v15 = vpop.f32.mrb[41].mxu0 }
0x16e4   : > { %v5932_v37 = vadd.f32 %v5931_v30, %v15071_v20  ;;  %v5871_v35 = vadd.f32 %v5870_v15, %v15071_v20  ;;  %v5933_v53 = vpop.f32.mrb[41].mxu1  ;;  %v5872_v18 = vpop.f32.mrb[42].mxu0  ;;  %6050 = vmatprep.subr.bf16.mxu0 %v5975_v54 }
0x16e5   : > { %v5934_v29 = vadd.f32 %v5933_v53, %v15071_v20  ;;  %v5873_v22 = vadd.f32 %v5872_v18, %v15072_v33  ;;  %v5935_v9 = vpop.f32.mrb[42].mxu1  ;;  %6109 = vmatprep.subr.bf16.mxu1 %v5977_v31  ;;  %v5874_v7 = vpop.f32.mrb[43].mxu0  ;;  %6051 = vmatpush1.bf16.msra.mxu0 %v5974_v34  ;;  %v5958_v11 = vmax.f32 %v5869_v62, 0.0  ;;  %v11066_v53 = vld [vmem:[%s14592_s1 + $0x60] sm:$0xff]  }
0x16e6   : > { %v5936_v19 = vadd.f32 %v5935_v9, %v15072_v33  ;;  %v5875_v42 = vadd.f32 %v5874_v7, %v15072_v33  ;;  %v5937_v2 = vpop.f32.mrb[43].mxu1  ;;  %6110 = vmatpush1.bf16.msra.mxu1 %v5976_v43  ;;  %v5960_v61 = vmax.f32 %v5932_v37, 0.0  ;;  %v5959_v26 = vmax.f32 %v5871_v35, 0.0 }
0x16e7   : > { %v5962_v24 = vmax.f32 %v5873_v22, 0.0  ;;  %v5938_v47 = vadd.f32 %v5937_v2, %v15072_v33  ;;  %v5961_v50 = vmax.f32 %v5934_v29, 0.0 }
0x16e8   : > { %v5964_v57 = vmax.f32 %v5936_v19, 0.0  ;;  %v5963_v46 = vmax.f32 %v5875_v42, 0.0 }
0x16e9   : > { %v5978_v12 = vpack.c.bf16 %v5962_v24, %v5958_v11  ;;  %v5965_v0 = vmax.f32 %v5938_v47, 0.0 }
0x16ea   : > { %v5980_v14 = vpack.c.bf16 %v5964_v57, %v5960_v61  ;;  %v5979_v27 = vpack.c.bf16 %v5963_v46, %v5959_v26  ;;  %v5878_v38 = vpop.f32.mrb[44].mxu0 }
0x16eb   : > { %v5981_v39 = vpack.c.bf16 %v5965_v0, %v5961_v50  ;;  %v5879_v63 = vadd.f32 %v5878_v38, %v12793_v13  ;;  %v5941_v56 = vpop.f32.mrb[44].mxu1  ;;  %v5880_v16 = vpop.f32.mrb[45].mxu0 }
0x16ec   : > { %v5942_v58 = vadd.f32 %v5941_v56, %v12793_v13  ;;  %v5881_v40 = vadd.f32 %v5880_v16, %v12793_v13  ;;  %v5943_v52 = vpop.f32.mrb[45].mxu1  ;;  %v5882_v51 = vpop.f32.mrb[46].mxu0  ;;  %6052 = vmatprep.subr.bf16.mxu0 %v5979_v27  ;;  %v15073_v16 = vld [vmem:[#allocation18_spill] sm:$0xff] }
0x16ed   : > { %v5944_v1 = vadd.f32 %v5943_v52, %v12793_v13  ;;  %v5883_v36 = vadd.f32 %v5882_v51, %v12791_v10  ;;  %v5945_v28 = vpop.f32.mrb[46].mxu1  ;;  %6111 = vmatprep.subr.bf16.mxu1 %v5981_v39  ;;  %v5884_v55 = vpop.f32.mrb[47].mxu0  ;;  %6053 = vmatpush1.bf16.msra.mxu0 %v5978_v12  ;;  %v5966_v34 = vmax.f32 %v5879_v63, 0.0 }
0x16ee   : > { %v5946_v23 = vadd.f32 %v5945_v28, %v12791_v10  ;;  %v5885_v44 = vadd.f32 %v5884_v55, %v12791_v10  ;;  %v5947_v21 = vpop.f32.mrb[47].mxu1  ;;  %6112 = vmatpush1.bf16.msra.mxu1 %v5980_v14  ;;  %v5968_v54 = vmax.f32 %v5942_v58, 0.0  ;;  %v5967_v17 = vmax.f32 %v5881_v40, 0.0  ;;  %v15074_v55 = vld [vmem:[#allocation16_spill] sm:$0xff] }
0x16ef   : > { %v5970_v49 = vmax.f32 %v5883_v36, 0.0  ;;  %v5948_v43 = vadd.f32 %v5947_v21, %v12791_v10  ;;  %v5969_v20 = vmax.f32 %v5944_v1, 0.0  ;;  %v11067_v10 = vld [vmem:[%s14592_s1 + $0x68] sm:$0xff]  }
0x16f0   : > { %v5972_v31 = vmax.f32 %v5946_v23, 0.0  ;;  %v5971_v13 = vmax.f32 %v5885_v44, 0.0 }
0x16f1   : > { %v5982_v62 = vpack.c.bf16 %v5970_v49, %v5966_v34  ;;  %v5973_v30 = vmax.f32 %v5948_v43, 0.0 }
0x16f2   : > { %v5984_v15 = vpack.c.bf16 %v5972_v31, %v5968_v54  ;;  %v5983_v37 = vpack.c.bf16 %v5971_v13, %v5967_v17 }
0x16f3   : > { %v5985_v35 = vpack.c.bf16 %v5973_v30, %v5969_v20 }
0x16f4   : > { %6054 = vmatprep.subr.bf16.mxu0 %v5983_v37 }
0x16f5   : > { %6113 = vmatprep.subr.bf16.mxu1 %v5985_v35  ;;  %6055 = vmatpush1.bf16.msra.mxu0 %v5982_v62 }
0x16f6   : > { %6114 = vmatpush1.bf16.msra.mxu1 %v5984_v15  ;;  %6258 = vmatprep.subr.bf16.mxu0 %v13509_v5  ;;  %v11068_v5 = vld [vmem:[%s14592_s1 + $0x70] sm:$0xff]  }
0x16f7   : > { %6321 = vmatprep.subr.bf16.mxu1 %v13514_v59 }
0x16f8   : > { %10511 = vmatmul.mubr.msk.bf16.vlgmr.msra.gmra.mrb[48].mxu0 %vm270_vm0, %v11066_v53 }
0x16f9   : > { %10514 = vmatmul.mubr.msk.bf16.vlgmr.msra.gmra.mrb[48].mxu1 %vm270_vm0, %v11066_v53  ;;  %6092 = vmatprep.mubr.bf16.mxu0 %v14836_v25 }
0x16fa   : > { %6151 = vmatprep.mubr.bf16.mxu1 %v14836_v25  ;;  %6259 = vmatpush1.bf16.msra.mxu0 %v13523_v32 }
0x16fb   : > { %6322 = vmatpush1.bf16.msra.mxu1 %v13526_v60 }
0x1700   : > { %10512 = vmatmul.mubr.msk.bf16.gmra.mrb[52].mxu0 %vm270_vm0, %v11067_v10 }
0x1701   : > { %10515 = vmatmul.mubr.msk.bf16.gmra.mrb[52].mxu1 %vm270_vm0, %v11067_v10  ;;  %6102 = vmatprep.mubr.bf16.mxu0 %v14836_v25 }
0x1702   : > { %6161 = vmatprep.mubr.bf16.mxu1 %v14836_v25 }
0x1708   : > { %10513 = vmatmul.mubr.msk.bf16.gmra.mrb[56].mxu0 %vm270_vm0, %v11068_v5 }
0x1709   : > { %10516 = vmatmul.mubr.msk.bf16.gmra.mrb[56].mxu1 %vm270_vm0, %v11068_v5  ;;  %6290 = vmatprep.mubr.bf16.mxu0 %v14836_v25 }
0x170a   : > { %6353 = vmatprep.mubr.bf16.mxu1 %v14836_v25 }
0x17cb   : > { %v6084_v59 = vpop.f32.mrb[48].mxu0 }
0x17cc   : > { %v6085_v32 = vadd.f32 %v6084_v59, %v12797_v4  ;;  %v6143_v60 = vpop.f32.mrb[48].mxu1  ;;  %v6086_v18 = vpop.f32.mrb[49].mxu0  ;;  %v11069_v59 = vld [vmem:[%s14592_s1 + $0x78] sm:$0xff]  }
0x17cd   : > { %v6144_v29 = vadd.f32 %v6143_v60, %v12797_v4  ;;  %v6087_v33 = vadd.f32 %v6086_v18, %v12797_v4  ;;  %v6145_v22 = vpop.f32.mrb[49].mxu1  ;;  %v6088_v9 = vpop.f32.mrb[50].mxu0  ;;  %v11071_v60 = vld [vmem:[%s14592_s1 + $0x88] sm:$0xff]  }
0x17ce   : > { %v6146_v7 = vadd.f32 %v6145_v22, %v12797_v4  ;;  %v6089_v19 = vadd.f32 %v6088_v9, %v12795_v3  ;;  %v6147_v42 = vpop.f32.mrb[50].mxu1  ;;  %v6090_v2 = vpop.f32.mrb[51].mxu0  ;;  %v6168_v61 = vmax.f32 %v6085_v32, 0.0  ;;  %v11070_v32 = vld [vmem:[%s14592_s1 + $0x80] sm:$0xff]  }
0x17cf   : > { %v6148_v11 = vadd.f32 %v6147_v42, %v12795_v3  ;;  %v6091_v24 = vadd.f32 %v6090_v2, %v12795_v3  ;;  %v6149_v47 = vpop.f32.mrb[51].mxu1  ;;  %v6170_v46 = vmax.f32 %v6144_v29, 0.0  ;;  %v6169_v50 = vmax.f32 %v6087_v33, 0.0 }
0x17d0   : > { %v6172_v26 = vmax.f32 %v6089_v19, 0.0  ;;  %v6150_v57 = vadd.f32 %v6149_v47, %v12795_v3  ;;  %v6171_v14 = vmax.f32 %v6146_v7, 0.0 }
0x17d1   : > { %v6174_v12 = vmax.f32 %v6148_v11, 0.0  ;;  %v6173_v0 = vmax.f32 %v6091_v24, 0.0  ;;  %v15075_v11 = vld [vmem:[#allocation20_spill] sm:$0xff] }
0x17d2   : > { %v6184_v27 = vpack.c.bf16 %v6172_v26, %v6168_v61  ;;  %v6175_v4 = vmax.f32 %v6150_v57, 0.0 }
0x17d3   : > { %v6186_v38 = vpack.c.bf16 %v6174_v12, %v6170_v46  ;;  %v6185_v39 = vpack.c.bf16 %v6173_v0, %v6169_v50  ;;  %v6094_v63 = vpop.f32.mrb[52].mxu0  ;;  %v15076_v0 = vld [vmem:[#allocation17_spill] sm:$0xff] }
0x17d4   : > { %v6187_v56 = vpack.c.bf16 %v6175_v4, %v6171_v14  ;;  %v6095_v58 = vadd.f32 %v6094_v63, %v15073_v16  ;;  %v6153_v40 = vpop.f32.mrb[52].mxu1  ;;  %v6096_v52 = vpop.f32.mrb[53].mxu0 }
0x17d5   : > { %v6154_v51 = vadd.f32 %v6153_v40, %v15073_v16  ;;  %v6097_v1 = vadd.f32 %v6096_v52, %v15073_v16  ;;  %v6155_v3 = vpop.f32.mrb[53].mxu1  ;;  %v6098_v36 = vpop.f32.mrb[54].mxu0  ;;  %6260 = vmatprep.subr.bf16.mxu0 %v6185_v39 }
0x17d6   : > { %v6156_v28 = vadd.f32 %v6155_v3, %v15073_v16  ;;  %v6099_v23 = vadd.f32 %v6098_v36, %v15074_v55  ;;  %v6157_v44 = vpop.f32.mrb[54].mxu1  ;;  %6323 = vmatprep.subr.bf16.mxu1 %v6187_v56  ;;  %v6100_v21 = vpop.f32.mrb[55].mxu0  ;;  %6261 = vmatpush1.bf16.msra.mxu0 %v6184_v27  ;;  %v6176_v54 = vmax.f32 %v6095_v58, 0.0 }
0x17d7   : > { %v6158_v34 = vadd.f32 %v6157_v44, %v15074_v55  ;;  %v6101_v49 = vadd.f32 %v6100_v21, %v15074_v55  ;;  %v6159_v43 = vpop.f32.mrb[55].mxu1  ;;  %6324 = vmatpush1.bf16.msra.mxu1 %v6186_v38  ;;  %v6178_v13 = vmax.f32 %v6154_v51, 0.0  ;;  %v6177_v20 = vmax.f32 %v6097_v1, 0.0 }
0x17d8   : > { %v6180_v17 = vmax.f32 %v6099_v23, 0.0  ;;  %v6160_v31 = vadd.f32 %v6159_v43, %v15074_v55  ;;  %v6179_v15 = vmax.f32 %v6156_v28, 0.0 }
0x17d9   : > { %v6182_v62 = vmax.f32 %v6158_v34, 0.0  ;;  %v6181_v30 = vmax.f32 %v6101_v49, 0.0  ;;  %v15077_v34 = vld [vmem:[#allocation22_spill] sm:$0xff] }
0x17da   : > { %v6188_v37 = vpack.c.bf16 %v6180_v17, %v6176_v54  ;;  %v6183_v35 = vmax.f32 %v6160_v31, 0.0 }
0x17db   : > { %v6190_v53 = vpack.c.bf16 %v6182_v62, %v6178_v13  ;;  %v6189_v10 = vpack.c.bf16 %v6181_v30, %v6177_v20  ;;  %v6104_v18 = vpop.f32.mrb[56].mxu0  ;;  %v15078_v30 = vld [vmem:[#allocation19_spill] sm:$0xff] }
0x17dc   : > { %v6191_v5 = vpack.c.bf16 %v6183_v35, %v6179_v15  ;;  %v6163_v29 = vpop.f32.mrb[56].mxu1  ;;  %v6105_v33 = vpop.f32.mrb[57].mxu0 }
0x17dd   : > { %6262 = vmatprep.subr.bf16.mxu0 %v6189_v10  ;;  %v6164_v22 = vpop.f32.mrb[57].mxu1  ;;  %v6106_v9 = vpop.f32.mrb[58].mxu0 }
0x17de   : > { %6325 = vmatprep.subr.bf16.mxu1 %v6191_v5  ;;  %6263 = vmatpush1.bf16.msra.mxu0 %v6188_v37  ;;  %v6165_v7 = vpop.f32.mrb[58].mxu1  ;;  %v6107_v19 = vpop.f32.mrb[59].mxu0 }
0x17df   : > { %6326 = vmatpush1.bf16.msra.mxu1 %v6190_v53  ;;  %v6166_v42 = vpop.f32.mrb[59].mxu1 }
0x17e1   : > { %10532 = vmatmul.mubr.msk.bf16.vlgmr.msra.gmra.mrb[60].mxu0 %vm270_vm0, %v11069_v59 }
0x17e2   : > { %10535 = vmatmul.mubr.msk.bf16.vlgmr.msra.gmra.mrb[60].mxu1 %vm270_vm0, %v11069_v59  ;;  %6300 = vmatprep.mubr.bf16.mxu0 %v14836_v25 }
0x17e3   : > { %6363 = vmatprep.mubr.bf16.mxu1 %v14836_v25 }
0x17e9   : > { %10533 = vmatmul.mubr.msk.bf16.gmra.mrb[64].mxu0 %vm270_vm0, %v11070_v32 }
0x17ea   : > { %10536 = vmatmul.mubr.msk.bf16.gmra.mrb[64].mxu1 %vm270_vm0, %v11070_v32  ;;  %6310 = vmatprep.mubr.bf16.mxu0 %v14836_v25 }
0x17eb   : > { %6373 = vmatprep.mubr.bf16.mxu1 %v14836_v25 }
0x17f1   : > { %10534 = vmatmul.mubr.msk.bf16.gmra.mrb[68].mxu0 %vm270_vm0, %v11071_v60 }
0x17f2   : > { %10537 = vmatmul.mubr.msk.bf16.gmra.mrb[68].mxu1 %vm270_vm0, %v11071_v60  ;;  %6518 = vmatprep.mubr.bf16.mxu0 %v14836_v25 }
0x17f3   : > { %6581 = vmatprep.mubr.bf16.mxu1 %v14836_v25 }
0x18b4   : > { %v6292_v2 = vpop.f32.mrb[60].mxu0 }
0x18b5   : > { %v6293_v24 = vadd.f32 %v6292_v2, %v15075_v11  ;;  %v6355_v47 = vpop.f32.mrb[60].mxu1  ;;  %v6294_v61 = vpop.f32.mrb[61].mxu0 }
0x18b6   : > { %v6356_v26 = vadd.f32 %v6355_v47, %v15075_v11  ;;  %v6295_v57 = vadd.f32 %v6294_v61, %v15075_v11  ;;  %v6357_v46 = vpop.f32.mrb[61].mxu1  ;;  %v6296_v50 = vpop.f32.mrb[62].mxu0  ;;  %v15079_v47 = vld [vmem:[#allocation24_spill] sm:$0xff] }
0x18b7   : > { %v6358_v12 = vadd.f32 %v6357_v46, %v15075_v11  ;;  %v6297_v14 = vadd.f32 %v6296_v50, %v15076_v0  ;;  %v6359_v27 = vpop.f32.mrb[62].mxu1  ;;  %v6298_v4 = vpop.f32.mrb[63].mxu0  ;;  %v6384_v56 = vmax.f32 %v6293_v24, 0.0 }
0x18b8   : > { %v6360_v38 = vadd.f32 %v6359_v27, %v15076_v0  ;;  %v6299_v39 = vadd.f32 %v6298_v4, %v15076_v0  ;;  %v6361_v63 = vpop.f32.mrb[63].mxu1  ;;  %v6386_v40 = vmax.f32 %v6356_v26, 0.0  ;;  %v6385_v52 = vmax.f32 %v6295_v57, 0.0  ;;  %v15080_v27 = vld [vmem:[#allocation21_spill] sm:$0xff] }
0x18b9   : > { %v6388_v16 = vmax.f32 %v6297_v14, 0.0  ;;  %v6362_v58 = vadd.f32 %v6361_v63, %v15076_v0  ;;  %v6387_v3 = vmax.f32 %v6358_v12, 0.0 }
0x18ba   : > { %v6390_v51 = vmax.f32 %v6360_v38, 0.0  ;;  %v6389_v1 = vmax.f32 %v6299_v39, 0.0 }
0x18bb   : > { %v6408_v36 = vpack.c.bf16 %v6388_v16, %v6384_v56  ;;  %v6391_v28 = vmax.f32 %v6362_v58, 0.0 }
0x18bc   : > { %v6410_v55 = vpack.c.bf16 %v6390_v51, %v6386_v40  ;;  %v6409_v23 = vpack.c.bf16 %v6389_v1, %v6385_v52  ;;  %v6302_v44 = vpop.f32.mrb[64].mxu0 }
0x18bd   : > { %v6411_v21 = vpack.c.bf16 %v6391_v28, %v6387_v3  ;;  %v6303_v49 = vadd.f32 %v6302_v44, %v15077_v34  ;;  %v6365_v43 = vpop.f32.mrb[64].mxu1  ;;  %v6304_v54 = vpop.f32.mrb[65].mxu0 }
0x18be   : > { %v6366_v17 = vadd.f32 %v6365_v43, %v15077_v34  ;;  %v6305_v31 = vadd.f32 %v6304_v54, %v15077_v34  ;;  %v6367_v13 = vpop.f32.mrb[65].mxu1  ;;  %v6306_v20 = vpop.f32.mrb[66].mxu0  ;;  %6486 = vmatprep.subr.bf16.mxu0 %v6409_v23  ;;  %v11073_v43 = vld [vmem:[%s14592_s1 + $0x98] sm:$0xff]   ;;  %v11074_v54 = vld [vmem:[%s14592_s1 + $0xa0] sm:$0xff]  }
0x18bf   : > { %v6368_v62 = vadd.f32 %v6367_v13, %v15077_v34  ;;  %v6307_v15 = vadd.f32 %v6306_v20, %v15078_v30  ;;  %v6369_v37 = vpop.f32.mrb[66].mxu1  ;;  %6549 = vmatprep.subr.bf16.mxu1 %v6411_v21  ;;  %v6308_v35 = vpop.f32.mrb[67].mxu0  ;;  %6487 = vmatpush1.bf16.msra.mxu0 %v6408_v36  ;;  %v6392_v59 = vmax.f32 %v6303_v49, 0.0  ;;  %v11072_v49 = vld [vmem:[%s14592_s1 + $0x90] sm:$0xff]  }
0x18c0   : > { %v6370_v53 = vadd.f32 %v6369_v37, %v15078_v30  ;;  %v6309_v10 = vadd.f32 %v6308_v35, %v15078_v30  ;;  %v6371_v5 = vpop.f32.mrb[67].mxu1  ;;  %6550 = vmatpush1.bf16.msra.mxu1 %v6410_v55  ;;  %v6394_v18 = vmax.f32 %v6366_v17, 0.0  ;;  %v6393_v29 = vmax.f32 %v6305_v31, 0.0  ;;  %v15081_v31 = vld [vmem:[#allocation8_spill] sm:$0xff] }
0x18c1   : > { %v6396_v32 = vmax.f32 %v6307_v15, 0.0  ;;  %v6372_v60 = vadd.f32 %v6371_v5, %v15078_v30  ;;  %v6395_v9 = vmax.f32 %v6368_v62, 0.0 }
0x18c2   : > { %v6398_v33 = vmax.f32 %v6370_v53, 0.0  ;;  %v6397_v22 = vmax.f32 %v6309_v10, 0.0  ;;  %v15082_v10 = vld [vmem:[#allocation23_spill] sm:$0xff] }
0x18c3   : > { %v6412_v7 = vpack.c.bf16 %v6396_v32, %v6392_v59  ;;  %v6399_v19 = vmax.f32 %v6372_v60, 0.0 }
0x18c4   : > { %v6414_v42 = vpack.c.bf16 %v6398_v33, %v6394_v18  ;;  %v6413_v2 = vpack.c.bf16 %v6397_v22, %v6393_v29  ;;  %v6312_v11 = vpop.f32.mrb[68].mxu0 }
0x18c5   : > { %v6415_v24 = vpack.c.bf16 %v6399_v19, %v6395_v9  ;;  %v6313_v61 = vadd.f32 %v6312_v11, %v15079_v47  ;;  %v6375_v26 = vpop.f32.mrb[68].mxu1  ;;  %v6314_v57 = vpop.f32.mrb[69].mxu0 }
0x18c6   : > { %v6376_v46 = vadd.f32 %v6375_v26, %v15079_v47  ;;  %v6315_v50 = vadd.f32 %v6314_v57, %v15079_v47  ;;  %v6377_v12 = vpop.f32.mrb[69].mxu1  ;;  %v6316_v0 = vpop.f32.mrb[70].mxu0  ;;  %6488 = vmatprep.subr.bf16.mxu0 %v6413_v2 }
0x18c7   : > { %v6378_v14 = vadd.f32 %v6377_v12, %v15079_v47  ;;  %v6317_v4 = vadd.f32 %v6316_v0, %v15080_v27  ;;  %v6379_v38 = vpop.f32.mrb[70].mxu1  ;;  %6551 = vmatprep.subr.bf16.mxu1 %v6415_v24  ;;  %v6318_v39 = vpop.f32.mrb[71].mxu0  ;;  %6489 = vmatpush1.bf16.msra.mxu0 %v6412_v7  ;;  %v6400_v58 = vmax.f32 %v6313_v61, 0.0 }
0x18c8   : > { %v6380_v63 = vadd.f32 %v6379_v38, %v15080_v27  ;;  %v6319_v56 = vadd.f32 %v6318_v39, %v15080_v27  ;;  %v6381_v16 = vpop.f32.mrb[71].mxu1  ;;  %6552 = vmatpush1.bf16.msra.mxu1 %v6414_v42  ;;  %v6402_v51 = vmax.f32 %v6376_v46, 0.0  ;;  %v6401_v1 = vmax.f32 %v6315_v50, 0.0  ;;  %v15083_v50 = vld [vmem:[#allocation10_spill] sm:$0xff] }
0x18c9   : > { %v6404_v40 = vmax.f32 %v6317_v4, 0.0  ;;  %v6382_v52 = vadd.f32 %v6381_v16, %v15080_v27  ;;  %v6403_v28 = vmax.f32 %v6378_v14, 0.0 }
0x18ca   : > { %v6406_v3 = vmax.f32 %v6380_v63, 0.0  ;;  %v6405_v36 = vmax.f32 %v6319_v56, 0.0  ;;  %v15084_v56 = vld [vmem:[#allocation9_spill] sm:$0xff] }
0x18cb   : > { %v6416_v55 = vpack.c.bf16 %v6404_v40, %v6400_v58  ;;  %v6407_v23 = vmax.f32 %v6382_v52, 0.0 }
0x18cc   : > { %v6418_v44 = vpack.c.bf16 %v6406_v3, %v6402_v51  ;;  %v6417_v21 = vpack.c.bf16 %v6405_v36, %v6401_v1 }
0x18cd   : > { %v6419_v34 = vpack.c.bf16 %v6407_v23, %v6403_v28 }
0x18ce   : > { %6490 = vmatprep.subr.bf16.mxu0 %v6417_v21 }
0x18cf   : > { %6553 = vmatprep.subr.bf16.mxu1 %v6419_v34  ;;  %6491 = vmatpush1.bf16.msra.mxu0 %v6416_v55 }
0x18d0   : > { %6554 = vmatpush1.bf16.msra.mxu1 %v6418_v44 }
0x18d2   : > { %10553 = vmatmul.mubr.msk.bf16.vlgmr.msra.gmra.mrb[72].mxu0 %vm270_vm0, %v11072_v49 }
0x18d3   : > { %10556 = vmatmul.mubr.msk.bf16.vlgmr.msra.gmra.mrb[72].mxu1 %vm270_vm0, %v11072_v49  ;;  %6528 = vmatprep.mubr.bf16.mxu0 %v14836_v25 }
0x18d4   : > { %6591 = vmatprep.mubr.bf16.mxu1 %v14836_v25 }
0x18da   : > { %10554 = vmatmul.mubr.msk.bf16.gmra.mrb[76].mxu0 %vm270_vm0, %v11073_v43 }
0x18db   : > { %10557 = vmatmul.mubr.msk.bf16.gmra.mrb[76].mxu1 %vm270_vm0, %v11073_v43  ;;  %6538 = vmatprep.mubr.bf16.mxu0 %v14836_v25 }
0x18dc   : > { %6601 = vmatprep.mubr.bf16.mxu1 %v14836_v25 }
0x18e2   : > { %10555 = vmatmul.mubr.msk.bf16.gmra.mrb[80].mxu0 %vm270_vm0, %v11074_v54 }
0x18e3   : > { %10558 = vmatmul.mubr.msk.bf16.gmra.mrb[80].mxu1 %vm270_vm0, %v11074_v54  ;;  %6746 = vmatprep.mubr.bf16.mxu0 %v14836_v25 }
0x18e4   : > { %6809 = vmatprep.mubr.bf16.mxu1 %v14836_v25 }
0x19a5   : > { %v6520_v17 = vpop.f32.mrb[72].mxu0 }
0x19a6   : > { %v6521_v13 = vadd.f32 %v6520_v17, %v15081_v31  ;;  %v6583_v20 = vpop.f32.mrb[72].mxu1  ;;  %v6522_v62 = vpop.f32.mrb[73].mxu0 }
0x19a7   : > { %v6584_v30 = vadd.f32 %v6583_v20, %v15081_v31  ;;  %v6523_v15 = vadd.f32 %v6522_v62, %v15081_v31  ;;  %v6585_v37 = vpop.f32.mrb[73].mxu1  ;;  %v6524_v35 = vpop.f32.mrb[74].mxu0  ;;  %v15085_v20 = vld [vmem:[#allocation26_spill] sm:$0xff] }
0x19a8   : > { %v6586_v53 = vadd.f32 %v6585_v37, %v15081_v31  ;;  %v6525_v5 = vadd.f32 %v6524_v35, %v15082_v10  ;;  %v6587_v59 = vpop.f32.mrb[74].mxu1  ;;  %v6526_v32 = vpop.f32.mrb[75].mxu0  ;;  %v6612_v33 = vmax.f32 %v6521_v13, 0.0 }
0x19a9   : > { %v6588_v60 = vadd.f32 %v6587_v59, %v15082_v10  ;;  %v6527_v18 = vadd.f32 %v6526_v32, %v15082_v10  ;;  %v6589_v29 = vpop.f32.mrb[75].mxu1  ;;  %v6614_v7 = vmax.f32 %v6584_v30, 0.0  ;;  %v6613_v19 = vmax.f32 %v6523_v15, 0.0  ;;  %v15086_v59 = vld [vmem:[#allocation11_spill] sm:$0xff] }
0x19aa   : > { %v6616_v22 = vmax.f32 %v6525_v5, 0.0  ;;  %v6590_v9 = vadd.f32 %v6589_v29, %v15082_v10  ;;  %v6615_v11 = vmax.f32 %v6586_v53, 0.0 }
0x19ab   : > { %v6618_v42 = vmax.f32 %v6588_v60, 0.0  ;;  %v6617_v2 = vmax.f32 %v6527_v18, 0.0 }
0x19ac   : > { %v6636_v24 = vpack.c.bf16 %v6616_v22, %v6612_v33  ;;  %v6619_v47 = vmax.f32 %v6590_v9, 0.0 }
0x19ad   : > { %v6638_v61 = vpack.c.bf16 %v6618_v42, %v6614_v7  ;;  %v6637_v26 = vpack.c.bf16 %v6617_v2, %v6613_v19  ;;  %v6530_v57 = vpop.f32.mrb[76].mxu0 }
0x19ae   : > { %v6639_v46 = vpack.c.bf16 %v6619_v47, %v6615_v11  ;;  %v6531_v12 = vadd.f32 %v6530_v57, %v15083_v50  ;;  %v6593_v0 = vpop.f32.mrb[76].mxu1  ;;  %v6532_v14 = vpop.f32.mrb[77].mxu0 }
0x19af   : > { %v6594_v27 = vadd.f32 %v6593_v0, %v15083_v50  ;;  %v6533_v4 = vadd.f32 %v6532_v14, %v15083_v50  ;;  %v6595_v38 = vpop.f32.mrb[77].mxu1  ;;  %v6534_v39 = vpop.f32.mrb[78].mxu0  ;;  %6714 = vmatprep.subr.bf16.mxu0 %v6637_v26  ;;  %v11076_v0 = vld [vmem:[%s14592_s1 + $0xb0] sm:$0xff]   ;;  %v11077_v14 = vld [vmem:[%s14592_s1 + $0xb8] sm:$0xff]  }
0x19b0   : > { %v6596_v63 = vadd.f32 %v6595_v38, %v15083_v50  ;;  %v6535_v16 = vadd.f32 %v6534_v39, %v15084_v56  ;;  %v6597_v58 = vpop.f32.mrb[78].mxu1  ;;  %6777 = vmatprep.subr.bf16.mxu1 %v6639_v46  ;;  %v6536_v40 = vpop.f32.mrb[79].mxu0  ;;  %6715 = vmatpush1.bf16.msra.mxu0 %v6636_v24  ;;  %v6620_v3 = vmax.f32 %v6531_v12, 0.0  ;;  %v11075_v12 = vld [vmem:[%s14592_s1 + $0xa8] sm:$0xff]  }
0x19b1   : > { %v6598_v52 = vadd.f32 %v6597_v58, %v15084_v56  ;;  %v6537_v51 = vadd.f32 %v6536_v40, %v15084_v56  ;;  %v6599_v1 = vpop.f32.mrb[79].mxu1  ;;  %6778 = vmatpush1.bf16.msra.mxu1 %v6638_v61  ;;  %v6622_v55 = vmax.f32 %v6594_v27, 0.0  ;;  %v6621_v23 = vmax.f32 %v6533_v4, 0.0  ;;  %v15087_v4 = vld [vmem:[#allocation28_spill] sm:$0xff] }
0x19b2   : > { %v6624_v36 = vmax.f32 %v6535_v16, 0.0  ;;  %v6600_v28 = vadd.f32 %v6599_v1, %v15084_v56  ;;  %v6623_v34 = vmax.f32 %v6596_v63, 0.0 }
0x19b3   : > { %v6626_v44 = vmax.f32 %v6598_v52, 0.0  ;;  %v6625_v21 = vmax.f32 %v6537_v51, 0.0  ;;  %v15088_v51 = vld [vmem:[#allocation25_spill] sm:$0xff] }
0x19b4   : > { %v6640_v49 = vpack.c.bf16 %v6624_v36, %v6620_v3  ;;  %v6627_v43 = vmax.f32 %v6600_v28, 0.0 }
0x19b5   : > { %v6642_v54 = vpack.c.bf16 %v6626_v44, %v6622_v55  ;;  %v6641_v17 = vpack.c.bf16 %v6625_v21, %v6621_v23  ;;  %v6540_v31 = vpop.f32.mrb[80].mxu0 }
0x19b6   : > { %v6643_v13 = vpack.c.bf16 %v6627_v43, %v6623_v34  ;;  %v6541_v62 = vadd.f32 %v6540_v31, %v15085_v20  ;;  %v6603_v30 = vpop.f32.mrb[80].mxu1  ;;  %v6542_v15 = vpop.f32.mrb[81].mxu0 }
0x19b7   : > { %v6604_v37 = vadd.f32 %v6603_v30, %v15085_v20  ;;  %v6543_v35 = vadd.f32 %v6542_v15, %v15085_v20  ;;  %v6605_v53 = vpop.f32.mrb[81].mxu1  ;;  %v6544_v10 = vpop.f32.mrb[82].mxu0  ;;  %6716 = vmatprep.subr.bf16.mxu0 %v6641_v17 }
0x19b8   : > { %v6606_v5 = vadd.f32 %v6605_v53, %v15085_v20  ;;  %v6545_v32 = vadd.f32 %v6544_v10, %v15086_v59  ;;  %v6607_v60 = vpop.f32.mrb[82].mxu1  ;;  %6779 = vmatprep.subr.bf16.mxu1 %v6643_v13  ;;  %v6546_v18 = vpop.f32.mrb[83].mxu0  ;;  %6717 = vmatpush1.bf16.msra.mxu0 %v6640_v49  ;;  %v6628_v9 = vmax.f32 %v6541_v62, 0.0 }
0x19b9   : > { %v6608_v29 = vadd.f32 %v6607_v60, %v15086_v59  ;;  %v6547_v33 = vadd.f32 %v6546_v18, %v15086_v59  ;;  %v6609_v22 = vpop.f32.mrb[83].mxu1  ;;  %6780 = vmatpush1.bf16.msra.mxu1 %v6642_v54  ;;  %v6630_v42 = vmax.f32 %v6604_v37, 0.0  ;;  %v6629_v2 = vmax.f32 %v6543_v35, 0.0  ;;  %v15089_v35 = vld [vmem:[#allocation30_spill] sm:$0xff] }
0x19ba   : > { %v6632_v7 = vmax.f32 %v6545_v32, 0.0  ;;  %v6610_v19 = vadd.f32 %v6609_v22, %v15086_v59  ;;  %v6631_v47 = vmax.f32 %v6606_v5, 0.0 }
0x19bb   : > { %v6634_v11 = vmax.f32 %v6608_v29, 0.0  ;;  %v6633_v24 = vmax.f32 %v6547_v33, 0.0  ;;  %v15090_v33 = vld [vmem:[#allocation27_spill] sm:$0xff] }
0x19bc   : > { %v6644_v61 = vpack.c.bf16 %v6632_v7, %v6628_v9  ;;  %v6635_v26 = vmax.f32 %v6610_v19, 0.0 }
0x19bd   : > { %v6646_v57 = vpack.c.bf16 %v6634_v11, %v6630_v42  ;;  %v6645_v46 = vpack.c.bf16 %v6633_v24, %v6629_v2 }
0x19be   : > { %v6647_v50 = vpack.c.bf16 %v6635_v26, %v6631_v47 }
0x19bf   : > { %6718 = vmatprep.subr.bf16.mxu0 %v6645_v46 }
0x19c0   : > { %6781 = vmatprep.subr.bf16.mxu1 %v6647_v50  ;;  %6719 = vmatpush1.bf16.msra.mxu0 %v6644_v61 }
0x19c1   : > { %6782 = vmatpush1.bf16.msra.mxu1 %v6646_v57 }
0x19c3   : > { %10574 = vmatmul.mubr.msk.bf16.vlgmr.msra.gmra.mrb[84].mxu0 %vm270_vm0, %v11075_v12 }
0x19c4   : > { %10577 = vmatmul.mubr.msk.bf16.vlgmr.msra.gmra.mrb[84].mxu1 %vm270_vm0, %v11075_v12  ;;  %6756 = vmatprep.mubr.bf16.mxu0 %v14836_v25 }
0x19c5   : > { %6819 = vmatprep.mubr.bf16.mxu1 %v14836_v25 }
0x19cb   : > { %10575 = vmatmul.mubr.msk.bf16.gmra.mrb[88].mxu0 %vm270_vm0, %v11076_v0 }
0x19cc   : > { %10578 = vmatmul.mubr.msk.bf16.gmra.mrb[88].mxu1 %vm270_vm0, %v11076_v0  ;;  %6766 = vmatprep.mubr.bf16.mxu0 %v14836_v25 }
0x19cd   : > { %6829 = vmatprep.mubr.bf16.mxu1 %v14836_v25 }
0x19d3   : > { %10576 = vmatmul.mubr.msk.bf16.gmra.mrb[92].mxu0 %vm270_vm0, %v11077_v14 }
0x19d4   : > { %10579 = vmatmul.mubr.msk.bf16.gmra.mrb[92].mxu1 %vm270_vm0, %v11077_v14  ;;  %6973 = vmatprep.mubr.bf16.mxu0 %v14836_v25 }
0x19d5   : > { %7034 = vmatprep.mubr.bf16.mxu1 %v14836_v25 }
0x1a96   : > { %v6748_v27 = vpop.f32.mrb[84].mxu0 }
0x1a97   : > { %v6749_v38 = vadd.f32 %v6748_v27, %v15087_v4  ;;  %v6811_v39 = vpop.f32.mrb[84].mxu1  ;;  %v6750_v63 = vpop.f32.mrb[85].mxu0 }
0x1a98   : > { %v6812_v56 = vadd.f32 %v6811_v39, %v15087_v4  ;;  %v6751_v16 = vadd.f32 %v6750_v63, %v15087_v4  ;;  %v6813_v58 = vpop.f32.mrb[85].mxu1  ;;  %v6752_v40 = vpop.f32.mrb[86].mxu0  ;;  %v15091_v39 = vld [vmem:[#allocation32_spill] sm:$0xff] }
0x1a99   : > { %v6814_v52 = vadd.f32 %v6813_v58, %v15087_v4  ;;  %v6753_v1 = vadd.f32 %v6752_v40, %v15088_v51  ;;  %v6815_v3 = vpop.f32.mrb[86].mxu1  ;;  %v6754_v36 = vpop.f32.mrb[87].mxu0  ;;  %v6840_v44 = vmax.f32 %v6749_v38, 0.0 }
0x1a9a   : > { %v6816_v28 = vadd.f32 %v6815_v3, %v15088_v51  ;;  %v6755_v55 = vadd.f32 %v6754_v36, %v15088_v51  ;;  %v6817_v23 = vpop.f32.mrb[87].mxu1  ;;  %v6842_v49 = vmax.f32 %v6812_v56, 0.0  ;;  %v6841_v43 = vmax.f32 %v6751_v16, 0.0  ;;  %v15092_v3 = vld [vmem:[#allocation29_spill] sm:$0xff] }
0x1a9b   : > { %v6844_v21 = vmax.f32 %v6753_v1, 0.0  ;;  %v6818_v34 = vadd.f32 %v6817_v23, %v15088_v51  ;;  %v6843_v31 = vmax.f32 %v6814_v52, 0.0 }
0x1a9c   : > { %v6846_v54 = vmax.f32 %v6816_v28, 0.0  ;;  %v6845_v17 = vmax.f32 %v6755_v55, 0.0 }
0x1a9d   : > { %v6864_v13 = vpack.c.bf16 %v6844_v21, %v6840_v44  ;;  %v6847_v20 = vmax.f32 %v6818_v34, 0.0 }
0x1a9e   : > { %v6866_v62 = vpack.c.bf16 %v6846_v54, %v6842_v49  ;;  %v6865_v30 = vpack.c.bf16 %v6845_v17, %v6841_v43  ;;  %v6758_v15 = vpop.f32.mrb[88].mxu0 }
0x1a9f   : > { %v6867_v37 = vpack.c.bf16 %v6847_v20, %v6843_v31  ;;  %v6759_v53 = vadd.f32 %v6758_v15, %v15089_v35  ;;  %v6821_v10 = vpop.f32.mrb[88].mxu1  ;;  %v6760_v5 = vpop.f32.mrb[89].mxu0 }
0x1aa0   : > { %v6822_v59 = vadd.f32 %v6821_v10, %v15089_v35  ;;  %v6761_v32 = vadd.f32 %v6760_v5, %v15089_v35  ;;  %v6823_v60 = vpop.f32.mrb[89].mxu1  ;;  %v6762_v18 = vpop.f32.mrb[90].mxu0  ;;  %6941 = vmatprep.subr.bf16.mxu0 %v6865_v30  ;;  %v11079_v10 = vld [vmem:[%s14592_s1 + $0xc8] sm:$0xff]   ;;  %v11080_v5 = vld [vmem:[%s14592_s1 + $0xd0] sm:$0xff]  }
0x1aa1   : > { %v6824_v29 = vadd.f32 %v6823_v60, %v15089_v35  ;;  %v6763_v22 = vadd.f32 %v6762_v18, %v15090_v33  ;;  %v6825_v9 = vpop.f32.mrb[90].mxu1  ;;  %7002 = vmatprep.subr.bf16.mxu1 %v6867_v37  ;;  %v6764_v7 = vpop.f32.mrb[91].mxu0  ;;  %6942 = vmatpush1.bf16.msra.mxu0 %v6864_v13  ;;  %v6848_v11 = vmax.f32 %v6759_v53, 0.0  ;;  %v11078_v53 = vld [vmem:[%s14592_s1 + $0xc0] sm:$0xff]  }
0x1aa2   : > { %v6826_v19 = vadd.f32 %v6825_v9, %v15090_v33  ;;  %v6765_v42 = vadd.f32 %v6764_v7, %v15090_v33  ;;  %v6827_v2 = vpop.f32.mrb[91].mxu1  ;;  %7003 = vmatpush1.bf16.msra.mxu1 %v6866_v62  ;;  %v6850_v61 = vmax.f32 %v6822_v59, 0.0  ;;  %v6849_v26 = vmax.f32 %v6761_v32, 0.0  ;;  %v15094_v9 = vld [vmem:[#allocation31_spill] sm:$0xff] }
0x1aa3   : > { %v6852_v24 = vmax.f32 %v6763_v22, 0.0  ;;  %v6828_v47 = vadd.f32 %v6827_v2, %v15090_v33  ;;  %v6851_v50 = vmax.f32 %v6824_v29, 0.0  ;;  %v15093_v33 = vld [vmem:[#allocation34_spill] sm:$0xff] }
0x1aa4   : > { %v6854_v57 = vmax.f32 %v6826_v19, 0.0  ;;  %v6853_v46 = vmax.f32 %v6765_v42, 0.0 }
0x1aa5   : > { %v6868_v12 = vpack.c.bf16 %v6852_v24, %v6848_v11  ;;  %v6855_v0 = vmax.f32 %v6828_v47, 0.0 }
0x1aa6   : > { %v6870_v14 = vpack.c.bf16 %v6854_v57, %v6850_v61  ;;  %v6869_v27 = vpack.c.bf16 %v6853_v46, %v6849_v26  ;;  %v6768_v4 = vpop.f32.mrb[92].mxu0 }
0x1aa7   : > { %v6871_v38 = vpack.c.bf16 %v6855_v0, %v6851_v50  ;;  %v6769_v63 = vadd.f32 %v6768_v4, %v15091_v39  ;;  %v6831_v56 = vpop.f32.mrb[92].mxu1  ;;  %v6770_v16 = vpop.f32.mrb[93].mxu0 }
0x1aa8   : > { %v6832_v58 = vadd.f32 %v6831_v56, %v15091_v39  ;;  %v6771_v40 = vadd.f32 %v6770_v16, %v15091_v39  ;;  %v6833_v52 = vpop.f32.mrb[93].mxu1  ;;  %v6772_v51 = vpop.f32.mrb[94].mxu0  ;;  %6943 = vmatprep.subr.bf16.mxu0 %v6869_v27  ;;  %v15096_v16 = vld [vmem:[#allocation33_spill] sm:$0xff] }
0x1aa9   : > { %v6834_v1 = vadd.f32 %v6833_v52, %v15091_v39  ;;  %v6773_v36 = vadd.f32 %v6772_v51, %v15092_v3  ;;  %v6835_v28 = vpop.f32.mrb[94].mxu1  ;;  %7004 = vmatprep.subr.bf16.mxu1 %v6871_v38  ;;  %v6774_v55 = vpop.f32.mrb[95].mxu0  ;;  %6944 = vmatpush1.bf16.msra.mxu0 %v6868_v12  ;;  %v6856_v34 = vmax.f32 %v6769_v63, 0.0  ;;  %v15095_v63 = vld [vmem:[#allocation36_spill] sm:$0xff] }
0x1aaa   : > { %v6836_v23 = vadd.f32 %v6835_v28, %v15092_v3  ;;  %v6775_v44 = vadd.f32 %v6774_v55, %v15092_v3  ;;  %v6837_v21 = vpop.f32.mrb[95].mxu1  ;;  %7005 = vmatpush1.bf16.msra.mxu1 %v6870_v14  ;;  %v6858_v54 = vmax.f32 %v6832_v58, 0.0  ;;  %v6857_v17 = vmax.f32 %v6771_v40, 0.0 }
0x1aab   : > { %v6860_v49 = vmax.f32 %v6773_v36, 0.0  ;;  %v6838_v43 = vadd.f32 %v6837_v21, %v15092_v3  ;;  %v6859_v20 = vmax.f32 %v6834_v1, 0.0 }
0x1aac   : > { %v6862_v31 = vmax.f32 %v6836_v23, 0.0  ;;  %v6861_v13 = vmax.f32 %v6775_v44, 0.0 }
0x1aad   : > { %v6872_v62 = vpack.c.bf16 %v6860_v49, %v6856_v34  ;;  %v6863_v30 = vmax.f32 %v6838_v43, 0.0  ;;  %v11081_v43 = vld [vmem:[%s14592_s1 + $0xd8] sm:$0xff]  }
0x1aae   : > { %v6874_v15 = vpack.c.bf16 %v6862_v31, %v6858_v54  ;;  %v6873_v37 = vpack.c.bf16 %v6861_v13, %v6857_v17 }
0x1aaf   : > { %v6875_v35 = vpack.c.bf16 %v6863_v30, %v6859_v20 }
0x1ab0   : > { %6945 = vmatprep.subr.bf16.mxu0 %v6873_v37  ;;  %v15098_v37 = vld [vmem:[#allocation35_spill] sm:$0xff] }
0x1ab1   : > { %7006 = vmatprep.subr.bf16.mxu1 %v6875_v35  ;;  %6946 = vmatpush1.bf16.msra.mxu0 %v6872_v62 }
0x1ab2   : > { %7007 = vmatpush1.bf16.msra.mxu1 %v6874_v15 }
0x1ab4   : > { %10595 = vmatmul.mubr.msk.bf16.vlgmr.msra.gmra.mrb[96].mxu0 %vm270_vm0, %v11078_v53 }
0x1ab5   : > { %10598 = vmatmul.mubr.msk.bf16.vlgmr.msra.gmra.mrb[96].mxu1 %vm270_vm0, %v11078_v53  ;;  %6983 = vmatprep.mubr.bf16.mxu0 %v14836_v25 }
0x1ab6   : > { %7044 = vmatprep.mubr.bf16.mxu1 %v14836_v25 }
0x1abc   : > { %10596 = vmatmul.mubr.msk.bf16.gmra.mrb[100].mxu0 %vm270_vm0, %v11079_v10 }
0x1abd   : > { %10599 = vmatmul.mubr.msk.bf16.gmra.mrb[100].mxu1 %vm270_vm0, %v11079_v10  ;;  %6993 = vmatprep.mubr.bf16.mxu0 %v14836_v25 }
0x1abe   : > { %7054 = vmatprep.mubr.bf16.mxu1 %v14836_v25 }
0x1ac4   : > { %10597 = vmatmul.mubr.msk.bf16.gmra.mrb[108].mxu0 %vm270_vm0, %v11080_v5 }
0x1ac5   : > { %10600 = vmatmul.mubr.msk.bf16.gmra.mrb[108].mxu1 %vm270_vm0, %v11080_v5  ;;  %7169 = vmatprep.mubr.bf16.mxu0 %v14836_v25 }
0x1ac6   : > { %7232 = vmatprep.mubr.bf16.mxu1 %v14836_v25 }
0x1b87   : > { %v6975_v59 = vpop.f32.mrb[96].mxu0 }
0x1b88   : > { %v7036_v32 = vpop.f32.mrb[96].mxu1  ;;  %v6977_v60 = vpop.f32.mrb[97].mxu0  ;;  %v6976_v22 = vadd.f32 %v6975_v59, %v15093_v33 }
0x1b89   : > { %v7038_v18 = vpop.f32.mrb[97].mxu1  ;;  %v6979_v29 = vpop.f32.mrb[98].mxu0  ;;  %v7037_v2 = vadd.f32 %v7036_v32, %v15093_v33  ;;  %v6978_v11 = vadd.f32 %v6977_v60, %v15093_v33 }
0x1b8a   : > { %v6980_v7 = vadd.f32 %v6979_v29, %v15094_v9  ;;  %v7040_v19 = vpop.f32.mrb[98].mxu1  ;;  %v6981_v42 = vpop.f32.mrb[99].mxu0  ;;  %v7039_v26 = vadd.f32 %v7038_v18, %v15093_v33 }
0x1b8b   : > { %v7041_v24 = vadd.f32 %v7040_v19, %v15094_v9  ;;  %v6982_v47 = vadd.f32 %v6981_v42, %v15094_v9  ;;  %v7042_v61 = vpop.f32.mrb[99].mxu1 }
0x1b8c   : > { %v7063_v57 = vpack.c.bf16 %v6980_v7, %v6976_v22  ;;  %v7043_v46 = vadd.f32 %v7042_v61, %v15094_v9 }
0x1b8d   : > { %v7065_v50 = vpack.c.bf16 %v7041_v24, %v7037_v2  ;;  %v7064_v12 = vpack.c.bf16 %v6982_v47, %v6978_v11 }
0x1b8e   : > { %v7066_v0 = vpack.c.bf16 %v7043_v46, %v7039_v26  ;;  %v15099_v26 = vld [vmem:[#allocation40_spill] sm:$0xff] }
0x1b8f   : > { %v6985_v14 = vpop.f32.mrb[100].mxu0  ;;  %7137 = vmatprep.subr.bf16.mxu0 %v7064_v12 }
0x1b90   : > { %v7046_v27 = vpop.f32.mrb[100].mxu1  ;;  %7200 = vmatprep.subr.bf16.mxu1 %v7066_v0  ;;  %v6987_v4 = vpop.f32.mrb[101].mxu0  ;;  %7138 = vmatpush1.bf16.msra.mxu0 %v7063_v57  ;;  %v6986_v56 = vadd.f32 %v6985_v14, %v15095_v63 }
0x1b91   : > { %v7048_v38 = vpop.f32.mrb[101].mxu1  ;;  %7201 = vmatpush1.bf16.msra.mxu1 %v7065_v50  ;;  %v6989_v39 = vpop.f32.mrb[102].mxu0  ;;  %v7047_v51 = vadd.f32 %v7046_v27, %v15095_v63  ;;  %v6988_v1 = vadd.f32 %v6987_v4, %v15095_v63 }
0x1b92   : > { %v6990_v58 = vadd.f32 %v6989_v39, %v15096_v16  ;;  %v7050_v40 = vpop.f32.mrb[102].mxu1  ;;  %v6991_v52 = vpop.f32.mrb[103].mxu0  ;;  %v7049_v55 = vadd.f32 %v7048_v38, %v15095_v63  ;;  %v15100_v38 = vld [vmem:[#allocation37_spill] sm:$0xff] }
0x1b93   : > { %v7051_v3 = vadd.f32 %v7050_v40, %v15096_v16  ;;  %v6992_v36 = vadd.f32 %v6991_v52, %v15096_v16  ;;  %v7052_v28 = vpop.f32.mrb[103].mxu1 }
0x1b94   : > { %v7067_v23 = vpack.c.bf16 %v6990_v58, %v6986_v56  ;;  %v7053_v44 = vadd.f32 %v7052_v28, %v15096_v16 }
0x1b95   : > { %v7069_v21 = vpack.c.bf16 %v7051_v3, %v7047_v51  ;;  %v7068_v34 = vpack.c.bf16 %v6992_v36, %v6988_v1 }
0x1b96   : > { %v7070_v49 = vpack.c.bf16 %v7053_v44, %v7049_v55 }
0x1b97   : > { %7139 = vmatprep.subr.bf16.mxu0 %v7068_v34 }
0x1b98   : > { %7202 = vmatprep.subr.bf16.mxu1 %v7070_v49  ;;  %7140 = vmatpush1.bf16.msra.mxu0 %v7067_v23 }
0x1b99   : > { %7203 = vmatpush1.bf16.msra.mxu1 %v7069_v21  ;;  %7141 = vmatprep.subr.bf16.mxu0 %v13529_v48  ;;  %v11082_v48 = vld [vmem:[%s14592_s1 + $0xe0] sm:$0xff]  }
0x1b9a   : > { %7204 = vmatprep.subr.bf16.mxu1 %v13534_v8  ;;  %v11083_v8 = vld [vmem:[%s14592_s1 + $0xe8] sm:$0xff]  }
0x1b9c   : > { %7142 = vmatpush1.bf16.msra.mxu0 %v13542_v41 }
0x1b9d   : > { %7205 = vmatpush1.bf16.msra.mxu1 %v13547_v45  ;;  %v15097_v45 = vld [vmem:[#allocation38_spill] sm:$0xff] }
0x1b9f   : > { %10616 = vmatmul.mubr.msk.bf16.vlgmr.msra.gmra.mrb[112].mxu0 %vm270_vm0, %v11081_v43 }
0x1ba0   : > { %10619 = vmatmul.mubr.msk.bf16.vlgmr.msra.gmra.mrb[112].mxu1 %vm270_vm0, %v11081_v43  ;;  %7179 = vmatprep.mubr.bf16.mxu0 %v14836_v25 }
0x1ba1   : > { %7242 = vmatprep.mubr.bf16.mxu1 %v14836_v25 }
0x1ba7   : > { %10617 = vmatmul.mubr.msk.bf16.gmra.mrb[116].mxu0 %vm270_vm0, %v11082_v48 }
0x1ba8   : > { %10620 = vmatmul.mubr.msk.bf16.gmra.mrb[116].mxu1 %vm270_vm0, %v11082_v48  ;;  %7189 = vmatprep.mubr.bf16.mxu0 %v14836_v25 }
0x1ba9   : > { %7252 = vmatprep.mubr.bf16.mxu1 %v14836_v25 }
0x1baf   : > { %10618 = vmatmul.mubr.msk.bf16.gmra.mrb[104].mxu0 %vm270_vm0, %v11083_v8 }
0x1bb0   : > { %10621 = vmatmul.mubr.msk.bf16.gmra.mrb[104].mxu1 %vm270_vm0, %v11083_v8  ;;  %7392 = vmatprep.mubr.bf16.mxu0 %v14836_v25  ;;  %v15101_v8 = vld [vmem:[#allocation42_spill] sm:$0xff] }
0x1bb1   : > { %7445 = vmatprep.mubr.bf16.mxu1 %v14836_v25 }
0x1c72   : > { %v7171_v41 = vpop.f32.mrb[112].mxu0 }
0x1c73   : > { %v7172_v54 = vadd.f32 %v7171_v41, %v15097_v45  ;;  %v7234_v17 = vpop.f32.mrb[112].mxu1  ;;  %v7173_v31 = vpop.f32.mrb[113].mxu0 }
0x1c74   : > { %v7235_v13 = vadd.f32 %v7234_v17, %v15097_v45  ;;  %v7174_v20 = vadd.f32 %v7173_v31, %v15097_v45  ;;  %v7236_v62 = vpop.f32.mrb[113].mxu1  ;;  %v7175_v30 = vpop.f32.mrb[114].mxu0 }
0x1c75   : > { %v7237_v15 = vadd.f32 %v7236_v62, %v15097_v45  ;;  %v7176_v35 = vadd.f32 %v7175_v30, %v15098_v37  ;;  %v7238_v53 = vpop.f32.mrb[114].mxu1  ;;  %v7177_v10 = vpop.f32.mrb[115].mxu0  ;;  %v7263_v60 = vmax.f32 %v7172_v54, 0.0  ;;  %v15102_v30 = vld [vmem:[#allocation39_spill] sm:$0xff] }
0x1c76   : > { %v7239_v5 = vadd.f32 %v7238_v53, %v15098_v37  ;;  %v7178_v59 = vadd.f32 %v7177_v10, %v15098_v37  ;;  %v7240_v32 = vpop.f32.mrb[115].mxu1  ;;  %v7265_v33 = vmax.f32 %v7235_v13, 0.0  ;;  %v7264_v22 = vmax.f32 %v7174_v20, 0.0 }
0x1c77   : > { %v7267_v18 = vmax.f32 %v7176_v35, 0.0  ;;  %v7241_v29 = vadd.f32 %v7240_v32, %v15098_v37  ;;  %v7266_v19 = vmax.f32 %v7237_v15, 0.0 }
0x1c78   : > { %v7269_v9 = vmax.f32 %v7239_v5, 0.0  ;;  %v7268_v7 = vmax.f32 %v7178_v59, 0.0 }
0x1c79   : > { %v7287_v42 = vpack.c.bf16 %v7267_v18, %v7263_v60  ;;  %v7270_v2 = vmax.f32 %v7241_v29, 0.0  ;;  %v7475_v18 = vld [vmem:[%s11377_s11 + $0x68] sm:$0xff] }
0x1c7a   : > { %v7289_v11 = vpack.c.bf16 %v7269_v9, %v7265_v33  ;;  %v7288_v24 = vpack.c.bf16 %v7268_v7, %v7264_v22  ;;  %v7181_v47 = vpop.f32.mrb[116].mxu0  ;;  %v7479_v29 = vld [vmem:[%s11377_s11 + $0xe8] sm:$0xff] }
0x1c7b   : > { %v7290_v61 = vpack.c.bf16 %v7270_v2, %v7266_v19  ;;  %v7182_v57 = vadd.f32 %v7181_v47, %v15099_v26  ;;  %v7244_v46 = vpop.f32.mrb[116].mxu1  ;;  %v7183_v50 = vpop.f32.mrb[117].mxu0  ;;  %v7477_v19 = vld [vmem:[%s11377_s11 + $0x78] sm:$0xff] }
0x1c7c   : > { %v7245_v12 = vadd.f32 %v7244_v46, %v15099_v26  ;;  %v7184_v0 = vadd.f32 %v7183_v50, %v15099_v26  ;;  %v7246_v14 = vpop.f32.mrb[117].mxu1  ;;  %v7185_v27 = vpop.f32.mrb[118].mxu0  ;;  %7360 = vmatprep.subr.bf16.mxu0 %v7288_v24  ;;  %v11084_v46 = vld [vmem:[%s14592_s1 + $0xf0] sm:$0xff]  }
0x1c7d   : > { %v7247_v4 = vadd.f32 %v7246_v14, %v15099_v26  ;;  %v7186_v39 = vadd.f32 %v7185_v27, %v15100_v38  ;;  %v7248_v63 = vpop.f32.mrb[118].mxu1  ;;  %7413 = vmatprep.subr.bf16.mxu1 %v7290_v61  ;;  %v7187_v56 = vpop.f32.mrb[119].mxu0  ;;  %7361 = vmatpush1.bf16.msra.mxu0 %v7287_v42  ;;  %v7271_v52 = vmax.f32 %v7182_v57, 0.0  ;;  %v7481_v42 = vld [vmem:[%s11377_s11 + $0xf8] sm:$0xff]  ;;  %v14016_v26 = vpack.c.bf16 %v7479_v29, %v7475_v18  ;;  %v7476_v14 = vld [vmem:[%s11377_s11 + $0x70] sm:$0xff] }
0x1c7e   : > { %v7249_v16 = vadd.f32 %v7248_v63, %v15100_v38  ;;  %v7188_v58 = vadd.f32 %v7187_v56, %v15100_v38  ;;  %v7250_v40 = vpop.f32.mrb[119].mxu1  ;;  %7414 = vmatpush1.bf16.msra.mxu1 %v7289_v11  ;;  %v7273_v3 = vmax.f32 %v7245_v12, 0.0  ;;  %v7272_v36 = vmax.f32 %v7184_v0, 0.0  ;;  %v7474_v12 = vld [vmem:[%s11377_s11 + $0x60] sm:$0xff]  ;;  %v7480_v27 = vld [vmem:[%s11377_s11 + $0xf0] sm:$0xff] }
0x1c7f   : > { %v7275_v51 = vmax.f32 %v7186_v39, 0.0  ;;  %v7251_v1 = vadd.f32 %v7250_v40, %v15100_v38  ;;  %v7274_v23 = vmax.f32 %v7247_v4, 0.0  ;;  %v14021_v50 = vpack.c.bf16 %v7481_v42, %v7477_v19  ;;  %v7478_v0 = vld [vmem:[%s11377_s11 + $0xe0] sm:$0xff]  ;;  %v7483_v4 = vld [vmem:[%s11377_s11 + $0x168] sm:$0xff]  ;;  %v7485_v38 = vld [vmem:[%s11377_s11 + $0x178] sm:$0xff] }
0x1c80   : > { %v7277_v28 = vmax.f32 %v7249_v16, 0.0  ;;  %v7276_v55 = vmax.f32 %v7188_v58, 0.0  ;;  %v14030_v39 = vpack.c.bf16 %v7478_v0, %v7474_v12  ;;  %v14033_v63 = vpack.c.bf16 %v7480_v27, %v7476_v14  ;;  %v7482_v16 = vld [vmem:[%s11377_s11 + $0x160] sm:$0xff]  ;;  %v7484_v40 = vld [vmem:[%s11377_s11 + $0x170] sm:$0xff] }
0x1c81   : > { %v7291_v44 = vpack.c.bf16 %v7275_v51, %v7271_v52  ;;  %v7278_v21 = vmax.f32 %v7251_v1, 0.0  ;;  %v14036_v56 = vpack.c.bf16 %v14952_v6, %v7483_v4  ;;  %v14041_v58 = vpack.c.bf16 %v14952_v6, %v7485_v38  ;;  %v11085_v1 = vld [vmem:[%s14592_s1 + $0xf8] sm:$0xff]  }
0x1c82   : > { %v7293_v34 = vpack.c.bf16 %v7277_v28, %v7273_v3  ;;  %v7292_v49 = vpack.c.bf16 %v7276_v55, %v7272_v36  ;;  %v7191_v43 = vpop.f32.mrb[104].mxu0  ;;  %v14049_v52 = vpack.c.bf16 %v14952_v6, %v7482_v16  ;;  %v14054_v51 = vpack.c.bf16 %v14952_v6, %v7484_v40  ;;  %v11086_v6 = vld [vmem:[%s14592_s1 + $0x100] sm:$0xff]   ;;  %v11088_v36 = vld [vmem:[%s14592_s1 + $0x8] sm:$0xff]   ;;  %v11089_v28 = vld [vmem:[%s14592_s1 + $0x10] sm:$0xff]   ;;  %v7314_v55 = vpop.permute.xlu1 %7313 }
0x1c83   : > { %v7294_v48 = vpack.c.bf16 %v7278_v21, %v7274_v23  ;;  %v7192_v41 = vadd.f32 %v7191_v43, %v15101_v8  ;;  %v7254_v45 = vpop.f32.mrb[104].mxu1  ;;  %v7193_v54 = vpop.f32.mrb[105].mxu0  ;;  %v11087_v3 = vld [vmem:[%s14592_s1] sm:$0xff]  }
0x1c84   : > { %v7255_v17 = vadd.f32 %v7254_v45, %v15101_v8  ;;  %v7194_v31 = vadd.f32 %v7193_v54, %v15101_v8  ;;  %v7256_v13 = vpop.f32.mrb[105].mxu1  ;;  %v7195_v20 = vpop.f32.mrb[106].mxu0  ;;  %7362 = vmatprep.subr.bf16.mxu0 %v7292_v49 }
0x1c85   : > { %v7257_v62 = vadd.f32 %v7256_v13, %v15101_v8  ;;  %v7196_v15 = vadd.f32 %v7195_v20, %v15102_v30  ;;  %v7258_v37 = vpop.f32.mrb[106].mxu1  ;;  %7415 = vmatprep.subr.bf16.mxu1 %v7294_v48  ;;  %v7197_v35 = vpop.f32.mrb[107].mxu0  ;;  %7363 = vmatpush1.bf16.msra.mxu0 %v7291_v44  ;;  %v7279_v59 = vmax.f32 %v7192_v41, 0.0 }
0x1c86   : > { %v7259_v53 = vadd.f32 %v7258_v37, %v15102_v30  ;;  %v7198_v10 = vadd.f32 %v7197_v35, %v15102_v30  ;;  %v7260_v5 = vpop.f32.mrb[107].mxu1  ;;  %7416 = vmatpush1.bf16.msra.mxu1 %v7293_v34  ;;  %v7281_v33 = vmax.f32 %v7255_v17, 0.0  ;;  %v7280_v22 = vmax.f32 %v7194_v31, 0.0  ;;  %v6911_v23 = vpop.permute.xlu0 %6910 }
0x1c87   : > { %v7283_v32 = vmax.f32 %v7196_v15, 0.0  ;;  %v7261_v60 = vadd.f32 %v7260_v5, %v15102_v30  ;;  %v7282_v2 = vmax.f32 %v7257_v62, 0.0  ;;  %v10885_v44 = vadd.f32 %v7314_v55, %v6911_v23 }
0x1c88   : > { %v7285_v9 = vmax.f32 %v7259_v53, 0.0  ;;  %v7284_v7 = vmax.f32 %v7198_v10, 0.0 }
0x1c89   : > { %v7295_v11 = vpack.c.bf16 %v7283_v32, %v7279_v59  ;;  %v7286_v24 = vmax.f32 %v7261_v60, 0.0 }
0x1c8a   : > { %v7297_v47 = vpack.c.bf16 %v7285_v9, %v7281_v33  ;;  %v7296_v61 = vpack.c.bf16 %v7284_v7, %v7280_v22  ;;  %v15103_v7 = vld [vmem:[#allocation44_spill] sm:$0xff] }
0x1c8b   : > { %v7298_v57 = vpack.c.bf16 %v7286_v24, %v7282_v2 }
0x1c8c   : > { %7364 = vmatprep.subr.bf16.mxu0 %v7296_v61 }
0x1c8d   : > { %7417 = vmatprep.subr.bf16.mxu1 %v7298_v57  ;;  %7365 = vmatpush1.bf16.msra.mxu0 %v7295_v11 }
0x1c8e   : > { %7418 = vmatpush1.bf16.msra.mxu1 %v7297_v47  ;;  %7560 = vmatprep.subr.bf16.mxu0 %v14016_v26 }
0x1c8f   : > { %7623 = vmatprep.subr.bf16.mxu1 %v14021_v50 }
0x1c90   : > { %10637 = vmatmul.mubr.msk.bf16.vlgmr.msra.gmra.mrb[108].mxu0 %vm270_vm0, %v11084_v46 }
0x1c91   : > { %10640 = vmatmul.mubr.msk.bf16.vlgmr.msra.gmra.mrb[108].mxu1 %vm270_vm0, %v11084_v46  ;;  %7400 = vmatprep.mubr.bf16.mxu0 %v14836_v25  ;;  %v15104_v46 = vld [vmem:[#allocation41_spill] sm:$0xff] }
0x1c92   : > { %7453 = vmatprep.mubr.bf16.mxu1 %v14836_v25  ;;  %7561 = vmatpush1.bf16.msra.mxu0 %v14030_v39 }
0x1c93   : > { %7624 = vmatpush1.bf16.msra.mxu1 %v14033_v63  ;;  %7562 = vmatprep.subr.bf16.mxu0 %v14036_v56 }
0x1c94   : > { %7625 = vmatprep.subr.bf16.mxu1 %v14041_v58 }
0x1c96   : > { %7563 = vmatpush1.bf16.msra.mxu0 %v14049_v52 }
0x1c97   : > { %7626 = vmatpush1.bf16.msra.mxu1 %v14054_v51 }
0x1c98   : > { %10638 = vmatmul.mubr.msk.bf16.gmra.mrb[120].mxu0 %vm270_vm0, %v11085_v1 }
0x1c99   : > { %10641 = vmatmul.mubr.msk.bf16.gmra.mrb[120].mxu1 %vm270_vm0, %v11085_v1  ;;  %7406 = vmatprep.mubr.bf16.mxu0 %v14836_v25 }
0x1c9a   : > { %7459 = vmatprep.mubr.bf16.mxu1 %v14836_v25 }
0x1ca0   : > { %10639 = vmatmul.mubr.msk.bf16.gmra.mrb[124].mxu0 %vm270_vm0, %v11086_v6 }
0x1ca1   : > { %10642 = vmatmul.mubr.msk.bf16.gmra.mrb[124].mxu1 %vm270_vm0, %v11086_v6  ;;  %7592 = vmatprep.mubr.bf16.mxu0 %v14836_v25 }
0x1ca2   : > { %7655 = vmatprep.mubr.bf16.mxu1 %v14836_v25 }
0x1ca8   : > { %10646 = vmatmul.mubr.msk.bf16.vlgmr.msra.gmra.mrb[128].mxu0 %vm270_vm0, %v11087_v3 }
0x1ca9   : > { %10649 = vmatmul.mubr.msk.bf16.vlgmr.msra.gmra.mrb[128].mxu1 %vm270_vm0, %v11087_v3  ;;  %7602 = vmatprep.mubr.bf16.mxu0 %v14836_v25 }
0x1caa   : > { %7665 = vmatprep.mubr.bf16.mxu1 %v14836_v25 }
0x1cb0   : > { %10647 = vmatmul.mubr.msk.bf16.gmra.mrb[132].mxu0 %vm270_vm0, %v11088_v36 }
0x1cb1   : > { %10650 = vmatmul.mubr.msk.bf16.gmra.mrb[132].mxu1 %vm270_vm0, %v11088_v36  ;;  %7612 = vmatprep.mubr.bf16.mxu0 %v14836_v25 }
0x1cb2   : > { %7675 = vmatprep.mubr.bf16.mxu1 %v14836_v25 }
0x1cb8   : > { %10648 = vmatmul.mubr.msk.bf16.gmra.mrb[136].mxu0 %vm270_vm0, %v11089_v28 }
0x1cb9   : > { %10651 = vmatmul.mubr.msk.bf16.gmra.mrb[136].mxu1 %vm270_vm0, %v11089_v28  ;;  %7820 = vmatprep.mubr.bf16.mxu0 %v14836_v25 }
0x1cba   : > { %7883 = vmatprep.mubr.bf16.mxu1 %v14836_v25 }
0x1d63   : > { %v7394_v21 = vpop.f32.mrb[108].mxu0 }
0x1d64   : > { %v10886_v34 = vadd.f32 %v10885_v44, %v7394_v21  ;;  %v7447_v49 = vpop.f32.mrb[108].mxu1  ;;  %v7396_v43 = vpop.f32.mrb[109].mxu0 }
0x1d65   : > { %v10890_v48 = vadd.f32 %v10885_v44, %v7447_v49  ;;  %v10888_v8 = vadd.f32 %v10885_v44, %v7396_v43  ;;  %v7449_v41 = vpop.f32.mrb[109].mxu1  ;;  %v7398_v45 = vpop.f32.mrb[110].mxu0 }
0x1d66   : > { %7470 = vst [vmem:[%s13078_s17 + $0x40] sm:$0xff] %v10886_v34  ;;  %v10892_v54 = vadd.f32 %v10885_v44, %v7449_v41  ;;  %v7451_v17 = vpop.f32.mrb[110].mxu1  ;;  %v7399_v31 = vpop.f32.mrb[111].mxu0 }
0x1d67   : > { %7472 = vst [vmem:[%s13078_s17 + $0x50] sm:$0xff] %v10890_v48  ;;  %7471 = vst [vmem:[%s13078_s17 + $0x48] sm:$0xff] %v10888_v8  ;;  %v7452_v13 = vpop.f32.mrb[111].mxu1  ;;  %v15105_v48 = vld [vmem:[#allocation46_spill] sm:$0xff] }
0x1d68   : > { %7473 = vst [vmem:[%s13078_s17 + $0x58] sm:$0xff] %v10892_v54 }
0x1d6b   : > { %v7402_v20 = vpop.f32.mrb[120].mxu0 }
0x1d6c   : > { %v7455_v62 = vpop.f32.mrb[120].mxu1  ;;  %v7403_v30 = vpop.f32.mrb[121].mxu0 }
0x1d6d   : > { %v7456_v15 = vpop.f32.mrb[121].mxu1  ;;  %v7404_v37 = vpop.f32.mrb[122].mxu0  ;;  %v15106_v62 = vld [vmem:[#allocation43_spill] sm:$0xff] }
0x1d6e   : > { %v7457_v35 = vpop.f32.mrb[122].mxu1  ;;  %v7405_v53 = vpop.f32.mrb[123].mxu0 }
0x1d6f   : > { %v7458_v10 = vpop.f32.mrb[123].mxu1 }
0x1d73   : > { %v7408_v5 = vpop.f32.mrb[124].mxu0 }
0x1d74   : > { %v7461_v59 = vpop.f32.mrb[124].mxu1  ;;  %v7409_v32 = vpop.f32.mrb[125].mxu0 }
0x1d75   : > { %v7462_v60 = vpop.f32.mrb[125].mxu1  ;;  %v7410_v18 = vpop.f32.mrb[126].mxu0 }
0x1d76   : > { %v7463_v29 = vpop.f32.mrb[126].mxu1  ;;  %v7411_v33 = vpop.f32.mrb[127].mxu0 }
0x1d77   : > { %v7464_v22 = vpop.f32.mrb[127].mxu1 }
0x1d7b   : > { %v7594_v9 = vpop.f32.mrb[128].mxu0 }
0x1d7c   : > { %v7595_v19 = vadd.f32 %v7594_v9, %v15103_v7  ;;  %v7657_v42 = vpop.f32.mrb[128].mxu1  ;;  %v7596_v2 = vpop.f32.mrb[129].mxu0 }
0x1d7d   : > { %v7658_v11 = vadd.f32 %v7657_v42, %v15103_v7  ;;  %v7597_v24 = vadd.f32 %v7596_v2, %v15103_v7  ;;  %v7659_v47 = vpop.f32.mrb[129].mxu1  ;;  %v7598_v61 = vpop.f32.mrb[130].mxu0 }
0x1d7e   : > { %v7660_v57 = vadd.f32 %v7659_v47, %v15103_v7  ;;  %v7599_v12 = vadd.f32 %v7598_v61, %v15104_v46  ;;  %v7661_v0 = vpop.f32.mrb[130].mxu1  ;;  %v7600_v14 = vpop.f32.mrb[131].mxu0  ;;  %v7686_v16 = vmax.f32 %v7595_v19, 0.0 }
0x1d7f   : > { %v7662_v27 = vadd.f32 %v7661_v0, %v15104_v46  ;;  %v7601_v4 = vadd.f32 %v7600_v14, %v15104_v46  ;;  %v7663_v38 = vpop.f32.mrb[131].mxu1  ;;  %v7688_v6 = vmax.f32 %v7658_v11, 0.0  ;;  %v7687_v3 = vmax.f32 %v7597_v24, 0.0  ;;  %v15107_v24 = vld [vmem:[#allocation48_spill] sm:$0xff] }
0x1d80   : > { %v7690_v40 = vmax.f32 %v7599_v12, 0.0  ;;  %v7664_v1 = vadd.f32 %v7663_v38, %v15104_v46  ;;  %v7689_v55 = vmax.f32 %v7660_v57, 0.0 }
0x1d81   : > { %v7692_v36 = vmax.f32 %v7662_v27, 0.0  ;;  %v7691_v28 = vmax.f32 %v7601_v4, 0.0  ;;  %v15108_v4 = vld [vmem:[#allocation45_spill] sm:$0xff] }
0x1d82   : > { %v7710_v23 = vpack.c.bf16 %v7690_v40, %v7686_v16  ;;  %v7693_v44 = vmax.f32 %v7664_v1, 0.0 }
0x1d83   : > { %v7712_v21 = vpack.c.bf16 %v7692_v36, %v7688_v6  ;;  %v7711_v34 = vpack.c.bf16 %v7691_v28, %v7687_v3  ;;  %v7604_v49 = vpop.f32.mrb[132].mxu0 }
0x1d84   : > { %v7713_v43 = vpack.c.bf16 %v7693_v44, %v7689_v55  ;;  %v7605_v8 = vadd.f32 %v7604_v49, %v15105_v48  ;;  %v7667_v41 = vpop.f32.mrb[132].mxu1  ;;  %v7606_v45 = vpop.f32.mrb[133].mxu0 }
0x1d85   : > { %v7668_v54 = vadd.f32 %v7667_v41, %v15105_v48  ;;  %v7607_v17 = vadd.f32 %v7606_v45, %v15105_v48  ;;  %v7669_v31 = vpop.f32.mrb[133].mxu1  ;;  %v7608_v13 = vpop.f32.mrb[134].mxu0  ;;  %7788 = vmatprep.subr.bf16.mxu0 %v7711_v34 }
0x1d86   : > { %v7670_v20 = vadd.f32 %v7669_v31, %v15105_v48  ;;  %v7609_v30 = vadd.f32 %v7608_v13, %v15106_v62  ;;  %v7671_v15 = vpop.f32.mrb[134].mxu1  ;;  %7851 = vmatprep.subr.bf16.mxu1 %v7713_v43  ;;  %v7610_v37 = vpop.f32.mrb[135].mxu0  ;;  %7789 = vmatpush1.bf16.msra.mxu0 %v7710_v23  ;;  %v7694_v5 = vmax.f32 %v7605_v8, 0.0  ;;  %v11092_v31 = vld [vmem:[%s14592_s1 + $0x28] sm:$0xff]  }
0x1d87   : > { %v7672_v35 = vadd.f32 %v7671_v15, %v15106_v62  ;;  %v7611_v53 = vadd.f32 %v7610_v37, %v15106_v62  ;;  %v7673_v10 = vpop.f32.mrb[135].mxu1  ;;  %7852 = vmatpush1.bf16.msra.mxu1 %v7712_v21  ;;  %v7696_v60 = vmax.f32 %v7668_v54, 0.0  ;;  %v7695_v18 = vmax.f32 %v7607_v17, 0.0  ;;  %v11090_v54 = vld [vmem:[%s14592_s1 + $0x18] sm:$0xff]   ;;  %v11091_v17 = vld [vmem:[%s14592_s1 + $0x20] sm:$0xff]  }
0x1d88   : > { %v7698_v59 = vmax.f32 %v7609_v30, 0.0  ;;  %v7674_v32 = vadd.f32 %v7673_v10, %v15106_v62  ;;  %v7697_v22 = vmax.f32 %v7670_v20, 0.0  ;;  %v15109_v20 = vld [vmem:[#allocation50_spill] sm:$0xff] }
0x1d89   : > { %v7700_v29 = vmax.f32 %v7672_v35, 0.0  ;;  %v7699_v33 = vmax.f32 %v7611_v53, 0.0 }
0x1d8a   : > { %v7714_v9 = vpack.c.bf16 %v7698_v59, %v7694_v5  ;;  %v7701_v7 = vmax.f32 %v7674_v32, 0.0  ;;  %v15110_v59 = vld [vmem:[#allocation47_spill] sm:$0xff] }
0x1d8b   : > { %v7716_v19 = vpack.c.bf16 %v7700_v29, %v7696_v60  ;;  %v7715_v42 = vpack.c.bf16 %v7699_v33, %v7695_v18  ;;  %v7614_v2 = vpop.f32.mrb[136].mxu0 }
0x1d8c   : > { %v7717_v11 = vpack.c.bf16 %v7701_v7, %v7697_v22  ;;  %v7615_v47 = vadd.f32 %v7614_v2, %v15107_v24  ;;  %v7677_v61 = vpop.f32.mrb[136].mxu1  ;;  %v7616_v57 = vpop.f32.mrb[137].mxu0 }
0x1d8d   : > { %v7678_v46 = vadd.f32 %v7677_v61, %v15107_v24  ;;  %v7617_v12 = vadd.f32 %v7616_v57, %v15107_v24  ;;  %v7679_v0 = vpop.f32.mrb[137].mxu1  ;;  %v7618_v14 = vpop.f32.mrb[138].mxu0  ;;  %7790 = vmatprep.subr.bf16.mxu0 %v7715_v42 }
0x1d8e   : > { %v7680_v27 = vadd.f32 %v7679_v0, %v15107_v24  ;;  %v7619_v38 = vadd.f32 %v7618_v14, %v15108_v4  ;;  %v7681_v16 = vpop.f32.mrb[138].mxu1  ;;  %7853 = vmatprep.subr.bf16.mxu1 %v7717_v11  ;;  %v7620_v40 = vpop.f32.mrb[139].mxu0  ;;  %7791 = vmatpush1.bf16.msra.mxu0 %v7714_v9  ;;  %v7702_v36 = vmax.f32 %v7615_v47, 0.0 }
0x1d8f   : > { %v7682_v1 = vadd.f32 %v7681_v16, %v15108_v4  ;;  %v7621_v6 = vadd.f32 %v7620_v40, %v15108_v4  ;;  %v7683_v3 = vpop.f32.mrb[139].mxu1  ;;  %7854 = vmatpush1.bf16.msra.mxu1 %v7716_v19  ;;  %v7704_v23 = vmax.f32 %v7678_v46, 0.0  ;;  %v7703_v44 = vmax.f32 %v7617_v12, 0.0 }
0x1d90   : > { %v7706_v28 = vmax.f32 %v7619_v38, 0.0  ;;  %v7684_v55 = vadd.f32 %v7683_v3, %v15108_v4  ;;  %v7705_v49 = vmax.f32 %v7680_v27, 0.0  ;;  %v15111_v27 = vld [vmem:[#allocation12_spill] sm:$0xff] }
0x1d91   : > { %v7708_v21 = vmax.f32 %v7682_v1, 0.0  ;;  %v7707_v34 = vmax.f32 %v7621_v6, 0.0 }
0x1d92   : > { %v7718_v43 = vpack.c.bf16 %v7706_v28, %v7702_v36  ;;  %v7709_v48 = vmax.f32 %v7684_v55, 0.0  ;;  %v15112_v28 = vld [vmem:[#allocation49_spill] sm:$0xff] }
0x1d93   : > { %v7720_v8 = vpack.c.bf16 %v7708_v21, %v7704_v23  ;;  %v7719_v41 = vpack.c.bf16 %v7707_v34, %v7703_v44 }
0x1d94   : > { %v7721_v45 = vpack.c.bf16 %v7709_v48, %v7705_v49 }
0x1d95   : > { %7792 = vmatprep.subr.bf16.mxu0 %v7719_v41 }
0x1d96   : > { %7855 = vmatprep.subr.bf16.mxu1 %v7721_v45  ;;  %7793 = vmatpush1.bf16.msra.mxu0 %v7718_v43 }
0x1d97   : > { %7856 = vmatpush1.bf16.msra.mxu1 %v7720_v8 }
0x1d99   : > { %10667 = vmatmul.mubr.msk.bf16.vlgmr.msra.gmra.mrb[140].mxu0 %vm270_vm0, %v11090_v54 }
0x1d9a   : > { %10670 = vmatmul.mubr.msk.bf16.vlgmr.msra.gmra.mrb[140].mxu1 %vm270_vm0, %v11090_v54  ;;  %7830 = vmatprep.mubr.bf16.mxu0 %v14836_v25 }
0x1d9b   : > { %7893 = vmatprep.mubr.bf16.mxu1 %v14836_v25 }
0x1da1   : > { %10668 = vmatmul.mubr.msk.bf16.gmra.mrb[144].mxu0 %vm270_vm0, %v11091_v17 }
0x1da2   : > { %10671 = vmatmul.mubr.msk.bf16.gmra.mrb[144].mxu1 %vm270_vm0, %v11091_v17  ;;  %7840 = vmatprep.mubr.bf16.mxu0 %v14836_v25 }
0x1da3   : > { %7903 = vmatprep.mubr.bf16.mxu1 %v14836_v25 }
0x1da9   : > { %10669 = vmatmul.mubr.msk.bf16.gmra.mrb[148].mxu0 %vm270_vm0, %v11092_v31 }
0x1daa   : > { %10672 = vmatmul.mubr.msk.bf16.gmra.mrb[148].mxu1 %vm270_vm0, %v11092_v31  ;;  %8048 = vmatprep.mubr.bf16.mxu0 %v14836_v25 }
0x1dab   : > { %8111 = vmatprep.mubr.bf16.mxu1 %v14836_v25 }
0x1e6c   : > { %v7822_v13 = vpop.f32.mrb[140].mxu0 }
0x1e6d   : > { %v7823_v62 = vadd.f32 %v7822_v13, %v15109_v20  ;;  %v7885_v30 = vpop.f32.mrb[140].mxu1  ;;  %v7824_v15 = vpop.f32.mrb[141].mxu0 }
0x1e6e   : > { %v7886_v37 = vadd.f32 %v7885_v30, %v15109_v20  ;;  %v7825_v35 = vadd.f32 %v7824_v15, %v15109_v20  ;;  %v7887_v53 = vpop.f32.mrb[141].mxu1  ;;  %v7826_v10 = vpop.f32.mrb[142].mxu0 }
0x1e6f   : > { %v7888_v5 = vadd.f32 %v7887_v53, %v15109_v20  ;;  %v7827_v32 = vadd.f32 %v7826_v10, %v15110_v59  ;;  %v7889_v60 = vpop.f32.mrb[142].mxu1  ;;  %v7828_v18 = vpop.f32.mrb[143].mxu0  ;;  %v7914_v9 = vmax.f32 %v7823_v62, 0.0 }
0x1e70   : > { %v7890_v29 = vadd.f32 %v7889_v60, %v15110_v59  ;;  %v7829_v33 = vadd.f32 %v7828_v18, %v15110_v59  ;;  %v7891_v22 = vpop.f32.mrb[143].mxu1  ;;  %v7916_v42 = vmax.f32 %v7886_v37, 0.0  ;;  %v7915_v2 = vmax.f32 %v7825_v35, 0.0  ;;  %v15113_v35 = vld [vmem:[#allocation14_spill] sm:$0xff] }
0x1e71   : > { %v7918_v7 = vmax.f32 %v7827_v32, 0.0  ;;  %v7892_v19 = vadd.f32 %v7891_v22, %v15110_v59  ;;  %v7917_v47 = vmax.f32 %v7888_v5, 0.0 }
0x1e72   : > { %v7920_v11 = vmax.f32 %v7890_v29, 0.0  ;;  %v7919_v24 = vmax.f32 %v7829_v33, 0.0  ;;  %v15114_v33 = vld [vmem:[#allocation13_spill] sm:$0xff] }
0x1e73   : > { %v7938_v61 = vpack.c.bf16 %v7918_v7, %v7914_v9  ;;  %v7921_v57 = vmax.f32 %v7892_v19, 0.0 }
0x1e74   : > { %v7940_v46 = vpack.c.bf16 %v7920_v11, %v7916_v42  ;;  %v7939_v12 = vpack.c.bf16 %v7919_v24, %v7915_v2  ;;  %v7832_v0 = vpop.f32.mrb[144].mxu0 }
0x1e75   : > { %v7941_v14 = vpack.c.bf16 %v7921_v57, %v7917_v47  ;;  %v7833_v4 = vadd.f32 %v7832_v0, %v15111_v27  ;;  %v7895_v38 = vpop.f32.mrb[144].mxu1  ;;  %v7834_v16 = vpop.f32.mrb[145].mxu0 }
0x1e76   : > { %v7896_v40 = vadd.f32 %v7895_v38, %v15111_v27  ;;  %v7835_v1 = vadd.f32 %v7834_v16, %v15111_v27  ;;  %v7897_v6 = vpop.f32.mrb[145].mxu1  ;;  %v7836_v3 = vpop.f32.mrb[146].mxu0  ;;  %8016 = vmatprep.subr.bf16.mxu0 %v7939_v12 }
0x1e77   : > { %v7898_v36 = vadd.f32 %v7897_v6, %v15111_v27  ;;  %v7837_v55 = vadd.f32 %v7836_v3, %v15112_v28  ;;  %v7899_v23 = vpop.f32.mrb[146].mxu1  ;;  %8079 = vmatprep.subr.bf16.mxu1 %v7941_v14  ;;  %v7838_v44 = vpop.f32.mrb[147].mxu0  ;;  %8017 = vmatpush1.bf16.msra.mxu0 %v7938_v61  ;;  %v7922_v43 = vmax.f32 %v7833_v4, 0.0  ;;  %v11095_v6 = vld [vmem:[%s14592_s1 + $0x40] sm:$0xff]  }
0x1e78   : > { %v7900_v21 = vadd.f32 %v7899_v23, %v15112_v28  ;;  %v7839_v34 = vadd.f32 %v7838_v44, %v15112_v28  ;;  %v7901_v49 = vpop.f32.mrb[147].mxu1  ;;  %8080 = vmatpush1.bf16.msra.mxu1 %v7940_v46  ;;  %v7924_v41 = vmax.f32 %v7896_v40, 0.0  ;;  %v7923_v45 = vmax.f32 %v7835_v1, 0.0  ;;  %v11093_v40 = vld [vmem:[%s14592_s1 + $0x30] sm:$0xff]   ;;  %v11094_v1 = vld [vmem:[%s14592_s1 + $0x38] sm:$0xff]  }
0x1e79   : > { %v7926_v48 = vmax.f32 %v7837_v55, 0.0  ;;  %v7902_v8 = vadd.f32 %v7901_v49, %v15112_v28  ;;  %v7925_v31 = vmax.f32 %v7898_v36, 0.0  ;;  %v15115_v36 = vld [vmem:[#allocation51_spill] sm:$0xff] }
0x1e7a   : > { %v7928_v54 = vmax.f32 %v7900_v21, 0.0  ;;  %v7927_v17 = vmax.f32 %v7839_v34, 0.0 }
0x1e7b   : > { %v7942_v13 = vpack.c.bf16 %v7926_v48, %v7922_v43  ;;  %v7929_v20 = vmax.f32 %v7902_v8, 0.0  ;;  %v15116_v48 = vld [vmem:[#allocation15_spill] sm:$0xff] }
0x1e7c   : > { %v7944_v62 = vpack.c.bf16 %v7928_v54, %v7924_v41  ;;  %v7943_v30 = vpack.c.bf16 %v7927_v17, %v7923_v45  ;;  %v7842_v15 = vpop.f32.mrb[148].mxu0 }
0x1e7d   : > { %v7945_v37 = vpack.c.bf16 %v7929_v20, %v7925_v31  ;;  %v7843_v53 = vadd.f32 %v7842_v15, %v15113_v35  ;;  %v7905_v10 = vpop.f32.mrb[148].mxu1  ;;  %v7844_v5 = vpop.f32.mrb[149].mxu0 }
0x1e7e   : > { %v7906_v59 = vadd.f32 %v7905_v10, %v15113_v35  ;;  %v7845_v32 = vadd.f32 %v7844_v5, %v15113_v35  ;;  %v7907_v60 = vpop.f32.mrb[149].mxu1  ;;  %v7846_v18 = vpop.f32.mrb[150].mxu0  ;;  %8018 = vmatprep.subr.bf16.mxu0 %v7943_v30 }
0x1e7f   : > { %v7908_v29 = vadd.f32 %v7907_v60, %v15113_v35  ;;  %v7847_v22 = vadd.f32 %v7846_v18, %v15114_v33  ;;  %v7909_v9 = vpop.f32.mrb[150].mxu1  ;;  %8081 = vmatprep.subr.bf16.mxu1 %v7945_v37  ;;  %v7848_v7 = vpop.f32.mrb[151].mxu0  ;;  %8019 = vmatpush1.bf16.msra.mxu0 %v7942_v13  ;;  %v7930_v11 = vmax.f32 %v7843_v53, 0.0 }
0x1e80   : > { %v7910_v19 = vadd.f32 %v7909_v9, %v15114_v33  ;;  %v7849_v42 = vadd.f32 %v7848_v7, %v15114_v33  ;;  %v7911_v2 = vpop.f32.mrb[151].mxu1  ;;  %8082 = vmatpush1.bf16.msra.mxu1 %v7944_v62  ;;  %v7932_v61 = vmax.f32 %v7906_v59, 0.0  ;;  %v7931_v57 = vmax.f32 %v7845_v32, 0.0 }
0x1e81   : > { %v7934_v24 = vmax.f32 %v7847_v22, 0.0  ;;  %v7912_v47 = vadd.f32 %v7911_v2, %v15114_v33  ;;  %v7933_v0 = vmax.f32 %v7908_v29, 0.0  ;;  %v15117_v29 = vld [vmem:[#allocation53_spill] sm:$0xff] }
0x1e82   : > { %v7936_v46 = vmax.f32 %v7910_v19, 0.0  ;;  %v7935_v12 = vmax.f32 %v7849_v42, 0.0 }
0x1e83   : > { %v7946_v14 = vpack.c.bf16 %v7934_v24, %v7930_v11  ;;  %v7937_v27 = vmax.f32 %v7912_v47, 0.0  ;;  %v15118_v24 = vld [vmem:[#allocation52_spill] sm:$0xff] }
0x1e84   : > { %v7948_v4 = vpack.c.bf16 %v7936_v46, %v7932_v61  ;;  %v7947_v38 = vpack.c.bf16 %v7935_v12, %v7931_v57 }
0x1e85   : > { %v7949_v16 = vpack.c.bf16 %v7937_v27, %v7933_v0 }
0x1e86   : > { %8020 = vmatprep.subr.bf16.mxu0 %v7947_v38 }
0x1e87   : > { %8083 = vmatprep.subr.bf16.mxu1 %v7949_v16  ;;  %8021 = vmatpush1.bf16.msra.mxu0 %v7946_v14 }
0x1e88   : > { %8084 = vmatpush1.bf16.msra.mxu1 %v7948_v4 }
0x1e8a   : > { %10688 = vmatmul.mubr.msk.bf16.vlgmr.msra.gmra.mrb[152].mxu0 %vm270_vm0, %v11093_v40 }
0x1e8b   : > { %10691 = vmatmul.mubr.msk.bf16.vlgmr.msra.gmra.mrb[152].mxu1 %vm270_vm0, %v11093_v40  ;;  %8058 = vmatprep.mubr.bf16.mxu0 %v14836_v25 }
0x1e8c   : > { %8121 = vmatprep.mubr.bf16.mxu1 %v14836_v25 }
0x1e92   : > { %10689 = vmatmul.mubr.msk.bf16.gmra.mrb[156].mxu0 %vm270_vm0, %v11094_v1 }
0x1e93   : > { %10692 = vmatmul.mubr.msk.bf16.gmra.mrb[156].mxu1 %vm270_vm0, %v11094_v1  ;;  %8068 = vmatprep.mubr.bf16.mxu0 %v14836_v25 }
0x1e94   : > { %8131 = vmatprep.mubr.bf16.mxu1 %v14836_v25 }
0x1e9a   : > { %10690 = vmatmul.mubr.msk.bf16.gmra.mrb[160].mxu0 %vm270_vm0, %v11095_v6 }
0x1e9b   : > { %10693 = vmatmul.mubr.msk.bf16.gmra.mrb[160].mxu1 %vm270_vm0, %v11095_v6  ;;  %8276 = vmatprep.mubr.bf16.mxu0 %v14836_v25 }
0x1e9c   : > { %8339 = vmatprep.mubr.bf16.mxu1 %v14836_v25 }
0x1f5d   : > { %v8050_v3 = vpop.f32.mrb[152].mxu0 }
0x1f5e   : > { %v8051_v28 = vadd.f32 %v8050_v3, %v15115_v36  ;;  %v8113_v55 = vpop.f32.mrb[152].mxu1  ;;  %v8052_v23 = vpop.f32.mrb[153].mxu0 }
0x1f5f   : > { %v8114_v44 = vadd.f32 %v8113_v55, %v15115_v36  ;;  %v8053_v21 = vadd.f32 %v8052_v23, %v15115_v36  ;;  %v8115_v34 = vpop.f32.mrb[153].mxu1  ;;  %v8054_v49 = vpop.f32.mrb[154].mxu0 }
0x1f60   : > { %v8116_v43 = vadd.f32 %v8115_v34, %v15115_v36  ;;  %v8055_v8 = vadd.f32 %v8054_v49, %v15116_v48  ;;  %v8117_v41 = vpop.f32.mrb[154].mxu1  ;;  %v8056_v45 = vpop.f32.mrb[155].mxu0  ;;  %v8142_v13 = vmax.f32 %v8051_v28, 0.0 }
0x1f61   : > { %v8118_v54 = vadd.f32 %v8117_v41, %v15116_v48  ;;  %v8057_v17 = vadd.f32 %v8056_v45, %v15116_v48  ;;  %v8119_v31 = vpop.f32.mrb[155].mxu1  ;;  %v8144_v30 = vmax.f32 %v8114_v44, 0.0  ;;  %v8143_v15 = vmax.f32 %v8053_v21, 0.0  ;;  %v15119_v21 = vld [vmem:[#allocation107_spill] sm:$0xff] }
0x1f62   : > { %v8146_v20 = vmax.f32 %v8055_v8, 0.0  ;;  %v8120_v62 = vadd.f32 %v8119_v31, %v15116_v48  ;;  %v8145_v53 = vmax.f32 %v8116_v43, 0.0 }
0x1f63   : > { %v8148_v37 = vmax.f32 %v8118_v54, 0.0  ;;  %v8147_v35 = vmax.f32 %v8057_v17, 0.0  ;;  %v15120_v17 = vld [vmem:[#allocation106_spill] sm:$0xff] }
0x1f64   : > { %v8166_v10 = vpack.c.bf16 %v8146_v20, %v8142_v13  ;;  %v8149_v5 = vmax.f32 %v8120_v62, 0.0 }
0x1f65   : > { %v8168_v59 = vpack.c.bf16 %v8148_v37, %v8144_v30  ;;  %v8167_v32 = vpack.c.bf16 %v8147_v35, %v8143_v15  ;;  %v8060_v60 = vpop.f32.mrb[156].mxu0 }
0x1f66   : > { %v8169_v18 = vpack.c.bf16 %v8149_v5, %v8145_v53  ;;  %v8061_v33 = vadd.f32 %v8060_v60, %v15117_v29  ;;  %v8123_v22 = vpop.f32.mrb[156].mxu1  ;;  %v8062_v9 = vpop.f32.mrb[157].mxu0 }
0x1f67   : > { %v8124_v7 = vadd.f32 %v8123_v22, %v15117_v29  ;;  %v8063_v19 = vadd.f32 %v8062_v9, %v15117_v29  ;;  %v8125_v42 = vpop.f32.mrb[157].mxu1  ;;  %v8064_v2 = vpop.f32.mrb[158].mxu0  ;;  %8244 = vmatprep.subr.bf16.mxu0 %v8167_v32 }
0x1f68   : > { %v8126_v11 = vadd.f32 %v8125_v42, %v15117_v29  ;;  %v8065_v47 = vadd.f32 %v8064_v2, %v15118_v24  ;;  %v8127_v61 = vpop.f32.mrb[158].mxu1  ;;  %8307 = vmatprep.subr.bf16.mxu1 %v8169_v18  ;;  %v8066_v57 = vpop.f32.mrb[159].mxu0  ;;  %8245 = vmatpush1.bf16.msra.mxu0 %v8166_v10  ;;  %v8150_v14 = vmax.f32 %v8061_v33, 0.0  ;;  %v11098_v42 = vld [vmem:[%s14592_s1 + $0x58] sm:$0xff]  }
0x1f69   : > { %v8128_v46 = vadd.f32 %v8127_v61, %v15118_v24  ;;  %v8067_v12 = vadd.f32 %v8066_v57, %v15118_v24  ;;  %v8129_v0 = vpop.f32.mrb[159].mxu1  ;;  %8308 = vmatpush1.bf16.msra.mxu1 %v8168_v59  ;;  %v8152_v38 = vmax.f32 %v8124_v7, 0.0  ;;  %v8151_v16 = vmax.f32 %v8063_v19, 0.0  ;;  %v11096_v7 = vld [vmem:[%s14592_s1 + $0x48] sm:$0xff]   ;;  %v11097_v19 = vld [vmem:[%s14592_s1 + $0x50] sm:$0xff]  }
0x1f6a   : > { %v8154_v27 = vmax.f32 %v8065_v47, 0.0  ;;  %v8130_v4 = vadd.f32 %v8129_v0, %v15118_v24  ;;  %v8153_v6 = vmax.f32 %v8126_v11, 0.0  ;;  %v15121_v11 = vld [vmem:[#allocation109_spill] sm:$0xff] }
0x1f6b   : > { %v8156_v40 = vmax.f32 %v8128_v46, 0.0  ;;  %v8155_v1 = vmax.f32 %v8067_v12, 0.0 }
0x1f6c   : > { %v8170_v3 = vpack.c.bf16 %v8154_v27, %v8150_v14  ;;  %v8157_v36 = vmax.f32 %v8130_v4, 0.0  ;;  %v15122_v27 = vld [vmem:[#allocation108_spill] sm:$0xff] }
0x1f6d   : > { %v8172_v28 = vpack.c.bf16 %v8156_v40, %v8152_v38  ;;  %v8171_v55 = vpack.c.bf16 %v8155_v1, %v8151_v16  ;;  %v8070_v23 = vpop.f32.mrb[160].mxu0 }
0x1f6e   : > { %v8173_v44 = vpack.c.bf16 %v8157_v36, %v8153_v6  ;;  %v8071_v34 = vadd.f32 %v8070_v23, %v15119_v21  ;;  %v8133_v49 = vpop.f32.mrb[160].mxu1  ;;  %v8072_v43 = vpop.f32.mrb[161].mxu0 }
0x1f6f   : > { %v8134_v48 = vadd.f32 %v8133_v49, %v15119_v21  ;;  %v8073_v8 = vadd.f32 %v8072_v43, %v15119_v21  ;;  %v8135_v41 = vpop.f32.mrb[161].mxu1  ;;  %v8074_v45 = vpop.f32.mrb[162].mxu0  ;;  %8246 = vmatprep.subr.bf16.mxu0 %v8171_v55 }
0x1f70   : > { %v8136_v54 = vadd.f32 %v8135_v41, %v15119_v21  ;;  %v8075_v31 = vadd.f32 %v8074_v45, %v15120_v17  ;;  %v8137_v13 = vpop.f32.mrb[162].mxu1  ;;  %8309 = vmatprep.subr.bf16.mxu1 %v8173_v44  ;;  %v8076_v20 = vpop.f32.mrb[163].mxu0  ;;  %8247 = vmatpush1.bf16.msra.mxu0 %v8170_v3  ;;  %v8158_v37 = vmax.f32 %v8071_v34, 0.0 }
0x1f71   : > { %v8138_v62 = vadd.f32 %v8137_v13, %v15120_v17  ;;  %v8077_v30 = vadd.f32 %v8076_v20, %v15120_v17  ;;  %v8139_v15 = vpop.f32.mrb[163].mxu1  ;;  %8310 = vmatpush1.bf16.msra.mxu1 %v8172_v28  ;;  %v8160_v10 = vmax.f32 %v8134_v48, 0.0  ;;  %v8159_v5 = vmax.f32 %v8073_v8, 0.0 }
0x1f72   : > { %v8162_v35 = vmax.f32 %v8075_v31, 0.0  ;;  %v8140_v53 = vadd.f32 %v8139_v15, %v15120_v17  ;;  %v8161_v60 = vmax.f32 %v8136_v54, 0.0  ;;  %v15123_v54 = vld [vmem:[#allocation111_spill] sm:$0xff] }
0x1f73   : > { %v8164_v59 = vmax.f32 %v8138_v62, 0.0  ;;  %v8163_v32 = vmax.f32 %v8077_v30, 0.0 }
0x1f74   : > { %v8174_v18 = vpack.c.bf16 %v8162_v35, %v8158_v37  ;;  %v8165_v29 = vmax.f32 %v8140_v53, 0.0  ;;  %v15124_v35 = vld [vmem:[#allocation110_spill] sm:$0xff] }
0x1f75   : > { %v8176_v33 = vpack.c.bf16 %v8164_v59, %v8160_v10  ;;  %v8175_v22 = vpack.c.bf16 %v8163_v32, %v8159_v5 }
0x1f76   : > { %v8177_v9 = vpack.c.bf16 %v8165_v29, %v8161_v60 }
0x1f77   : > { %8248 = vmatprep.subr.bf16.mxu0 %v8175_v22 }
0x1f78   : > { %8311 = vmatprep.subr.bf16.mxu1 %v8177_v9  ;;  %8249 = vmatpush1.bf16.msra.mxu0 %v8174_v18 }
0x1f79   : > { %8312 = vmatpush1.bf16.msra.mxu1 %v8176_v33 }
0x1f7b   : > { %10709 = vmatmul.mubr.msk.bf16.vlgmr.msra.gmra.mrb[164].mxu0 %vm270_vm0, %v11096_v7 }
0x1f7c   : > { %10712 = vmatmul.mubr.msk.bf16.vlgmr.msra.gmra.mrb[164].mxu1 %vm270_vm0, %v11096_v7  ;;  %8286 = vmatprep.mubr.bf16.mxu0 %v14836_v25 }
0x1f7d   : > { %8349 = vmatprep.mubr.bf16.mxu1 %v14836_v25 }
0x1f83   : > { %10710 = vmatmul.mubr.msk.bf16.gmra.mrb[168].mxu0 %vm270_vm0, %v11097_v19 }
0x1f84   : > { %10713 = vmatmul.mubr.msk.bf16.gmra.mrb[168].mxu1 %vm270_vm0, %v11097_v19  ;;  %8296 = vmatprep.mubr.bf16.mxu0 %v14836_v25 }
0x1f85   : > { %8359 = vmatprep.mubr.bf16.mxu1 %v14836_v25 }
0x1f8b   : > { %10711 = vmatmul.mubr.msk.bf16.gmra.mrb[172].mxu0 %vm270_vm0, %v11098_v42 }
0x1f8c   : > { %10714 = vmatmul.mubr.msk.bf16.gmra.mrb[172].mxu1 %vm270_vm0, %v11098_v42  ;;  %8502 = vmatprep.mubr.bf16.mxu0 %v14836_v25 }
0x1f8d   : > { %8561 = vmatprep.mubr.bf16.mxu1 %v14836_v25 }
0x204e   : > { %v8278_v2 = vpop.f32.mrb[164].mxu0 }
0x204f   : > { %v8279_v24 = vadd.f32 %v8278_v2, %v15121_v11  ;;  %v8341_v47 = vpop.f32.mrb[164].mxu1  ;;  %v8280_v61 = vpop.f32.mrb[165].mxu0 }
0x2050   : > { %v8342_v57 = vadd.f32 %v8341_v47, %v15121_v11  ;;  %v8281_v46 = vadd.f32 %v8280_v61, %v15121_v11  ;;  %v8343_v12 = vpop.f32.mrb[165].mxu1  ;;  %v8282_v0 = vpop.f32.mrb[166].mxu0 }
0x2051   : > { %v8344_v14 = vadd.f32 %v8343_v12, %v15121_v11  ;;  %v8283_v4 = vadd.f32 %v8282_v0, %v15122_v27  ;;  %v8345_v38 = vpop.f32.mrb[166].mxu1  ;;  %v8284_v16 = vpop.f32.mrb[167].mxu0  ;;  %v8370_v3 = vmax.f32 %v8279_v24, 0.0 }
0x2052   : > { %v8346_v40 = vadd.f32 %v8345_v38, %v15122_v27  ;;  %v8285_v1 = vadd.f32 %v8284_v16, %v15122_v27  ;;  %v8347_v6 = vpop.f32.mrb[167].mxu1  ;;  %v8372_v55 = vmax.f32 %v8342_v57, 0.0  ;;  %v8371_v23 = vmax.f32 %v8281_v46, 0.0  ;;  %v15125_v46 = vld [vmem:[#allocation113_spill] sm:$0xff] }
0x2053   : > { %v8374_v36 = vmax.f32 %v8283_v4, 0.0  ;;  %v8348_v28 = vadd.f32 %v8347_v6, %v15122_v27  ;;  %v8373_v34 = vmax.f32 %v8344_v14, 0.0 }
0x2054   : > { %v8376_v44 = vmax.f32 %v8346_v40, 0.0  ;;  %v8375_v21 = vmax.f32 %v8285_v1, 0.0  ;;  %v15126_v1 = vld [vmem:[#allocation112_spill] sm:$0xff] }
0x2055   : > { %v8394_v49 = vpack.c.bf16 %v8374_v36, %v8370_v3  ;;  %v8377_v43 = vmax.f32 %v8348_v28, 0.0 }
0x2056   : > { %v8396_v48 = vpack.c.bf16 %v8376_v44, %v8372_v55  ;;  %v8395_v8 = vpack.c.bf16 %v8375_v21, %v8371_v23  ;;  %v8288_v41 = vpop.f32.mrb[168].mxu0 }
0x2057   : > { %v8397_v45 = vpack.c.bf16 %v8377_v43, %v8373_v34  ;;  %v8289_v17 = vadd.f32 %v8288_v41, %v15123_v54  ;;  %v8351_v31 = vpop.f32.mrb[168].mxu1  ;;  %v8290_v13 = vpop.f32.mrb[169].mxu0 }
0x2058   : > { %v8352_v20 = vadd.f32 %v8351_v31, %v15123_v54  ;;  %v8291_v62 = vadd.f32 %v8290_v13, %v15123_v54  ;;  %v8353_v30 = vpop.f32.mrb[169].mxu1  ;;  %v8292_v15 = vpop.f32.mrb[170].mxu0  ;;  %8470 = vmatprep.subr.bf16.mxu0 %v8395_v8 }
0x2059   : > { %v8354_v37 = vadd.f32 %v8353_v30, %v15123_v54  ;;  %v8293_v53 = vadd.f32 %v8292_v15, %v15124_v35  ;;  %v8355_v10 = vpop.f32.mrb[170].mxu1  ;;  %8529 = vmatprep.subr.bf16.mxu1 %v8397_v45  ;;  %v8294_v5 = vpop.f32.mrb[171].mxu0  ;;  %8471 = vmatpush1.bf16.msra.mxu0 %v8394_v49  ;;  %v8378_v18 = vmax.f32 %v8289_v17, 0.0 }
0x205a   : > { %v8356_v59 = vadd.f32 %v8355_v10, %v15124_v35  ;;  %v8295_v32 = vadd.f32 %v8294_v5, %v15124_v35  ;;  %v8357_v60 = vpop.f32.mrb[171].mxu1  ;;  %8530 = vmatpush1.bf16.msra.mxu1 %v8396_v48  ;;  %v8380_v22 = vmax.f32 %v8352_v20, 0.0  ;;  %v8379_v9 = vmax.f32 %v8291_v62, 0.0  ;;  %v11099_v20 = vld [vmem:[%s14592_s1 + $0x60] sm:$0xff]   ;;  %v11100_v62 = vld [vmem:[%s14592_s1 + $0x68] sm:$0xff]  }
0x205b   : > { %v8382_v29 = vmax.f32 %v8293_v53, 0.0  ;;  %v8358_v33 = vadd.f32 %v8357_v60, %v15124_v35  ;;  %v8381_v42 = vmax.f32 %v8354_v37, 0.0 }
0x205c   : > { %v8384_v7 = vmax.f32 %v8356_v59, 0.0  ;;  %v8383_v19 = vmax.f32 %v8295_v32, 0.0  ;;  %v15128_v59 = vld [vmem:[#allocation114_spill] sm:$0xff] }
0x205d   : > { %v8398_v2 = vpack.c.bf16 %v8382_v29, %v8378_v18  ;;  %v8385_v11 = vmax.f32 %v8358_v33, 0.0 }
0x205e   : > { %v8400_v24 = vpack.c.bf16 %v8384_v7, %v8380_v22  ;;  %v8399_v47 = vpack.c.bf16 %v8383_v19, %v8379_v9  ;;  %v8298_v61 = vpop.f32.mrb[172].mxu0 }
0x205f   : > { %v8401_v57 = vpack.c.bf16 %v8385_v11, %v8381_v42  ;;  %v8299_v12 = vadd.f32 %v8298_v61, %v15125_v46  ;;  %v8361_v0 = vpop.f32.mrb[172].mxu1  ;;  %v8300_v14 = vpop.f32.mrb[173].mxu0 }
0x2060   : > { %v8362_v27 = vadd.f32 %v8361_v0, %v15125_v46  ;;  %v8301_v4 = vadd.f32 %v8300_v14, %v15125_v46  ;;  %v8363_v38 = vpop.f32.mrb[173].mxu1  ;;  %v8302_v16 = vpop.f32.mrb[174].mxu0  ;;  %8472 = vmatprep.subr.bf16.mxu0 %v8399_v47 }
0x2061   : > { %v8364_v40 = vadd.f32 %v8363_v38, %v15125_v46  ;;  %v8303_v6 = vadd.f32 %v8302_v16, %v15126_v1  ;;  %v8365_v3 = vpop.f32.mrb[174].mxu1  ;;  %8531 = vmatprep.subr.bf16.mxu1 %v8401_v57  ;;  %v8304_v36 = vpop.f32.mrb[175].mxu0  ;;  %8473 = vmatpush1.bf16.msra.mxu0 %v8398_v2  ;;  %v8386_v44 = vmax.f32 %v8299_v12, 0.0 }
0x2062   : > { %v8366_v28 = vadd.f32 %v8365_v3, %v15126_v1  ;;  %v8305_v55 = vadd.f32 %v8304_v36, %v15126_v1  ;;  %v8367_v23 = vpop.f32.mrb[175].mxu1  ;;  %8532 = vmatpush1.bf16.msra.mxu1 %v8400_v24  ;;  %v8388_v49 = vmax.f32 %v8362_v27, 0.0  ;;  %v8387_v43 = vmax.f32 %v8301_v4, 0.0  ;;  %v15129_v27 = vld [vmem:[#allocation117_spill] sm:$0xff] }
0x2063   : > { %v8390_v21 = vmax.f32 %v8303_v6, 0.0  ;;  %v8368_v34 = vadd.f32 %v8367_v23, %v15126_v1  ;;  %v8389_v41 = vmax.f32 %v8364_v40, 0.0 }
0x2064   : > { %v8392_v48 = vmax.f32 %v8366_v28, 0.0  ;;  %v8391_v8 = vmax.f32 %v8305_v55, 0.0  ;;  %v15130_v28 = vld [vmem:[#allocation116_spill] sm:$0xff] }
0x2065   : > { %v8402_v45 = vpack.c.bf16 %v8390_v21, %v8386_v44  ;;  %v8393_v54 = vmax.f32 %v8368_v34, 0.0 }
0x2066   : > { %v8404_v17 = vpack.c.bf16 %v8392_v48, %v8388_v49  ;;  %v8403_v31 = vpack.c.bf16 %v8391_v8, %v8387_v43 }
0x2067   : > { %v8405_v13 = vpack.c.bf16 %v8393_v54, %v8389_v41 }
0x2068   : > { %8474 = vmatprep.subr.bf16.mxu0 %v8403_v31 }
0x2069   : > { %8533 = vmatprep.subr.bf16.mxu1 %v8405_v13  ;;  %8475 = vmatpush1.bf16.msra.mxu0 %v8402_v45 }
0x206a   : > { %8534 = vmatpush1.bf16.msra.mxu1 %v8404_v17  ;;  %8678 = vmatprep.subr.bf16.mxu0 %v14016_v26  ;;  %v11101_v26 = vld [vmem:[%s14592_s1 + $0x70] sm:$0xff]  }
0x206b   : > { %8741 = vmatprep.subr.bf16.mxu1 %v14021_v50 }
0x206c   : > { %10730 = vmatmul.mubr.msk.bf16.vlgmr.msra.gmra.mrb[176].mxu0 %vm270_vm0, %v11099_v20 }
0x206d   : > { %10733 = vmatmul.mubr.msk.bf16.vlgmr.msra.gmra.mrb[176].mxu1 %vm270_vm0, %v11099_v20  ;;  %8512 = vmatprep.mubr.bf16.mxu0 %v14836_v25 }
0x206e   : > { %8571 = vmatprep.mubr.bf16.mxu1 %v14836_v25  ;;  %8679 = vmatpush1.bf16.msra.mxu0 %v14030_v39  ;;  %v15127_v39 = vld [vmem:[#allocation115_spill] sm:$0xff] }
0x206f   : > { %8742 = vmatpush1.bf16.msra.mxu1 %v14033_v63 }
0x2074   : > { %10731 = vmatmul.mubr.msk.bf16.gmra.mrb[180].mxu0 %vm270_vm0, %v11100_v62 }
0x2075   : > { %10734 = vmatmul.mubr.msk.bf16.gmra.mrb[180].mxu1 %vm270_vm0, %v11100_v62  ;;  %8522 = vmatprep.mubr.bf16.mxu0 %v14836_v25 }
0x2076   : > { %8581 = vmatprep.mubr.bf16.mxu1 %v14836_v25 }
0x207c   : > { %10732 = vmatmul.mubr.msk.bf16.gmra.mrb[184].mxu0 %vm270_vm0, %v11101_v26 }
0x207d   : > { %10735 = vmatmul.mubr.msk.bf16.gmra.mrb[184].mxu1 %vm270_vm0, %v11101_v26  ;;  %8710 = vmatprep.mubr.bf16.mxu0 %v14836_v25 }
0x207e   : > { %8773 = vmatprep.mubr.bf16.mxu1 %v14836_v25 }
0x213f   : > { %v8504_v50 = vpop.f32.mrb[176].mxu0 }
0x2140   : > { %v8505_v63 = vadd.f32 %v8504_v50, %v15127_v39  ;;  %v8563_v30 = vpop.f32.mrb[176].mxu1  ;;  %v8506_v15 = vpop.f32.mrb[177].mxu0 }
0x2141   : > { %v8564_v37 = vadd.f32 %v8563_v30, %v15127_v39  ;;  %v8507_v35 = vadd.f32 %v8506_v15, %v15127_v39  ;;  %v8565_v53 = vpop.f32.mrb[177].mxu1  ;;  %v8508_v10 = vpop.f32.mrb[178].mxu0  ;;  %v11104_v30 = vld [vmem:[%s14592_s1 + $0x88] sm:$0xff]  }
0x2142   : > { %v8566_v5 = vadd.f32 %v8565_v53, %v15127_v39  ;;  %v8509_v32 = vadd.f32 %v8508_v10, %v15128_v59  ;;  %v8567_v60 = vpop.f32.mrb[178].mxu1  ;;  %v8510_v18 = vpop.f32.mrb[179].mxu0  ;;  %v8588_v9 = vmax.f32 %v8505_v63, 0.0  ;;  %v11102_v39 = vld [vmem:[%s14592_s1 + $0x78] sm:$0xff]   ;;  %v11103_v63 = vld [vmem:[%s14592_s1 + $0x80] sm:$0xff]  }
0x2143   : > { %v8568_v29 = vadd.f32 %v8567_v60, %v15128_v59  ;;  %v8511_v33 = vadd.f32 %v8510_v18, %v15128_v59  ;;  %v8569_v22 = vpop.f32.mrb[179].mxu1  ;;  %v8590_v42 = vmax.f32 %v8564_v37, 0.0  ;;  %v8589_v2 = vmax.f32 %v8507_v35, 0.0  ;;  %v15131_v18 = vld [vmem:[#allocation119_spill] sm:$0xff] }
0x2144   : > { %v8592_v7 = vmax.f32 %v8509_v32, 0.0  ;;  %v8570_v19 = vadd.f32 %v8569_v22, %v15128_v59  ;;  %v8591_v47 = vmax.f32 %v8566_v5, 0.0 }
0x2145   : > { %v8594_v11 = vmax.f32 %v8568_v29, 0.0  ;;  %v8593_v24 = vmax.f32 %v8511_v33, 0.0 }
0x2146   : > { %v8604_v61 = vpack.c.bf16 %v8592_v7, %v8588_v9  ;;  %v8595_v57 = vmax.f32 %v8570_v19, 0.0 }
0x2147   : > { %v8606_v46 = vpack.c.bf16 %v8594_v11, %v8590_v42  ;;  %v8605_v12 = vpack.c.bf16 %v8593_v24, %v8589_v2  ;;  %v8514_v0 = vpop.f32.mrb[180].mxu0  ;;  %v15132_v11 = vld [vmem:[#allocation118_spill] sm:$0xff] }
0x2148   : > { %v8607_v14 = vpack.c.bf16 %v8595_v57, %v8591_v47  ;;  %v8515_v4 = vadd.f32 %v8514_v0, %v15129_v27  ;;  %v8573_v38 = vpop.f32.mrb[180].mxu1  ;;  %v8516_v16 = vpop.f32.mrb[181].mxu0 }
0x2149   : > { %v8574_v40 = vadd.f32 %v8573_v38, %v15129_v27  ;;  %v8517_v1 = vadd.f32 %v8516_v16, %v15129_v27  ;;  %v8575_v6 = vpop.f32.mrb[181].mxu1  ;;  %v8518_v3 = vpop.f32.mrb[182].mxu0  ;;  %8680 = vmatprep.subr.bf16.mxu0 %v8605_v12 }
0x214a   : > { %v8576_v36 = vadd.f32 %v8575_v6, %v15129_v27  ;;  %v8519_v55 = vadd.f32 %v8518_v3, %v15130_v28  ;;  %v8577_v23 = vpop.f32.mrb[182].mxu1  ;;  %8743 = vmatprep.subr.bf16.mxu1 %v8607_v14  ;;  %v8520_v44 = vpop.f32.mrb[183].mxu0  ;;  %8681 = vmatpush1.bf16.msra.mxu0 %v8604_v61  ;;  %v8596_v43 = vmax.f32 %v8515_v4, 0.0 }
0x214b   : > { %v8578_v21 = vadd.f32 %v8577_v23, %v15130_v28  ;;  %v8521_v34 = vadd.f32 %v8520_v44, %v15130_v28  ;;  %v8579_v49 = vpop.f32.mrb[183].mxu1  ;;  %8744 = vmatpush1.bf16.msra.mxu1 %v8606_v46  ;;  %v8598_v41 = vmax.f32 %v8574_v40, 0.0  ;;  %v8597_v45 = vmax.f32 %v8517_v1, 0.0  ;;  %v15133_v44 = vld [vmem:[#allocation121_spill] sm:$0xff] }
0x214c   : > { %v8600_v48 = vmax.f32 %v8519_v55, 0.0  ;;  %v8580_v8 = vadd.f32 %v8579_v49, %v15130_v28  ;;  %v8599_v31 = vmax.f32 %v8576_v36, 0.0 }
0x214d   : > { %v8602_v54 = vmax.f32 %v8578_v21, 0.0  ;;  %v8601_v17 = vmax.f32 %v8521_v34, 0.0 }
0x214e   : > { %v8608_v13 = vpack.c.bf16 %v8600_v48, %v8596_v43  ;;  %v8603_v20 = vmax.f32 %v8580_v8, 0.0 }
0x214f   : > { %v8610_v62 = vpack.c.bf16 %v8602_v54, %v8598_v41  ;;  %v8609_v26 = vpack.c.bf16 %v8601_v17, %v8597_v45  ;;  %v8524_v15 = vpop.f32.mrb[184].mxu0  ;;  %v15134_v54 = vld [vmem:[#allocation120_spill] sm:$0xff] }
0x2150   : > { %v8611_v50 = vpack.c.bf16 %v8603_v20, %v8599_v31  ;;  %v8583_v37 = vpop.f32.mrb[184].mxu1  ;;  %v8525_v35 = vpop.f32.mrb[185].mxu0 }
0x2151   : > { %8682 = vmatprep.subr.bf16.mxu0 %v8609_v26  ;;  %v8584_v53 = vpop.f32.mrb[185].mxu1  ;;  %v8526_v10 = vpop.f32.mrb[186].mxu0 }
0x2152   : > { %8745 = vmatprep.subr.bf16.mxu1 %v8611_v50  ;;  %8683 = vmatpush1.bf16.msra.mxu0 %v8608_v13  ;;  %v8585_v5 = vpop.f32.mrb[186].mxu1  ;;  %v8527_v59 = vpop.f32.mrb[187].mxu0 }
0x2153   : > { %8746 = vmatpush1.bf16.msra.mxu1 %v8610_v62  ;;  %v8586_v32 = vpop.f32.mrb[187].mxu1 }
0x2155   : > { %10751 = vmatmul.mubr.msk.bf16.vlgmr.msra.gmra.mrb[188].mxu0 %vm270_vm0, %v11102_v39 }
0x2156   : > { %10754 = vmatmul.mubr.msk.bf16.vlgmr.msra.gmra.mrb[188].mxu1 %vm270_vm0, %v11102_v39  ;;  %8720 = vmatprep.mubr.bf16.mxu0 %v14836_v25 }
0x2157   : > { %8783 = vmatprep.mubr.bf16.mxu1 %v14836_v25 }
0x215d   : > { %10752 = vmatmul.mubr.msk.bf16.gmra.mrb[192].mxu0 %vm270_vm0, %v11103_v63 }
0x215e   : > { %10755 = vmatmul.mubr.msk.bf16.gmra.mrb[192].mxu1 %vm270_vm0, %v11103_v63  ;;  %8730 = vmatprep.mubr.bf16.mxu0 %v14836_v25 }
0x215f   : > { %8793 = vmatprep.mubr.bf16.mxu1 %v14836_v25 }
0x2165   : > { %10753 = vmatmul.mubr.msk.bf16.gmra.mrb[196].mxu0 %vm270_vm0, %v11104_v30 }
0x2166   : > { %10756 = vmatmul.mubr.msk.bf16.gmra.mrb[196].mxu1 %vm270_vm0, %v11104_v30  ;;  %8938 = vmatprep.mubr.bf16.mxu0 %v14836_v25 }
0x2167   : > { %9001 = vmatprep.mubr.bf16.mxu1 %v14836_v25 }
0x2228   : > { %v8712_v60 = vpop.f32.mrb[188].mxu0 }
0x2229   : > { %v8713_v29 = vadd.f32 %v8712_v60, %v15131_v18  ;;  %v8775_v33 = vpop.f32.mrb[188].mxu1  ;;  %v8714_v22 = vpop.f32.mrb[189].mxu0 }
0x222a   : > { %v8776_v9 = vadd.f32 %v8775_v33, %v15131_v18  ;;  %v8715_v7 = vadd.f32 %v8714_v22, %v15131_v18  ;;  %v8777_v19 = vpop.f32.mrb[189].mxu1  ;;  %v8716_v42 = vpop.f32.mrb[190].mxu0 }
0x222b   : > { %v8778_v2 = vadd.f32 %v8777_v19, %v15131_v18  ;;  %v8717_v24 = vadd.f32 %v8716_v42, %v15132_v11  ;;  %v8779_v47 = vpop.f32.mrb[190].mxu1  ;;  %v8718_v61 = vpop.f32.mrb[191].mxu0  ;;  %v8804_v0 = vmax.f32 %v8713_v29, 0.0  ;;  %v15135_v29 = vld [vmem:[#allocation123_spill] sm:$0xff] }
0x222c   : > { %v8780_v57 = vadd.f32 %v8779_v47, %v15132_v11  ;;  %v8719_v46 = vadd.f32 %v8718_v61, %v15132_v11  ;;  %v8781_v12 = vpop.f32.mrb[191].mxu1  ;;  %v8806_v4 = vmax.f32 %v8776_v9, 0.0  ;;  %v8805_v38 = vmax.f32 %v8715_v7, 0.0 }
0x222d   : > { %v8808_v14 = vmax.f32 %v8717_v24, 0.0  ;;  %v8782_v27 = vadd.f32 %v8781_v12, %v15132_v11  ;;  %v8807_v1 = vmax.f32 %v8778_v2, 0.0  ;;  %v15136_v24 = vld [vmem:[#allocation122_spill] sm:$0xff] }
0x222e   : > { %v8810_v16 = vmax.f32 %v8780_v57, 0.0  ;;  %v8809_v40 = vmax.f32 %v8719_v46, 0.0 }
0x222f   : > { %v8828_v6 = vpack.c.bf16 %v8808_v14, %v8804_v0  ;;  %v8811_v3 = vmax.f32 %v8782_v27, 0.0 }
0x2230   : > { %v8830_v36 = vpack.c.bf16 %v8810_v16, %v8806_v4  ;;  %v8829_v28 = vpack.c.bf16 %v8809_v40, %v8805_v38  ;;  %v8722_v55 = vpop.f32.mrb[192].mxu0 }
0x2231   : > { %v8831_v23 = vpack.c.bf16 %v8811_v3, %v8807_v1  ;;  %v8723_v21 = vadd.f32 %v8722_v55, %v15133_v44  ;;  %v8785_v34 = vpop.f32.mrb[192].mxu1  ;;  %v8724_v49 = vpop.f32.mrb[193].mxu0 }
0x2232   : > { %v8786_v43 = vadd.f32 %v8785_v34, %v15133_v44  ;;  %v8725_v48 = vadd.f32 %v8724_v49, %v15133_v44  ;;  %v8787_v8 = vpop.f32.mrb[193].mxu1  ;;  %v8726_v41 = vpop.f32.mrb[194].mxu0  ;;  %8906 = vmatprep.subr.bf16.mxu0 %v8829_v28  ;;  %v11107_v34 = vld [vmem:[%s14592_s1 + $0xa0] sm:$0xff]  }
0x2233   : > { %v8788_v45 = vadd.f32 %v8787_v8, %v15133_v44  ;;  %v8727_v17 = vadd.f32 %v8726_v41, %v15134_v54  ;;  %v8789_v31 = vpop.f32.mrb[194].mxu1  ;;  %8969 = vmatprep.subr.bf16.mxu1 %v8831_v23  ;;  %v8728_v13 = vpop.f32.mrb[195].mxu0  ;;  %8907 = vmatpush1.bf16.msra.mxu0 %v8828_v6  ;;  %v8812_v50 = vmax.f32 %v8723_v21, 0.0  ;;  %v11105_v44 = vld [vmem:[%s14592_s1 + $0x90] sm:$0xff]   ;;  %v11106_v21 = vld [vmem:[%s14592_s1 + $0x98] sm:$0xff]  }
0x2234   : > { %v8790_v20 = vadd.f32 %v8789_v31, %v15134_v54  ;;  %v8729_v62 = vadd.f32 %v8728_v13, %v15134_v54  ;;  %v8791_v26 = vpop.f32.mrb[195].mxu1  ;;  %8970 = vmatpush1.bf16.msra.mxu1 %v8830_v36  ;;  %v8814_v30 = vmax.f32 %v8786_v43, 0.0  ;;  %v8813_v15 = vmax.f32 %v8725_v48, 0.0  ;;  %v15137_v43 = vld [vmem:[#allocation125_spill] sm:$0xff] }
0x2235   : > { %v8816_v39 = vmax.f32 %v8727_v17, 0.0  ;;  %v8792_v63 = vadd.f32 %v8791_v26, %v15134_v54  ;;  %v8815_v53 = vmax.f32 %v8788_v45, 0.0 }
0x2236   : > { %v8818_v37 = vmax.f32 %v8790_v20, 0.0  ;;  %v8817_v35 = vmax.f32 %v8729_v62, 0.0  ;;  %v15138_v20 = vld [vmem:[#allocation124_spill] sm:$0xff] }
0x2237   : > { %v8832_v10 = vpack.c.bf16 %v8816_v39, %v8812_v50  ;;  %v8819_v5 = vmax.f32 %v8792_v63, 0.0 }
0x2238   : > { %v8834_v59 = vpack.c.bf16 %v8818_v37, %v8814_v30  ;;  %v8833_v32 = vpack.c.bf16 %v8817_v35, %v8813_v15  ;;  %v8732_v60 = vpop.f32.mrb[196].mxu0 }
0x2239   : > { %v8835_v18 = vpack.c.bf16 %v8819_v5, %v8815_v53  ;;  %v8733_v33 = vadd.f32 %v8732_v60, %v15135_v29  ;;  %v8795_v22 = vpop.f32.mrb[196].mxu1  ;;  %v8734_v9 = vpop.f32.mrb[197].mxu0 }
0x223a   : > { %v8796_v7 = vadd.f32 %v8795_v22, %v15135_v29  ;;  %v8735_v19 = vadd.f32 %v8734_v9, %v15135_v29  ;;  %v8797_v42 = vpop.f32.mrb[197].mxu1  ;;  %v8736_v2 = vpop.f32.mrb[198].mxu0  ;;  %8908 = vmatprep.subr.bf16.mxu0 %v8833_v32 }
0x223b   : > { %v8798_v11 = vadd.f32 %v8797_v42, %v15135_v29  ;;  %v8737_v47 = vadd.f32 %v8736_v2, %v15136_v24  ;;  %v8799_v61 = vpop.f32.mrb[198].mxu1  ;;  %8971 = vmatprep.subr.bf16.mxu1 %v8835_v18  ;;  %v8738_v57 = vpop.f32.mrb[199].mxu0  ;;  %8909 = vmatpush1.bf16.msra.mxu0 %v8832_v10  ;;  %v8820_v14 = vmax.f32 %v8733_v33, 0.0 }
0x223c   : > { %v8800_v46 = vadd.f32 %v8799_v61, %v15136_v24  ;;  %v8739_v12 = vadd.f32 %v8738_v57, %v15136_v24  ;;  %v8801_v0 = vpop.f32.mrb[199].mxu1  ;;  %8972 = vmatpush1.bf16.msra.mxu1 %v8834_v59  ;;  %v8822_v38 = vmax.f32 %v8796_v7, 0.0  ;;  %v8821_v16 = vmax.f32 %v8735_v19, 0.0  ;;  %v15139_v7 = vld [vmem:[#allocation127_spill] sm:$0xff] }
0x223d   : > { %v8824_v27 = vmax.f32 %v8737_v47, 0.0  ;;  %v8802_v4 = vadd.f32 %v8801_v0, %v15136_v24  ;;  %v8823_v6 = vmax.f32 %v8798_v11, 0.0 }
0x223e   : > { %v8826_v40 = vmax.f32 %v8800_v46, 0.0  ;;  %v8825_v1 = vmax.f32 %v8739_v12, 0.0  ;;  %v15140_v46 = vld [vmem:[#allocation126_spill] sm:$0xff] }
0x223f   : > { %v8836_v3 = vpack.c.bf16 %v8824_v27, %v8820_v14  ;;  %v8827_v36 = vmax.f32 %v8802_v4, 0.0 }
0x2240   : > { %v8838_v28 = vpack.c.bf16 %v8826_v40, %v8822_v38  ;;  %v8837_v55 = vpack.c.bf16 %v8825_v1, %v8821_v16 }
0x2241   : > { %v8839_v23 = vpack.c.bf16 %v8827_v36, %v8823_v6 }
0x2242   : > { %8910 = vmatprep.subr.bf16.mxu0 %v8837_v55 }
0x2243   : > { %8973 = vmatprep.subr.bf16.mxu1 %v8839_v23  ;;  %8911 = vmatpush1.bf16.msra.mxu0 %v8836_v3 }
0x2244   : > { %8974 = vmatpush1.bf16.msra.mxu1 %v8838_v28 }
0x2246   : > { %10772 = vmatmul.mubr.msk.bf16.vlgmr.msra.gmra.mrb[200].mxu0 %vm270_vm0, %v11105_v44 }
0x2247   : > { %10775 = vmatmul.mubr.msk.bf16.vlgmr.msra.gmra.mrb[200].mxu1 %vm270_vm0, %v11105_v44  ;;  %8948 = vmatprep.mubr.bf16.mxu0 %v14836_v25 }
0x2248   : > { %9011 = vmatprep.mubr.bf16.mxu1 %v14836_v25 }
0x224e   : > { %10773 = vmatmul.mubr.msk.bf16.gmra.mrb[204].mxu0 %vm270_vm0, %v11106_v21 }
0x224f   : > { %10776 = vmatmul.mubr.msk.bf16.gmra.mrb[204].mxu1 %vm270_vm0, %v11106_v21  ;;  %8958 = vmatprep.mubr.bf16.mxu0 %v14836_v25 }
0x2250   : > { %9021 = vmatprep.mubr.bf16.mxu1 %v14836_v25 }
0x2256   : > { %10774 = vmatmul.mubr.msk.bf16.gmra.mrb[208].mxu0 %vm270_vm0, %v11107_v34 }
0x2257   : > { %10777 = vmatmul.mubr.msk.bf16.gmra.mrb[208].mxu1 %vm270_vm0, %v11107_v34  ;;  %9166 = vmatprep.mubr.bf16.mxu0 %v14836_v25 }
0x2258   : > { %9229 = vmatprep.mubr.bf16.mxu1 %v14836_v25 }
0x2319   : > { %v8940_v49 = vpop.f32.mrb[200].mxu0 }
0x231a   : > { %v8941_v48 = vadd.f32 %v8940_v49, %v15137_v43  ;;  %v9003_v8 = vpop.f32.mrb[200].mxu1  ;;  %v8942_v41 = vpop.f32.mrb[201].mxu0 }
0x231b   : > { %v9004_v45 = vadd.f32 %v9003_v8, %v15137_v43  ;;  %v8943_v54 = vadd.f32 %v8942_v41, %v15137_v43  ;;  %v9005_v17 = vpop.f32.mrb[201].mxu1  ;;  %v8944_v31 = vpop.f32.mrb[202].mxu0 }
0x231c   : > { %v9006_v13 = vadd.f32 %v9005_v17, %v15137_v43  ;;  %v8945_v62 = vadd.f32 %v8944_v31, %v15138_v20  ;;  %v9007_v26 = vpop.f32.mrb[202].mxu1  ;;  %v8946_v50 = vpop.f32.mrb[203].mxu0  ;;  %v9032_v15 = vmax.f32 %v8941_v48, 0.0  ;;  %v15141_v48 = vld [vmem:[#allocation129_spill] sm:$0xff] }
0x231d   : > { %v9008_v39 = vadd.f32 %v9007_v26, %v15138_v20  ;;  %v8947_v63 = vadd.f32 %v8946_v50, %v15138_v20  ;;  %v9009_v30 = vpop.f32.mrb[203].mxu1  ;;  %v9034_v53 = vmax.f32 %v9004_v45, 0.0  ;;  %v9033_v10 = vmax.f32 %v8943_v54, 0.0 }
0x231e   : > { %v9036_v37 = vmax.f32 %v8945_v62, 0.0  ;;  %v9010_v35 = vadd.f32 %v9009_v30, %v15138_v20  ;;  %v9035_v32 = vmax.f32 %v9006_v13, 0.0  ;;  %v15142_v62 = vld [vmem:[#allocation128_spill] sm:$0xff] }
0x231f   : > { %v9038_v5 = vmax.f32 %v9008_v39, 0.0  ;;  %v9037_v59 = vmax.f32 %v8947_v63, 0.0 }
0x2320   : > { %v9056_v60 = vpack.c.bf16 %v9036_v37, %v9032_v15  ;;  %v9039_v18 = vmax.f32 %v9010_v35, 0.0 }
0x2321   : > { %v9058_v29 = vpack.c.bf16 %v9038_v5, %v9034_v53  ;;  %v9057_v33 = vpack.c.bf16 %v9037_v59, %v9033_v10  ;;  %v8950_v22 = vpop.f32.mrb[204].mxu0 }
0x2322   : > { %v9059_v9 = vpack.c.bf16 %v9039_v18, %v9035_v32  ;;  %v8951_v19 = vadd.f32 %v8950_v22, %v15139_v7  ;;  %v9013_v42 = vpop.f32.mrb[204].mxu1  ;;  %v8952_v2 = vpop.f32.mrb[205].mxu0 }
0x2323   : > { %v9014_v11 = vadd.f32 %v9013_v42, %v15139_v7  ;;  %v8953_v24 = vadd.f32 %v8952_v2, %v15139_v7  ;;  %v9015_v47 = vpop.f32.mrb[205].mxu1  ;;  %v8954_v61 = vpop.f32.mrb[206].mxu0  ;;  %9134 = vmatprep.subr.bf16.mxu0 %v9057_v33  ;;  %v11110_v42 = vld [vmem:[%s14592_s1 + $0xb8] sm:$0xff]  }
0x2324   : > { %v9016_v57 = vadd.f32 %v9015_v47, %v15139_v7  ;;  %v8955_v12 = vadd.f32 %v8954_v61, %v15140_v46  ;;  %v9017_v0 = vpop.f32.mrb[206].mxu1  ;;  %9197 = vmatprep.subr.bf16.mxu1 %v9059_v9  ;;  %v8956_v14 = vpop.f32.mrb[207].mxu0  ;;  %9135 = vmatpush1.bf16.msra.mxu0 %v9056_v60  ;;  %v9040_v16 = vmax.f32 %v8951_v19, 0.0  ;;  %v11108_v7 = vld [vmem:[%s14592_s1 + $0xa8] sm:$0xff]   ;;  %v11109_v19 = vld [vmem:[%s14592_s1 + $0xb0] sm:$0xff]  }
0x2325   : > { %v9018_v27 = vadd.f32 %v9017_v0, %v15140_v46  ;;  %v8957_v4 = vadd.f32 %v8956_v14, %v15140_v46  ;;  %v9019_v38 = vpop.f32.mrb[207].mxu1  ;;  %9198 = vmatpush1.bf16.msra.mxu1 %v9058_v29  ;;  %v9042_v6 = vmax.f32 %v9014_v11, 0.0  ;;  %v9041_v3 = vmax.f32 %v8953_v24, 0.0  ;;  %v15143_v11 = vld [vmem:[#allocation131_spill] sm:$0xff] }
0x2326   : > { %v9044_v40 = vmax.f32 %v8955_v12, 0.0  ;;  %v9020_v1 = vadd.f32 %v9019_v38, %v15140_v46  ;;  %v9043_v55 = vmax.f32 %v9016_v57, 0.0 }
0x2327   : > { %v9046_v36 = vmax.f32 %v9018_v27, 0.0  ;;  %v9045_v28 = vmax.f32 %v8957_v4, 0.0  ;;  %v15144_v27 = vld [vmem:[#allocation130_spill] sm:$0xff] }
0x2328   : > { %v9060_v23 = vpack.c.bf16 %v9044_v40, %v9040_v16  ;;  %v9047_v44 = vmax.f32 %v9020_v1, 0.0 }
0x2329   : > { %v9062_v21 = vpack.c.bf16 %v9046_v36, %v9042_v6  ;;  %v9061_v34 = vpack.c.bf16 %v9045_v28, %v9041_v3  ;;  %v8960_v49 = vpop.f32.mrb[208].mxu0 }
0x232a   : > { %v9063_v43 = vpack.c.bf16 %v9047_v44, %v9043_v55  ;;  %v8961_v8 = vadd.f32 %v8960_v49, %v15141_v48  ;;  %v9023_v41 = vpop.f32.mrb[208].mxu1  ;;  %v8962_v45 = vpop.f32.mrb[209].mxu0 }
0x232b   : > { %v9024_v54 = vadd.f32 %v9023_v41, %v15141_v48  ;;  %v8963_v17 = vadd.f32 %v8962_v45, %v15141_v48  ;;  %v9025_v31 = vpop.f32.mrb[209].mxu1  ;;  %v8964_v13 = vpop.f32.mrb[210].mxu0  ;;  %9136 = vmatprep.subr.bf16.mxu0 %v9061_v34 }
0x232c   : > { %v9026_v20 = vadd.f32 %v9025_v31, %v15141_v48  ;;  %v8965_v26 = vadd.f32 %v8964_v13, %v15142_v62  ;;  %v9027_v50 = vpop.f32.mrb[210].mxu1  ;;  %9199 = vmatprep.subr.bf16.mxu1 %v9063_v43  ;;  %v8966_v39 = vpop.f32.mrb[211].mxu0  ;;  %9137 = vmatpush1.bf16.msra.mxu0 %v9060_v23  ;;  %v9048_v37 = vmax.f32 %v8961_v8, 0.0 }
0x232d   : > { %v9028_v63 = vadd.f32 %v9027_v50, %v15142_v62  ;;  %v8967_v30 = vadd.f32 %v8966_v39, %v15142_v62  ;;  %v9029_v15 = vpop.f32.mrb[211].mxu1  ;;  %9200 = vmatpush1.bf16.msra.mxu1 %v9062_v21  ;;  %v9050_v10 = vmax.f32 %v9024_v54, 0.0  ;;  %v9049_v5 = vmax.f32 %v8963_v17, 0.0  ;;  %v15145_v54 = vld [vmem:[#allocation133_spill] sm:$0xff] }
0x232e   : > { %v9052_v35 = vmax.f32 %v8965_v26, 0.0  ;;  %v9030_v53 = vadd.f32 %v9029_v15, %v15142_v62  ;;  %v9051_v60 = vmax.f32 %v9026_v20, 0.0 }
0x232f   : > { %v9054_v59 = vmax.f32 %v9028_v63, 0.0  ;;  %v9053_v32 = vmax.f32 %v8967_v30, 0.0  ;;  %v15146_v63 = vld [vmem:[#allocation132_spill] sm:$0xff] }
0x2330   : > { %v9064_v18 = vpack.c.bf16 %v9052_v35, %v9048_v37  ;;  %v9055_v29 = vmax.f32 %v9030_v53, 0.0 }
0x2331   : > { %v9066_v33 = vpack.c.bf16 %v9054_v59, %v9050_v10  ;;  %v9065_v22 = vpack.c.bf16 %v9053_v32, %v9049_v5 }
0x2332   : > { %v9067_v9 = vpack.c.bf16 %v9055_v29, %v9051_v60 }
0x2333   : > { %9138 = vmatprep.subr.bf16.mxu0 %v9065_v22 }
0x2334   : > { %9201 = vmatprep.subr.bf16.mxu1 %v9067_v9  ;;  %9139 = vmatpush1.bf16.msra.mxu0 %v9064_v18 }
0x2335   : > { %9202 = vmatpush1.bf16.msra.mxu1 %v9066_v33 }
0x2337   : > { %10793 = vmatmul.mubr.msk.bf16.vlgmr.msra.gmra.mrb[212].mxu0 %vm270_vm0, %v11108_v7 }
0x2338   : > { %10796 = vmatmul.mubr.msk.bf16.vlgmr.msra.gmra.mrb[212].mxu1 %vm270_vm0, %v11108_v7  ;;  %9176 = vmatprep.mubr.bf16.mxu0 %v14836_v25 }
0x2339   : > { %9239 = vmatprep.mubr.bf16.mxu1 %v14836_v25 }
0x233f   : > { %10794 = vmatmul.mubr.msk.bf16.gmra.mrb[216].mxu0 %vm270_vm0, %v11109_v19 }
0x2340   : > { %10797 = vmatmul.mubr.msk.bf16.gmra.mrb[216].mxu1 %vm270_vm0, %v11109_v19  ;;  %9186 = vmatprep.mubr.bf16.mxu0 %v14836_v25 }
0x2341   : > { %9249 = vmatprep.mubr.bf16.mxu1 %v14836_v25 }
0x2347   : > { %10795 = vmatmul.mubr.msk.bf16.gmra.mrb[220].mxu0 %vm270_vm0, %v11110_v42 }
0x2348   : > { %10798 = vmatmul.mubr.msk.bf16.gmra.mrb[220].mxu1 %vm270_vm0, %v11110_v42  ;;  %9393 = vmatprep.mubr.bf16.mxu0 %v14836_v25 }
0x2349   : > { %9454 = vmatprep.mubr.bf16.mxu1 %v14836_v25 }
0x240a   : > { %v9168_v2 = vpop.f32.mrb[212].mxu0 }
0x240b   : > { %v9169_v24 = vadd.f32 %v9168_v2, %v15143_v11  ;;  %v9231_v47 = vpop.f32.mrb[212].mxu1  ;;  %v9170_v61 = vpop.f32.mrb[213].mxu0 }
0x240c   : > { %v9232_v57 = vadd.f32 %v9231_v47, %v15143_v11  ;;  %v9171_v46 = vadd.f32 %v9170_v61, %v15143_v11  ;;  %v9233_v12 = vpop.f32.mrb[213].mxu1  ;;  %v9172_v0 = vpop.f32.mrb[214].mxu0 }
0x240d   : > { %v9234_v14 = vadd.f32 %v9233_v12, %v15143_v11  ;;  %v9173_v4 = vadd.f32 %v9172_v0, %v15144_v27  ;;  %v9235_v38 = vpop.f32.mrb[214].mxu1  ;;  %v9174_v16 = vpop.f32.mrb[215].mxu0  ;;  %v9260_v3 = vmax.f32 %v9169_v24, 0.0  ;;  %v15147_v24 = vld [vmem:[#allocation135_spill] sm:$0xff] }
0x240e   : > { %v9236_v40 = vadd.f32 %v9235_v38, %v15144_v27  ;;  %v9175_v1 = vadd.f32 %v9174_v16, %v15144_v27  ;;  %v9237_v6 = vpop.f32.mrb[215].mxu1  ;;  %v9262_v55 = vmax.f32 %v9232_v57, 0.0  ;;  %v9261_v23 = vmax.f32 %v9171_v46, 0.0 }
0x240f   : > { %v9264_v36 = vmax.f32 %v9173_v4, 0.0  ;;  %v9238_v28 = vadd.f32 %v9237_v6, %v15144_v27  ;;  %v9263_v34 = vmax.f32 %v9234_v14, 0.0  ;;  %v15148_v4 = vld [vmem:[#allocation134_spill] sm:$0xff] }
0x2410   : > { %v9266_v44 = vmax.f32 %v9236_v40, 0.0  ;;  %v9265_v21 = vmax.f32 %v9175_v1, 0.0 }
0x2411   : > { %v9284_v49 = vpack.c.bf16 %v9264_v36, %v9260_v3  ;;  %v9267_v43 = vmax.f32 %v9238_v28, 0.0 }
0x2412   : > { %v9286_v48 = vpack.c.bf16 %v9266_v44, %v9262_v55  ;;  %v9285_v8 = vpack.c.bf16 %v9265_v21, %v9261_v23  ;;  %v9178_v41 = vpop.f32.mrb[216].mxu0 }
0x2413   : > { %v9287_v45 = vpack.c.bf16 %v9267_v43, %v9263_v34  ;;  %v9179_v17 = vadd.f32 %v9178_v41, %v15145_v54  ;;  %v9241_v31 = vpop.f32.mrb[216].mxu1  ;;  %v9180_v13 = vpop.f32.mrb[217].mxu0 }
0x2414   : > { %v9242_v20 = vadd.f32 %v9241_v31, %v15145_v54  ;;  %v9181_v62 = vadd.f32 %v9180_v13, %v15145_v54  ;;  %v9243_v26 = vpop.f32.mrb[217].mxu1  ;;  %v9182_v50 = vpop.f32.mrb[218].mxu0  ;;  %9361 = vmatprep.subr.bf16.mxu0 %v9285_v8  ;;  %v11113_v31 = vld [vmem:[%s14592_s1 + $0xd0] sm:$0xff]  }
0x2415   : > { %v9244_v39 = vadd.f32 %v9243_v26, %v15145_v54  ;;  %v9183_v30 = vadd.f32 %v9182_v50, %v15146_v63  ;;  %v9245_v15 = vpop.f32.mrb[218].mxu1  ;;  %9422 = vmatprep.subr.bf16.mxu1 %v9287_v45  ;;  %v9184_v37 = vpop.f32.mrb[219].mxu0  ;;  %9362 = vmatpush1.bf16.msra.mxu0 %v9284_v49  ;;  %v9268_v5 = vmax.f32 %v9179_v17, 0.0  ;;  %v11111_v54 = vld [vmem:[%s14592_s1 + $0xc0] sm:$0xff]   ;;  %v11112_v17 = vld [vmem:[%s14592_s1 + $0xc8] sm:$0xff]  }
0x2416   : > { %v9246_v35 = vadd.f32 %v9245_v15, %v15146_v63  ;;  %v9185_v53 = vadd.f32 %v9184_v37, %v15146_v63  ;;  %v9247_v10 = vpop.f32.mrb[219].mxu1  ;;  %9423 = vmatpush1.bf16.msra.mxu1 %v9286_v48  ;;  %v9270_v60 = vmax.f32 %v9242_v20, 0.0  ;;  %v9269_v18 = vmax.f32 %v9181_v62, 0.0 }
0x2417   : > { %v9272_v59 = vmax.f32 %v9183_v30, 0.0  ;;  %v9248_v32 = vadd.f32 %v9247_v10, %v15146_v63  ;;  %v9271_v22 = vmax.f32 %v9244_v39, 0.0  ;;  %v15149_v39 = vld [vmem:[#allocation137_spill] sm:$0xff]  ;;  %v15150_v30 = vld [vmem:[#allocation136_spill] sm:$0xff] }
0x2418   : > { %v9274_v29 = vmax.f32 %v9246_v35, 0.0  ;;  %v9273_v33 = vmax.f32 %v9185_v53, 0.0 }
0x2419   : > { %v9288_v9 = vpack.c.bf16 %v9272_v59, %v9268_v5  ;;  %v9275_v7 = vmax.f32 %v9248_v32, 0.0 }
0x241a   : > { %v9290_v19 = vpack.c.bf16 %v9274_v29, %v9270_v60  ;;  %v9289_v42 = vpack.c.bf16 %v9273_v33, %v9269_v18  ;;  %v9188_v2 = vpop.f32.mrb[220].mxu0 }
0x241b   : > { %v9291_v11 = vpack.c.bf16 %v9275_v7, %v9271_v22  ;;  %v9189_v47 = vadd.f32 %v9188_v2, %v15147_v24  ;;  %v9251_v61 = vpop.f32.mrb[220].mxu1  ;;  %v9190_v57 = vpop.f32.mrb[221].mxu0 }
0x241c   : > { %v9252_v46 = vadd.f32 %v9251_v61, %v15147_v24  ;;  %v9191_v12 = vadd.f32 %v9190_v57, %v15147_v24  ;;  %v9253_v0 = vpop.f32.mrb[221].mxu1  ;;  %v9192_v14 = vpop.f32.mrb[222].mxu0  ;;  %9363 = vmatprep.subr.bf16.mxu0 %v9289_v42  ;;  %v15152_v61 = vld [vmem:[#allocation138_spill] sm:$0xff] }
0x241d   : > { %v9254_v27 = vadd.f32 %v9253_v0, %v15147_v24  ;;  %v9193_v38 = vadd.f32 %v9192_v14, %v15148_v4  ;;  %v9255_v16 = vpop.f32.mrb[222].mxu1  ;;  %9424 = vmatprep.subr.bf16.mxu1 %v9291_v11  ;;  %v9194_v40 = vpop.f32.mrb[223].mxu0  ;;  %9364 = vmatpush1.bf16.msra.mxu0 %v9288_v9  ;;  %v9276_v36 = vmax.f32 %v9189_v47, 0.0  ;;  %v15151_v24 = vld [vmem:[#allocation139_spill] sm:$0xff] }
0x241e   : > { %v9256_v1 = vadd.f32 %v9255_v16, %v15148_v4  ;;  %v9195_v6 = vadd.f32 %v9194_v40, %v15148_v4  ;;  %v9257_v3 = vpop.f32.mrb[223].mxu1  ;;  %9425 = vmatpush1.bf16.msra.mxu1 %v9290_v19  ;;  %v9278_v23 = vmax.f32 %v9252_v46, 0.0  ;;  %v9277_v44 = vmax.f32 %v9191_v12, 0.0 }
0x241f   : > { %v9280_v28 = vmax.f32 %v9193_v38, 0.0  ;;  %v9258_v55 = vadd.f32 %v9257_v3, %v15148_v4  ;;  %v9279_v49 = vmax.f32 %v9254_v27, 0.0 }
0x2420   : > { %v9282_v21 = vmax.f32 %v9256_v1, 0.0  ;;  %v9281_v34 = vmax.f32 %v9195_v6, 0.0 }
0x2421   : > { %v9292_v43 = vpack.c.bf16 %v9280_v28, %v9276_v36  ;;  %v9283_v48 = vmax.f32 %v9258_v55, 0.0  ;;  %v11114_v28 = vld [vmem:[%s14592_s1 + $0xd8] sm:$0xff]  }
0x2422   : > { %v9294_v8 = vpack.c.bf16 %v9282_v21, %v9278_v23  ;;  %v9293_v41 = vpack.c.bf16 %v9281_v34, %v9277_v44 }
0x2423   : > { %v9295_v45 = vpack.c.bf16 %v9283_v48, %v9279_v49 }
0x2424   : > { %9365 = vmatprep.subr.bf16.mxu0 %v9293_v41 }
0x2425   : > { %9426 = vmatprep.subr.bf16.mxu1 %v9295_v45  ;;  %9366 = vmatpush1.bf16.msra.mxu0 %v9292_v43 }
0x2426   : > { %9427 = vmatpush1.bf16.msra.mxu1 %v9294_v8  ;;  %v15154_v8 = vld [vmem:[#allocation140_spill] sm:$0xff] }
0x2428   : > { %10814 = vmatmul.mubr.msk.bf16.vlgmr.msra.gmra.mrb[224].mxu0 %vm270_vm0, %v11111_v54 }
0x2429   : > { %10817 = vmatmul.mubr.msk.bf16.vlgmr.msra.gmra.mrb[224].mxu1 %vm270_vm0, %v11111_v54  ;;  %9403 = vmatprep.mubr.bf16.mxu0 %v14836_v25 }
0x242a   : > { %9464 = vmatprep.mubr.bf16.mxu1 %v14836_v25 }
0x2430   : > { %10815 = vmatmul.mubr.msk.bf16.gmra.mrb[228].mxu0 %vm270_vm0, %v11112_v17 }
0x2431   : > { %10818 = vmatmul.mubr.msk.bf16.gmra.mrb[228].mxu1 %vm270_vm0, %v11112_v17  ;;  %9413 = vmatprep.mubr.bf16.mxu0 %v14836_v25 }
0x2432   : > { %9474 = vmatprep.mubr.bf16.mxu1 %v14836_v25 }
0x2438   : > { %10816 = vmatmul.mubr.msk.bf16.gmra.mrb[236].mxu0 %vm270_vm0, %v11113_v31 }
0x2439   : > { %10819 = vmatmul.mubr.msk.bf16.gmra.mrb[236].mxu1 %vm270_vm0, %v11113_v31  ;;  %9589 = vmatprep.mubr.bf16.mxu0 %v14836_v25 }
0x243a   : > { %9652 = vmatprep.mubr.bf16.mxu1 %v14836_v25 }
0x24fb   : > { %v9395_v13 = vpop.f32.mrb[224].mxu0 }
0x24fc   : > { %v9456_v20 = vpop.f32.mrb[224].mxu1  ;;  %v9397_v62 = vpop.f32.mrb[225].mxu0  ;;  %v9396_v63 = vadd.f32 %v9395_v13, %v15149_v39 }
0x24fd   : > { %v9458_v26 = vpop.f32.mrb[225].mxu1  ;;  %v9399_v50 = vpop.f32.mrb[226].mxu0  ;;  %v9457_v53 = vadd.f32 %v9456_v20, %v15149_v39  ;;  %v9398_v10 = vadd.f32 %v9397_v62, %v15149_v39 }
0x24fe   : > { %v9400_v15 = vadd.f32 %v9399_v50, %v15150_v30  ;;  %v9460_v37 = vpop.f32.mrb[226].mxu1  ;;  %v9401_v35 = vpop.f32.mrb[227].mxu0  ;;  %v9459_v60 = vadd.f32 %v9458_v26, %v15149_v39 }
0x24ff   : > { %v9461_v5 = vadd.f32 %v9460_v37, %v15150_v30  ;;  %v9402_v59 = vadd.f32 %v9401_v35, %v15150_v30  ;;  %v9462_v32 = vpop.f32.mrb[227].mxu1 }
0x2500   : > { %v9483_v18 = vpack.c.bf16 %v9400_v15, %v9396_v63  ;;  %v9463_v29 = vadd.f32 %v9462_v32, %v15150_v30  ;;  %v15155_v32 = vld [vmem:[#allocation143_spill] sm:$0xff] }
0x2501   : > { %v9485_v33 = vpack.c.bf16 %v9461_v5, %v9457_v53  ;;  %v9484_v22 = vpack.c.bf16 %v9402_v59, %v9398_v10 }
0x2502   : > { %v9486_v9 = vpack.c.bf16 %v9463_v29, %v9459_v60 }
0x2503   : > { %v9405_v7 = vpop.f32.mrb[228].mxu0  ;;  %9557 = vmatprep.subr.bf16.mxu0 %v9484_v22 }
0x2504   : > { %v9466_v19 = vpop.f32.mrb[228].mxu1  ;;  %9620 = vmatprep.subr.bf16.mxu1 %v9486_v9  ;;  %v9407_v42 = vpop.f32.mrb[229].mxu0  ;;  %9558 = vmatpush1.bf16.msra.mxu0 %v9483_v18  ;;  %v9406_v47 = vadd.f32 %v9405_v7, %v15151_v24 }
0x2505   : > { %v9468_v2 = vpop.f32.mrb[229].mxu1  ;;  %9621 = vmatpush1.bf16.msra.mxu1 %v9485_v33  ;;  %v9409_v11 = vpop.f32.mrb[230].mxu0  ;;  %v9467_v0 = vadd.f32 %v9466_v19, %v15151_v24  ;;  %v9408_v14 = vadd.f32 %v9407_v42, %v15151_v24  ;;  %v15156_v42 = vld [vmem:[#allocation142_spill] sm:$0xff] }
0x2506   : > { %v9410_v57 = vadd.f32 %v9409_v11, %v15152_v61  ;;  %v9470_v46 = vpop.f32.mrb[230].mxu1  ;;  %v9411_v12 = vpop.f32.mrb[231].mxu0  ;;  %v9469_v16 = vadd.f32 %v9468_v2, %v15151_v24 }
0x2507   : > { %v9471_v27 = vadd.f32 %v9470_v46, %v15152_v61  ;;  %v9412_v4 = vadd.f32 %v9411_v12, %v15152_v61  ;;  %v9472_v38 = vpop.f32.mrb[231].mxu1 }
0x2508   : > { %v9487_v40 = vpack.c.bf16 %v9410_v57, %v9406_v47  ;;  %v9473_v1 = vadd.f32 %v9472_v38, %v15152_v61 }
0x2509   : > { %v9489_v6 = vpack.c.bf16 %v9471_v27, %v9467_v0  ;;  %v9488_v3 = vpack.c.bf16 %v9412_v4, %v9408_v14 }
0x250a   : > { %v9490_v36 = vpack.c.bf16 %v9473_v1, %v9469_v16 }
0x250b   : > { %9559 = vmatprep.subr.bf16.mxu0 %v9488_v3 }
0x250c   : > { %9622 = vmatprep.subr.bf16.mxu1 %v9490_v36  ;;  %9560 = vmatpush1.bf16.msra.mxu0 %v9487_v40 }
0x250d   : > { %9623 = vmatpush1.bf16.msra.mxu1 %v9489_v6  ;;  %9561 = vmatprep.subr.bf16.mxu0 %v14036_v56  ;;  %v11115_v56 = vld [vmem:[%s14592_s1 + $0xe0] sm:$0xff]  }
0x250e   : > { %9624 = vmatprep.subr.bf16.mxu1 %v14041_v58  ;;  %v11116_v58 = vld [vmem:[%s14592_s1 + $0xe8] sm:$0xff]  }
0x2510   : > { %9562 = vmatpush1.bf16.msra.mxu0 %v14049_v52 }
0x2511   : > { %9625 = vmatpush1.bf16.msra.mxu1 %v14054_v51  ;;  %v15153_v51 = vld [vmem:[#allocation141_spill] sm:$0xff] }
0x2513   : > { %10835 = vmatmul.mubr.msk.bf16.vlgmr.msra.gmra.mrb[240].mxu0 %vm270_vm0, %v11114_v28 }
0x2514   : > { %10838 = vmatmul.mubr.msk.bf16.vlgmr.msra.gmra.mrb[240].mxu1 %vm270_vm0, %v11114_v28  ;;  %9599 = vmatprep.mubr.bf16.mxu0 %v14836_v25 }
0x2515   : > { %9662 = vmatprep.mubr.bf16.mxu1 %v14836_v25 }
0x251b   : > { %10836 = vmatmul.mubr.msk.bf16.gmra.mrb[244].mxu0 %vm270_vm0, %v11115_v56 }
0x251c   : > { %10839 = vmatmul.mubr.msk.bf16.gmra.mrb[244].mxu1 %vm270_vm0, %v11115_v56  ;;  %9609 = vmatprep.mubr.bf16.mxu0 %v14836_v25  ;;  %v15157_v56 = vld [vmem:[#allocation145_spill] sm:$0xff] }
0x251d   : > { %9672 = vmatprep.mubr.bf16.mxu1 %v14836_v25 }
0x2523   : > { %10837 = vmatmul.mubr.msk.bf16.gmra.mrb[232].mxu0 %vm270_vm0, %v11116_v58 }
0x2524   : > { %10840 = vmatmul.mubr.msk.bf16.gmra.mrb[232].mxu1 %vm270_vm0, %v11116_v58  ;;  %9812 = vmatprep.mubr.bf16.mxu0 %v14836_v25 }
0x2525   : > { %9865 = vmatprep.mubr.bf16.mxu1 %v14836_v25 }
0x25e6   : > { %v9591_v52 = vpop.f32.mrb[240].mxu0 }
0x25e7   : > { %v9592_v55 = vadd.f32 %v9591_v52, %v15153_v51  ;;  %v9654_v23 = vpop.f32.mrb[240].mxu1  ;;  %v9593_v44 = vpop.f32.mrb[241].mxu0 }
0x25e8   : > { %v9655_v21 = vadd.f32 %v9654_v23, %v15153_v51  ;;  %v9594_v34 = vadd.f32 %v9593_v44, %v15153_v51  ;;  %v9656_v49 = vpop.f32.mrb[241].mxu1  ;;  %v9595_v43 = vpop.f32.mrb[242].mxu0 }
0x25e9   : > { %v9657_v48 = vadd.f32 %v9656_v49, %v15153_v51  ;;  %v9596_v41 = vadd.f32 %v9595_v43, %v15154_v8  ;;  %v9658_v45 = vpop.f32.mrb[242].mxu1  ;;  %v9597_v54 = vpop.f32.mrb[243].mxu0  ;;  %v9683_v20 = vmax.f32 %v9592_v55, 0.0  ;;  %v15158_v49 = vld [vmem:[#allocation144_spill] sm:$0xff] }
0x25ea   : > { %v9659_v17 = vadd.f32 %v9658_v45, %v15154_v8  ;;  %v9598_v31 = vadd.f32 %v9597_v54, %v15154_v8  ;;  %v9660_v13 = vpop.f32.mrb[243].mxu1  ;;  %v9685_v50 = vmax.f32 %v9655_v21, 0.0  ;;  %v9684_v39 = vmax.f32 %v9594_v34, 0.0 }
0x25eb   : > { %v9687_v62 = vmax.f32 %v9596_v41, 0.0  ;;  %v9661_v26 = vadd.f32 %v9660_v13, %v15154_v8  ;;  %v9686_v15 = vmax.f32 %v9657_v48, 0.0 }
0x25ec   : > { %v9689_v63 = vmax.f32 %v9659_v17, 0.0  ;;  %v9688_v30 = vmax.f32 %v9598_v31, 0.0 }
0x25ed   : > { %v9707_v37 = vpack.c.bf16 %v9687_v62, %v9683_v20  ;;  %v9690_v35 = vmax.f32 %v9661_v26, 0.0 }
0x25ee   : > { %v9709_v53 = vpack.c.bf16 %v9689_v63, %v9685_v50  ;;  %v9708_v10 = vpack.c.bf16 %v9688_v30, %v9684_v39  ;;  %v9601_v5 = vpop.f32.mrb[244].mxu0 }
0x25ef   : > { %v9710_v59 = vpack.c.bf16 %v9690_v35, %v9686_v15  ;;  %v9602_v60 = vadd.f32 %v9601_v5, %v15155_v32  ;;  %v9664_v18 = vpop.f32.mrb[244].mxu1  ;;  %v9603_v29 = vpop.f32.mrb[245].mxu0  ;;  %v11119_v5 = vld [vmem:[%s14592_s1 + $0x100] sm:$0xff]  }
0x25f0   : > { %v9665_v33 = vadd.f32 %v9664_v18, %v15155_v32  ;;  %v9604_v22 = vadd.f32 %v9603_v29, %v15155_v32  ;;  %v9666_v9 = vpop.f32.mrb[245].mxu1  ;;  %v9605_v7 = vpop.f32.mrb[246].mxu0  ;;  %9780 = vmatprep.subr.bf16.mxu0 %v9708_v10  ;;  %v11118_v10 = vld [vmem:[%s14592_s1 + $0xf8] sm:$0xff]  }
0x25f1   : > { %v9667_v19 = vadd.f32 %v9666_v9, %v15155_v32  ;;  %v9606_v2 = vadd.f32 %v9605_v7, %v15156_v42  ;;  %v9668_v11 = vpop.f32.mrb[246].mxu1  ;;  %9833 = vmatprep.subr.bf16.mxu1 %v9710_v59  ;;  %v9607_v24 = vpop.f32.mrb[247].mxu0  ;;  %9781 = vmatpush1.bf16.msra.mxu0 %v9707_v37  ;;  %v9691_v46 = vmax.f32 %v9602_v60, 0.0 }
0x25f2   : > { %v9669_v47 = vadd.f32 %v9668_v11, %v15156_v42  ;;  %v9608_v61 = vadd.f32 %v9607_v24, %v15156_v42  ;;  %v9670_v57 = vpop.f32.mrb[247].mxu1  ;;  %9834 = vmatpush1.bf16.msra.mxu1 %v9709_v53  ;;  %v9693_v14 = vmax.f32 %v9665_v33, 0.0  ;;  %v9692_v27 = vmax.f32 %v9604_v22, 0.0  ;;  %v11117_v53 = vld [vmem:[%s14592_s1 + $0xf0] sm:$0xff]   ;;  %v9734_v59 = vpop.permute.xlu1 %9733 }
0x25f3   : > { %v9695_v12 = vmax.f32 %v9606_v2, 0.0  ;;  %v9671_v0 = vadd.f32 %v9670_v57, %v15156_v42  ;;  %v9694_v16 = vmax.f32 %v9667_v19, 0.0  ;;  %v9331_v32 = vpop.permute.xlu0 %9330 }
0x25f4   : > { %v9697_v4 = vmax.f32 %v9669_v47, 0.0  ;;  %v9696_v38 = vmax.f32 %v9608_v61, 0.0  ;;  %v10893_v60 = vadd.f32 %v9734_v59, %v9331_v32 }
0x25f5   : > { %v9711_v40 = vpack.c.bf16 %v9695_v12, %v9691_v46  ;;  %v9698_v1 = vmax.f32 %v9671_v0, 0.0 }
0x25f6   : > { %v9713_v6 = vpack.c.bf16 %v9697_v4, %v9693_v14  ;;  %v9712_v3 = vpack.c.bf16 %v9696_v38, %v9692_v27  ;;  %v9611_v36 = vpop.f32.mrb[232].mxu0 }
0x25f7   : > { %v9714_v28 = vpack.c.bf16 %v9698_v1, %v9694_v16  ;;  %v9612_v58 = vadd.f32 %v9611_v36, %v15157_v56  ;;  %v9674_v52 = vpop.f32.mrb[232].mxu1  ;;  %v9613_v51 = vpop.f32.mrb[233].mxu0 }
0x25f8   : > { %v9675_v55 = vadd.f32 %v9674_v52, %v15157_v56  ;;  %v9614_v23 = vadd.f32 %v9613_v51, %v15157_v56  ;;  %v9676_v44 = vpop.f32.mrb[233].mxu1  ;;  %v9615_v21 = vpop.f32.mrb[234].mxu0  ;;  %9782 = vmatprep.subr.bf16.mxu0 %v9712_v3 }
0x25f9   : > { %v9677_v34 = vadd.f32 %v9676_v44, %v15157_v56  ;;  %v9616_v43 = vadd.f32 %v9615_v21, %v15158_v49  ;;  %v9678_v48 = vpop.f32.mrb[234].mxu1  ;;  %9835 = vmatprep.subr.bf16.mxu1 %v9714_v28  ;;  %v9617_v8 = vpop.f32.mrb[235].mxu0  ;;  %9783 = vmatpush1.bf16.msra.mxu0 %v9711_v40  ;;  %v9699_v17 = vmax.f32 %v9612_v58, 0.0 }
0x25fa   : > { %v9679_v41 = vadd.f32 %v9678_v48, %v15158_v49  ;;  %v9618_v45 = vadd.f32 %v9617_v8, %v15158_v49  ;;  %v9680_v54 = vpop.f32.mrb[235].mxu1  ;;  %9836 = vmatpush1.bf16.msra.mxu1 %v9713_v6  ;;  %v9701_v20 = vmax.f32 %v9675_v55, 0.0  ;;  %v9700_v62 = vmax.f32 %v9614_v23, 0.0 }
0x25fb   : > { %v9703_v31 = vmax.f32 %v9616_v43, 0.0  ;;  %v9681_v13 = vadd.f32 %v9680_v54, %v15158_v49  ;;  %v9702_v39 = vmax.f32 %v9677_v34, 0.0 }
0x25fc   : > { %v9705_v26 = vmax.f32 %v9679_v41, 0.0  ;;  %v9704_v50 = vmax.f32 %v9618_v45, 0.0 }
0x25fd   : > { %v9715_v63 = vpack.c.bf16 %v9703_v31, %v9699_v17  ;;  %v9706_v30 = vmax.f32 %v9681_v13, 0.0 }
0x25fe   : > { %v9717_v15 = vpack.c.bf16 %v9705_v26, %v9701_v20  ;;  %v9716_v37 = vpack.c.bf16 %v9704_v50, %v9700_v62 }
0x25ff   : > { %v9718_v35 = vpack.c.bf16 %v9706_v30, %v9702_v39 }
0x2600   : > { %9784 = vmatprep.subr.bf16.mxu0 %v9716_v37 }
0x2601   : > { %9837 = vmatprep.subr.bf16.mxu1 %v9718_v35  ;;  %9785 = vmatpush1.bf16.msra.mxu0 %v9715_v63 }
0x2602   : > { %9838 = vmatpush1.bf16.msra.mxu1 %v9717_v15 }
0x2604   : > { %10856 = vmatmul.mubr.msk.bf16.vlgmr.msra.gmra.mrb[236].mxu0 %vm270_vm0, %v11117_v53 }
0x2605   : > { %10859 = vmatmul.mubr.msk.bf16.vlgmr.msra.gmra.mrb[236].mxu1 %vm270_vm0, %v11117_v53  ;;  %9820 = vmatprep.mubr.bf16.mxu0 %v14836_v25 }
0x2606   : > { %9873 = vmatprep.mubr.bf16.mxu1 %v14836_v25 }
0x260c   : > { %10857 = vmatmul.mubr.msk.bf16.gmra.mrb[248].mxu0 %vm270_vm0, %v11118_v10 }
0x260d   : > { %10860 = vmatmul.mubr.msk.bf16.gmra.mrb[248].mxu1 %vm270_vm0, %v11118_v10  ;;  %9826 = vmatprep.mubr.bf16.mxu0 %v14836_v25 }
0x260e   : > { %9879 = vmatprep.mubr.bf16.mxu1 %v14836_v25 }
0x2614   : > { %10858 = vmatmul.mubr.msk.bf16.gmra.mrb[252].mxu0 %vm270_vm0, %v11119_v5 }
0x2615   : > { %10861 = vmatmul.mubr.msk.bf16.gmra.mrb[252].mxu1 %vm270_vm0, %v11119_v5 }
0x26d7   : > { %v9814_v18 = vpop.f32.mrb[236].mxu0 }
0x26d8   : > { %v10894_v29 = vadd.f32 %v10893_v60, %v9814_v18  ;;  %v9867_v25 = vpop.f32.mrb[236].mxu1  ;;  %v9816_v33 = vpop.f32.mrb[237].mxu0 }
0x26d9   : > { %v10898_v22 = vadd.f32 %v10893_v60, %v9867_v25  ;;  %v10896_v9 = vadd.f32 %v10893_v60, %v9816_v33  ;;  %v9869_v7 = vpop.f32.mrb[237].mxu1  ;;  %v9818_v19 = vpop.f32.mrb[238].mxu0 }
0x26da   : > { %9890 = vst [vmem:[%s13078_s17 + $0x60] sm:$0xff] %v10894_v29  ;;  %v10900_v42 = vadd.f32 %v10893_v60, %v9869_v7  ;;  %v9871_v2 = vpop.f32.mrb[238].mxu1  ;;  %v9819_v11 = vpop.f32.mrb[239].mxu0 }
0x26db   : > { %9892 = vst [vmem:[%s13078_s17 + $0x70] sm:$0xff] %v10898_v22  ;;  %9891 = vst [vmem:[%s13078_s17 + $0x68] sm:$0xff] %v10896_v9  ;;  %v9872_v24 = vpop.f32.mrb[239].mxu1 }
0x26dc   : > { %9893 = vst [vmem:[%s13078_s17 + $0x78] sm:$0xff] %v10900_v42 }
0x26dd   : > { %11191 = shalt.err (!%p11188_p3)
}
0x26de   : > { %s11192_s8 = scalar_lea.hbm %s14544_s16, 2048  ;;  %s11196_s25 = scalar_lea.hbm %s14594_s3, 4096 }
0x26df   : > { %p11193_p5 = scmp.ne.s32.totalorder %s14544_s16, %s11192_s8  ;;  %p11197_p9 = scmp.lt.u32.totalorder %s14544_s16, %s14594_s3 }
0x26e0   : > { %p11198_p0 = scmp.lt.u32.totalorder %s11196_s25, %s11192_s8  ;;  %p11200_p6 = scmp.lt.u32.totalorder %s11192_s8, %s14544_s16 }
0x26e1   : > { %p11194_p7 = pnand %p11193_p5, %p15159_p11 }
0x26e2   : > { %p11199_p2 = por %p11198_p0, %p11197_p9 }
0x26e3   : > { %p11195_p8 = pneg %p11194_p7 }
0x26e4   : > { %p11201_p12 = por %p11200_p6, %p11199_p2 }
0x26e6   : > { %p11202_p13 = pnand %p11201_p12, %p11195_p8 }
0x26e8   : > { %11205 = shalt.err (!%p11202_p13)
}
0x26e9   : > { %10937 = dma.vmem_to_hbm [thread:$0]  (%p15159_p11), %s14546_s9, 2048, %s14544_s16, %s9895_s22   ;;  %v9822_v47 = vpop.f32.mrb[248].mxu0  ;;  %v9875_v61 = vpop.f32.mrb[248].mxu1 }
0x26ea   : > { %v9823_v57 = vpop.f32.mrb[249].mxu0  ;;  %v9876_v46 = vpop.f32.mrb[249].mxu1 }
0x26eb   : > { %v9824_v12 = vpop.f32.mrb[250].mxu0  ;;  %v9877_v0 = vpop.f32.mrb[250].mxu1 }
0x26ec   : > { %v9825_v14 = vpop.f32.mrb[251].mxu0  ;;  %v9878_v27 = vpop.f32.mrb[251].mxu1 }
0x26ed   : > { %v9828_v4 = vpop.f32.mrb[252].mxu0  ;;  %v9881_v38 = vpop.f32.mrb[252].mxu1 }
0x26ee   : > { %v9829_v16 = vpop.f32.mrb[253].mxu0  ;;  %v9882_v40 = vpop.f32.mrb[253].mxu1 }
0x26ef   : > { %v9830_v1 = vpop.f32.mrb[254].mxu0  ;;  %v9883_v6 = vpop.f32.mrb[254].mxu1 }
0x26f0   : > { %v9831_v3 = vpop.f32.mrb[255].mxu0  ;;  %v9884_v36 = vpop.f32.mrb[255].mxu1 }
0x26f1 PF: > { %s9921_s23 = sand.u32 1, %s11232_s12   ;;  %p15160_p11 = scmp.ne.s32.totalorder %s14786_s24, 0 }
0x26f2   : > { %p15161_p4 = scmp.ge.s32.totalorder %s11244_s15, 2  ;;  %s9922_s27 = scalar_lea.sflag [#allocation4], %s9921_s23 }
0x26f4   : > { %p10944_p10 = pnand %p15161_p4, %p15160_p11 }
0x26f6   : > { %11227 = dma.done.wait (!%p10944_p10), %s9922_s27, 2048  }
0x26f7   : > { %11229 = vsyncadd (!%p10944_p10), %s9922_s27, 4294965248  ;;  %p16_p1 = scmp.ge.s32.totalorder %s11298_s18, 4   ;;  %s15162_s12 = smov %s11236_s13 }
0x26f8   : > { %s15163_s13 = smov %s11240_s14  ;;  %s15164_s14 = smov %s11310_s21 }
0x26f9   : > { %s15165_s15 = smov %s11298_s18  ;;  %18 = sbr.rel (!%p16_p1) target bundleno = 5 (0x5), region = 97 }
0x2700   :  { %9927 = vsyncpa [#allocation3], 1 }
0x2701   :  { %9929 = vsyncpa [#allocation3 + $0x1], 1 }
0x2702   :  { %9930 = vsyncpa [#allocation4], 1 }
0x2703   :  { %9932 = vsyncpa [#allocation4 + $0x1], 1 }

</bundles_post_ra>
